<compile_context>
chip_gen: v7x
topology: tpu7x:2x2x1
jax: 0.10.0
libtpu: 0.0.40
codegen_flags: <defaults>
</compile_context>

<pallas_src>
import functools
import math

import jax
import jax.numpy as jnp
from jax import lax
from jax.experimental import pallas as pl
from jax.experimental.pallas import tpu as pltpu

HIGH = jax.lax.Precision.HIGHEST
NEG_INF = -1e30  # finite mask sentinel (no exp(-inf) NaNs)


def _round_up(x, m):
    return (x + m - 1) // m * m


# --------------------------- in-kernel helpers ---------------------------

def _layernorm(x, g, b, eps=1e-5):
    x = x.astype(jnp.float32)
    mu = jnp.mean(x, axis=-1, keepdims=True)
    var = jnp.mean(jnp.square(x - mu), axis=-1, keepdims=True)
    return (x - mu) * lax.rsqrt(var + eps) * g + b


def _gelu(x):
    # exact (erf-based) GELU, matching nn.GELU() default approximate='none'
    return 0.5 * x * (1.0 + lax.erf(x * 0.7071067811865476))


def _bf16(x):
    return x.astype(jnp.bfloat16)


def _mha(q_in, k_in, v_in, wq, bq, wk, bk, wv, bv, wo, bo, kbias, nhead):
    """Multi-head attention over all heads, fully in-kernel.

    q_in: (Lq, D), k_in/v_in: (Lk, D) f32 values.
    wq/wk/wv/wo: (D, D) bf16 refs (pre-transposed, x @ w layout);
    bq/bk/bv/bo: (1, D) f32 refs; kbias: (1, Lk) additive key bias or None.
    Returns (Lq, D) f32 with the out-projection + bias applied.
    """
    lq, d = q_in.shape
    hd = d // nhead
    scale = 1.0 / math.sqrt(hd)

    # Fused full-width projections: single (L,D)x(D,D) MXU matmuls (full tile
    # width) instead of nhead hd-wide ones.
    qh = _bf16(jnp.dot(_bf16(q_in), wq[...], preferred_element_type=jnp.float32) + bq[...])
    kh = _bf16(jnp.dot(_bf16(k_in), wk[...], preferred_element_type=jnp.float32) + bk[...])
    vh = _bf16(jnp.dot(_bf16(v_in), wv[...], preferred_element_type=jnp.float32) + bv[...])

    # Per-head scores / softmax / context (hd-wide dims are inherent to MHA;
    # the slices below are static lane slices of already-projected values).
    ctx = []
    for h in range(nhead):
        sl = slice(h * hd, (h + 1) * hd)
        s = lax.dot_general(qh[:, sl], kh[:, sl], (((1,), (1,)), ((), ())),
                            preferred_element_type=jnp.float32) * scale
        if kbias is not None:
            s = s + kbias
        s = s - jnp.max(s, axis=-1, keepdims=True)
        p = jnp.exp(s)
        p = p * pl.reciprocal(jnp.sum(p, axis=-1, keepdims=True), approx=True)
        ctx.append(jnp.dot(_bf16(p), vh[:, sl], preferred_element_type=jnp.float32))

    # Head-concat + single full-width out-projection.
    ctx = jnp.concatenate(ctx, axis=-1)                      # (Lq, D)
    return jnp.dot(_bf16(ctx), wo[...], preferred_element_type=jnp.float32) + bo[...]


# --------------------------- fused layer kernel ---------------------------

_PARAM_ORDER = (
    "sa_wq", "sa_bq", "sa_wk", "sa_bk", "sa_wv", "sa_bv", "sa_wo", "sa_bo",
    "ca_wq", "ca_bq", "ca_wk", "ca_bk", "ca_wv", "ca_bv", "ca_wo", "ca_bo",
    "n1_g", "n1_b", "n2_g", "n2_b", "n3_g", "n3_b",
    "ffn_w1", "ffn_b1", "ffn_w2", "ffn_b2",
)


def _decoder_layer_kernel(vfull_ref, vq_ref, t_ref, posv_ref, posq_ref, post_ref,
                          kbias_ref, vbias_ref, *refs, nhead, apply_final_norm):
    (sa_wq, sa_bq, sa_wk, sa_bk, sa_wv, sa_bv, sa_wo, sa_bo,
     ca_wq, ca_bq, ca_wk, ca_bk, ca_wv, ca_bv, ca_wo, ca_bo,
     n1_g, n1_b, n2_g, n2_b, n3_g, n3_b,
     w1, b1, w2, b2) = refs[:26]
    o_ref = refs[-1]

    x_full = vfull_ref[0].astype(jnp.float32)     # (Lv, D) full residual stream
    x_q = vq_ref[0].astype(jnp.float32)           # (tq, D) query-row tile
    t_full = t_ref[0].astype(jnp.float32)         # (Lt, D) text memory
    pos_v = posv_ref[...]                         # (Lv, D)
    pos_q = posq_ref[...]                         # (tq, D)
    pos_t = post_ref[...]                         # (Lt, D)
    kbias = kbias_ref[0]                          # (1, Lt) cross-attn key-pad bias
    vbias = vbias_ref[...]                        # (1, Lv) self-attn row-pad bias

    # --- self-attention sublayer (norm -> attn -> residual) ---
    keys_sa = _layernorm(x_full, n1_g[...], n1_b[...]) + pos_v   # keys over all rows
    q_sa = _layernorm(x_q, n1_g[...], n1_b[...]) + pos_q         # queries (tile rows)
    x_q = x_q + _mha(q_sa, keys_sa, x_full,
                     sa_wq, sa_bq, sa_wk, sa_bk, sa_wv, sa_bv, sa_wo, sa_bo,
                     vbias, nhead)

    # --- cross-attention sublayer ---
    q_ca = _layernorm(x_q, n2_g[...], n2_b[...]) + pos_q
    k_ca = t_full + pos_t
    x_q = x_q + _mha(q_ca, k_ca, t_full,
                     ca_wq, ca_bq, ca_wk, ca_bk, ca_wv, ca_bv, ca_wo, ca_bo,
                     kbias, nhead)

    # --- FFN sublayer ---
    n3 = _layernorm(x_q, n3_g[...], n3_b[...])
    h = jnp.dot(_bf16(n3), w1[...], preferred_element_type=jnp.float32) + b1[...]
    h = _gelu(h)
    x_q = x_q + jnp.dot(_bf16(h), w2[...], preferred_element_type=jnp.float32) + b2[...]

    # --- final decoder LayerNorm fused into the last layer's kernel ---
    if apply_final_norm:
        fg, fb = refs[26], refs[27]
        x_q = _layernorm(x_q, fg[...], fb[...])

    o_ref[0] = x_q.astype(o_ref.dtype)


def _replicated_spec(a):
    nd = a.ndim
    return pl.BlockSpec(a.shape, lambda b, q: (0,) * nd)


def decoder_layer(v, t, pos_v, pos_t, kbias, vbias, layer_params, nhead, tq,
                  final_ln=None):
    B, Lv, D = v.shape
    Lt = t.shape[1]
    n_qt = Lv // tq
    F = layer_params["ffn_w1"].shape[1]

    param_args = [layer_params[k] for k in _PARAM_ORDER]
    apply_final = final_ln is not None
    if apply_final:
        param_args = param_args + [final_ln[0], final_ln[1]]

    in_specs = [
        pl.BlockSpec((1, Lv, D), lambda b, q: (b, 0, 0)),    # full residual (SA K/V)
        pl.BlockSpec((1, tq, D), lambda b, q: (b, q, 0)),    # query-row tile
        pl.BlockSpec((1, Lt, D), lambda b, q: (b, 0, 0)),    # text memory
        pl.BlockSpec((Lv, D), lambda b, q: (0, 0)),          # pos_v (full, batch-shared)
        pl.BlockSpec((tq, D), lambda b, q: (q, 0)),          # pos_v (query tile)
        pl.BlockSpec((Lt, D), lambda b, q: (0, 0)),          # pos_t (batch-shared)
        pl.BlockSpec((1, 1, Lt), lambda b, q: (b, 0, 0)),    # cross-attn key-pad bias
        pl.BlockSpec((1, Lv), lambda b, q: (0, 0)),          # self-attn row-pad bias
    ] + [_replicated_spec(a) for a in param_args]

    out_specs = pl.BlockSpec((1, tq, D), lambda b, q: (b, q, 0))

    # --- VMEM budget: double-buffered blocks + rough in-kernel temporaries ---
    def nbytes(shape, dtype):
        n = 1
        for s in shape:
            n *= int(s)
        return n * jnp.dtype(dtype).itemsize

    block_bytes = (
        nbytes((1, Lv, D), v.dtype) + nbytes((1, tq, D), v.dtype)
        + nbytes((1, Lt, D), t.dtype) + nbytes((Lv, D), pos_v.dtype)
        + nbytes((tq, D), pos_v.dtype) + nbytes((Lt, D), pos_t.dtype)
        + nbytes((1, 1, Lt), kbias.dtype) + nbytes((1, Lv), vbias.dtype)
        + sum(nbytes(a.shape, a.dtype) for a in param_args)
        + nbytes((1, tq, D), jnp.float32))
    tmp_bytes = 4 * (8 * Lv * D + 4 * Lt * D + 8 * tq * max(Lv, Lt) + 4 * tq * F)
    vmem_limit = int(min(max(2 * block_bytes + tmp_bytes + (4 << 20), 32 << 20),
                         128 << 20))

    kernel = functools.partial(_decoder_layer_kernel, nhead=nhead,
                               apply_final_norm=apply_final)
    return pl.pallas_call(
        kernel,
        grid=(B, n_qt),
        in_specs=in_specs,
        out_specs=out_specs,
        out_shape=jax.ShapeDtypeStruct((B, Lv, D), jnp.float32),
        compiler_params=pltpu.CompilerParams(
            dimension_semantics=("parallel", "parallel"),
            vmem_limit_bytes=vmem_limit),
    )(v, v, t, pos_v, pos_v, pos_t, kbias, vbias, *param_args)


# ------------------------ positional encodings (JAX) ------------------------

def sinusoid_pos_1d(d, length):
    pos = jnp.arange(length, dtype=jnp.float32)[:, None]
    div = jnp.exp(jnp.arange(0, d, 2, dtype=jnp.float32) * (-math.log(10000.0) / d))
    pe = jnp.zeros((length, d), jnp.float32)
    pe = pe.at[:, 0::2].set(jnp.sin(pos * div))
    pe = pe.at[:, 1::2].set(jnp.cos(pos * div))
    return pe                                            # (L, d)


def sinusoid_pos_2d(d, h, w):
    if d % 4 != 0:
        raise ValueError("d_model must be multiple of 4")
    div = jnp.exp(jnp.arange(0, d // 2, 2, dtype=jnp.float32)
                  * (-math.log(10000.0) / (d // 2)))     # (d//4,)
    gw = jnp.arange(w, dtype=jnp.float32)[:, None]
    gh = jnp.arange(h, dtype=jnp.float32)[:, None]
    sw, cw = jnp.sin(gw * div).T, jnp.cos(gw * div).T    # (d//4, w)
    sh, ch = jnp.sin(gh * div).T, jnp.cos(gh * div).T    # (d//4, h)
    pe = jnp.zeros((d, h, w), jnp.float32)
    pe = pe.at[0::4].set(jnp.broadcast_to(sw[:, None, :], (d // 4, h, w)))
    pe = pe.at[1::4].set(jnp.broadcast_to(cw[:, None, :], (d // 4, h, w)))
    pe = pe.at[2::4].set(jnp.broadcast_to(sh[:, :, None], (d // 4, h, w)))
    pe = pe.at[3::4].set(jnp.broadcast_to(ch[:, :, None], (d // 4, h, w)))
    return pe.reshape(d, h * w).T                        # (h*w, d)


# ------------------------------ full decoder ------------------------------

def decoder_forward(vis, txt, pad_mask, packed, nhead, q_tile=256):
    B, C, H, W = vis.shape
    Lt = txt.shape[1]
    Lv = H * W

    pos_v = sinusoid_pos_2d(C, H, W)                     # (Lv, C)
    pos_t = sinusoid_pos_1d(C, Lt)                       # (Lt, C)
    v = vis.reshape(B, C, Lv).transpose(0, 2, 1)         # (B, Lv, C) batch-first

    # Pad Lv to a multiple of the query-row tile (multiple of 8 sublanes);
    # padded rows are masked out of self-attention via an additive bias.
    tq = min(q_tile, _round_up(Lv, 8))
    lv_pad = _round_up(Lv, tq)
    if lv_pad != Lv:
        v = jnp.pad(v, ((0, 0), (0, lv_pad - Lv), (0, 0)))
        pos_v = jnp.pad(pos_v, ((0, lv_pad - Lv), (0, 0)))
    vbias = jnp.where(jnp.arange(lv_pad) < Lv, 0.0, NEG_INF)
    vbias = vbias.astype(jnp.float32).reshape(1, lv_pad)

    # Pad Lt to a lane-dense multiple of 128; padded keys are masked via kbias.
    lt_pad = _round_up(Lt, 128)
    pm = jnp.pad(pad_mask, ((0, 0), (0, lt_pad - Lt)), constant_values=True)
    kbias = jnp.where(pm, NEG_INF, 0.0).astype(jnp.float32).reshape(B, 1, lt_pad)
    t = jnp.pad(txt, ((0, 0), (0, lt_pad - Lt), (0, 0)))
    pos_t = jnp.pad(pos_t, ((0, lt_pad - Lt), (0, 0)))

    n_layers = len(packed["layers"])
    for i, lp in enumerate(packed["layers"]):
        final_ln = (packed["norm_g"], packed["norm_b"]) if i == n_layers - 1 else None
        v = decoder_layer(v, t, pos_v, pos_t, kbias, vbias, lp, nhead, tq, final_ln)

    v = v[:, :Lv, :]
    return v.transpose(0, 2, 1).reshape(B, C, H, W)


# ------------------------------- parameters -------------------------------

def init_params(key, num_layers, d, f):
    layers = []
    s = 0.05
    for lk in jax.random.split(key, num_layers):
        ks = jax.random.split(lk, 12)
        nrm = lambda k, shape: jax.random.normal(k, shape, jnp.float32) * s
        layers.append({
            "sa_in_w": nrm(ks[0], (3 * d, d)), "sa_in_b": nrm(ks[1], (3 * d,)),
            "sa_out_w": nrm(ks[2], (d, d)),    "sa_out_b": nrm(ks[3], (d,)),
            "ca_in_w": nrm(ks[4], (3 * d, d)), "ca_in_b": nrm(ks[5], (3 * d,)),
            "ca_out_w": nrm(ks[6], (d, d)),    "ca_out_b": nrm(ks[7], (d,)),
            "ffn_w1": nrm(ks[8], (f, d)),      "ffn_b1": nrm(ks[9], (f,)),
            "ffn_w2": nrm(ks[10], (d, f)),     "ffn_b2": nrm(ks[11], (d,)),
            "norm1_g": jnp.ones((d,), jnp.float32), "norm1_b": jnp.zeros((d,), jnp.float32),
            "norm2_g": jnp.ones((d,), jnp.float32), "norm2_b": jnp.zeros((d,), jnp.float32),
            "norm3_g": jnp.ones((d,), jnp.float32), "norm3_b": jnp.zeros((d,), jnp.float32),
        })
    return {"layers": layers,
            "norm_g": jnp.ones((d,), jnp.float32),
            "norm_b": jnp.zeros((d,), jnp.float32)}


def pack_params(params):
    """One-time packing: transpose + bf16-cast all MXU-feeding weights so the
    forward path has no `.T` and no runtime weight casts (halves weight DMA)."""
    d = params["norm_g"].shape[0]

    def w(x):   # MXU weight: x @ w layout, bf16
        return jnp.asarray(x.T, jnp.bfloat16)

    def b(x):   # bias / LayerNorm param: f32 row-vector
        return jnp.asarray(x, jnp.float32).reshape(1, -1)

    layers = []
    for lp in params["layers"]:
        layers.append({
            "sa_wq": w(lp["sa_in_w"][:d]),       "sa_bq": b(lp["sa_in_b"][:d]),
            "sa_wk": w(lp["sa_in_w"][d:2 * d]),  "sa_bk": b(lp["sa_in_b"][d:2 * d]),
            "sa_wv": w(lp["sa_in_w"][2 * d:]),   "sa_bv": b(lp["sa_in_b"][2 * d:]),
            "sa_wo": w(lp["sa_out_w"]),          "sa_bo": b(lp["sa_out_b"]),
            "ca_wq": w(lp["ca_in_w"][:d]),       "ca_bq": b(lp["ca_in_b"][:d]),
            "ca_wk": w(lp["ca_in_w"][d:2 * d]),  "ca_bk": b(lp["ca_in_b"][d:2 * d]),
            "ca_wv": w(lp["ca_in_w"][2 * d:]),   "ca_bv": b(lp["ca_in_b"][2 * d:]),
            "ca_wo": w(lp["ca_out_w"]),          "ca_bo": b(lp["ca_out_b"]),
            "n1_g": b(lp["norm1_g"]), "n1_b": b(lp["norm1_b"]),
            "n2_g": b(lp["norm2_g"]), "n2_b": b(lp["norm2_b"]),
            "n3_g": b(lp["norm3_g"]), "n3_b": b(lp["norm3_b"]),
            "ffn_w1": w(lp["ffn_w1"]), "ffn_b1": b(lp["ffn_b1"]),
            "ffn_w2": w(lp["ffn_w2"]), "ffn_b2": b(lp["ffn_b2"]),
        })
    return {"layers": layers,
            "norm_g": b(params["norm_g"]),
            "norm_b": b(params["norm_b"])}


# ---------------------------- pure-JAX reference ----------------------------

def _ref_ln(x, g, b):
    mu = jnp.mean(x, axis=-1, keepdims=True)
    var = jnp.mean(jnp.square(x - mu), axis=-1, keepdims=True)
    return (x - mu) * lax.rsqrt(var + 1e-5) * g + b


def _ref_mha(q, k, v, in_w, in_b, out_w, out_b, nhead, pad_mask=None):
    B, Lq, D = q.shape
    Lk = k.shape[1]
    hd = D // nhead
    wq, wk, wv = in_w[:D], in_w[D:2 * D], in_w[2 * D:]
    bq, bk, bv = in_b[:D], in_b[D:2 * D], in_b[2 * D:]
    qp = jnp.einsum("bld,ed->ble", q, wq, precision=HIGH) + bq
    kp = jnp.einsum("bld,ed->ble", k, wk, precision=HIGH) + bk
    vp = jnp.einsum("bld,ed->ble", v, wv, precision=HIGH) + bv
    heads = lambda x, L: x.reshape(B, L, nhead, hd).transpose(0, 2, 1, 3)
    qh, kh, vh = heads(qp, Lq), heads(kp, Lk), heads(vp, Lk)
    s = jnp.einsum("bhqd,bhkd->bhqk", qh, kh, precision=HIGH) / math.sqrt(hd)
    if pad_mask is not None:
        s = jnp.where(pad_mask[:, None, None, :], -jnp.inf, s)
    p = jax.nn.softmax(s, axis=-1)
    o = jnp.einsum("bhqk,bhkd->bhqd", p, vh, precision=HIGH)
    o = o.transpose(0, 2, 1, 3).reshape(B, Lq, D)
    return jnp.einsum("bld,ed->ble", o, out_w, precision=HIGH) + out_b


def _ref_layer(v, t, pos_v, pos_t, pad_mask, lp, nhead):
    q = k = _ref_ln(v, lp["norm1_g"], lp["norm1_b"]) + pos_v
    v = v + _ref_mha(q, k, v, lp["sa_in_w"], lp["sa_in_b"],
                     lp["sa_out_w"], lp["sa_out_b"], nhead)
    q = _ref_ln(v, lp["norm2_g"], lp["norm2_b"]) + pos_v
    k = t + pos_t
    v = v + _ref_mha(q, k, t, lp["ca_in_w"], lp["ca_in_b"],
                     lp["ca_out_w"], lp["ca_out_b"], nhead, pad_mask)
    h = _ref_ln(v, lp["norm3_g"], lp["norm3_b"])
    h = jnp.einsum("bld,fd->blf", h, lp["ffn_w1"], precision=HIGH) + lp["ffn_b1"]
    h = 0.5 * h * (1.0 + lax.erf(h * 0.7071067811865476))
    h = jnp.einsum("blf,df->bld", h, lp["ffn_w2"], precision=HIGH) + lp["ffn_b2"]
    return v + h


def reference_forward(vis, txt, pad_mask, params, nhead):
    B, C, H, W = vis.shape
    L = txt.shape[1]
    pos_v = sinusoid_pos_2d(C, H, W)
    pos_t = sinusoid_pos_1d(C, L)
    v = vis.reshape(B, C, H * W).transpose(0, 2, 1)
    for lp in params["layers"]:
        v = _ref_layer(v, txt, pos_v, pos_t, pad_mask, lp, nhead)
    v = _ref_ln(v, params["norm_g"], params["norm_b"])
    return v.transpose(0, 2, 1).reshape(B, C, H, W)


# ---------------------------------- main ----------------------------------

if __name__ == "__main__":
    num_layers, d_model, nhead, dim_ffn = 2, 32, 4, 64
    B, H, W, Lt = 2, 4, 4, 8

    key = jax.random.PRNGKey(0)
    k_par, k_vis, k_txt = jax.random.split(key, 3)
    params = init_params(k_par, num_layers, d_model, dim_ffn)
    packed = pack_params(params)      # one-time weight transpose / bf16 cast

    vis = jax.random.normal(k_vis, (B, d_model, H, W), jnp.float32)
    txt = jax.random.normal(k_txt, (B, Lt, d_model), jnp.float32)
    pad_mask = jnp.zeros((B, Lt), jnp.bool_).at[1, 6:].set(True)

    fwd = jax.jit(functools.partial(decoder_forward, nhead=nhead))
    out = jax.block_until_ready(fwd(vis, txt, pad_mask, packed))

    ref = reference_forward(vis, txt, pad_mask, params, nhead)
    assert out.shape == (B, d_model, H, W)
    assert bool(jnp.all(jnp.isfinite(out)))
    max_err = float(jnp.max(jnp.abs(out - ref)))
    assert max_err < 2e-2, f"mismatch vs reference: {max_err}"
    print("KERNEL_OK")
</pallas_src>

<mosaic_0001>
module attributes {stable_mosaic.version = 11 : i64} {
  func.func @_decoder_layer_kernel(%arg0: i32, %arg1: i32, %arg2: memref<1x16x32xf32, #tpu.memory_space<vmem>>, %arg3: memref<1x16x32xf32, #tpu.memory_space<vmem>>, %arg4: memref<1x128x32xf32, #tpu.memory_space<vmem>>, %arg5: memref<16x32xf32, #tpu.memory_space<vmem>>, %arg6: memref<16x32xf32, #tpu.memory_space<vmem>>, %arg7: memref<128x32xf32, #tpu.memory_space<vmem>>, %arg8: memref<1x1x128xf32, #tpu.memory_space<vmem>>, %arg9: memref<1x16xf32, #tpu.memory_space<vmem>>, %arg10: memref<32x32xbf16, #tpu.memory_space<vmem>>, %arg11: memref<1x32xf32, #tpu.memory_space<vmem>>, %arg12: memref<32x32xbf16, #tpu.memory_space<vmem>>, %arg13: memref<1x32xf32, #tpu.memory_space<vmem>>, %arg14: memref<32x32xbf16, #tpu.memory_space<vmem>>, %arg15: memref<1x32xf32, #tpu.memory_space<vmem>>, %arg16: memref<32x32xbf16, #tpu.memory_space<vmem>>, %arg17: memref<1x32xf32, #tpu.memory_space<vmem>>, %arg18: memref<32x32xbf16, #tpu.memory_space<vmem>>, %arg19: memref<1x32xf32, #tpu.memory_space<vmem>>, %arg20: memref<32x32xbf16, #tpu.memory_space<vmem>>, %arg21: memref<1x32xf32, #tpu.memory_space<vmem>>, %arg22: memref<32x32xbf16, #tpu.memory_space<vmem>>, %arg23: memref<1x32xf32, #tpu.memory_space<vmem>>, %arg24: memref<32x32xbf16, #tpu.memory_space<vmem>>, %arg25: memref<1x32xf32, #tpu.memory_space<vmem>>, %arg26: memref<1x32xf32, #tpu.memory_space<vmem>>, %arg27: memref<1x32xf32, #tpu.memory_space<vmem>>, %arg28: memref<1x32xf32, #tpu.memory_space<vmem>>, %arg29: memref<1x32xf32, #tpu.memory_space<vmem>>, %arg30: memref<1x32xf32, #tpu.memory_space<vmem>>, %arg31: memref<1x32xf32, #tpu.memory_space<vmem>>, %arg32: memref<32x64xbf16, #tpu.memory_space<vmem>>, %arg33: memref<1x64xf32, #tpu.memory_space<vmem>>, %arg34: memref<64x32xbf16, #tpu.memory_space<vmem>>, %arg35: memref<1x32xf32, #tpu.memory_space<vmem>>, %arg36: memref<1x16x32xf32, #tpu.memory_space<vmem>>) attributes {dimension_semantics = [#tpu.dimension_semantics<parallel>, #tpu.dimension_semantics<parallel>], iteration_bounds = array<i64: 2, 1>, scalar_prefetch = 0 : i64, scratch_operands = 0 : i64, tpu.core_type = #tpu.core_type<tc>, window_params = [{transform_indices = @transform_0, window_bounds = array<i64: 1, 16, 32>}, {transform_indices = @transform_1, window_bounds = array<i64: 1, 16, 32>}, {transform_indices = @transform_2, window_bounds = array<i64: 1, 128, 32>}, {pipeline_mode = #tpu.pipeline_mode<synchronous>, transform_indices = @transform_3, window_bounds = array<i64: 16, 32>}, {transform_indices = @transform_4, window_bounds = array<i64: 16, 32>}, {pipeline_mode = #tpu.pipeline_mode<synchronous>, transform_indices = @transform_5, window_bounds = array<i64: 128, 32>}, {transform_indices = @transform_6, window_bounds = array<i64: 1, 1, 128>}, {pipeline_mode = #tpu.pipeline_mode<synchronous>, transform_indices = @transform_7, window_bounds = array<i64: 1, 16>}, {pipeline_mode = #tpu.pipeline_mode<synchronous>, transform_indices = @transform_8, window_bounds = array<i64: 32, 32>}, {pipeline_mode = #tpu.pipeline_mode<synchronous>, transform_indices = @transform_9, window_bounds = array<i64: 1, 32>}, {pipeline_mode = #tpu.pipeline_mode<synchronous>, transform_indices = @transform_10, window_bounds = array<i64: 32, 32>}, {pipeline_mode = #tpu.pipeline_mode<synchronous>, transform_indices = @transform_11, window_bounds = array<i64: 1, 32>}, {pipeline_mode = #tpu.pipeline_mode<synchronous>, transform_indices = @transform_12, window_bounds = array<i64: 32, 32>}, {pipeline_mode = #tpu.pipeline_mode<synchronous>, transform_indices = @transform_13, window_bounds = array<i64: 1, 32>}, {pipeline_mode = #tpu.pipeline_mode<synchronous>, transform_indices = @transform_14, window_bounds = array<i64: 32, 32>}, {pipeline_mode = #tpu.pipeline_mode<synchronous>, transform_indices = @transform_15, window_bounds = array<i64: 1, 32>}, {pipeline_mode = #tpu.pipeline_mode<synchronous>, transform_indices = @transform_16, window_bounds = array<i64: 32, 32>}, {pipeline_mode = #tpu.pipeline_mode<synchronous>, transform_indices = @transform_17, window_bounds = array<i64: 1, 32>}, {pipeline_mode = #tpu.pipeline_mode<synchronous>, transform_indices = @transform_18, window_bounds = array<i64: 32, 32>}, {pipeline_mode = #tpu.pipeline_mode<synchronous>, transform_indices = @transform_19, window_bounds = array<i64: 1, 32>}, {pipeline_mode = #tpu.pipeline_mode<synchronous>, transform_indices = @transform_20, window_bounds = array<i64: 32, 32>}, {pipeline_mode = #tpu.pipeline_mode<synchronous>, transform_indices = @transform_21, window_bounds = array<i64: 1, 32>}, {pipeline_mode = #tpu.pipeline_mode<synchronous>, transform_indices = @transform_22, window_bounds = array<i64: 32, 32>}, {pipeline_mode = #tpu.pipeline_mode<synchronous>, transform_indices = @transform_23, window_bounds = array<i64: 1, 32>}, {pipeline_mode = #tpu.pipeline_mode<synchronous>, transform_indices = @transform_24, window_bounds = array<i64: 1, 32>}, {pipeline_mode = #tpu.pipeline_mode<synchronous>, transform_indices = @transform_25, window_bounds = array<i64: 1, 32>}, {pipeline_mode = #tpu.pipeline_mode<synchronous>, transform_indices = @transform_26, window_bounds = array<i64: 1, 32>}, {pipeline_mode = #tpu.pipeline_mode<synchronous>, transform_indices = @transform_27, window_bounds = array<i64: 1, 32>}, {pipeline_mode = #tpu.pipeline_mode<synchronous>, transform_indices = @transform_28, window_bounds = array<i64: 1, 32>}, {pipeline_mode = #tpu.pipeline_mode<synchronous>, transform_indices = @transform_29, window_bounds = array<i64: 1, 32>}, {pipeline_mode = #tpu.pipeline_mode<synchronous>, transform_indices = @transform_30, window_bounds = array<i64: 32, 64>}, {pipeline_mode = #tpu.pipeline_mode<synchronous>, transform_indices = @transform_31, window_bounds = array<i64: 1, 64>}, {pipeline_mode = #tpu.pipeline_mode<synchronous>, transform_indices = @transform_32, window_bounds = array<i64: 64, 32>}, {pipeline_mode = #tpu.pipeline_mode<synchronous>, transform_indices = @transform_33, window_bounds = array<i64: 1, 32>}, {transform_indices = @transform_34, window_bounds = array<i64: 1, 16, 32>}]} {
    %c0 = arith.constant 0 : index
    %c0_0 = arith.constant 0 : index
    %c0_1 = arith.constant 0 : index
    %0 = vector.load %arg2[%c0, %c0_0, %c0_1] : memref<1x16x32xf32, #tpu.memory_space<vmem>>, vector<1x16x32xf32>
    %1 = vector.shape_cast %0 : vector<1x16x32xf32> to vector<16x32xf32>
    %c0_2 = arith.constant 0 : index
    %c0_3 = arith.constant 0 : index
    %c0_4 = arith.constant 0 : index
    %2 = vector.load %arg3[%c0_2, %c0_3, %c0_4] : memref<1x16x32xf32, #tpu.memory_space<vmem>>, vector<1x16x32xf32>
    %3 = vector.shape_cast %2 : vector<1x16x32xf32> to vector<16x32xf32>
    %c0_5 = arith.constant 0 : index
    %c0_6 = arith.constant 0 : index
    %c0_7 = arith.constant 0 : index
    %4 = vector.load %arg4[%c0_5, %c0_6, %c0_7] : memref<1x128x32xf32, #tpu.memory_space<vmem>>, vector<1x128x32xf32>
    %5 = vector.shape_cast %4 : vector<1x128x32xf32> to vector<128x32xf32>
    %c0_8 = arith.constant 0 : index
    %c0_9 = arith.constant 0 : index
    %6 = vector.load %arg5[%c0_8, %c0_9] : memref<16x32xf32, #tpu.memory_space<vmem>>, vector<16x32xf32>
    %c0_10 = arith.constant 0 : index
    %c0_11 = arith.constant 0 : index
    %7 = vector.load %arg6[%c0_10, %c0_11] : memref<16x32xf32, #tpu.memory_space<vmem>>, vector<16x32xf32>
    %c0_12 = arith.constant 0 : index
    %c0_13 = arith.constant 0 : index
    %8 = vector.load %arg7[%c0_12, %c0_13] : memref<128x32xf32, #tpu.memory_space<vmem>>, vector<128x32xf32>
    %c0_14 = arith.constant 0 : index
    %c0_15 = arith.constant 0 : index
    %c0_16 = arith.constant 0 : index
    %9 = vector.load %arg8[%c0_14, %c0_15, %c0_16] : memref<1x1x128xf32, #tpu.memory_space<vmem>>, vector<1x1x128xf32>
    %10 = vector.shape_cast %9 : vector<1x1x128xf32> to vector<1x128xf32>
    %c0_17 = arith.constant 0 : index
    %c0_18 = arith.constant 0 : index
    %11 = vector.load %arg9[%c0_17, %c0_18] : memref<1x16xf32, #tpu.memory_space<vmem>>, vector<1x16xf32>
    %c0_19 = arith.constant 0 : index
    %c0_20 = arith.constant 0 : index
    %12 = vector.load %arg26[%c0_19, %c0_20] : memref<1x32xf32, #tpu.memory_space<vmem>>, vector<1x32xf32>
    %c0_21 = arith.constant 0 : index
    %c0_22 = arith.constant 0 : index
    %13 = vector.load %arg27[%c0_21, %c0_22] : memref<1x32xf32, #tpu.memory_space<vmem>>, vector<1x32xf32>
    %cst = arith.constant dense<0.000000e+00> : vector<16xf32>
    %14 = vector.multi_reduction <add>, %1, %cst [1] : vector<16x32xf32> to vector<16xf32>
    %15 = vector.shape_cast %14 : vector<16xf32> to vector<16x1xf32>
    %cst_23 = arith.constant 3.200000e+01 : f32
    %16 = vector.broadcast %cst_23 : f32 to vector<16x1xf32>
    %17 = arith.divf %15, %16 : vector<16x1xf32>
    %18 = vector.broadcast %17 : vector<16x1xf32> to vector<16x32xf32>
    %19 = arith.subf %1, %18 : vector<16x32xf32>
    %20 = arith.mulf %19, %19 : vector<16x32xf32>
    %cst_24 = arith.constant dense<0.000000e+00> : vector<16xf32>
    %21 = vector.multi_reduction <add>, %20, %cst_24 [1] : vector<16x32xf32> to vector<16xf32>
    %22 = vector.shape_cast %21 : vector<16xf32> to vector<16x1xf32>
    %cst_25 = arith.constant 3.200000e+01 : f32
    %23 = vector.broadcast %cst_25 : f32 to vector<16x1xf32>
    %24 = arith.divf %22, %23 : vector<16x1xf32>
    %25 = vector.broadcast %17 : vector<16x1xf32> to vector<16x32xf32>
    %26 = arith.subf %1, %25 : vector<16x32xf32>
    %cst_26 = arith.constant 9.99999974E-6 : f32
    %27 = vector.broadcast %cst_26 : f32 to vector<16x1xf32>
    %28 = arith.addf %24, %27 : vector<16x1xf32>
    %29 = math.rsqrt %28 : vector<16x1xf32>
    %30 = vector.broadcast %29 : vector<16x1xf32> to vector<16x32xf32>
    %31 = arith.mulf %26, %30 : vector<16x32xf32>
    %32 = vector.broadcast %12 : vector<1x32xf32> to vector<16x32xf32>
    %33 = arith.mulf %31, %32 : vector<16x32xf32>
    %34 = vector.broadcast %13 : vector<1x32xf32> to vector<16x32xf32>
    %35 = arith.addf %33, %34 : vector<16x32xf32>
    %36 = arith.addf %35, %6 : vector<16x32xf32>
    %c0_27 = arith.constant 0 : index
    %c0_28 = arith.constant 0 : index
    %37 = vector.load %arg26[%c0_27, %c0_28] : memref<1x32xf32, #tpu.memory_space<vmem>>, vector<1x32xf32>
    %c0_29 = arith.constant 0 : index
    %c0_30 = arith.constant 0 : index
    %38 = vector.load %arg27[%c0_29, %c0_30] : memref<1x32xf32, #tpu.memory_space<vmem>>, vector<1x32xf32>
    %cst_31 = arith.constant dense<0.000000e+00> : vector<16xf32>
    %39 = vector.multi_reduction <add>, %3, %cst_31 [1] : vector<16x32xf32> to vector<16xf32>
    %40 = vector.shape_cast %39 : vector<16xf32> to vector<16x1xf32>
    %cst_32 = arith.constant 3.200000e+01 : f32
    %41 = vector.broadcast %cst_32 : f32 to vector<16x1xf32>
    %42 = arith.divf %40, %41 : vector<16x1xf32>
    %43 = vector.broadcast %42 : vector<16x1xf32> to vector<16x32xf32>
    %44 = arith.subf %3, %43 : vector<16x32xf32>
    %45 = arith.mulf %44, %44 : vector<16x32xf32>
    %cst_33 = arith.constant dense<0.000000e+00> : vector<16xf32>
    %46 = vector.multi_reduction <add>, %45, %cst_33 [1] : vector<16x32xf32> to vector<16xf32>
    %47 = vector.shape_cast %46 : vector<16xf32> to vector<16x1xf32>
    %cst_34 = arith.constant 3.200000e+01 : f32
    %48 = vector.broadcast %cst_34 : f32 to vector<16x1xf32>
    %49 = arith.divf %47, %48 : vector<16x1xf32>
    %50 = vector.broadcast %42 : vector<16x1xf32> to vector<16x32xf32>
    %51 = arith.subf %3, %50 : vector<16x32xf32>
    %cst_35 = arith.constant 9.99999974E-6 : f32
    %52 = vector.broadcast %cst_35 : f32 to vector<16x1xf32>
    %53 = arith.addf %49, %52 : vector<16x1xf32>
    %54 = math.rsqrt %53 : vector<16x1xf32>
    %55 = vector.broadcast %54 : vector<16x1xf32> to vector<16x32xf32>
    %56 = arith.mulf %51, %55 : vector<16x32xf32>
    %57 = vector.broadcast %37 : vector<1x32xf32> to vector<16x32xf32>
    %58 = arith.mulf %56, %57 : vector<16x32xf32>
    %59 = vector.broadcast %38 : vector<1x32xf32> to vector<16x32xf32>
    %60 = arith.addf %58, %59 : vector<16x32xf32>
    %61 = arith.addf %60, %7 : vector<16x32xf32>
    %62 = arith.truncf %61 : vector<16x32xf32> to vector<16x32xbf16>
    %c0_36 = arith.constant 0 : index
    %c0_37 = arith.constant 0 : index
    %63 = vector.load %arg10[%c0_36, %c0_37] : memref<32x32xbf16, #tpu.memory_space<vmem>>, vector<32x32xbf16>
    %cst_38 = arith.constant dense<0.000000e+00> : vector<16x32xf32>
    %64 = tpu.matmul %62, %63, %cst_38 {dimension_numbers = #tpu.dot_dimension_numbers<[1], [0], [0], [1], [0, 0, 1, 1], [], []>} : vector<16x32xbf16>, vector<32x32xbf16>, vector<16x32xf32> -> vector<16x32xf32>
    %c0_39 = arith.constant 0 : index
    %c0_40 = arith.constant 0 : index
    %65 = vector.load %arg11[%c0_39, %c0_40] : memref<1x32xf32, #tpu.memory_space<vmem>>, vector<1x32xf32>
    %66 = vector.broadcast %65 : vector<1x32xf32> to vector<16x32xf32>
    %67 = arith.addf %64, %66 : vector<16x32xf32>
    %68 = arith.truncf %67 : vector<16x32xf32> to vector<16x32xbf16>
    %69 = arith.truncf %36 : vector<16x32xf32> to vector<16x32xbf16>
    %c0_41 = arith.constant 0 : index
    %c0_42 = arith.constant 0 : index
    %70 = vector.load %arg12[%c0_41, %c0_42] : memref<32x32xbf16, #tpu.memory_space<vmem>>, vector<32x32xbf16>
    %cst_43 = arith.constant dense<0.000000e+00> : vector<16x32xf32>
    %71 = tpu.matmul %69, %70, %cst_43 {dimension_numbers = #tpu.dot_dimension_numbers<[1], [0], [0], [1], [0, 0, 1, 1], [], []>} : vector<16x32xbf16>, vector<32x32xbf16>, vector<16x32xf32> -> vector<16x32xf32>
    %c0_44 = arith.constant 0 : index
    %c0_45 = arith.constant 0 : index
    %72 = vector.load %arg13[%c0_44, %c0_45] : memref<1x32xf32, #tpu.memory_space<vmem>>, vector<1x32xf32>
    %73 = vector.broadcast %72 : vector<1x32xf32> to vector<16x32xf32>
    %74 = arith.addf %71, %73 : vector<16x32xf32>
    %75 = arith.truncf %74 : vector<16x32xf32> to vector<16x32xbf16>
    %76 = arith.truncf %1 : vector<16x32xf32> to vector<16x32xbf16>
    %c0_46 = arith.constant 0 : index
    %c0_47 = arith.constant 0 : index
    %77 = vector.load %arg14[%c0_46, %c0_47] : memref<32x32xbf16, #tpu.memory_space<vmem>>, vector<32x32xbf16>
    %cst_48 = arith.constant dense<0.000000e+00> : vector<16x32xf32>
    %78 = tpu.matmul %76, %77, %cst_48 {dimension_numbers = #tpu.dot_dimension_numbers<[1], [0], [0], [1], [0, 0, 1, 1], [], []>} : vector<16x32xbf16>, vector<32x32xbf16>, vector<16x32xf32> -> vector<16x32xf32>
    %c0_49 = arith.constant 0 : index
    %c0_50 = arith.constant 0 : index
    %79 = vector.load %arg15[%c0_49, %c0_50] : memref<1x32xf32, #tpu.memory_space<vmem>>, vector<1x32xf32>
    %80 = vector.broadcast %79 : vector<1x32xf32> to vector<16x32xf32>
    %81 = arith.addf %78, %80 : vector<16x32xf32>
    %82 = arith.truncf %81 : vector<16x32xf32> to vector<16x32xbf16>
    %83 = vector.extract_strided_slice %68 {offsets = [0, 0], sizes = [16, 8], strides = [1, 1]} : vector<16x32xbf16> to vector<16x8xbf16>
    %84 = vector.extract_strided_slice %75 {offsets = [0, 0], sizes = [16, 8], strides = [1, 1]} : vector<16x32xbf16> to vector<16x8xbf16>
    %cst_51 = arith.constant dense<0.000000e+00> : vector<16x16xf32>
    %85 = tpu.matmul %83, %84, %cst_51 {dimension_numbers = #tpu.dot_dimension_numbers<[1], [1], [0], [0], [0, 0, 1, 0], [], []>} : vector<16x8xbf16>, vector<16x8xbf16>, vector<16x16xf32> -> vector<16x16xf32>
    %cst_52 = arith.constant 0.353553385 : f32
    %86 = vector.broadcast %cst_52 : f32 to vector<16x16xf32>
    %87 = arith.mulf %85, %86 : vector<16x16xf32>
    %88 = vector.broadcast %11 : vector<1x16xf32> to vector<16x16xf32>
    %89 = arith.addf %87, %88 : vector<16x16xf32>
    %cst_53 = arith.constant dense<0xFF800000> : vector<16xf32>
    %90 = vector.multi_reduction <maximumf>, %89, %cst_53 [1] : vector<16x16xf32> to vector<16xf32>
    %91 = vector.shape_cast %90 : vector<16xf32> to vector<16x1xf32>
    %92 = vector.broadcast %91 : vector<16x1xf32> to vector<16x16xf32>
    %93 = arith.subf %89, %92 : vector<16x16xf32>
    %94 = math.exp %93 : vector<16x16xf32>
    %cst_54 = arith.constant dense<0.000000e+00> : vector<16xf32>
    %95 = vector.multi_reduction <add>, %94, %cst_54 [1] : vector<16x16xf32> to vector<16xf32>
    %96 = vector.shape_cast %95 : vector<16xf32> to vector<16x1xf32>
    %97 = tpu.reciprocal %96 {approx = true} : vector<16x1xf32> -> vector<16x1xf32>
    %98 = vector.broadcast %97 : vector<16x1xf32> to vector<16x16xf32>
    %99 = arith.mulf %94, %98 : vector<16x16xf32>
    %100 = arith.truncf %99 : vector<16x16xf32> to vector<16x16xbf16>
    %101 = vector.extract_strided_slice %82 {offsets = [0, 0], sizes = [16, 8], strides = [1, 1]} : vector<16x32xbf16> to vector<16x8xbf16>
    %cst_55 = arith.constant dense<0.000000e+00> : vector<16x8xf32>
    %102 = tpu.matmul %100, %101, %cst_55 {dimension_numbers = #tpu.dot_dimension_numbers<[1], [0], [0], [1], [0, 0, 1, 1], [], []>} : vector<16x16xbf16>, vector<16x8xbf16>, vector<16x8xf32> -> vector<16x8xf32>
    %103 = vector.extract_strided_slice %68 {offsets = [0, 8], sizes = [16, 8], strides = [1, 1]} : vector<16x32xbf16> to vector<16x8xbf16>
    %104 = vector.extract_strided_slice %75 {offsets = [0, 8], sizes = [16, 8], strides = [1, 1]} : vector<16x32xbf16> to vector<16x8xbf16>
    %cst_56 = arith.constant dense<0.000000e+00> : vector<16x16xf32>
    %105 = tpu.matmul %103, %104, %cst_56 {dimension_numbers = #tpu.dot_dimension_numbers<[1], [1], [0], [0], [0, 0, 1, 0], [], []>} : vector<16x8xbf16>, vector<16x8xbf16>, vector<16x16xf32> -> vector<16x16xf32>
    %cst_57 = arith.constant 0.353553385 : f32
    %106 = vector.broadcast %cst_57 : f32 to vector<16x16xf32>
    %107 = arith.mulf %105, %106 : vector<16x16xf32>
    %108 = vector.broadcast %11 : vector<1x16xf32> to vector<16x16xf32>
    %109 = arith.addf %107, %108 : vector<16x16xf32>
    %cst_58 = arith.constant dense<0xFF800000> : vector<16xf32>
    %110 = vector.multi_reduction <maximumf>, %109, %cst_58 [1] : vector<16x16xf32> to vector<16xf32>
    %111 = vector.shape_cast %110 : vector<16xf32> to vector<16x1xf32>
    %112 = vector.broadcast %111 : vector<16x1xf32> to vector<16x16xf32>
    %113 = arith.subf %109, %112 : vector<16x16xf32>
    %114 = math.exp %113 : vector<16x16xf32>
    %cst_59 = arith.constant dense<0.000000e+00> : vector<16xf32>
    %115 = vector.multi_reduction <add>, %114, %cst_59 [1] : vector<16x16xf32> to vector<16xf32>
    %116 = vector.shape_cast %115 : vector<16xf32> to vector<16x1xf32>
    %117 = tpu.reciprocal %116 {approx = true} : vector<16x1xf32> -> vector<16x1xf32>
    %118 = vector.broadcast %117 : vector<16x1xf32> to vector<16x16xf32>
    %119 = arith.mulf %114, %118 : vector<16x16xf32>
    %120 = arith.truncf %119 : vector<16x16xf32> to vector<16x16xbf16>
    %121 = vector.extract_strided_slice %82 {offsets = [0, 8], sizes = [16, 8], strides = [1, 1]} : vector<16x32xbf16> to vector<16x8xbf16>
    %cst_60 = arith.constant dense<0.000000e+00> : vector<16x8xf32>
    %122 = tpu.matmul %120, %121, %cst_60 {dimension_numbers = #tpu.dot_dimension_numbers<[1], [0], [0], [1], [0, 0, 1, 1], [], []>} : vector<16x16xbf16>, vector<16x8xbf16>, vector<16x8xf32> -> vector<16x8xf32>
    %123 = vector.extract_strided_slice %68 {offsets = [0, 16], sizes = [16, 8], strides = [1, 1]} : vector<16x32xbf16> to vector<16x8xbf16>
    %124 = vector.extract_strided_slice %75 {offsets = [0, 16], sizes = [16, 8], strides = [1, 1]} : vector<16x32xbf16> to vector<16x8xbf16>
    %cst_61 = arith.constant dense<0.000000e+00> : vector<16x16xf32>
    %125 = tpu.matmul %123, %124, %cst_61 {dimension_numbers = #tpu.dot_dimension_numbers<[1], [1], [0], [0], [0, 0, 1, 0], [], []>} : vector<16x8xbf16>, vector<16x8xbf16>, vector<16x16xf32> -> vector<16x16xf32>
    %cst_62 = arith.constant 0.353553385 : f32
    %126 = vector.broadcast %cst_62 : f32 to vector<16x16xf32>
    %127 = arith.mulf %125, %126 : vector<16x16xf32>
    %128 = vector.broadcast %11 : vector<1x16xf32> to vector<16x16xf32>
    %129 = arith.addf %127, %128 : vector<16x16xf32>
    %cst_63 = arith.constant dense<0xFF800000> : vector<16xf32>
    %130 = vector.multi_reduction <maximumf>, %129, %cst_63 [1] : vector<16x16xf32> to vector<16xf32>
    %131 = vector.shape_cast %130 : vector<16xf32> to vector<16x1xf32>
    %132 = vector.broadcast %131 : vector<16x1xf32> to vector<16x16xf32>
    %133 = arith.subf %129, %132 : vector<16x16xf32>
    %134 = math.exp %133 : vector<16x16xf32>
    %cst_64 = arith.constant dense<0.000000e+00> : vector<16xf32>
    %135 = vector.multi_reduction <add>, %134, %cst_64 [1] : vector<16x16xf32> to vector<16xf32>
    %136 = vector.shape_cast %135 : vector<16xf32> to vector<16x1xf32>
    %137 = tpu.reciprocal %136 {approx = true} : vector<16x1xf32> -> vector<16x1xf32>
    %138 = vector.broadcast %137 : vector<16x1xf32> to vector<16x16xf32>
    %139 = arith.mulf %134, %138 : vector<16x16xf32>
    %140 = arith.truncf %139 : vector<16x16xf32> to vector<16x16xbf16>
    %141 = vector.extract_strided_slice %82 {offsets = [0, 16], sizes = [16, 8], strides = [1, 1]} : vector<16x32xbf16> to vector<16x8xbf16>
    %cst_65 = arith.constant dense<0.000000e+00> : vector<16x8xf32>
    %142 = tpu.matmul %140, %141, %cst_65 {dimension_numbers = #tpu.dot_dimension_numbers<[1], [0], [0], [1], [0, 0, 1, 1], [], []>} : vector<16x16xbf16>, vector<16x8xbf16>, vector<16x8xf32> -> vector<16x8xf32>
    %143 = vector.extract_strided_slice %68 {offsets = [0, 24], sizes = [16, 8], strides = [1, 1]} : vector<16x32xbf16> to vector<16x8xbf16>
    %144 = vector.extract_strided_slice %75 {offsets = [0, 24], sizes = [16, 8], strides = [1, 1]} : vector<16x32xbf16> to vector<16x8xbf16>
    %cst_66 = arith.constant dense<0.000000e+00> : vector<16x16xf32>
    %145 = tpu.matmul %143, %144, %cst_66 {dimension_numbers = #tpu.dot_dimension_numbers<[1], [1], [0], [0], [0, 0, 1, 0], [], []>} : vector<16x8xbf16>, vector<16x8xbf16>, vector<16x16xf32> -> vector<16x16xf32>
    %cst_67 = arith.constant 0.353553385 : f32
    %146 = vector.broadcast %cst_67 : f32 to vector<16x16xf32>
    %147 = arith.mulf %145, %146 : vector<16x16xf32>
    %148 = vector.broadcast %11 : vector<1x16xf32> to vector<16x16xf32>
    %149 = arith.addf %147, %148 : vector<16x16xf32>
    %cst_68 = arith.constant dense<0xFF800000> : vector<16xf32>
    %150 = vector.multi_reduction <maximumf>, %149, %cst_68 [1] : vector<16x16xf32> to vector<16xf32>
    %151 = vector.shape_cast %150 : vector<16xf32> to vector<16x1xf32>
    %152 = vector.broadcast %151 : vector<16x1xf32> to vector<16x16xf32>
    %153 = arith.subf %149, %152 : vector<16x16xf32>
    %154 = math.exp %153 : vector<16x16xf32>
    %cst_69 = arith.constant dense<0.000000e+00> : vector<16xf32>
    %155 = vector.multi_reduction <add>, %154, %cst_69 [1] : vector<16x16xf32> to vector<16xf32>
    %156 = vector.shape_cast %155 : vector<16xf32> to vector<16x1xf32>
    %157 = tpu.reciprocal %156 {approx = true} : vector<16x1xf32> -> vector<16x1xf32>
    %158 = vector.broadcast %157 : vector<16x1xf32> to vector<16x16xf32>
    %159 = arith.mulf %154, %158 : vector<16x16xf32>
    %160 = arith.truncf %159 : vector<16x16xf32> to vector<16x16xbf16>
    %161 = vector.extract_strided_slice %82 {offsets = [0, 24], sizes = [16, 8], strides = [1, 1]} : vector<16x32xbf16> to vector<16x8xbf16>
    %cst_70 = arith.constant dense<0.000000e+00> : vector<16x8xf32>
    %162 = tpu.matmul %160, %161, %cst_70 {dimension_numbers = #tpu.dot_dimension_numbers<[1], [0], [0], [1], [0, 0, 1, 1], [], []>} : vector<16x16xbf16>, vector<16x8xbf16>, vector<16x8xf32> -> vector<16x8xf32>
    %163 = tpu.concatenate %102, %122, %142, %162 in 1 : vector<16x8xf32>, vector<16x8xf32>, vector<16x8xf32>, vector<16x8xf32> -> vector<16x32xf32>
    %164 = arith.truncf %163 : vector<16x32xf32> to vector<16x32xbf16>
    %c0_71 = arith.constant 0 : index
    %c0_72 = arith.constant 0 : index
    %165 = vector.load %arg16[%c0_71, %c0_72] : memref<32x32xbf16, #tpu.memory_space<vmem>>, vector<32x32xbf16>
    %cst_73 = arith.constant dense<0.000000e+00> : vector<16x32xf32>
    %166 = tpu.matmul %164, %165, %cst_73 {dimension_numbers = #tpu.dot_dimension_numbers<[1], [0], [0], [1], [0, 0, 1, 1], [], []>} : vector<16x32xbf16>, vector<32x32xbf16>, vector<16x32xf32> -> vector<16x32xf32>
    %c0_74 = arith.constant 0 : index
    %c0_75 = arith.constant 0 : index
    %167 = vector.load %arg17[%c0_74, %c0_75] : memref<1x32xf32, #tpu.memory_space<vmem>>, vector<1x32xf32>
    %168 = vector.broadcast %167 : vector<1x32xf32> to vector<16x32xf32>
    %169 = arith.addf %166, %168 : vector<16x32xf32>
    %170 = arith.addf %3, %169 : vector<16x32xf32>
    %c0_76 = arith.constant 0 : index
    %c0_77 = arith.constant 0 : index
    %171 = vector.load %arg28[%c0_76, %c0_77] : memref<1x32xf32, #tpu.memory_space<vmem>>, vector<1x32xf32>
    %c0_78 = arith.constant 0 : index
    %c0_79 = arith.constant 0 : index
    %172 = vector.load %arg29[%c0_78, %c0_79] : memref<1x32xf32, #tpu.memory_space<vmem>>, vector<1x32xf32>
    %cst_80 = arith.constant dense<0.000000e+00> : vector<16xf32>
    %173 = vector.multi_reduction <add>, %170, %cst_80 [1] : vector<16x32xf32> to vector<16xf32>
    %174 = vector.shape_cast %173 : vector<16xf32> to vector<16x1xf32>
    %cst_81 = arith.constant 3.200000e+01 : f32
    %175 = vector.broadcast %cst_81 : f32 to vector<16x1xf32>
    %176 = arith.divf %174, %175 : vector<16x1xf32>
    %177 = vector.broadcast %176 : vector<16x1xf32> to vector<16x32xf32>
    %178 = arith.subf %170, %177 : vector<16x32xf32>
    %179 = arith.mulf %178, %178 : vector<16x32xf32>
    %cst_82 = arith.constant dense<0.000000e+00> : vector<16xf32>
    %180 = vector.multi_reduction <add>, %179, %cst_82 [1] : vector<16x32xf32> to vector<16xf32>
    %181 = vector.shape_cast %180 : vector<16xf32> to vector<16x1xf32>
    %cst_83 = arith.constant 3.200000e+01 : f32
    %182 = vector.broadcast %cst_83 : f32 to vector<16x1xf32>
    %183 = arith.divf %181, %182 : vector<16x1xf32>
    %184 = vector.broadcast %176 : vector<16x1xf32> to vector<16x32xf32>
    %185 = arith.subf %170, %184 : vector<16x32xf32>
    %cst_84 = arith.constant 9.99999974E-6 : f32
    %186 = vector.broadcast %cst_84 : f32 to vector<16x1xf32>
    %187 = arith.addf %183, %186 : vector<16x1xf32>
    %188 = math.rsqrt %187 : vector<16x1xf32>
    %189 = vector.broadcast %188 : vector<16x1xf32> to vector<16x32xf32>
    %190 = arith.mulf %185, %189 : vector<16x32xf32>
    %191 = vector.broadcast %171 : vector<1x32xf32> to vector<16x32xf32>
    %192 = arith.mulf %190, %191 : vector<16x32xf32>
    %193 = vector.broadcast %172 : vector<1x32xf32> to vector<16x32xf32>
    %194 = arith.addf %192, %193 : vector<16x32xf32>
    %195 = arith.addf %194, %7 : vector<16x32xf32>
    %196 = arith.addf %5, %8 : vector<128x32xf32>
    %197 = arith.truncf %195 : vector<16x32xf32> to vector<16x32xbf16>
    %c0_85 = arith.constant 0 : index
    %c0_86 = arith.constant 0 : index
    %198 = vector.load %arg18[%c0_85, %c0_86] : memref<32x32xbf16, #tpu.memory_space<vmem>>, vector<32x32xbf16>
    %cst_87 = arith.constant dense<0.000000e+00> : vector<16x32xf32>
    %199 = tpu.matmul %197, %198, %cst_87 {dimension_numbers = #tpu.dot_dimension_numbers<[1], [0], [0], [1], [0, 0, 1, 1], [], []>} : vector<16x32xbf16>, vector<32x32xbf16>, vector<16x32xf32> -> vector<16x32xf32>
    %c0_88 = arith.constant 0 : index
    %c0_89 = arith.constant 0 : index
    %200 = vector.load %arg19[%c0_88, %c0_89] : memref<1x32xf32, #tpu.memory_space<vmem>>, vector<1x32xf32>
    %201 = vector.broadcast %200 : vector<1x32xf32> to vector<16x32xf32>
    %202 = arith.addf %199, %201 : vector<16x32xf32>
    %203 = arith.truncf %202 : vector<16x32xf32> to vector<16x32xbf16>
    %204 = arith.truncf %196 : vector<128x32xf32> to vector<128x32xbf16>
    %c0_90 = arith.constant 0 : index
    %c0_91 = arith.constant 0 : index
    %205 = vector.load %arg20[%c0_90, %c0_91] : memref<32x32xbf16, #tpu.memory_space<vmem>>, vector<32x32xbf16>
    %cst_92 = arith.constant dense<0.000000e+00> : vector<128x32xf32>
    %206 = tpu.matmul %204, %205, %cst_92 {dimension_numbers = #tpu.dot_dimension_numbers<[1], [0], [0], [1], [0, 0, 1, 1], [], []>} : vector<128x32xbf16>, vector<32x32xbf16>, vector<128x32xf32> -> vector<128x32xf32>
    %c0_93 = arith.constant 0 : index
    %c0_94 = arith.constant 0 : index
    %207 = vector.load %arg21[%c0_93, %c0_94] : memref<1x32xf32, #tpu.memory_space<vmem>>, vector<1x32xf32>
    %208 = vector.broadcast %207 : vector<1x32xf32> to vector<128x32xf32>
    %209 = arith.addf %206, %208 : vector<128x32xf32>
    %210 = arith.truncf %209 : vector<128x32xf32> to vector<128x32xbf16>
    %211 = arith.truncf %5 : vector<128x32xf32> to vector<128x32xbf16>
    %c0_95 = arith.constant 0 : index
    %c0_96 = arith.constant 0 : index
    %212 = vector.load %arg22[%c0_95, %c0_96] : memref<32x32xbf16, #tpu.memory_space<vmem>>, vector<32x32xbf16>
    %cst_97 = arith.constant dense<0.000000e+00> : vector<128x32xf32>
    %213 = tpu.matmul %211, %212, %cst_97 {dimension_numbers = #tpu.dot_dimension_numbers<[1], [0], [0], [1], [0, 0, 1, 1], [], []>} : vector<128x32xbf16>, vector<32x32xbf16>, vector<128x32xf32> -> vector<128x32xf32>
    %c0_98 = arith.constant 0 : index
    %c0_99 = arith.constant 0 : index
    %214 = vector.load %arg23[%c0_98, %c0_99] : memref<1x32xf32, #tpu.memory_space<vmem>>, vector<1x32xf32>
    %215 = vector.broadcast %214 : vector<1x32xf32> to vector<128x32xf32>
    %216 = arith.addf %213, %215 : vector<128x32xf32>
    %217 = arith.truncf %216 : vector<128x32xf32> to vector<128x32xbf16>
    %218 = vector.extract_strided_slice %203 {offsets = [0, 0], sizes = [16, 8], strides = [1, 1]} : vector<16x32xbf16> to vector<16x8xbf16>
    %219 = vector.extract_strided_slice %210 {offsets = [0, 0], sizes = [128, 8], strides = [1, 1]} : vector<128x32xbf16> to vector<128x8xbf16>
    %cst_100 = arith.constant dense<0.000000e+00> : vector<16x128xf32>
    %220 = tpu.matmul %218, %219, %cst_100 {dimension_numbers = #tpu.dot_dimension_numbers<[1], [1], [0], [0], [0, 0, 1, 0], [], []>} : vector<16x8xbf16>, vector<128x8xbf16>, vector<16x128xf32> -> vector<16x128xf32>
    %cst_101 = arith.constant 0.353553385 : f32
    %221 = vector.broadcast %cst_101 : f32 to vector<16x128xf32>
    %222 = arith.mulf %220, %221 : vector<16x128xf32>
    %223 = vector.broadcast %10 : vector<1x128xf32> to vector<16x128xf32>
    %224 = arith.addf %222, %223 : vector<16x128xf32>
    %cst_102 = arith.constant dense<0xFF800000> : vector<16xf32>
    %225 = vector.multi_reduction <maximumf>, %224, %cst_102 [1] : vector<16x128xf32> to vector<16xf32>
    %226 = vector.shape_cast %225 : vector<16xf32> to vector<16x1xf32>
    %227 = vector.broadcast %226 : vector<16x1xf32> to vector<16x128xf32>
    %228 = arith.subf %224, %227 : vector<16x128xf32>
    %229 = math.exp %228 : vector<16x128xf32>
    %cst_103 = arith.constant dense<0.000000e+00> : vector<16xf32>
    %230 = vector.multi_reduction <add>, %229, %cst_103 [1] : vector<16x128xf32> to vector<16xf32>
    %231 = vector.shape_cast %230 : vector<16xf32> to vector<16x1xf32>
    %232 = tpu.reciprocal %231 {approx = true} : vector<16x1xf32> -> vector<16x1xf32>
    %233 = vector.broadcast %232 : vector<16x1xf32> to vector<16x128xf32>
    %234 = arith.mulf %229, %233 : vector<16x128xf32>
    %235 = arith.truncf %234 : vector<16x128xf32> to vector<16x128xbf16>
    %236 = vector.extract_strided_slice %217 {offsets = [0, 0], sizes = [128, 8], strides = [1, 1]} : vector<128x32xbf16> to vector<128x8xbf16>
    %cst_104 = arith.constant dense<0.000000e+00> : vector<16x8xf32>
    %237 = tpu.matmul %235, %236, %cst_104 {dimension_numbers = #tpu.dot_dimension_numbers<[1], [0], [0], [1], [0, 0, 1, 1], [], []>} : vector<16x128xbf16>, vector<128x8xbf16>, vector<16x8xf32> -> vector<16x8xf32>
    %238 = vector.extract_strided_slice %203 {offsets = [0, 8], sizes = [16, 8], strides = [1, 1]} : vector<16x32xbf16> to vector<16x8xbf16>
    %239 = vector.extract_strided_slice %210 {offsets = [0, 8], sizes = [128, 8], strides = [1, 1]} : vector<128x32xbf16> to vector<128x8xbf16>
    %cst_105 = arith.constant dense<0.000000e+00> : vector<16x128xf32>
    %240 = tpu.matmul %238, %239, %cst_105 {dimension_numbers = #tpu.dot_dimension_numbers<[1], [1], [0], [0], [0, 0, 1, 0], [], []>} : vector<16x8xbf16>, vector<128x8xbf16>, vector<16x128xf32> -> vector<16x128xf32>
    %cst_106 = arith.constant 0.353553385 : f32
    %241 = vector.broadcast %cst_106 : f32 to vector<16x128xf32>
    %242 = arith.mulf %240, %241 : vector<16x128xf32>
    %243 = vector.broadcast %10 : vector<1x128xf32> to vector<16x128xf32>
    %244 = arith.addf %242, %243 : vector<16x128xf32>
    %cst_107 = arith.constant dense<0xFF800000> : vector<16xf32>
    %245 = vector.multi_reduction <maximumf>, %244, %cst_107 [1] : vector<16x128xf32> to vector<16xf32>
    %246 = vector.shape_cast %245 : vector<16xf32> to vector<16x1xf32>
    %247 = vector.broadcast %246 : vector<16x1xf32> to vector<16x128xf32>
    %248 = arith.subf %244, %247 : vector<16x128xf32>
    %249 = math.exp %248 : vector<16x128xf32>
    %cst_108 = arith.constant dense<0.000000e+00> : vector<16xf32>
    %250 = vector.multi_reduction <add>, %249, %cst_108 [1] : vector<16x128xf32> to vector<16xf32>
    %251 = vector.shape_cast %250 : vector<16xf32> to vector<16x1xf32>
    %252 = tpu.reciprocal %251 {approx = true} : vector<16x1xf32> -> vector<16x1xf32>
    %253 = vector.broadcast %252 : vector<16x1xf32> to vector<16x128xf32>
    %254 = arith.mulf %249, %253 : vector<16x128xf32>
    %255 = arith.truncf %254 : vector<16x128xf32> to vector<16x128xbf16>
    %256 = vector.extract_strided_slice %217 {offsets = [0, 8], sizes = [128, 8], strides = [1, 1]} : vector<128x32xbf16> to vector<128x8xbf16>
    %cst_109 = arith.constant dense<0.000000e+00> : vector<16x8xf32>
    %257 = tpu.matmul %255, %256, %cst_109 {dimension_numbers = #tpu.dot_dimension_numbers<[1], [0], [0], [1], [0, 0, 1, 1], [], []>} : vector<16x128xbf16>, vector<128x8xbf16>, vector<16x8xf32> -> vector<16x8xf32>
    %258 = vector.extract_strided_slice %203 {offsets = [0, 16], sizes = [16, 8], strides = [1, 1]} : vector<16x32xbf16> to vector<16x8xbf16>
    %259 = vector.extract_strided_slice %210 {offsets = [0, 16], sizes = [128, 8], strides = [1, 1]} : vector<128x32xbf16> to vector<128x8xbf16>
    %cst_110 = arith.constant dense<0.000000e+00> : vector<16x128xf32>
    %260 = tpu.matmul %258, %259, %cst_110 {dimension_numbers = #tpu.dot_dimension_numbers<[1], [1], [0], [0], [0, 0, 1, 0], [], []>} : vector<16x8xbf16>, vector<128x8xbf16>, vector<16x128xf32> -> vector<16x128xf32>
    %cst_111 = arith.constant 0.353553385 : f32
    %261 = vector.broadcast %cst_111 : f32 to vector<16x128xf32>
    %262 = arith.mulf %260, %261 : vector<16x128xf32>
    %263 = vector.broadcast %10 : vector<1x128xf32> to vector<16x128xf32>
    %264 = arith.addf %262, %263 : vector<16x128xf32>
    %cst_112 = arith.constant dense<0xFF800000> : vector<16xf32>
    %265 = vector.multi_reduction <maximumf>, %264, %cst_112 [1] : vector<16x128xf32> to vector<16xf32>
    %266 = vector.shape_cast %265 : vector<16xf32> to vector<16x1xf32>
    %267 = vector.broadcast %266 : vector<16x1xf32> to vector<16x128xf32>
    %268 = arith.subf %264, %267 : vector<16x128xf32>
    %269 = math.exp %268 : vector<16x128xf32>
    %cst_113 = arith.constant dense<0.000000e+00> : vector<16xf32>
    %270 = vector.multi_reduction <add>, %269, %cst_113 [1] : vector<16x128xf32> to vector<16xf32>
    %271 = vector.shape_cast %270 : vector<16xf32> to vector<16x1xf32>
    %272 = tpu.reciprocal %271 {approx = true} : vector<16x1xf32> -> vector<16x1xf32>
    %273 = vector.broadcast %272 : vector<16x1xf32> to vector<16x128xf32>
    %274 = arith.mulf %269, %273 : vector<16x128xf32>
    %275 = arith.truncf %274 : vector<16x128xf32> to vector<16x128xbf16>
    %276 = vector.extract_strided_slice %217 {offsets = [0, 16], sizes = [128, 8], strides = [1, 1]} : vector<128x32xbf16> to vector<128x8xbf16>
    %cst_114 = arith.constant dense<0.000000e+00> : vector<16x8xf32>
    %277 = tpu.matmul %275, %276, %cst_114 {dimension_numbers = #tpu.dot_dimension_numbers<[1], [0], [0], [1], [0, 0, 1, 1], [], []>} : vector<16x128xbf16>, vector<128x8xbf16>, vector<16x8xf32> -> vector<16x8xf32>
    %278 = vector.extract_strided_slice %203 {offsets = [0, 24], sizes = [16, 8], strides = [1, 1]} : vector<16x32xbf16> to vector<16x8xbf16>
    %279 = vector.extract_strided_slice %210 {offsets = [0, 24], sizes = [128, 8], strides = [1, 1]} : vector<128x32xbf16> to vector<128x8xbf16>
    %cst_115 = arith.constant dense<0.000000e+00> : vector<16x128xf32>
    %280 = tpu.matmul %278, %279, %cst_115 {dimension_numbers = #tpu.dot_dimension_numbers<[1], [1], [0], [0], [0, 0, 1, 0], [], []>} : vector<16x8xbf16>, vector<128x8xbf16>, vector<16x128xf32> -> vector<16x128xf32>
    %cst_116 = arith.constant 0.353553385 : f32
    %281 = vector.broadcast %cst_116 : f32 to vector<16x128xf32>
    %282 = arith.mulf %280, %281 : vector<16x128xf32>
    %283 = vector.broadcast %10 : vector<1x128xf32> to vector<16x128xf32>
    %284 = arith.addf %282, %283 : vector<16x128xf32>
    %cst_117 = arith.constant dense<0xFF800000> : vector<16xf32>
    %285 = vector.multi_reduction <maximumf>, %284, %cst_117 [1] : vector<16x128xf32> to vector<16xf32>
    %286 = vector.shape_cast %285 : vector<16xf32> to vector<16x1xf32>
    %287 = vector.broadcast %286 : vector<16x1xf32> to vector<16x128xf32>
    %288 = arith.subf %284, %287 : vector<16x128xf32>
    %289 = math.exp %288 : vector<16x128xf32>
    %cst_118 = arith.constant dense<0.000000e+00> : vector<16xf32>
    %290 = vector.multi_reduction <add>, %289, %cst_118 [1] : vector<16x128xf32> to vector<16xf32>
    %291 = vector.shape_cast %290 : vector<16xf32> to vector<16x1xf32>
    %292 = tpu.reciprocal %291 {approx = true} : vector<16x1xf32> -> vector<16x1xf32>
    %293 = vector.broadcast %292 : vector<16x1xf32> to vector<16x128xf32>
    %294 = arith.mulf %289, %293 : vector<16x128xf32>
    %295 = arith.truncf %294 : vector<16x128xf32> to vector<16x128xbf16>
    %296 = vector.extract_strided_slice %217 {offsets = [0, 24], sizes = [128, 8], strides = [1, 1]} : vector<128x32xbf16> to vector<128x8xbf16>
    %cst_119 = arith.constant dense<0.000000e+00> : vector<16x8xf32>
    %297 = tpu.matmul %295, %296, %cst_119 {dimension_numbers = #tpu.dot_dimension_numbers<[1], [0], [0], [1], [0, 0, 1, 1], [], []>} : vector<16x128xbf16>, vector<128x8xbf16>, vector<16x8xf32> -> vector<16x8xf32>
    %298 = tpu.concatenate %237, %257, %277, %297 in 1 : vector<16x8xf32>, vector<16x8xf32>, vector<16x8xf32>, vector<16x8xf32> -> vector<16x32xf32>
    %299 = arith.truncf %298 : vector<16x32xf32> to vector<16x32xbf16>
    %c0_120 = arith.constant 0 : index
    %c0_121 = arith.constant 0 : index
    %300 = vector.load %arg24[%c0_120, %c0_121] : memref<32x32xbf16, #tpu.memory_space<vmem>>, vector<32x32xbf16>
    %cst_122 = arith.constant dense<0.000000e+00> : vector<16x32xf32>
    %301 = tpu.matmul %299, %300, %cst_122 {dimension_numbers = #tpu.dot_dimension_numbers<[1], [0], [0], [1], [0, 0, 1, 1], [], []>} : vector<16x32xbf16>, vector<32x32xbf16>, vector<16x32xf32> -> vector<16x32xf32>
    %c0_123 = arith.constant 0 : index
    %c0_124 = arith.constant 0 : index
    %302 = vector.load %arg25[%c0_123, %c0_124] : memref<1x32xf32, #tpu.memory_space<vmem>>, vector<1x32xf32>
    %303 = vector.broadcast %302 : vector<1x32xf32> to vector<16x32xf32>
    %304 = arith.addf %301, %303 : vector<16x32xf32>
    %305 = arith.addf %170, %304 : vector<16x32xf32>
    %c0_125 = arith.constant 0 : index
    %c0_126 = arith.constant 0 : index
    %306 = vector.load %arg30[%c0_125, %c0_126] : memref<1x32xf32, #tpu.memory_space<vmem>>, vector<1x32xf32>
    %c0_127 = arith.constant 0 : index
    %c0_128 = arith.constant 0 : index
    %307 = vector.load %arg31[%c0_127, %c0_128] : memref<1x32xf32, #tpu.memory_space<vmem>>, vector<1x32xf32>
    %cst_129 = arith.constant dense<0.000000e+00> : vector<16xf32>
    %308 = vector.multi_reduction <add>, %305, %cst_129 [1] : vector<16x32xf32> to vector<16xf32>
    %309 = vector.shape_cast %308 : vector<16xf32> to vector<16x1xf32>
    %cst_130 = arith.constant 3.200000e+01 : f32
    %310 = vector.broadcast %cst_130 : f32 to vector<16x1xf32>
    %311 = arith.divf %309, %310 : vector<16x1xf32>
    %312 = vector.broadcast %311 : vector<16x1xf32> to vector<16x32xf32>
    %313 = arith.subf %305, %312 : vector<16x32xf32>
    %314 = arith.mulf %313, %313 : vector<16x32xf32>
    %cst_131 = arith.constant dense<0.000000e+00> : vector<16xf32>
    %315 = vector.multi_reduction <add>, %314, %cst_131 [1] : vector<16x32xf32> to vector<16xf32>
    %316 = vector.shape_cast %315 : vector<16xf32> to vector<16x1xf32>
    %cst_132 = arith.constant 3.200000e+01 : f32
    %317 = vector.broadcast %cst_132 : f32 to vector<16x1xf32>
    %318 = arith.divf %316, %317 : vector<16x1xf32>
    %319 = vector.broadcast %311 : vector<16x1xf32> to vector<16x32xf32>
    %320 = arith.subf %305, %319 : vector<16x32xf32>
    %cst_133 = arith.constant 9.99999974E-6 : f32
    %321 = vector.broadcast %cst_133 : f32 to vector<16x1xf32>
    %322 = arith.addf %318, %321 : vector<16x1xf32>
    %323 = math.rsqrt %322 : vector<16x1xf32>
    %324 = vector.broadcast %323 : vector<16x1xf32> to vector<16x32xf32>
    %325 = arith.mulf %320, %324 : vector<16x32xf32>
    %326 = vector.broadcast %306 : vector<1x32xf32> to vector<16x32xf32>
    %327 = arith.mulf %325, %326 : vector<16x32xf32>
    %328 = vector.broadcast %307 : vector<1x32xf32> to vector<16x32xf32>
    %329 = arith.addf %327, %328 : vector<16x32xf32>
    %330 = arith.truncf %329 : vector<16x32xf32> to vector<16x32xbf16>
    %c0_134 = arith.constant 0 : index
    %c0_135 = arith.constant 0 : index
    %331 = vector.load %arg32[%c0_134, %c0_135] : memref<32x64xbf16, #tpu.memory_space<vmem>>, vector<32x64xbf16>
    %cst_136 = arith.constant dense<0.000000e+00> : vector<16x64xf32>
    %332 = tpu.matmul %330, %331, %cst_136 {dimension_numbers = #tpu.dot_dimension_numbers<[1], [0], [0], [1], [0, 0, 1, 1], [], []>} : vector<16x32xbf16>, vector<32x64xbf16>, vector<16x64xf32> -> vector<16x64xf32>
    %c0_137 = arith.constant 0 : index
    %c0_138 = arith.constant 0 : index
    %333 = vector.load %arg33[%c0_137, %c0_138] : memref<1x64xf32, #tpu.memory_space<vmem>>, vector<1x64xf32>
    %334 = vector.broadcast %333 : vector<1x64xf32> to vector<16x64xf32>
    %335 = arith.addf %332, %334 : vector<16x64xf32>
    %cst_139 = arith.constant 5.000000e-01 : f32
    %336 = vector.broadcast %cst_139 : f32 to vector<16x64xf32>
    %337 = arith.mulf %336, %335 : vector<16x64xf32>
    %cst_140 = arith.constant 0.707106769 : f32
    %338 = vector.broadcast %cst_140 : f32 to vector<16x64xf32>
    %339 = arith.mulf %335, %338 : vector<16x64xf32>
    %340 = math.erf %339 : vector<16x64xf32>
    %cst_141 = arith.constant 1.000000e+00 : f32
    %341 = vector.broadcast %cst_141 : f32 to vector<16x64xf32>
    %342 = arith.addf %341, %340 : vector<16x64xf32>
    %343 = arith.mulf %337, %342 : vector<16x64xf32>
    %344 = arith.truncf %343 : vector<16x64xf32> to vector<16x64xbf16>
    %c0_142 = arith.constant 0 : index
    %c0_143 = arith.constant 0 : index
    %345 = vector.load %arg34[%c0_142, %c0_143] : memref<64x32xbf16, #tpu.memory_space<vmem>>, vector<64x32xbf16>
    %cst_144 = arith.constant dense<0.000000e+00> : vector<16x32xf32>
    %346 = tpu.matmul %344, %345, %cst_144 {dimension_numbers = #tpu.dot_dimension_numbers<[1], [0], [0], [1], [0, 0, 1, 1], [], []>} : vector<16x64xbf16>, vector<64x32xbf16>, vector<16x32xf32> -> vector<16x32xf32>
    %347 = arith.addf %305, %346 : vector<16x32xf32>
    %c0_145 = arith.constant 0 : index
    %c0_146 = arith.constant 0 : index
    %348 = vector.load %arg35[%c0_145, %c0_146] : memref<1x32xf32, #tpu.memory_space<vmem>>, vector<1x32xf32>
    %349 = vector.broadcast %348 : vector<1x32xf32> to vector<16x32xf32>
    %350 = arith.addf %347, %349 : vector<16x32xf32>
    %c0_147 = arith.constant 0 : index
    %c0_148 = arith.constant 0 : index
    %c0_149 = arith.constant 0 : index
    %351 = vector.load %arg36[%c0_147, %c0_148, %c0_149] : memref<1x16x32xf32, #tpu.memory_space<vmem>>, vector<1x16x32xf32>
    %352 = vector.shape_cast %351 : vector<1x16x32xf32> to vector<16x32xf32>
    %353 = vector.shape_cast %350 : vector<16x32xf32> to vector<1x16x32xf32>
    tpu.vector_store %arg36[%c0_147, %c0_148, %c0_149], %353 {strides = array<i32>} : memref<1x16x32xf32, #tpu.memory_space<vmem>>, vector<1x16x32xf32>,
    return
  }
  func.func @transform_0(%arg0: i32, %arg1: i32) -> (i32, i32, i32) {
    %c0_i32 = arith.constant 0 : i32
    %c0_i32_0 = arith.constant 0 : i32
    %c0_i32_1 = arith.constant 0 : i32
    return %arg0, %c0_i32, %c0_i32_0 : i32, i32, i32
  }
  func.func @transform_1(%arg0: i32, %arg1: i32) -> (i32, i32, i32) {
    %c0_i32 = arith.constant 0 : i32
    %c0_i32_0 = arith.constant 0 : i32
    return %arg0, %arg1, %c0_i32 : i32, i32, i32
  }
  func.func @transform_2(%arg0: i32, %arg1: i32) -> (i32, i32, i32) {
    %c0_i32 = arith.constant 0 : i32
    %c0_i32_0 = arith.constant 0 : i32
    %c0_i32_1 = arith.constant 0 : i32
    return %arg0, %c0_i32, %c0_i32_0 : i32, i32, i32
  }
  func.func @transform_3(%arg0: i32, %arg1: i32) -> (i32, i32) {
    %c0_i32 = arith.constant 0 : i32
    %c0_i32_0 = arith.constant 0 : i32
    %c0_i32_1 = arith.constant 0 : i32
    return %c0_i32, %c0_i32_0 : i32, i32
  }
  func.func @transform_4(%arg0: i32, %arg1: i32) -> (i32, i32) {
    %c0_i32 = arith.constant 0 : i32
    %c0_i32_0 = arith.constant 0 : i32
    return %arg1, %c0_i32 : i32, i32
  }
  func.func @transform_5(%arg0: i32, %arg1: i32) -> (i32, i32) {
    %c0_i32 = arith.constant 0 : i32
    %c0_i32_0 = arith.constant 0 : i32
    %c0_i32_1 = arith.constant 0 : i32
    return %c0_i32, %c0_i32_0 : i32, i32
  }
  func.func @transform_6(%arg0: i32, %arg1: i32) -> (i32, i32, i32) {
    %c0_i32 = arith.constant 0 : i32
    %c0_i32_0 = arith.constant 0 : i32
    %c0_i32_1 = arith.constant 0 : i32
    return %arg0, %c0_i32, %c0_i32_0 : i32, i32, i32
  }
  func.func @transform_7(%arg0: i32, %arg1: i32) -> (i32, i32) {
    %c0_i32 = arith.constant 0 : i32
    %c0_i32_0 = arith.constant 0 : i32
    %c0_i32_1 = arith.constant 0 : i32
    return %c0_i32, %c0_i32_0 : i32, i32
  }
  func.func @transform_8(%arg0: i32, %arg1: i32) -> (i32, i32) {
    %c0_i32 = arith.constant 0 : i32
    %c0_i32_0 = arith.constant 0 : i32
    %c0_i32_1 = arith.constant 0 : i32
    return %c0_i32, %c0_i32_0 : i32, i32
  }
  func.func @transform_9(%arg0: i32, %arg1: i32) -> (i32, i32) {
    %c0_i32 = arith.constant 0 : i32
    %c0_i32_0 = arith.constant 0 : i32
    %c0_i32_1 = arith.constant 0 : i32
    return %c0_i32, %c0_i32_0 : i32, i32
  }
  func.func @transform_10(%arg0: i32, %arg1: i32) -> (i32, i32) {
    %c0_i32 = arith.constant 0 : i32
    %c0_i32_0 = arith.constant 0 : i32
    %c0_i32_1 = arith.constant 0 : i32
    return %c0_i32, %c0_i32_0 : i32, i32
  }
  func.func @transform_11(%arg0: i32, %arg1: i32) -> (i32, i32) {
    %c0_i32 = arith.constant 0 : i32
    %c0_i32_0 = arith.constant 0 : i32
    %c0_i32_1 = arith.constant 0 : i32
    return %c0_i32, %c0_i32_0 : i32, i32
  }
  func.func @transform_12(%arg0: i32, %arg1: i32) -> (i32, i32) {
    %c0_i32 = arith.constant 0 : i32
    %c0_i32_0 = arith.constant 0 : i32
    %c0_i32_1 = arith.constant 0 : i32
    return %c0_i32, %c0_i32_0 : i32, i32
  }
  func.func @transform_13(%arg0: i32, %arg1: i32) -> (i32, i32) {
    %c0_i32 = arith.constant 0 : i32
    %c0_i32_0 = arith.constant 0 : i32
    %c0_i32_1 = arith.constant 0 : i32
    return %c0_i32, %c0_i32_0 : i32, i32
  }
  func.func @transform_14(%arg0: i32, %arg1: i32) -> (i32, i32) {
    %c0_i32 = arith.constant 0 : i32
    %c0_i32_0 = arith.constant 0 : i32
    %c0_i32_1 = arith.constant 0 : i32
    return %c0_i32, %c0_i32_0 : i32, i32
  }
  func.func @transform_15(%arg0: i32, %arg1: i32) -> (i32, i32) {
    %c0_i32 = arith.constant 0 : i32
    %c0_i32_0 = arith.constant 0 : i32
    %c0_i32_1 = arith.constant 0 : i32
    return %c0_i32, %c0_i32_0 : i32, i32
  }
  func.func @transform_16(%arg0: i32, %arg1: i32) -> (i32, i32) {
    %c0_i32 = arith.constant 0 : i32
    %c0_i32_0 = arith.constant 0 : i32
    %c0_i32_1 = arith.constant 0 : i32
    return %c0_i32, %c0_i32_0 : i32, i32
  }
  func.func @transform_17(%arg0: i32, %arg1: i32) -> (i32, i32) {
    %c0_i32 = arith.constant 0 : i32
    %c0_i32_0 = arith.constant 0 : i32
    %c0_i32_1 = arith.constant 0 : i32
    return %c0_i32, %c0_i32_0 : i32, i32
  }
  func.func @transform_18(%arg0: i32, %arg1: i32) -> (i32, i32) {
    %c0_i32 = arith.constant 0 : i32
    %c0_i32_0 = arith.constant 0 : i32
    %c0_i32_1 = arith.constant 0 : i32
    return %c0_i32, %c0_i32_0 : i32, i32
  }
  func.func @transform_19(%arg0: i32, %arg1: i32) -> (i32, i32) {
    %c0_i32 = arith.constant 0 : i32
    %c0_i32_0 = arith.constant 0 : i32
    %c0_i32_1 = arith.constant 0 : i32
    return %c0_i32, %c0_i32_0 : i32, i32
  }
  func.func @transform_20(%arg0: i32, %arg1: i32) -> (i32, i32) {
    %c0_i32 = arith.constant 0 : i32
    %c0_i32_0 = arith.constant 0 : i32
    %c0_i32_1 = arith.constant 0 : i32
    return %c0_i32, %c0_i32_0 : i32, i32
  }
  func.func @transform_21(%arg0: i32, %arg1: i32) -> (i32, i32) {
    %c0_i32 = arith.constant 0 : i32
    %c0_i32_0 = arith.constant 0 : i32
    %c0_i32_1 = arith.constant 0 : i32
    return %c0_i32, %c0_i32_0 : i32, i32
  }
  func.func @transform_22(%arg0: i32, %arg1: i32) -> (i32, i32) {
    %c0_i32 = arith.constant 0 : i32
    %c0_i32_0 = arith.constant 0 : i32
    %c0_i32_1 = arith.constant 0 : i32
    return %c0_i32, %c0_i32_0 : i32, i32
  }
  func.func @transform_23(%arg0: i32, %arg1: i32) -> (i32, i32) {
    %c0_i32 = arith.constant 0 : i32
    %c0_i32_0 = arith.constant 0 : i32
    %c0_i32_1 = arith.constant 0 : i32
    return %c0_i32, %c0_i32_0 : i32, i32
  }
  func.func @transform_24(%arg0: i32, %arg1: i32) -> (i32, i32) {
    %c0_i32 = arith.constant 0 : i32
    %c0_i32_0 = arith.constant 0 : i32
    %c0_i32_1 = arith.constant 0 : i32
    return %c0_i32, %c0_i32_0 : i32, i32
  }
  func.func @transform_25(%arg0: i32, %arg1: i32) -> (i32, i32) {
    %c0_i32 = arith.constant 0 : i32
    %c0_i32_0 = arith.constant 0 : i32
    %c0_i32_1 = arith.constant 0 : i32
    return %c0_i32, %c0_i32_0 : i32, i32
  }
  func.func @transform_26(%arg0: i32, %arg1: i32) -> (i32, i32) {
    %c0_i32 = arith.constant 0 : i32
    %c0_i32_0 = arith.constant 0 : i32
    %c0_i32_1 = arith.constant 0 : i32
    return %c0_i32, %c0_i32_0 : i32, i32
  }
  func.func @transform_27(%arg0: i32, %arg1: i32) -> (i32, i32) {
    %c0_i32 = arith.constant 0 : i32
    %c0_i32_0 = arith.constant 0 : i32
    %c0_i32_1 = arith.constant 0 : i32
    return %c0_i32, %c0_i32_0 : i32, i32
  }
  func.func @transform_28(%arg0: i32, %arg1: i32) -> (i32, i32) {
    %c0_i32 = arith.constant 0 : i32
    %c0_i32_0 = arith.constant 0 : i32
    %c0_i32_1 = arith.constant 0 : i32
    return %c0_i32, %c0_i32_0 : i32, i32
  }
  func.func @transform_29(%arg0: i32, %arg1: i32) -> (i32, i32) {
    %c0_i32 = arith.constant 0 : i32
    %c0_i32_0 = arith.constant 0 : i32
    %c0_i32_1 = arith.constant 0 : i32
    return %c0_i32, %c0_i32_0 : i32, i32
  }
  func.func @transform_30(%arg0: i32, %arg1: i32) -> (i32, i32) {
    %c0_i32 = arith.constant 0 : i32
    %c0_i32_0 = arith.constant 0 : i32
    %c0_i32_1 = arith.constant 0 : i32
    return %c0_i32, %c0_i32_0 : i32, i32
  }
  func.func @transform_31(%arg0: i32, %arg1: i32) -> (i32, i32) {
    %c0_i32 = arith.constant 0 : i32
    %c0_i32_0 = arith.constant 0 : i32
    %c0_i32_1 = arith.constant 0 : i32
    return %c0_i32, %c0_i32_0 : i32, i32
  }
  func.func @transform_32(%arg0: i32, %arg1: i32) -> (i32, i32) {
    %c0_i32 = arith.constant 0 : i32
    %c0_i32_0 = arith.constant 0 : i32
    %c0_i32_1 = arith.constant 0 : i32
    return %c0_i32, %c0_i32_0 : i32, i32
  }
  func.func @transform_33(%arg0: i32, %arg1: i32) -> (i32, i32) {
    %c0_i32 = arith.constant 0 : i32
    %c0_i32_0 = arith.constant 0 : i32
    %c0_i32_1 = arith.constant 0 : i32
    return %c0_i32, %c0_i32_0 : i32, i32
  }
  func.func @transform_34(%arg0: i32, %arg1: i32) -> (i32, i32, i32) {
    %c0_i32 = arith.constant 0 : i32
    %c0_i32_0 = arith.constant 0 : i32
    return %arg0, %arg1, %c0_i32 : i32, i32, i32
  }
}

module attributes {stable_mosaic.version = 11 : i64} {
  func.func @_decoder_layer_kernel(%arg0: i32, %arg1: i32, %arg2: memref<1x16x32xf32, #tpu.memory_space<vmem>>, %arg3: memref<1x16x32xf32, #tpu.memory_space<vmem>>, %arg4: memref<1x128x32xf32, #tpu.memory_space<vmem>>, %arg5: memref<16x32xf32, #tpu.memory_space<vmem>>, %arg6: memref<16x32xf32, #tpu.memory_space<vmem>>, %arg7: memref<128x32xf32, #tpu.memory_space<vmem>>, %arg8: memref<1x1x128xf32, #tpu.memory_space<vmem>>, %arg9: memref<1x16xf32, #tpu.memory_space<vmem>>, %arg10: memref<32x32xbf16, #tpu.memory_space<vmem>>, %arg11: memref<1x32xf32, #tpu.memory_space<vmem>>, %arg12: memref<32x32xbf16, #tpu.memory_space<vmem>>, %arg13: memref<1x32xf32, #tpu.memory_space<vmem>>, %arg14: memref<32x32xbf16, #tpu.memory_space<vmem>>, %arg15: memref<1x32xf32, #tpu.memory_space<vmem>>, %arg16: memref<32x32xbf16, #tpu.memory_space<vmem>>, %arg17: memref<1x32xf32, #tpu.memory_space<vmem>>, %arg18: memref<32x32xbf16, #tpu.memory_space<vmem>>, %arg19: memref<1x32xf32, #tpu.memory_space<vmem>>, %arg20: memref<32x32xbf16, #tpu.memory_space<vmem>>, %arg21: memref<1x32xf32, #tpu.memory_space<vmem>>, %arg22: memref<32x32xbf16, #tpu.memory_space<vmem>>, %arg23: memref<1x32xf32, #tpu.memory_space<vmem>>, %arg24: memref<32x32xbf16, #tpu.memory_space<vmem>>, %arg25: memref<1x32xf32, #tpu.memory_space<vmem>>, %arg26: memref<1x32xf32, #tpu.memory_space<vmem>>, %arg27: memref<1x32xf32, #tpu.memory_space<vmem>>, %arg28: memref<1x32xf32, #tpu.memory_space<vmem>>, %arg29: memref<1x32xf32, #tpu.memory_space<vmem>>, %arg30: memref<1x32xf32, #tpu.memory_space<vmem>>, %arg31: memref<1x32xf32, #tpu.memory_space<vmem>>, %arg32: memref<32x64xbf16, #tpu.memory_space<vmem>>, %arg33: memref<1x64xf32, #tpu.memory_space<vmem>>, %arg34: memref<64x32xbf16, #tpu.memory_space<vmem>>, %arg35: memref<1x32xf32, #tpu.memory_space<vmem>>, %arg36: memref<1x32xf32, #tpu.memory_space<vmem>>, %arg37: memref<1x32xf32, #tpu.memory_space<vmem>>, %arg38: memref<1x16x32xf32, #tpu.memory_space<vmem>>) attributes {dimension_semantics = [#tpu.dimension_semantics<parallel>, #tpu.dimension_semantics<parallel>], iteration_bounds = array<i64: 2, 1>, scalar_prefetch = 0 : i64, scratch_operands = 0 : i64, tpu.core_type = #tpu.core_type<tc>, window_params = [{transform_indices = @transform_0, window_bounds = array<i64: 1, 16, 32>}, {transform_indices = @transform_1, window_bounds = array<i64: 1, 16, 32>}, {transform_indices = @transform_2, window_bounds = array<i64: 1, 128, 32>}, {pipeline_mode = #tpu.pipeline_mode<synchronous>, transform_indices = @transform_3, window_bounds = array<i64: 16, 32>}, {transform_indices = @transform_4, window_bounds = array<i64: 16, 32>}, {pipeline_mode = #tpu.pipeline_mode<synchronous>, transform_indices = @transform_5, window_bounds = array<i64: 128, 32>}, {transform_indices = @transform_6, window_bounds = array<i64: 1, 1, 128>}, {pipeline_mode = #tpu.pipeline_mode<synchronous>, transform_indices = @transform_7, window_bounds = array<i64: 1, 16>}, {pipeline_mode = #tpu.pipeline_mode<synchronous>, transform_indices = @transform_8, window_bounds = array<i64: 32, 32>}, {pipeline_mode = #tpu.pipeline_mode<synchronous>, transform_indices = @transform_9, window_bounds = array<i64: 1, 32>}, {pipeline_mode = #tpu.pipeline_mode<synchronous>, transform_indices = @transform_10, window_bounds = array<i64: 32, 32>}, {pipeline_mode = #tpu.pipeline_mode<synchronous>, transform_indices = @transform_11, window_bounds = array<i64: 1, 32>}, {pipeline_mode = #tpu.pipeline_mode<synchronous>, transform_indices = @transform_12, window_bounds = array<i64: 32, 32>}, {pipeline_mode = #tpu.pipeline_mode<synchronous>, transform_indices = @transform_13, window_bounds = array<i64: 1, 32>}, {pipeline_mode = #tpu.pipeline_mode<synchronous>, transform_indices = @transform_14, window_bounds = array<i64: 32, 32>}, {pipeline_mode = #tpu.pipeline_mode<synchronous>, transform_indices = @transform_15, window_bounds = array<i64: 1, 32>}, {pipeline_mode = #tpu.pipeline_mode<synchronous>, transform_indices = @transform_16, window_bounds = array<i64: 32, 32>}, {pipeline_mode = #tpu.pipeline_mode<synchronous>, transform_indices = @transform_17, window_bounds = array<i64: 1, 32>}, {pipeline_mode = #tpu.pipeline_mode<synchronous>, transform_indices = @transform_18, window_bounds = array<i64: 32, 32>}, {pipeline_mode = #tpu.pipeline_mode<synchronous>, transform_indices = @transform_19, window_bounds = array<i64: 1, 32>}, {pipeline_mode = #tpu.pipeline_mode<synchronous>, transform_indices = @transform_20, window_bounds = array<i64: 32, 32>}, {pipeline_mode = #tpu.pipeline_mode<synchronous>, transform_indices = @transform_21, window_bounds = array<i64: 1, 32>}, {pipeline_mode = #tpu.pipeline_mode<synchronous>, transform_indices = @transform_22, window_bounds = array<i64: 32, 32>}, {pipeline_mode = #tpu.pipeline_mode<synchronous>, transform_indices = @transform_23, window_bounds = array<i64: 1, 32>}, {pipeline_mode = #tpu.pipeline_mode<synchronous>, transform_indices = @transform_24, window_bounds = array<i64: 1, 32>}, {pipeline_mode = #tpu.pipeline_mode<synchronous>, transform_indices = @transform_25, window_bounds = array<i64: 1, 32>}, {pipeline_mode = #tpu.pipeline_mode<synchronous>, transform_indices = @transform_26, window_bounds = array<i64: 1, 32>}, {pipeline_mode = #tpu.pipeline_mode<synchronous>, transform_indices = @transform_27, window_bounds = array<i64: 1, 32>}, {pipeline_mode = #tpu.pipeline_mode<synchronous>, transform_indices = @transform_28, window_bounds = array<i64: 1, 32>}, {pipeline_mode = #tpu.pipeline_mode<synchronous>, transform_indices = @transform_29, window_bounds = array<i64: 1, 32>}, {pipeline_mode = #tpu.pipeline_mode<synchronous>, transform_indices = @transform_30, window_bounds = array<i64: 32, 64>}, {pipeline_mode = #tpu.pipeline_mode<synchronous>, transform_indices = @transform_31, window_bounds = array<i64: 1, 64>}, {pipeline_mode = #tpu.pipeline_mode<synchronous>, transform_indices = @transform_32, window_bounds = array<i64: 64, 32>}, {pipeline_mode = #tpu.pipeline_mode<synchronous>, transform_indices = @transform_33, window_bounds = array<i64: 1, 32>}, {pipeline_mode = #tpu.pipeline_mode<synchronous>, transform_indices = @transform_34, window_bounds = array<i64: 1, 32>}, {pipeline_mode = #tpu.pipeline_mode<synchronous>, transform_indices = @transform_35, window_bounds = array<i64: 1, 32>}, {transform_indices = @transform_36, window_bounds = array<i64: 1, 16, 32>}]} {
    %c0 = arith.constant 0 : index
    %c0_0 = arith.constant 0 : index
    %c0_1 = arith.constant 0 : index
    %0 = vector.load %arg2[%c0, %c0_0, %c0_1] : memref<1x16x32xf32, #tpu.memory_space<vmem>>, vector<1x16x32xf32>
    %1 = vector.shape_cast %0 : vector<1x16x32xf32> to vector<16x32xf32>
    %c0_2 = arith.constant 0 : index
    %c0_3 = arith.constant 0 : index
    %c0_4 = arith.constant 0 : index
    %2 = vector.load %arg3[%c0_2, %c0_3, %c0_4] : memref<1x16x32xf32, #tpu.memory_space<vmem>>, vector<1x16x32xf32>
    %3 = vector.shape_cast %2 : vector<1x16x32xf32> to vector<16x32xf32>
    %c0_5 = arith.constant 0 : index
    %c0_6 = arith.constant 0 : index
    %c0_7 = arith.constant 0 : index
    %4 = vector.load %arg4[%c0_5, %c0_6, %c0_7] : memref<1x128x32xf32, #tpu.memory_space<vmem>>, vector<1x128x32xf32>
    %5 = vector.shape_cast %4 : vector<1x128x32xf32> to vector<128x32xf32>
    %c0_8 = arith.constant 0 : index
    %c0_9 = arith.constant 0 : index
    %6 = vector.load %arg5[%c0_8, %c0_9] : memref<16x32xf32, #tpu.memory_space<vmem>>, vector<16x32xf32>
    %c0_10 = arith.constant 0 : index
    %c0_11 = arith.constant 0 : index
    %7 = vector.load %arg6[%c0_10, %c0_11] : memref<16x32xf32, #tpu.memory_space<vmem>>, vector<16x32xf32>
    %c0_12 = arith.constant 0 : index
    %c0_13 = arith.constant 0 : index
    %8 = vector.load %arg7[%c0_12, %c0_13] : memref<128x32xf32, #tpu.memory_space<vmem>>, vector<128x32xf32>
    %c0_14 = arith.constant 0 : index
    %c0_15 = arith.constant 0 : index
    %c0_16 = arith.constant 0 : index
    %9 = vector.load %arg8[%c0_14, %c0_15, %c0_16] : memref<1x1x128xf32, #tpu.memory_space<vmem>>, vector<1x1x128xf32>
    %10 = vector.shape_cast %9 : vector<1x1x128xf32> to vector<1x128xf32>
    %c0_17 = arith.constant 0 : index
    %c0_18 = arith.constant 0 : index
    %11 = vector.load %arg9[%c0_17, %c0_18] : memref<1x16xf32, #tpu.memory_space<vmem>>, vector<1x16xf32>
    %c0_19 = arith.constant 0 : index
    %c0_20 = arith.constant 0 : index
    %12 = vector.load %arg26[%c0_19, %c0_20] : memref<1x32xf32, #tpu.memory_space<vmem>>, vector<1x32xf32>
    %c0_21 = arith.constant 0 : index
    %c0_22 = arith.constant 0 : index
    %13 = vector.load %arg27[%c0_21, %c0_22] : memref<1x32xf32, #tpu.memory_space<vmem>>, vector<1x32xf32>
    %cst = arith.constant dense<0.000000e+00> : vector<16xf32>
    %14 = vector.multi_reduction <add>, %1, %cst [1] : vector<16x32xf32> to vector<16xf32>
    %15 = vector.shape_cast %14 : vector<16xf32> to vector<16x1xf32>
    %cst_23 = arith.constant 3.200000e+01 : f32
    %16 = vector.broadcast %cst_23 : f32 to vector<16x1xf32>
    %17 = arith.divf %15, %16 : vector<16x1xf32>
    %18 = vector.broadcast %17 : vector<16x1xf32> to vector<16x32xf32>
    %19 = arith.subf %1, %18 : vector<16x32xf32>
    %20 = arith.mulf %19, %19 : vector<16x32xf32>
    %cst_24 = arith.constant dense<0.000000e+00> : vector<16xf32>
    %21 = vector.multi_reduction <add>, %20, %cst_24 [1] : vector<16x32xf32> to vector<16xf32>
    %22 = vector.shape_cast %21 : vector<16xf32> to vector<16x1xf32>
    %cst_25 = arith.constant 3.200000e+01 : f32
    %23 = vector.broadcast %cst_25 : f32 to vector<16x1xf32>
    %24 = arith.divf %22, %23 : vector<16x1xf32>
    %25 = vector.broadcast %17 : vector<16x1xf32> to vector<16x32xf32>
    %26 = arith.subf %1, %25 : vector<16x32xf32>
    %cst_26 = arith.constant 9.99999974E-6 : f32
    %27 = vector.broadcast %cst_26 : f32 to vector<16x1xf32>
    %28 = arith.addf %24, %27 : vector<16x1xf32>
    %29 = math.rsqrt %28 : vector<16x1xf32>
    %30 = vector.broadcast %29 : vector<16x1xf32> to vector<16x32xf32>
    %31 = arith.mulf %26, %30 : vector<16x32xf32>
    %32 = vector.broadcast %12 : vector<1x32xf32> to vector<16x32xf32>
    %33 = arith.mulf %31, %32 : vector<16x32xf32>
    %34 = vector.broadcast %13 : vector<1x32xf32> to vector<16x32xf32>
    %35 = arith.addf %33, %34 : vector<16x32xf32>
    %36 = arith.addf %35, %6 : vector<16x32xf32>
    %c0_27 = arith.constant 0 : index
    %c0_28 = arith.constant 0 : index
    %37 = vector.load %arg26[%c0_27, %c0_28] : memref<1x32xf32, #tpu.memory_space<vmem>>, vector<1x32xf32>
    %c0_29 = arith.constant 0 : index
    %c0_30 = arith.constant 0 : index
    %38 = vector.load %arg27[%c0_29, %c0_30] : memref<1x32xf32, #tpu.memory_space<vmem>>, vector<1x32xf32>
    %cst_31 = arith.constant dense<0.000000e+00> : vector<16xf32>
    %39 = vector.multi_reduction <add>, %3, %cst_31 [1] : vector<16x32xf32> to vector<16xf32>
    %40 = vector.shape_cast %39 : vector<16xf32> to vector<16x1xf32>
    %cst_32 = arith.constant 3.200000e+01 : f32
    %41 = vector.broadcast %cst_32 : f32 to vector<16x1xf32>
    %42 = arith.divf %40, %41 : vector<16x1xf32>
    %43 = vector.broadcast %42 : vector<16x1xf32> to vector<16x32xf32>
    %44 = arith.subf %3, %43 : vector<16x32xf32>
    %45 = arith.mulf %44, %44 : vector<16x32xf32>
    %cst_33 = arith.constant dense<0.000000e+00> : vector<16xf32>
    %46 = vector.multi_reduction <add>, %45, %cst_33 [1] : vector<16x32xf32> to vector<16xf32>
    %47 = vector.shape_cast %46 : vector<16xf32> to vector<16x1xf32>
    %cst_34 = arith.constant 3.200000e+01 : f32
    %48 = vector.broadcast %cst_34 : f32 to vector<16x1xf32>
    %49 = arith.divf %47, %48 : vector<16x1xf32>
    %50 = vector.broadcast %42 : vector<16x1xf32> to vector<16x32xf32>
    %51 = arith.subf %3, %50 : vector<16x32xf32>
    %cst_35 = arith.constant 9.99999974E-6 : f32
    %52 = vector.broadcast %cst_35 : f32 to vector<16x1xf32>
    %53 = arith.addf %49, %52 : vector<16x1xf32>
    %54 = math.rsqrt %53 : vector<16x1xf32>
    %55 = vector.broadcast %54 : vector<16x1xf32> to vector<16x32xf32>
    %56 = arith.mulf %51, %55 : vector<16x32xf32>
    %57 = vector.broadcast %37 : vector<1x32xf32> to vector<16x32xf32>
    %58 = arith.mulf %56, %57 : vector<16x32xf32>
    %59 = vector.broadcast %38 : vector<1x32xf32> to vector<16x32xf32>
    %60 = arith.addf %58, %59 : vector<16x32xf32>
    %61 = arith.addf %60, %7 : vector<16x32xf32>
    %62 = arith.truncf %61 : vector<16x32xf32> to vector<16x32xbf16>
    %c0_36 = arith.constant 0 : index
    %c0_37 = arith.constant 0 : index
    %63 = vector.load %arg10[%c0_36, %c0_37] : memref<32x32xbf16, #tpu.memory_space<vmem>>, vector<32x32xbf16>
    %cst_38 = arith.constant dense<0.000000e+00> : vector<16x32xf32>
    %64 = tpu.matmul %62, %63, %cst_38 {dimension_numbers = #tpu.dot_dimension_numbers<[1], [0], [0], [1], [0, 0, 1, 1], [], []>} : vector<16x32xbf16>, vector<32x32xbf16>, vector<16x32xf32> -> vector<16x32xf32>
    %c0_39 = arith.constant 0 : index
    %c0_40 = arith.constant 0 : index
    %65 = vector.load %arg11[%c0_39, %c0_40] : memref<1x32xf32, #tpu.memory_space<vmem>>, vector<1x32xf32>
    %66 = vector.broadcast %65 : vector<1x32xf32> to vector<16x32xf32>
    %67 = arith.addf %64, %66 : vector<16x32xf32>
    %68 = arith.truncf %67 : vector<16x32xf32> to vector<16x32xbf16>
    %69 = arith.truncf %36 : vector<16x32xf32> to vector<16x32xbf16>
    %c0_41 = arith.constant 0 : index
    %c0_42 = arith.constant 0 : index
    %70 = vector.load %arg12[%c0_41, %c0_42] : memref<32x32xbf16, #tpu.memory_space<vmem>>, vector<32x32xbf16>
    %cst_43 = arith.constant dense<0.000000e+00> : vector<16x32xf32>
    %71 = tpu.matmul %69, %70, %cst_43 {dimension_numbers = #tpu.dot_dimension_numbers<[1], [0], [0], [1], [0, 0, 1, 1], [], []>} : vector<16x32xbf16>, vector<32x32xbf16>, vector<16x32xf32> -> vector<16x32xf32>
    %c0_44 = arith.constant 0 : index
    %c0_45 = arith.constant 0 : index
    %72 = vector.load %arg13[%c0_44, %c0_45] : memref<1x32xf32, #tpu.memory_space<vmem>>, vector<1x32xf32>
    %73 = vector.broadcast %72 : vector<1x32xf32> to vector<16x32xf32>
    %74 = arith.addf %71, %73 : vector<16x32xf32>
    %75 = arith.truncf %74 : vector<16x32xf32> to vector<16x32xbf16>
    %76 = arith.truncf %1 : vector<16x32xf32> to vector<16x32xbf16>
    %c0_46 = arith.constant 0 : index
    %c0_47 = arith.constant 0 : index
    %77 = vector.load %arg14[%c0_46, %c0_47] : memref<32x32xbf16, #tpu.memory_space<vmem>>, vector<32x32xbf16>
    %cst_48 = arith.constant dense<0.000000e+00> : vector<16x32xf32>
    %78 = tpu.matmul %76, %77, %cst_48 {dimension_numbers = #tpu.dot_dimension_numbers<[1], [0], [0], [1], [0, 0, 1, 1], [], []>} : vector<16x32xbf16>, vector<32x32xbf16>, vector<16x32xf32> -> vector<16x32xf32>
    %c0_49 = arith.constant 0 : index
    %c0_50 = arith.constant 0 : index
    %79 = vector.load %arg15[%c0_49, %c0_50] : memref<1x32xf32, #tpu.memory_space<vmem>>, vector<1x32xf32>
    %80 = vector.broadcast %79 : vector<1x32xf32> to vector<16x32xf32>
    %81 = arith.addf %78, %80 : vector<16x32xf32>
    %82 = arith.truncf %81 : vector<16x32xf32> to vector<16x32xbf16>
    %83 = vector.extract_strided_slice %68 {offsets = [0, 0], sizes = [16, 8], strides = [1, 1]} : vector<16x32xbf16> to vector<16x8xbf16>
    %84 = vector.extract_strided_slice %75 {offsets = [0, 0], sizes = [16, 8], strides = [1, 1]} : vector<16x32xbf16> to vector<16x8xbf16>
    %cst_51 = arith.constant dense<0.000000e+00> : vector<16x16xf32>
    %85 = tpu.matmul %83, %84, %cst_51 {dimension_numbers = #tpu.dot_dimension_numbers<[1], [1], [0], [0], [0, 0, 1, 0], [], []>} : vector<16x8xbf16>, vector<16x8xbf16>, vector<16x16xf32> -> vector<16x16xf32>
    %cst_52 = arith.constant 0.353553385 : f32
    %86 = vector.broadcast %cst_52 : f32 to vector<16x16xf32>
    %87 = arith.mulf %85, %86 : vector<16x16xf32>
    %88 = vector.broadcast %11 : vector<1x16xf32> to vector<16x16xf32>
    %89 = arith.addf %87, %88 : vector<16x16xf32>
    %cst_53 = arith.constant dense<0xFF800000> : vector<16xf32>
    %90 = vector.multi_reduction <maximumf>, %89, %cst_53 [1] : vector<16x16xf32> to vector<16xf32>
    %91 = vector.shape_cast %90 : vector<16xf32> to vector<16x1xf32>
    %92 = vector.broadcast %91 : vector<16x1xf32> to vector<16x16xf32>
    %93 = arith.subf %89, %92 : vector<16x16xf32>
    %94 = math.exp %93 : vector<16x16xf32>
    %cst_54 = arith.constant dense<0.000000e+00> : vector<16xf32>
    %95 = vector.multi_reduction <add>, %94, %cst_54 [1] : vector<16x16xf32> to vector<16xf32>
    %96 = vector.shape_cast %95 : vector<16xf32> to vector<16x1xf32>
    %97 = tpu.reciprocal %96 {approx = true} : vector<16x1xf32> -> vector<16x1xf32>
    %98 = vector.broadcast %97 : vector<16x1xf32> to vector<16x16xf32>
    %99 = arith.mulf %94, %98 : vector<16x16xf32>
    %100 = arith.truncf %99 : vector<16x16xf32> to vector<16x16xbf16>
    %101 = vector.extract_strided_slice %82 {offsets = [0, 0], sizes = [16, 8], strides = [1, 1]} : vector<16x32xbf16> to vector<16x8xbf16>
    %cst_55 = arith.constant dense<0.000000e+00> : vector<16x8xf32>
    %102 = tpu.matmul %100, %101, %cst_55 {dimension_numbers = #tpu.dot_dimension_numbers<[1], [0], [0], [1], [0, 0, 1, 1], [], []>} : vector<16x16xbf16>, vector<16x8xbf16>, vector<16x8xf32> -> vector<16x8xf32>
    %103 = vector.extract_strided_slice %68 {offsets = [0, 8], sizes = [16, 8], strides = [1, 1]} : vector<16x32xbf16> to vector<16x8xbf16>
    %104 = vector.extract_strided_slice %75 {offsets = [0, 8], sizes = [16, 8], strides = [1, 1]} : vector<16x32xbf16> to vector<16x8xbf16>
    %cst_56 = arith.constant dense<0.000000e+00> : vector<16x16xf32>
    %105 = tpu.matmul %103, %104, %cst_56 {dimension_numbers = #tpu.dot_dimension_numbers<[1], [1], [0], [0], [0, 0, 1, 0], [], []>} : vector<16x8xbf16>, vector<16x8xbf16>, vector<16x16xf32> -> vector<16x16xf32>
    %cst_57 = arith.constant 0.353553385 : f32
    %106 = vector.broadcast %cst_57 : f32 to vector<16x16xf32>
    %107 = arith.mulf %105, %106 : vector<16x16xf32>
    %108 = vector.broadcast %11 : vector<1x16xf32> to vector<16x16xf32>
    %109 = arith.addf %107, %108 : vector<16x16xf32>
    %cst_58 = arith.constant dense<0xFF800000> : vector<16xf32>
    %110 = vector.multi_reduction <maximumf>, %109, %cst_58 [1] : vector<16x16xf32> to vector<16xf32>
    %111 = vector.shape_cast %110 : vector<16xf32> to vector<16x1xf32>
    %112 = vector.broadcast %111 : vector<16x1xf32> to vector<16x16xf32>
    %113 = arith.subf %109, %112 : vector<16x16xf32>
    %114 = math.exp %113 : vector<16x16xf32>
    %cst_59 = arith.constant dense<0.000000e+00> : vector<16xf32>
    %115 = vector.multi_reduction <add>, %114, %cst_59 [1] : vector<16x16xf32> to vector<16xf32>
    %116 = vector.shape_cast %115 : vector<16xf32> to vector<16x1xf32>
    %117 = tpu.reciprocal %116 {approx = true} : vector<16x1xf32> -> vector<16x1xf32>
    %118 = vector.broadcast %117 : vector<16x1xf32> to vector<16x16xf32>
    %119 = arith.mulf %114, %118 : vector<16x16xf32>
    %120 = arith.truncf %119 : vector<16x16xf32> to vector<16x16xbf16>
    %121 = vector.extract_strided_slice %82 {offsets = [0, 8], sizes = [16, 8], strides = [1, 1]} : vector<16x32xbf16> to vector<16x8xbf16>
    %cst_60 = arith.constant dense<0.000000e+00> : vector<16x8xf32>
    %122 = tpu.matmul %120, %121, %cst_60 {dimension_numbers = #tpu.dot_dimension_numbers<[1], [0], [0], [1], [0, 0, 1, 1], [], []>} : vector<16x16xbf16>, vector<16x8xbf16>, vector<16x8xf32> -> vector<16x8xf32>
    %123 = vector.extract_strided_slice %68 {offsets = [0, 16], sizes = [16, 8], strides = [1, 1]} : vector<16x32xbf16> to vector<16x8xbf16>
    %124 = vector.extract_strided_slice %75 {offsets = [0, 16], sizes = [16, 8], strides = [1, 1]} : vector<16x32xbf16> to vector<16x8xbf16>
    %cst_61 = arith.constant dense<0.000000e+00> : vector<16x16xf32>
    %125 = tpu.matmul %123, %124, %cst_61 {dimension_numbers = #tpu.dot_dimension_numbers<[1], [1], [0], [0], [0, 0, 1, 0], [], []>} : vector<16x8xbf16>, vector<16x8xbf16>, vector<16x16xf32> -> vector<16x16xf32>
    %cst_62 = arith.constant 0.353553385 : f32
    %126 = vector.broadcast %cst_62 : f32 to vector<16x16xf32>
    %127 = arith.mulf %125, %126 : vector<16x16xf32>
    %128 = vector.broadcast %11 : vector<1x16xf32> to vector<16x16xf32>
    %129 = arith.addf %127, %128 : vector<16x16xf32>
    %cst_63 = arith.constant dense<0xFF800000> : vector<16xf32>
    %130 = vector.multi_reduction <maximumf>, %129, %cst_63 [1] : vector<16x16xf32> to vector<16xf32>
    %131 = vector.shape_cast %130 : vector<16xf32> to vector<16x1xf32>
    %132 = vector.broadcast %131 : vector<16x1xf32> to vector<16x16xf32>
    %133 = arith.subf %129, %132 : vector<16x16xf32>
    %134 = math.exp %133 : vector<16x16xf32>
    %cst_64 = arith.constant dense<0.000000e+00> : vector<16xf32>
    %135 = vector.multi_reduction <add>, %134, %cst_64 [1] : vector<16x16xf32> to vector<16xf32>
    %136 = vector.shape_cast %135 : vector<16xf32> to vector<16x1xf32>
    %137 = tpu.reciprocal %136 {approx = true} : vector<16x1xf32> -> vector<16x1xf32>
    %138 = vector.broadcast %137 : vector<16x1xf32> to vector<16x16xf32>
    %139 = arith.mulf %134, %138 : vector<16x16xf32>
    %140 = arith.truncf %139 : vector<16x16xf32> to vector<16x16xbf16>
    %141 = vector.extract_strided_slice %82 {offsets = [0, 16], sizes = [16, 8], strides = [1, 1]} : vector<16x32xbf16> to vector<16x8xbf16>
    %cst_65 = arith.constant dense<0.000000e+00> : vector<16x8xf32>
    %142 = tpu.matmul %140, %141, %cst_65 {dimension_numbers = #tpu.dot_dimension_numbers<[1], [0], [0], [1], [0, 0, 1, 1], [], []>} : vector<16x16xbf16>, vector<16x8xbf16>, vector<16x8xf32> -> vector<16x8xf32>
    %143 = vector.extract_strided_slice %68 {offsets = [0, 24], sizes = [16, 8], strides = [1, 1]} : vector<16x32xbf16> to vector<16x8xbf16>
    %144 = vector.extract_strided_slice %75 {offsets = [0, 24], sizes = [16, 8], strides = [1, 1]} : vector<16x32xbf16> to vector<16x8xbf16>
    %cst_66 = arith.constant dense<0.000000e+00> : vector<16x16xf32>
    %145 = tpu.matmul %143, %144, %cst_66 {dimension_numbers = #tpu.dot_dimension_numbers<[1], [1], [0], [0], [0, 0, 1, 0], [], []>} : vector<16x8xbf16>, vector<16x8xbf16>, vector<16x16xf32> -> vector<16x16xf32>
    %cst_67 = arith.constant 0.353553385 : f32
    %146 = vector.broadcast %cst_67 : f32 to vector<16x16xf32>
    %147 = arith.mulf %145, %146 : vector<16x16xf32>
    %148 = vector.broadcast %11 : vector<1x16xf32> to vector<16x16xf32>
    %149 = arith.addf %147, %148 : vector<16x16xf32>
    %cst_68 = arith.constant dense<0xFF800000> : vector<16xf32>
    %150 = vector.multi_reduction <maximumf>, %149, %cst_68 [1] : vector<16x16xf32> to vector<16xf32>
    %151 = vector.shape_cast %150 : vector<16xf32> to vector<16x1xf32>
    %152 = vector.broadcast %151 : vector<16x1xf32> to vector<16x16xf32>
    %153 = arith.subf %149, %152 : vector<16x16xf32>
    %154 = math.exp %153 : vector<16x16xf32>
    %cst_69 = arith.constant dense<0.000000e+00> : vector<16xf32>
    %155 = vector.multi_reduction <add>, %154, %cst_69 [1] : vector<16x16xf32> to vector<16xf32>
    %156 = vector.shape_cast %155 : vector<16xf32> to vector<16x1xf32>
    %157 = tpu.reciprocal %156 {approx = true} : vector<16x1xf32> -> vector<16x1xf32>
    %158 = vector.broadcast %157 : vector<16x1xf32> to vector<16x16xf32>
    %159 = arith.mulf %154, %158 : vector<16x16xf32>
    %160 = arith.truncf %159 : vector<16x16xf32> to vector<16x16xbf16>
    %161 = vector.extract_strided_slice %82 {offsets = [0, 24], sizes = [16, 8], strides = [1, 1]} : vector<16x32xbf16> to vector<16x8xbf16>
    %cst_70 = arith.constant dense<0.000000e+00> : vector<16x8xf32>
    %162 = tpu.matmul %160, %161, %cst_70 {dimension_numbers = #tpu.dot_dimension_numbers<[1], [0], [0], [1], [0, 0, 1, 1], [], []>} : vector<16x16xbf16>, vector<16x8xbf16>, vector<16x8xf32> -> vector<16x8xf32>
    %163 = tpu.concatenate %102, %122, %142, %162 in 1 : vector<16x8xf32>, vector<16x8xf32>, vector<16x8xf32>, vector<16x8xf32> -> vector<16x32xf32>
    %164 = arith.truncf %163 : vector<16x32xf32> to vector<16x32xbf16>
    %c0_71 = arith.constant 0 : index
    %c0_72 = arith.constant 0 : index
    %165 = vector.load %arg16[%c0_71, %c0_72] : memref<32x32xbf16, #tpu.memory_space<vmem>>, vector<32x32xbf16>
    %cst_73 = arith.constant dense<0.000000e+00> : vector<16x32xf32>
    %166 = tpu.matmul %164, %165, %cst_73 {dimension_numbers = #tpu.dot_dimension_numbers<[1], [0], [0], [1], [0, 0, 1, 1], [], []>} : vector<16x32xbf16>, vector<32x32xbf16>, vector<16x32xf32> -> vector<16x32xf32>
    %c0_74 = arith.constant 0 : index
    %c0_75 = arith.constant 0 : index
    %167 = vector.load %arg17[%c0_74, %c0_75] : memref<1x32xf32, #tpu.memory_space<vmem>>, vector<1x32xf32>
    %168 = vector.broadcast %167 : vector<1x32xf32> to vector<16x32xf32>
    %169 = arith.addf %166, %168 : vector<16x32xf32>
    %170 = arith.addf %3, %169 : vector<16x32xf32>
    %c0_76 = arith.constant 0 : index
    %c0_77 = arith.constant 0 : index
    %171 = vector.load %arg28[%c0_76, %c0_77] : memref<1x32xf32, #tpu.memory_space<vmem>>, vector<1x32xf32>
    %c0_78 = arith.constant 0 : index
    %c0_79 = arith.constant 0 : index
    %172 = vector.load %arg29[%c0_78, %c0_79] : memref<1x32xf32, #tpu.memory_space<vmem>>, vector<1x32xf32>
    %cst_80 = arith.constant dense<0.000000e+00> : vector<16xf32>
    %173 = vector.multi_reduction <add>, %170, %cst_80 [1] : vector<16x32xf32> to vector<16xf32>
    %174 = vector.shape_cast %173 : vector<16xf32> to vector<16x1xf32>
    %cst_81 = arith.constant 3.200000e+01 : f32
    %175 = vector.broadcast %cst_81 : f32 to vector<16x1xf32>
    %176 = arith.divf %174, %175 : vector<16x1xf32>
    %177 = vector.broadcast %176 : vector<16x1xf32> to vector<16x32xf32>
    %178 = arith.subf %170, %177 : vector<16x32xf32>
    %179 = arith.mulf %178, %178 : vector<16x32xf32>
    %cst_82 = arith.constant dense<0.000000e+00> : vector<16xf32>
    %180 = vector.multi_reduction <add>, %179, %cst_82 [1] : vector<16x32xf32> to vector<16xf32>
    %181 = vector.shape_cast %180 : vector<16xf32> to vector<16x1xf32>
    %cst_83 = arith.constant 3.200000e+01 : f32
    %182 = vector.broadcast %cst_83 : f32 to vector<16x1xf32>
    %183 = arith.divf %181, %182 : vector<16x1xf32>
    %184 = vector.broadcast %176 : vector<16x1xf32> to vector<16x32xf32>
    %185 = arith.subf %170, %184 : vector<16x32xf32>
    %cst_84 = arith.constant 9.99999974E-6 : f32
    %186 = vector.broadcast %cst_84 : f32 to vector<16x1xf32>
    %187 = arith.addf %183, %186 : vector<16x1xf32>
    %188 = math.rsqrt %187 : vector<16x1xf32>
    %189 = vector.broadcast %188 : vector<16x1xf32> to vector<16x32xf32>
    %190 = arith.mulf %185, %189 : vector<16x32xf32>
    %191 = vector.broadcast %171 : vector<1x32xf32> to vector<16x32xf32>
    %192 = arith.mulf %190, %191 : vector<16x32xf32>
    %193 = vector.broadcast %172 : vector<1x32xf32> to vector<16x32xf32>
    %194 = arith.addf %192, %193 : vector<16x32xf32>
    %195 = arith.addf %194, %7 : vector<16x32xf32>
    %196 = arith.addf %5, %8 : vector<128x32xf32>
    %197 = arith.truncf %195 : vector<16x32xf32> to vector<16x32xbf16>
    %c0_85 = arith.constant 0 : index
    %c0_86 = arith.constant 0 : index
    %198 = vector.load %arg18[%c0_85, %c0_86] : memref<32x32xbf16, #tpu.memory_space<vmem>>, vector<32x32xbf16>
    %cst_87 = arith.constant dense<0.000000e+00> : vector<16x32xf32>
    %199 = tpu.matmul %197, %198, %cst_87 {dimension_numbers = #tpu.dot_dimension_numbers<[1], [0], [0], [1], [0, 0, 1, 1], [], []>} : vector<16x32xbf16>, vector<32x32xbf16>, vector<16x32xf32> -> vector<16x32xf32>
    %c0_88 = arith.constant 0 : index
    %c0_89 = arith.constant 0 : index
    %200 = vector.load %arg19[%c0_88, %c0_89] : memref<1x32xf32, #tpu.memory_space<vmem>>, vector<1x32xf32>
    %201 = vector.broadcast %200 : vector<1x32xf32> to vector<16x32xf32>
    %202 = arith.addf %199, %201 : vector<16x32xf32>
    %203 = arith.truncf %202 : vector<16x32xf32> to vector<16x32xbf16>
    %204 = arith.truncf %196 : vector<128x32xf32> to vector<128x32xbf16>
    %c0_90 = arith.constant 0 : index
    %c0_91 = arith.constant 0 : index
    %205 = vector.load %arg20[%c0_90, %c0_91] : memref<32x32xbf16, #tpu.memory_space<vmem>>, vector<32x32xbf16>
    %cst_92 = arith.constant dense<0.000000e+00> : vector<128x32xf32>
    %206 = tpu.matmul %204, %205, %cst_92 {dimension_numbers = #tpu.dot_dimension_numbers<[1], [0], [0], [1], [0, 0, 1, 1], [], []>} : vector<128x32xbf16>, vector<32x32xbf16>, vector<128x32xf32> -> vector<128x32xf32>
    %c0_93 = arith.constant 0 : index
    %c0_94 = arith.constant 0 : index
    %207 = vector.load %arg21[%c0_93, %c0_94] : memref<1x32xf32, #tpu.memory_space<vmem>>, vector<1x32xf32>
    %208 = vector.broadcast %207 : vector<1x32xf32> to vector<128x32xf32>
    %209 = arith.addf %206, %208 : vector<128x32xf32>
    %210 = arith.truncf %209 : vector<128x32xf32> to vector<128x32xbf16>
    %211 = arith.truncf %5 : vector<128x32xf32> to vector<128x32xbf16>
    %c0_95 = arith.constant 0 : index
    %c0_96 = arith.constant 0 : index
    %212 = vector.load %arg22[%c0_95, %c0_96] : memref<32x32xbf16, #tpu.memory_space<vmem>>, vector<32x32xbf16>
    %cst_97 = arith.constant dense<0.000000e+00> : vector<128x32xf32>
    %213 = tpu.matmul %211, %212, %cst_97 {dimension_numbers = #tpu.dot_dimension_numbers<[1], [0], [0], [1], [0, 0, 1, 1], [], []>} : vector<128x32xbf16>, vector<32x32xbf16>, vector<128x32xf32> -> vector<128x32xf32>
    %c0_98 = arith.constant 0 : index
    %c0_99 = arith.constant 0 : index
    %214 = vector.load %arg23[%c0_98, %c0_99] : memref<1x32xf32, #tpu.memory_space<vmem>>, vector<1x32xf32>
    %215 = vector.broadcast %214 : vector<1x32xf32> to vector<128x32xf32>
    %216 = arith.addf %213, %215 : vector<128x32xf32>
    %217 = arith.truncf %216 : vector<128x32xf32> to vector<128x32xbf16>
    %218 = vector.extract_strided_slice %203 {offsets = [0, 0], sizes = [16, 8], strides = [1, 1]} : vector<16x32xbf16> to vector<16x8xbf16>
    %219 = vector.extract_strided_slice %210 {offsets = [0, 0], sizes = [128, 8], strides = [1, 1]} : vector<128x32xbf16> to vector<128x8xbf16>
    %cst_100 = arith.constant dense<0.000000e+00> : vector<16x128xf32>
    %220 = tpu.matmul %218, %219, %cst_100 {dimension_numbers = #tpu.dot_dimension_numbers<[1], [1], [0], [0], [0, 0, 1, 0], [], []>} : vector<16x8xbf16>, vector<128x8xbf16>, vector<16x128xf32> -> vector<16x128xf32>
    %cst_101 = arith.constant 0.353553385 : f32
    %221 = vector.broadcast %cst_101 : f32 to vector<16x128xf32>
    %222 = arith.mulf %220, %221 : vector<16x128xf32>
    %223 = vector.broadcast %10 : vector<1x128xf32> to vector<16x128xf32>
    %224 = arith.addf %222, %223 : vector<16x128xf32>
    %cst_102 = arith.constant dense<0xFF800000> : vector<16xf32>
    %225 = vector.multi_reduction <maximumf>, %224, %cst_102 [1] : vector<16x128xf32> to vector<16xf32>
    %226 = vector.shape_cast %225 : vector<16xf32> to vector<16x1xf32>
    %227 = vector.broadcast %226 : vector<16x1xf32> to vector<16x128xf32>
    %228 = arith.subf %224, %227 : vector<16x128xf32>
    %229 = math.exp %228 : vector<16x128xf32>
    %cst_103 = arith.constant dense<0.000000e+00> : vector<16xf32>
    %230 = vector.multi_reduction <add>, %229, %cst_103 [1] : vector<16x128xf32> to vector<16xf32>
    %231 = vector.shape_cast %230 : vector<16xf32> to vector<16x1xf32>
    %232 = tpu.reciprocal %231 {approx = true} : vector<16x1xf32> -> vector<16x1xf32>
    %233 = vector.broadcast %232 : vector<16x1xf32> to vector<16x128xf32>
    %234 = arith.mulf %229, %233 : vector<16x128xf32>
    %235 = arith.truncf %234 : vector<16x128xf32> to vector<16x128xbf16>
    %236 = vector.extract_strided_slice %217 {offsets = [0, 0], sizes = [128, 8], strides = [1, 1]} : vector<128x32xbf16> to vector<128x8xbf16>
    %cst_104 = arith.constant dense<0.000000e+00> : vector<16x8xf32>
    %237 = tpu.matmul %235, %236, %cst_104 {dimension_numbers = #tpu.dot_dimension_numbers<[1], [0], [0], [1], [0, 0, 1, 1], [], []>} : vector<16x128xbf16>, vector<128x8xbf16>, vector<16x8xf32> -> vector<16x8xf32>
    %238 = vector.extract_strided_slice %203 {offsets = [0, 8], sizes = [16, 8], strides = [1, 1]} : vector<16x32xbf16> to vector<16x8xbf16>
    %239 = vector.extract_strided_slice %210 {offsets = [0, 8], sizes = [128, 8], strides = [1, 1]} : vector<128x32xbf16> to vector<128x8xbf16>
    %cst_105 = arith.constant dense<0.000000e+00> : vector<16x128xf32>
    %240 = tpu.matmul %238, %239, %cst_105 {dimension_numbers = #tpu.dot_dimension_numbers<[1], [1], [0], [0], [0, 0, 1, 0], [], []>} : vector<16x8xbf16>, vector<128x8xbf16>, vector<16x128xf32> -> vector<16x128xf32>
    %cst_106 = arith.constant 0.353553385 : f32
    %241 = vector.broadcast %cst_106 : f32 to vector<16x128xf32>
    %242 = arith.mulf %240, %241 : vector<16x128xf32>
    %243 = vector.broadcast %10 : vector<1x128xf32> to vector<16x128xf32>
    %244 = arith.addf %242, %243 : vector<16x128xf32>
    %cst_107 = arith.constant dense<0xFF800000> : vector<16xf32>
    %245 = vector.multi_reduction <maximumf>, %244, %cst_107 [1] : vector<16x128xf32> to vector<16xf32>
    %246 = vector.shape_cast %245 : vector<16xf32> to vector<16x1xf32>
    %247 = vector.broadcast %246 : vector<16x1xf32> to vector<16x128xf32>
    %248 = arith.subf %244, %247 : vector<16x128xf32>
    %249 = math.exp %248 : vector<16x128xf32>
    %cst_108 = arith.constant dense<0.000000e+00> : vector<16xf32>
    %250 = vector.multi_reduction <add>, %249, %cst_108 [1] : vector<16x128xf32> to vector<16xf32>
    %251 = vector.shape_cast %250 : vector<16xf32> to vector<16x1xf32>
    %252 = tpu.reciprocal %251 {approx = true} : vector<16x1xf32> -> vector<16x1xf32>
    %253 = vector.broadcast %252 : vector<16x1xf32> to vector<16x128xf32>
    %254 = arith.mulf %249, %253 : vector<16x128xf32>
    %255 = arith.truncf %254 : vector<16x128xf32> to vector<16x128xbf16>
    %256 = vector.extract_strided_slice %217 {offsets = [0, 8], sizes = [128, 8], strides = [1, 1]} : vector<128x32xbf16> to vector<128x8xbf16>
    %cst_109 = arith.constant dense<0.000000e+00> : vector<16x8xf32>
    %257 = tpu.matmul %255, %256, %cst_109 {dimension_numbers = #tpu.dot_dimension_numbers<[1], [0], [0], [1], [0, 0, 1, 1], [], []>} : vector<16x128xbf16>, vector<128x8xbf16>, vector<16x8xf32> -> vector<16x8xf32>
    %258 = vector.extract_strided_slice %203 {offsets = [0, 16], sizes = [16, 8], strides = [1, 1]} : vector<16x32xbf16> to vector<16x8xbf16>
    %259 = vector.extract_strided_slice %210 {offsets = [0, 16], sizes = [128, 8], strides = [1, 1]} : vector<128x32xbf16> to vector<128x8xbf16>
    %cst_110 = arith.constant dense<0.000000e+00> : vector<16x128xf32>
    %260 = tpu.matmul %258, %259, %cst_110 {dimension_numbers = #tpu.dot_dimension_numbers<[1], [1], [0], [0], [0, 0, 1, 0], [], []>} : vector<16x8xbf16>, vector<128x8xbf16>, vector<16x128xf32> -> vector<16x128xf32>
    %cst_111 = arith.constant 0.353553385 : f32
    %261 = vector.broadcast %cst_111 : f32 to vector<16x128xf32>
    %262 = arith.mulf %260, %261 : vector<16x128xf32>
    %263 = vector.broadcast %10 : vector<1x128xf32> to vector<16x128xf32>
    %264 = arith.addf %262, %263 : vector<16x128xf32>
    %cst_112 = arith.constant dense<0xFF800000> : vector<16xf32>
    %265 = vector.multi_reduction <maximumf>, %264, %cst_112 [1] : vector<16x128xf32> to vector<16xf32>
    %266 = vector.shape_cast %265 : vector<16xf32> to vector<16x1xf32>
    %267 = vector.broadcast %266 : vector<16x1xf32> to vector<16x128xf32>
    %268 = arith.subf %264, %267 : vector<16x128xf32>
    %269 = math.exp %268 : vector<16x128xf32>
    %cst_113 = arith.constant dense<0.000000e+00> : vector<16xf32>
    %270 = vector.multi_reduction <add>, %269, %cst_113 [1] : vector<16x128xf32> to vector<16xf32>
    %271 = vector.shape_cast %270 : vector<16xf32> to vector<16x1xf32>
    %272 = tpu.reciprocal %271 {approx = true} : vector<16x1xf32> -> vector<16x1xf32>
    %273 = vector.broadcast %272 : vector<16x1xf32> to vector<16x128xf32>
    %274 = arith.mulf %269, %273 : vector<16x128xf32>
    %275 = arith.truncf %274 : vector<16x128xf32> to vector<16x128xbf16>
    %276 = vector.extract_strided_slice %217 {offsets = [0, 16], sizes = [128, 8], strides = [1, 1]} : vector<128x32xbf16> to vector<128x8xbf16>
    %cst_114 = arith.constant dense<0.000000e+00> : vector<16x8xf32>
    %277 = tpu.matmul %275, %276, %cst_114 {dimension_numbers = #tpu.dot_dimension_numbers<[1], [0], [0], [1], [0, 0, 1, 1], [], []>} : vector<16x128xbf16>, vector<128x8xbf16>, vector<16x8xf32> -> vector<16x8xf32>
    %278 = vector.extract_strided_slice %203 {offsets = [0, 24], sizes = [16, 8], strides = [1, 1]} : vector<16x32xbf16> to vector<16x8xbf16>
    %279 = vector.extract_strided_slice %210 {offsets = [0, 24], sizes = [128, 8], strides = [1, 1]} : vector<128x32xbf16> to vector<128x8xbf16>
    %cst_115 = arith.constant dense<0.000000e+00> : vector<16x128xf32>
    %280 = tpu.matmul %278, %279, %cst_115 {dimension_numbers = #tpu.dot_dimension_numbers<[1], [1], [0], [0], [0, 0, 1, 0], [], []>} : vector<16x8xbf16>, vector<128x8xbf16>, vector<16x128xf32> -> vector<16x128xf32>
    %cst_116 = arith.constant 0.353553385 : f32
    %281 = vector.broadcast %cst_116 : f32 to vector<16x128xf32>
    %282 = arith.mulf %280, %281 : vector<16x128xf32>
    %283 = vector.broadcast %10 : vector<1x128xf32> to vector<16x128xf32>
    %284 = arith.addf %282, %283 : vector<16x128xf32>
    %cst_117 = arith.constant dense<0xFF800000> : vector<16xf32>
    %285 = vector.multi_reduction <maximumf>, %284, %cst_117 [1] : vector<16x128xf32> to vector<16xf32>
    %286 = vector.shape_cast %285 : vector<16xf32> to vector<16x1xf32>
    %287 = vector.broadcast %286 : vector<16x1xf32> to vector<16x128xf32>
    %288 = arith.subf %284, %287 : vector<16x128xf32>
    %289 = math.exp %288 : vector<16x128xf32>
    %cst_118 = arith.constant dense<0.000000e+00> : vector<16xf32>
    %290 = vector.multi_reduction <add>, %289, %cst_118 [1] : vector<16x128xf32> to vector<16xf32>
    %291 = vector.shape_cast %290 : vector<16xf32> to vector<16x1xf32>
    %292 = tpu.reciprocal %291 {approx = true} : vector<16x1xf32> -> vector<16x1xf32>
    %293 = vector.broadcast %292 : vector<16x1xf32> to vector<16x128xf32>
    %294 = arith.mulf %289, %293 : vector<16x128xf32>
    %295 = arith.truncf %294 : vector<16x128xf32> to vector<16x128xbf16>
    %296 = vector.extract_strided_slice %217 {offsets = [0, 24], sizes = [128, 8], strides = [1, 1]} : vector<128x32xbf16> to vector<128x8xbf16>
    %cst_119 = arith.constant dense<0.000000e+00> : vector<16x8xf32>
    %297 = tpu.matmul %295, %296, %cst_119 {dimension_numbers = #tpu.dot_dimension_numbers<[1], [0], [0], [1], [0, 0, 1, 1], [], []>} : vector<16x128xbf16>, vector<128x8xbf16>, vector<16x8xf32> -> vector<16x8xf32>
    %298 = tpu.concatenate %237, %257, %277, %297 in 1 : vector<16x8xf32>, vector<16x8xf32>, vector<16x8xf32>, vector<16x8xf32> -> vector<16x32xf32>
    %299 = arith.truncf %298 : vector<16x32xf32> to vector<16x32xbf16>
    %c0_120 = arith.constant 0 : index
    %c0_121 = arith.constant 0 : index
    %300 = vector.load %arg24[%c0_120, %c0_121] : memref<32x32xbf16, #tpu.memory_space<vmem>>, vector<32x32xbf16>
    %cst_122 = arith.constant dense<0.000000e+00> : vector<16x32xf32>
    %301 = tpu.matmul %299, %300, %cst_122 {dimension_numbers = #tpu.dot_dimension_numbers<[1], [0], [0], [1], [0, 0, 1, 1], [], []>} : vector<16x32xbf16>, vector<32x32xbf16>, vector<16x32xf32> -> vector<16x32xf32>
    %c0_123 = arith.constant 0 : index
    %c0_124 = arith.constant 0 : index
    %302 = vector.load %arg25[%c0_123, %c0_124] : memref<1x32xf32, #tpu.memory_space<vmem>>, vector<1x32xf32>
    %303 = vector.broadcast %302 : vector<1x32xf32> to vector<16x32xf32>
    %304 = arith.addf %301, %303 : vector<16x32xf32>
    %305 = arith.addf %170, %304 : vector<16x32xf32>
    %c0_125 = arith.constant 0 : index
    %c0_126 = arith.constant 0 : index
    %306 = vector.load %arg30[%c0_125, %c0_126] : memref<1x32xf32, #tpu.memory_space<vmem>>, vector<1x32xf32>
    %c0_127 = arith.constant 0 : index
    %c0_128 = arith.constant 0 : index
    %307 = vector.load %arg31[%c0_127, %c0_128] : memref<1x32xf32, #tpu.memory_space<vmem>>, vector<1x32xf32>
    %cst_129 = arith.constant dense<0.000000e+00> : vector<16xf32>
    %308 = vector.multi_reduction <add>, %305, %cst_129 [1] : vector<16x32xf32> to vector<16xf32>
    %309 = vector.shape_cast %308 : vector<16xf32> to vector<16x1xf32>
    %cst_130 = arith.constant 3.200000e+01 : f32
    %310 = vector.broadcast %cst_130 : f32 to vector<16x1xf32>
    %311 = arith.divf %309, %310 : vector<16x1xf32>
    %312 = vector.broadcast %311 : vector<16x1xf32> to vector<16x32xf32>
    %313 = arith.subf %305, %312 : vector<16x32xf32>
    %314 = arith.mulf %313, %313 : vector<16x32xf32>
    %cst_131 = arith.constant dense<0.000000e+00> : vector<16xf32>
    %315 = vector.multi_reduction <add>, %314, %cst_131 [1] : vector<16x32xf32> to vector<16xf32>
    %316 = vector.shape_cast %315 : vector<16xf32> to vector<16x1xf32>
    %cst_132 = arith.constant 3.200000e+01 : f32
    %317 = vector.broadcast %cst_132 : f32 to vector<16x1xf32>
    %318 = arith.divf %316, %317 : vector<16x1xf32>
    %319 = vector.broadcast %311 : vector<16x1xf32> to vector<16x32xf32>
    %320 = arith.subf %305, %319 : vector<16x32xf32>
    %cst_133 = arith.constant 9.99999974E-6 : f32
    %321 = vector.broadcast %cst_133 : f32 to vector<16x1xf32>
    %322 = arith.addf %318, %321 : vector<16x1xf32>
    %323 = math.rsqrt %322 : vector<16x1xf32>
    %324 = vector.broadcast %323 : vector<16x1xf32> to vector<16x32xf32>
    %325 = arith.mulf %320, %324 : vector<16x32xf32>
    %326 = vector.broadcast %306 : vector<1x32xf32> to vector<16x32xf32>
    %327 = arith.mulf %325, %326 : vector<16x32xf32>
    %328 = vector.broadcast %307 : vector<1x32xf32> to vector<16x32xf32>
    %329 = arith.addf %327, %328 : vector<16x32xf32>
    %330 = arith.truncf %329 : vector<16x32xf32> to vector<16x32xbf16>
    %c0_134 = arith.constant 0 : index
    %c0_135 = arith.constant 0 : index
    %331 = vector.load %arg32[%c0_134, %c0_135] : memref<32x64xbf16, #tpu.memory_space<vmem>>, vector<32x64xbf16>
    %cst_136 = arith.constant dense<0.000000e+00> : vector<16x64xf32>
    %332 = tpu.matmul %330, %331, %cst_136 {dimension_numbers = #tpu.dot_dimension_numbers<[1], [0], [0], [1], [0, 0, 1, 1], [], []>} : vector<16x32xbf16>, vector<32x64xbf16>, vector<16x64xf32> -> vector<16x64xf32>
    %c0_137 = arith.constant 0 : index
    %c0_138 = arith.constant 0 : index
    %333 = vector.load %arg33[%c0_137, %c0_138] : memref<1x64xf32, #tpu.memory_space<vmem>>, vector<1x64xf32>
    %334 = vector.broadcast %333 : vector<1x64xf32> to vector<16x64xf32>
    %335 = arith.addf %332, %334 : vector<16x64xf32>
    %cst_139 = arith.constant 5.000000e-01 : f32
    %336 = vector.broadcast %cst_139 : f32 to vector<16x64xf32>
    %337 = arith.mulf %336, %335 : vector<16x64xf32>
    %cst_140 = arith.constant 0.707106769 : f32
    %338 = vector.broadcast %cst_140 : f32 to vector<16x64xf32>
    %339 = arith.mulf %335, %338 : vector<16x64xf32>
    %340 = math.erf %339 : vector<16x64xf32>
    %cst_141 = arith.constant 1.000000e+00 : f32
    %341 = vector.broadcast %cst_141 : f32 to vector<16x64xf32>
    %342 = arith.addf %341, %340 : vector<16x64xf32>
    %343 = arith.mulf %337, %342 : vector<16x64xf32>
    %344 = arith.truncf %343 : vector<16x64xf32> to vector<16x64xbf16>
    %c0_142 = arith.constant 0 : index
    %c0_143 = arith.constant 0 : index
    %345 = vector.load %arg34[%c0_142, %c0_143] : memref<64x32xbf16, #tpu.memory_space<vmem>>, vector<64x32xbf16>
    %cst_144 = arith.constant dense<0.000000e+00> : vector<16x32xf32>
    %346 = tpu.matmul %344, %345, %cst_144 {dimension_numbers = #tpu.dot_dimension_numbers<[1], [0], [0], [1], [0, 0, 1, 1], [], []>} : vector<16x64xbf16>, vector<64x32xbf16>, vector<16x32xf32> -> vector<16x32xf32>
    %347 = arith.addf %305, %346 : vector<16x32xf32>
    %c0_145 = arith.constant 0 : index
    %c0_146 = arith.constant 0 : index
    %348 = vector.load %arg35[%c0_145, %c0_146] : memref<1x32xf32, #tpu.memory_space<vmem>>, vector<1x32xf32>
    %349 = vector.broadcast %348 : vector<1x32xf32> to vector<16x32xf32>
    %350 = arith.addf %347, %349 : vector<16x32xf32>
    %c0_147 = arith.constant 0 : index
    %c0_148 = arith.constant 0 : index
    %351 = vector.load %arg36[%c0_147, %c0_148] : memref<1x32xf32, #tpu.memory_space<vmem>>, vector<1x32xf32>
    %c0_149 = arith.constant 0 : index
    %c0_150 = arith.constant 0 : index
    %352 = vector.load %arg37[%c0_149, %c0_150] : memref<1x32xf32, #tpu.memory_space<vmem>>, vector<1x32xf32>
    %cst_151 = arith.constant dense<0.000000e+00> : vector<16xf32>
    %353 = vector.multi_reduction <add>, %350, %cst_151 [1] : vector<16x32xf32> to vector<16xf32>
    %354 = vector.shape_cast %353 : vector<16xf32> to vector<16x1xf32>
    %cst_152 = arith.constant 3.200000e+01 : f32
    %355 = vector.broadcast %cst_152 : f32 to vector<16x1xf32>
    %356 = arith.divf %354, %355 : vector<16x1xf32>
    %357 = vector.broadcast %356 : vector<16x1xf32> to vector<16x32xf32>
    %358 = arith.subf %350, %357 : vector<16x32xf32>
    %359 = arith.mulf %358, %358 : vector<16x32xf32>
    %cst_153 = arith.constant dense<0.000000e+00> : vector<16xf32>
    %360 = vector.multi_reduction <add>, %359, %cst_153 [1] : vector<16x32xf32> to vector<16xf32>
    %361 = vector.shape_cast %360 : vector<16xf32> to vector<16x1xf32>
    %cst_154 = arith.constant 3.200000e+01 : f32
    %362 = vector.broadcast %cst_154 : f32 to vector<16x1xf32>
    %363 = arith.divf %361, %362 : vector<16x1xf32>
    %364 = vector.broadcast %356 : vector<16x1xf32> to vector<16x32xf32>
    %365 = arith.subf %350, %364 : vector<16x32xf32>
    %cst_155 = arith.constant 9.99999974E-6 : f32
    %366 = vector.broadcast %cst_155 : f32 to vector<16x1xf32>
    %367 = arith.addf %363, %366 : vector<16x1xf32>
    %368 = math.rsqrt %367 : vector<16x1xf32>
    %369 = vector.broadcast %368 : vector<16x1xf32> to vector<16x32xf32>
    %370 = arith.mulf %365, %369 : vector<16x32xf32>
    %371 = vector.broadcast %351 : vector<1x32xf32> to vector<16x32xf32>
    %372 = arith.mulf %370, %371 : vector<16x32xf32>
    %373 = vector.broadcast %352 : vector<1x32xf32> to vector<16x32xf32>
    %374 = arith.addf %372, %373 : vector<16x32xf32>
    %c0_156 = arith.constant 0 : index
    %c0_157 = arith.constant 0 : index
    %c0_158 = arith.constant 0 : index
    %375 = vector.load %arg38[%c0_156, %c0_157, %c0_158] : memref<1x16x32xf32, #tpu.memory_space<vmem>>, vector<1x16x32xf32>
    %376 = vector.shape_cast %375 : vector<1x16x32xf32> to vector<16x32xf32>
    %377 = vector.shape_cast %374 : vector<16x32xf32> to vector<1x16x32xf32>
    tpu.vector_store %arg38[%c0_156, %c0_157, %c0_158], %377 {strides = array<i32>} : memref<1x16x32xf32, #tpu.memory_space<vmem>>, vector<1x16x32xf32>,
    return
  }
  func.func @transform_0(%arg0: i32, %arg1: i32) -> (i32, i32, i32) {
    %c0_i32 = arith.constant 0 : i32
    %c0_i32_0 = arith.constant 0 : i32
    %c0_i32_1 = arith.constant 0 : i32
    return %arg0, %c0_i32, %c0_i32_0 : i32, i32, i32
  }
  func.func @transform_1(%arg0: i32, %arg1: i32) -> (i32, i32, i32) {
    %c0_i32 = arith.constant 0 : i32
    %c0_i32_0 = arith.constant 0 : i32
    return %arg0, %arg1, %c0_i32 : i32, i32, i32
  }
  func.func @transform_2(%arg0: i32, %arg1: i32) -> (i32, i32, i32) {
    %c0_i32 = arith.constant 0 : i32
    %c0_i32_0 = arith.constant 0 : i32
    %c0_i32_1 = arith.constant 0 : i32
    return %arg0, %c0_i32, %c0_i32_0 : i32, i32, i32
  }
  func.func @transform_3(%arg0: i32, %arg1: i32) -> (i32, i32) {
    %c0_i32 = arith.constant 0 : i32
    %c0_i32_0 = arith.constant 0 : i32
    %c0_i32_1 = arith.constant 0 : i32
    return %c0_i32, %c0_i32_0 : i32, i32
  }
  func.func @transform_4(%arg0: i32, %arg1: i32) -> (i32, i32) {
    %c0_i32 = arith.constant 0 : i32
    %c0_i32_0 = arith.constant 0 : i32
    return %arg1, %c0_i32 : i32, i32
  }
  func.func @transform_5(%arg0: i32, %arg1: i32) -> (i32, i32) {
    %c0_i32 = arith.constant 0 : i32
    %c0_i32_0 = arith.constant 0 : i32
    %c0_i32_1 = arith.constant 0 : i32
    return %c0_i32, %c0_i32_0 : i32, i32
  }
  func.func @transform_6(%arg0: i32, %arg1: i32) -> (i32, i32, i32) {
    %c0_i32 = arith.constant 0 : i32
    %c0_i32_0 = arith.constant 0 : i32
    %c0_i32_1 = arith.constant 0 : i32
    return %arg0, %c0_i32, %c0_i32_0 : i32, i32, i32
  }
  func.func @transform_7(%arg0: i32, %arg1: i32) -> (i32, i32) {
    %c0_i32 = arith.constant 0 : i32
    %c0_i32_0 = arith.constant 0 : i32
    %c0_i32_1 = arith.constant 0 : i32
    return %c0_i32, %c0_i32_0 : i32, i32
  }
  func.func @transform_8(%arg0: i32, %arg1: i32) -> (i32, i32) {
    %c0_i32 = arith.constant 0 : i32
    %c0_i32_0 = arith.constant 0 : i32
    %c0_i32_1 = arith.constant 0 : i32
    return %c0_i32, %c0_i32_0 : i32, i32
  }
  func.func @transform_9(%arg0: i32, %arg1: i32) -> (i32, i32) {
    %c0_i32 = arith.constant 0 : i32
    %c0_i32_0 = arith.constant 0 : i32
    %c0_i32_1 = arith.constant 0 : i32
    return %c0_i32, %c0_i32_0 : i32, i32
  }
  func.func @transform_10(%arg0: i32, %arg1: i32) -> (i32, i32) {
    %c0_i32 = arith.constant 0 : i32
    %c0_i32_0 = arith.constant 0 : i32
    %c0_i32_1 = arith.constant 0 : i32
    return %c0_i32, %c0_i32_0 : i32, i32
  }
  func.func @transform_11(%arg0: i32, %arg1: i32) -> (i32, i32) {
    %c0_i32 = arith.constant 0 : i32
    %c0_i32_0 = arith.constant 0 : i32
    %c0_i32_1 = arith.constant 0 : i32
    return %c0_i32, %c0_i32_0 : i32, i32
  }
  func.func @transform_12(%arg0: i32, %arg1: i32) -> (i32, i32) {
    %c0_i32 = arith.constant 0 : i32
    %c0_i32_0 = arith.constant 0 : i32
    %c0_i32_1 = arith.constant 0 : i32
    return %c0_i32, %c0_i32_0 : i32, i32
  }
  func.func @transform_13(%arg0: i32, %arg1: i32) -> (i32, i32) {
    %c0_i32 = arith.constant 0 : i32
    %c0_i32_0 = arith.constant 0 : i32
    %c0_i32_1 = arith.constant 0 : i32
    return %c0_i32, %c0_i32_0 : i32, i32
  }
  func.func @transform_14(%arg0: i32, %arg1: i32) -> (i32, i32) {
    %c0_i32 = arith.constant 0 : i32
    %c0_i32_0 = arith.constant 0 : i32
    %c0_i32_1 = arith.constant 0 : i32
    return %c0_i32, %c0_i32_0 : i32, i32
  }
  func.func @transform_15(%arg0: i32, %arg1: i32) -> (i32, i32) {
    %c0_i32 = arith.constant 0 : i32
    %c0_i32_0 = arith.constant 0 : i32
    %c0_i32_1 = arith.constant 0 : i32
    return %c0_i32, %c0_i32_0 : i32, i32
  }
  func.func @transform_16(%arg0: i32, %arg1: i32) -> (i32, i32) {
    %c0_i32 = arith.constant 0 : i32
    %c0_i32_0 = arith.constant 0 : i32
    %c0_i32_1 = arith.constant 0 : i32
    return %c0_i32, %c0_i32_0 : i32, i32
  }
  func.func @transform_17(%arg0: i32, %arg1: i32) -> (i32, i32) {
    %c0_i32 = arith.constant 0 : i32
    %c0_i32_0 = arith.constant 0 : i32
    %c0_i32_1 = arith.constant 0 : i32
    return %c0_i32, %c0_i32_0 : i32, i32
  }
  func.func @transform_18(%arg0: i32, %arg1: i32) -> (i32, i32) {
    %c0_i32 = arith.constant 0 : i32
    %c0_i32_0 = arith.constant 0 : i32
    %c0_i32_1 = arith.constant 0 : i32
    return %c0_i32, %c0_i32_0 : i32, i32
  }
  func.func @transform_19(%arg0: i32, %arg1: i32) -> (i32, i32) {
    %c0_i32 = arith.constant 0 : i32
    %c0_i32_0 = arith.constant 0 : i32
    %c0_i32_1 = arith.constant 0 : i32
    return %c0_i32, %c0_i32_0 : i32, i32
  }
  func.func @transform_20(%arg0: i32, %arg1: i32) -> (i32, i32) {
    %c0_i32 = arith.constant 0 : i32
    %c0_i32_0 = arith.constant 0 : i32
    %c0_i32_1 = arith.constant 0 : i32
    return %c0_i32, %c0_i32_0 : i32, i32
  }
  func.func @transform_21(%arg0: i32, %arg1: i32) -> (i32, i32) {
    %c0_i32 = arith.constant 0 : i32
    %c0_i32_0 = arith.constant 0 : i32
    %c0_i32_1 = arith.constant 0 : i32
    return %c0_i32, %c0_i32_0 : i32, i32
  }
  func.func @transform_22(%arg0: i32, %arg1: i32) -> (i32, i32) {
    %c0_i32 = arith.constant 0 : i32
    %c0_i32_0 = arith.constant 0 : i32
    %c0_i32_1 = arith.constant 0 : i32
    return %c0_i32, %c0_i32_0 : i32, i32
  }
  func.func @transform_23(%arg0: i32, %arg1: i32) -> (i32, i32) {
    %c0_i32 = arith.constant 0 : i32
    %c0_i32_0 = arith.constant 0 : i32
    %c0_i32_1 = arith.constant 0 : i32
    return %c0_i32, %c0_i32_0 : i32, i32
  }
  func.func @transform_24(%arg0: i32, %arg1: i32) -> (i32, i32) {
    %c0_i32 = arith.constant 0 : i32
    %c0_i32_0 = arith.constant 0 : i32
    %c0_i32_1 = arith.constant 0 : i32
    return %c0_i32, %c0_i32_0 : i32, i32
  }
  func.func @transform_25(%arg0: i32, %arg1: i32) -> (i32, i32) {
    %c0_i32 = arith.constant 0 : i32
    %c0_i32_0 = arith.constant 0 : i32
    %c0_i32_1 = arith.constant 0 : i32
    return %c0_i32, %c0_i32_0 : i32, i32
  }
  func.func @transform_26(%arg0: i32, %arg1: i32) -> (i32, i32) {
    %c0_i32 = arith.constant 0 : i32
    %c0_i32_0 = arith.constant 0 : i32
    %c0_i32_1 = arith.constant 0 : i32
    return %c0_i32, %c0_i32_0 : i32, i32
  }
  func.func @transform_27(%arg0: i32, %arg1: i32) -> (i32, i32) {
    %c0_i32 = arith.constant 0 : i32
    %c0_i32_0 = arith.constant 0 : i32
    %c0_i32_1 = arith.constant 0 : i32
    return %c0_i32, %c0_i32_0 : i32, i32
  }
  func.func @transform_28(%arg0: i32, %arg1: i32) -> (i32, i32) {
    %c0_i32 = arith.constant 0 : i32
    %c0_i32_0 = arith.constant 0 : i32
    %c0_i32_1 = arith.constant 0 : i32
    return %c0_i32, %c0_i32_0 : i32, i32
  }
  func.func @transform_29(%arg0: i32, %arg1: i32) -> (i32, i32) {
    %c0_i32 = arith.constant 0 : i32
    %c0_i32_0 = arith.constant 0 : i32
    %c0_i32_1 = arith.constant 0 : i32
    return %c0_i32, %c0_i32_0 : i32, i32
  }
  func.func @transform_30(%arg0: i32, %arg1: i32) -> (i32, i32) {
    %c0_i32 = arith.constant 0 : i32
    %c0_i32_0 = arith.constant 0 : i32
    %c0_i32_1 = arith.constant 0 : i32
    return %c0_i32, %c0_i32_0 : i32, i32
  }
  func.func @transform_31(%arg0: i32, %arg1: i32) -> (i32, i32) {
    %c0_i32 = arith.constant 0 : i32
    %c0_i32_0 = arith.constant 0 : i32
    %c0_i32_1 = arith.constant 0 : i32
    return %c0_i32, %c0_i32_0 : i32, i32
  }
  func.func @transform_32(%arg0: i32, %arg1: i32) -> (i32, i32) {
    %c0_i32 = arith.constant 0 : i32
    %c0_i32_0 = arith.constant 0 : i32
    %c0_i32_1 = arith.constant 0 : i32
    return %c0_i32, %c0_i32_0 : i32, i32
  }
  func.func @transform_33(%arg0: i32, %arg1: i32) -> (i32, i32) {
    %c0_i32 = arith.constant 0 : i32
    %c0_i32_0 = arith.constant 0 : i32
    %c0_i32_1 = arith.constant 0 : i32
    return %c0_i32, %c0_i32_0 : i32, i32
  }
  func.func @transform_34(%arg0: i32, %arg1: i32) -> (i32, i32) {
    %c0_i32 = arith.constant 0 : i32
    %c0_i32_0 = arith.constant 0 : i32
    %c0_i32_1 = arith.constant 0 : i32
    return %c0_i32, %c0_i32_0 : i32, i32
  }
  func.func @transform_35(%arg0: i32, %arg1: i32) -> (i32, i32) {
    %c0_i32 = arith.constant 0 : i32
    %c0_i32_0 = arith.constant 0 : i32
    %c0_i32_1 = arith.constant 0 : i32
    return %c0_i32, %c0_i32_0 : i32, i32
  }
  func.func @transform_36(%arg0: i32, %arg1: i32) -> (i32, i32, i32) {
    %c0_i32 = arith.constant 0 : i32
    %c0_i32_0 = arith.constant 0 : i32
    return %arg0, %arg1, %c0_i32 : i32, i32, i32
  }
}

</mosaic_0001>

<bundles_post_ra>
// kernel: decoder_forward.3
= control target key start
LH: loop header
LB: loop body
LE: loop exit
PB: predicated region body
PF: predicated region fallthrough
CT: control target
= control target key end

     0   :  { %s5578_s6 = smov 1   ;;  %s5579_s10 = smov 2   ;;  %s6820_s0 = inlined_call_operand.smem [shape: u32[37], index: -1, kind: input, shape index: {}] }
   0x1   :  { %s5646_s5 = sld [smem:[%s6820_s0]]   ;;  %s5580_s14 = smov 3  }
   0x2   :  { %s5651_s9 = sld [smem:[%s6820_s0 + %s5578_s6]]   ;;  %s5581_s18 = smov 4  }
   0x3   :  { %s5656_s13 = sld [smem:[%s6820_s0 + %s5579_s10]]   ;;  %s5582_s22 = smov 5  }
   0x4   :  { %s5661_s17 = sld [smem:[%s6820_s0 + %s5580_s14]]   ;;  %s5583_s26 = smov 6  }
   0x5   :  { %s5666_s21 = sld [smem:[%s6820_s0 + %s5581_s18]]   ;;  %s5584_s30 = smov 7  }
   0x6   :  { %s5671_s25 = sld [smem:[%s6820_s0 + %s5582_s22]]   ;;  %s5585_s4 = smov 8  }
   0x7   :  { %6866 = sst [smem:[#allocation35_spill]] %s5646_s5  ;;  %s5586_s10 = smov 9  }
   0x8   :  { %6867 = sst [smem:[#allocation36_spill]] %s5651_s9  ;;  %s5587_s15 = smov 10  }
   0x9   :  { %6868 = sst [smem:[#allocation37_spill]] %s5656_s13  ;;  %s5588_s20 = smov 11  }
   0xa   :  { %6869 = sst [smem:[#allocation38_spill]] %s5661_s17  ;;  %s5590_s1 = smov 13  }
   0xb   :  { %6870 = sst [smem:[#allocation39_spill]] %s5666_s21  ;;  %s5591_s7 = smov 14  }
   0xc   :  { %6871 = sst [smem:[#allocation40_spill]] %s5671_s25  ;;  %s5593_s22 = smov 16  }
   0xd   :  { %s5676_s29 = sld [smem:[%s6820_s0 + %s5583_s26]]   ;;  %s5589_s26 = smov 12  }
   0xe   :  { %s5681_s3 = sld [smem:[%s6820_s0 + %s5584_s30]]   ;;  %s5594_s28 = smov 17  }
   0xf   :  { %s5686_s8 = sld [smem:[%s6820_s0 + %s5585_s4]]  }
  0x10   :  { %s5691_s14 = sld [smem:[%s6820_s0 + %s5586_s10]]  }
  0x11   :  { %s5696_s19 = sld [smem:[%s6820_s0 + %s5587_s15]]   ;;  %s5592_s15 = smov 15  }
  0x12   :  { %s5701_s24 = sld [smem:[%s6820_s0 + %s5588_s20]]  }
  0x13   :  { %6872 = sst [smem:[#allocation41_spill]] %s5676_s29 }
  0x14   :  { %6873 = sst [smem:[#allocation42_spill]] %s5681_s3 }
  0x15   :  { %6874 = sst [smem:[#allocation43_spill]] %s5686_s8 }
  0x16   :  { %6875 = sst [smem:[#allocation44_spill]] %s5691_s14 }
  0x17   :  { %s5706_s30 = sld [smem:[%s6820_s0 + %s5589_s26]]  }
  0x18   :  { %6876 = sst [smem:[#allocation45_spill]] %s5701_s24 }
  0x19   :  { %s5711_s6 = sld [smem:[%s6820_s0 + %s5590_s1]]  }
  0x1a   :  { %s5716_s12 = sld [smem:[%s6820_s0 + %s5591_s7]]   ;;  %s5595_s7 = smov 18  }
  0x1b   :  { %s5721_s20 = sld [smem:[%s6820_s0 + %s5592_s15]]   ;;  %s5596_s15 = smov 19  }
  0x1c   :  { %s5726_s27 = sld [smem:[%s6820_s0 + %s5593_s22]]   ;;  %s5597_s22 = smov 20  }
  0x1d   :  { %6877 = sst [smem:[#allocation46_spill]] %s5706_s30 }
  0x1e   :  { %s5731_s4 = sld [smem:[%s6820_s0 + %s5594_s28]]   ;;  %s5598_s28 = smov 21  }
  0x1f   :  { %6878 = sst [smem:[#allocation47_spill]] %s5711_s6 }
  0x20   :  { %6879 = sst [smem:[#allocation48_spill]] %s5716_s12 }
  0x21   :  { %6880 = sst [smem:[#allocation49_spill]] %s5721_s20 }
  0x22   :  { %6881 = sst [smem:[#allocation50_spill]] %s5726_s27 }
  0x23   :  { %s5736_s29 = sld [smem:[%s6820_s0 + %s5595_s7]]   ;;  %s5599_s7 = smov 22  }
  0x24   :  { %6882 = sst [smem:[#allocation51_spill]] %s5731_s4 }
  0x25   :  { %s5741_s25 = sld [smem:[%s6820_s0 + %s5596_s15]]   ;;  %s5600_s15 = smov 23  }
  0x26   :  { %s5746_s27 = sld [smem:[%s6820_s0 + %s5597_s22]]   ;;  %s5601_s22 = smov 24  }
  0x27   :  { %s5751_s13 = sld [smem:[%s6820_s0 + %s5598_s28]]   ;;  %s5602_s28 = smov 25  }
  0x28   :  { %s5761_s20 = sld [smem:[%s6820_s0 + %s5600_s15]]   ;;  %s5604_s15 = smov 27  }
  0x29   :  { %6883 = sst [smem:[#allocation52_spill]] %s5736_s29 }
  0x2a   :  { %s5756_s29 = sld [smem:[%s6820_s0 + %s5599_s7]]   ;;  %s5603_s7 = smov 26  }
  0x2b   :  { %s5771_s12 = sld [smem:[%s6820_s0 + %s5602_s28]]   ;;  %s5606_s28 = smov 29  }
  0x2c   :  { %6884 = sst [smem:[#allocation53_spill]] %s5746_s27 }
  0x2d   :  { %6885 = sst [smem:[#allocation54_spill]] %s5751_s13 }
  0x2e   :  { %s5766_s27 = sld [smem:[%s6820_s0 + %s5601_s22]]   ;;  %s5605_s22 = smov 28  }
  0x2f   :  { %s5781_s6 = sld [smem:[%s6820_s0 + %s5604_s15]]   ;;  %s5608_s15 = smov 31  }
  0x30   :  { %6886 = sst [smem:[#allocation55_spill]] %s5756_s29 }
  0x31   :  { %6887 = sst [smem:[#allocation56_spill]] %s5771_s12 }
  0x32   :  { %s5776_s29 = sld [smem:[%s6820_s0 + %s5603_s7]]   ;;  %s5607_s7 = smov 30  }
  0x33   :  { %s5786_s3 = sld [smem:[%s6820_s0 + %s5605_s22]]   ;;  %s5609_s22 = smov 32  }
  0x34   :  { %s5791_s30 = sld [smem:[%s6820_s0 + %s5606_s28]]   ;;  %s5610_s28 = smov 33  }
  0x35   :  { %6888 = sst [smem:[#allocation57_spill]] %s5781_s6 }
  0x36   :  { %s5796_s14 = sld [smem:[%s6820_s0 + %s5607_s7]]   ;;  %s5611_s7 = smov 34  }
  0x37   :  { %s5801_s24 = sld [smem:[%s6820_s0 + %s5608_s15]]   ;;  %s5612_s15 = smov 35  }
  0x38   :  { %s5806_s21 = sld [smem:[%s6820_s0 + %s5609_s22]]   ;;  %s5613_s22 = smov 36  }
  0x39   :  { %6889 = sst [smem:[#allocation58_spill]] %s5786_s3 }
  0x3a   :  { %s5811_s17 = sld [smem:[%s6820_s0 + %s5610_s28]]  }
  0x3b   :  { %s5821_s8 = sld [smem:[%s6820_s0 + %s5612_s15]]  }
  0x3c   :  { %6890 = sst [smem:[#allocation59_spill]] %s5796_s14 }
  0x3d   :  { %s5816_s14 = sld [smem:[%s6820_s0 + %s5611_s7]]  }
  0x3e   :  { %6891 = sst [smem:[#allocation60_spill]] %s5806_s21 }
  0x3f   :  { %s5826_s21 = sld [smem:[%s6820_s0 + %s5613_s22]]  }
  0x41   :  { %6892 = sst [smem:[#allocation61_spill]] %s5821_s8 }
  0x45   :  { %6893 = sst [smem:[#allocation62_spill]] %s5826_s21 }
  0x46   :  { %78 = vsyncpa [#allocation3], 0 }
  0x47   :  { %79 = vsyncpa [#allocation6], 0 }
  0x48   :  { %80 = vsyncpa [#allocation9], 0 }
  0x49   :  { %81 = vsyncpa [#allocation12], 0 }
  0x4a   :  { %82 = vsyncpa [#allocation15], 0 }
  0x4b   :  { %83 = vsyncpa [#allocation18], 0 }
  0x4c   :  { %84 = vsyncpa [#allocation21], 0 }
  0x4d   :  { %85 = vsyncpa [#allocation24], 0 }
  0x4e   :  { %86 = vsyncpa [#allocation4], 0 }
  0x4f   :  { %88 = vsyncpa [#allocation4 + $0x1], 0  ;;  %s5828_s28 = smov 0   ;;  %s5830_s1 = smov 0  }
  0x50   :  { %s5832_s2 = smov 0   ;;  %s5834_s7 = smov 0  }
  0x51   :  { %s5836_s0 = smov 0   ;;  %s5838_s10 = smov 0  }
  0x52 LB: > { %s6894_s13 = sld [smem:[#allocation54_spill]]  ;;  %s6895_s8 = sld [smem:[#allocation61_spill]]  ;;  %s5576_s10 = sphi %s5838_s10, %s94_s10   ;;  %s5572_s0 = sphi %s5836_s0, %s6959_s0   ;;  %s5568_s7 = sphi %s5834_s7, %s6958_s7   ;;  %s5564_s2 = sphi %s5832_s2, %s6957_s2   ;;  %s5560_s1 = sphi %s5830_s1, %s6961_s1   ;;  %s5556_s28 = sphi %s5828_s28, %s6960_s28  }
  0x53   : > { %s6896_s6 = sld [smem:[#allocation57_spill]]  ;;  %s6897_s4 = sld [smem:[#allocation51_spill]] }
  0x54   : > { %s6898_s3 = sld [smem:[#allocation58_spill]]  ;;  %s6899_s12 = sld [smem:[#allocation56_spill]] }
  0x55   : > { %6900 = sst [smem:[#allocation63_spill]] %s5556_s28  ;;  %s4115_s11 = sadd.s32 4294967295, %s5576_s10  }
  0x56   : > { %6901 = sst [smem:[#allocation64_spill]] %s5564_s2  ;;  %s4116_s15 = sadd.s32 4294967294, %s5576_s10  }
  0x57   : > { %6902 = sst [smem:[#allocation65_spill]] %s5572_s0  ;;  %s106_s16 = sadd.s32 1, %s5572_s0 }
  0x58   : > { %s898_s18 = sadd.s32 1, %s5564_s2  ;;  %p108_p0 = scmp.ge.s32.totalorder %s106_s16, 2 }
  0x59   : > { %p908_p1 = scmp.ne.s32.totalorder %s5564_s2, %s5560_s1  ;;  %p909_p2 = scmp.eq.s32.totalorder %s4115_s11, 1 }
  0x5a   : > { %p914_p3 = scmp.ne.s32.totalorder %s5560_s1, %s5556_s28  ;;  %s6963_s16 = smov (%p108_p0, %s106_s16), 0 }
  0x5b   : > { %6903 = sst [smem:[#allocation66_spill]] %s6963_s16  ;;  %p5868_p4 = por %p909_p2, %p908_p1 }
  0x5c   : > { %p915_p5 = scmp.eq.s32.totalorder %s4116_s15, 1  ;;  %s893_s23 = ssub.s32 %s5572_s0, %s6963_s16 }
  0x5d   : > { %s6904_s22 = scalar_select %p5868_p4, 1, 0 }
  0x5e   : > { %p4117_p6 = scmp.ge.s32.totalorder %s5576_s10, 1  ;;  %p896_p7 = scmp.eq.s32.totalorder %s893_s23, 0 }
  0x5f   : > { %6905 = sst [smem:[#allocation67_spill]] %s6904_s22  ;;  %p5875_p8 = por %p915_p5, %p914_p3 }
  0x60   : > { %p922_p9 = scmp.lt.s32.totalorder %s5576_s10, 3  ;;  %p5887_p11 = scmp.eq.s32.totalorder %s4115_s11, 0 }
  0x61   : > { %s6906_s26 = scalar_select %p5875_p8, 1, 0 }
  0x62   : > { %s5881_s21 = scalar_select %p896_p7, %s5564_s2, %s898_s18  }
  0x63   : > { %6907 = sst [smem:[#allocation68_spill]] %s6906_s26  ;;  %p5883_p10 = pnand %p4117_p6, %p922_p9 }
  0x64   : > { %6908 = sst [smem:[#allocation69_spill]] %s5881_s21  ;;  %s5614_s15 = smov [#allocation5]  }
  0x65   : > { %s6909_s28 = scalar_select %p5883_p10, 1, 0 }
  0x66   : > { %s6910_s22 = scalar_select %p5887_p11, 1, 0 }
  0x67   : > { %p4751_p12 = pneg %p5883_p10  ;;  %s994_s23 = sshll.u32 %s5614_s15, 4  ;;  %s995_s23 = int_to_ptr.vmem [resolvable:$true] %s994_s23 }
  0x68   : > { %s5615_s16 = smov [#allocation8]   ;;  %s5616_s11 = smov [#allocation11]  }
  0x69   : > { %s1022_s0 = sshll.u32 %s5615_s16, 4  ;;  %p5895_p13 = pnand %p5887_p11, %p4751_p12  ;;  %s5899_s0 = int_to_ptr.vmem [resolvable:$true] %s1022_s0 }
  0x6a   : > { %s5901_s21 = sshll.u32 %s5616_s11, 4  ;;  %s5074_s2 = scalar_lea.hbm %s5741_s25, 16  ;;  %s1045_s21 = int_to_ptr.vmem [resolvable:$true] %s5901_s21 }
  0x6b   : > { %p5075_p0 = scmp.ne.s32.totalorder %s5741_s25, %s5074_s2  ;;  %p5907_p1 = pneg %p5895_p13 }
  0x6c   : > { %p5081_p5 = scmp.lt.u32.totalorder %s5074_s2, %s5741_s25 }
  0x6d   : > { %p5077_p2 = pnand %p5907_p1, %p5075_p0 }
  0x6f   : > { %p5078_p3 = pneg %p5077_p2 }
  0x71   : > { %p5083_p6 = pnand %p5081_p5, %p5078_p3 }
  0x73   : > { %5086 = shalt.err (!%p5083_p6)
}
  0x74   : > { %s5087_s16 = scalar_lea.vmem %s995_s23, 16  ;;  %s5094_s15 = scalar_lea.vmem %s995_s23, 32 }
  0x75   : > { %p5088_p7 = scmp.ne.s32.totalorder %s995_s23, %s5087_s16  ;;  %p5095_p8 = scmp.lt.s32.totalorder %s995_s23, %s995_s23 }
  0x76   : > { %p5096_p4 = scmp.lt.s32.totalorder %s5094_s15, %s5087_s16 }
  0x77   : > { %p5090_p9 = pnand %p5088_p7, %p5907_p1 }
  0x78   : > { %p5097_p11 = por %p5096_p4, %p5095_p8 }
  0x79   : > { %p5091_p12 = pneg %p5090_p9 }
  0x7b   : > { %p5098_p10 = pnand %p5097_p11, %p5091_p12 }
  0x7d   : > { %5101 = shalt.err (!%p5098_p10)
}
  0x7e   : > { %4757 = dma.hbm_to_vmem [thread:$0]  (!%p5895_p13), %s5741_s25, 16, %s995_s23, [#allocation6]  }
  0x7f   : > { %s5102_s2 = scalar_lea.hbm %s5761_s20, 16 }
  0x80   : > { %p5103_p0 = scmp.ne.s32.totalorder %s5761_s20, %s5102_s2  ;;  %p5109_p5 = scmp.lt.u32.totalorder %s5102_s2, %s5761_s20 }
  0x82   : > { %p5105_p2 = pnand %p5103_p0, %p5907_p1 }
  0x84   : > { %p5106_p3 = pneg %p5105_p2 }
  0x86   : > { %p5111_p6 = pnand %p5109_p5, %p5106_p3 }
  0x88   : > { %5114 = shalt.err (!%p5111_p6)
}
  0x89   : > { %s5115_s11 = scalar_lea.vmem %s5899_s0, 16  ;;  %s5122_s16 = scalar_lea.vmem %s5899_s0, 32 }
  0x8a   : > { %p5116_p4 = scmp.ne.s32.totalorder %s5899_s0, %s5115_s11  ;;  %p5123_p11 = scmp.lt.s32.totalorder %s5899_s0, %s5899_s0 }
  0x8b   : > { %p5124_p7 = scmp.lt.s32.totalorder %s5122_s16, %s5115_s11 }
  0x8c   : > { %p5118_p8 = pnand %p5116_p4, %p5907_p1 }
  0x8d   : > { %p5125_p9 = por %p5124_p7, %p5123_p11 }
  0x8e   : > { %p5119_p10 = pneg %p5118_p8 }
  0x90   : > { %p5126_p12 = pnand %p5125_p9, %p5119_p10 }
  0x92   : > { %5129 = shalt.err (!%p5126_p12)
}
  0x93   : > { %4763 = dma.hbm_to_vmem [thread:$0]  (!%p5895_p13), %s5761_s20, 16, %s5899_s0, [#allocation9]  }
  0x94   : > { %s5617_s23 = smov [#allocation14]   ;;  %s5130_s2 = scalar_lea.hbm %s6899_s12, 16 }
  0x95   : > { %s1066_s15 = sshll.u32 %s5617_s23, 4  ;;  %p5131_p0 = scmp.ne.s32.totalorder %s6899_s12, %s5130_s2  ;;  %s1067_s15 = int_to_ptr.vmem [resolvable:$true] %s1066_s15 }
  0x96   : > { %p5137_p5 = scmp.lt.u32.totalorder %s5130_s2, %s6899_s12 }
  0x97   : > { %p5133_p2 = pnand %p5131_p0, %p5907_p1 }
  0x99   : > { %p5134_p3 = pneg %p5133_p2 }
  0x9b   : > { %p5139_p6 = pnand %p5137_p5, %p5134_p3 }
  0x9d   : > { %5142 = shalt.err (!%p5139_p6)
}
  0x9e   : > { %s5143_s11 = scalar_lea.vmem %s1045_s21, 16  ;;  %s5150_s16 = scalar_lea.vmem %s1045_s21, 32 }
  0x9f   : > { %p5144_p4 = scmp.ne.s32.totalorder %s1045_s21, %s5143_s11  ;;  %p5151_p11 = scmp.lt.s32.totalorder %s1045_s21, %s1045_s21 }
  0xa0   : > { %p5152_p7 = scmp.lt.s32.totalorder %s5150_s16, %s5143_s11 }
  0xa1   : > { %p5146_p8 = pnand %p5144_p4, %p5907_p1 }
  0xa2   : > { %p5153_p9 = por %p5152_p7, %p5151_p11 }
  0xa3   : > { %p5147_p10 = pneg %p5146_p8 }
  0xa5   : > { %p5154_p12 = pnand %p5153_p9, %p5147_p10 }
  0xa7   : > { %5157 = shalt.err (!%p5154_p12)
}
  0xa8   : > { %4769 = dma.hbm_to_vmem [thread:$0]  (!%p5895_p13), %s6899_s12, 16, %s1045_s21, [#allocation12]  }
  0xa9   : > { %s5158_s0 = scalar_lea.hbm %s6896_s6, 16 }
  0xaa   : > { %p5159_p0 = scmp.ne.s32.totalorder %s6896_s6, %s5158_s0  ;;  %p5165_p5 = scmp.lt.u32.totalorder %s5158_s0, %s6896_s6 }
  0xac   : > { %p5161_p2 = pnand %p5159_p0, %p5907_p1 }
  0xae   : > { %p5162_p3 = pneg %p5161_p2 }
  0xb0   : > { %p5167_p6 = pnand %p5165_p5, %p5162_p3 }
  0xb2   : > { %5170 = shalt.err (!%p5167_p6)
}
  0xb3   : > { %s5171_s23 = scalar_lea.vmem %s1067_s15, 16  ;;  %s5178_s2 = scalar_lea.vmem %s1067_s15, 32 }
  0xb4   : > { %p5172_p4 = scmp.ne.s32.totalorder %s1067_s15, %s5171_s23  ;;  %p5179_p11 = scmp.lt.s32.totalorder %s1067_s15, %s1067_s15 }
  0xb5   : > { %p5180_p7 = scmp.lt.s32.totalorder %s5178_s2, %s5171_s23 }
  0xb6   : > { %p5174_p8 = pnand %p5172_p4, %p5907_p1 }
  0xb7   : > { %p5181_p9 = por %p5180_p7, %p5179_p11 }
  0xb8   : > { %p5175_p10 = pneg %p5174_p8 }
  0xba   : > { %p5182_p12 = pnand %p5181_p9, %p5175_p10 }
  0xbc   : > { %5185 = shalt.err (!%p5182_p12)
}
  0xbd   : > { %4775 = dma.hbm_to_vmem [thread:$0]  (!%p5895_p13), %s6896_s6, 16, %s1067_s15, [#allocation15]  }
  0xbe   : > { %s5618_s21 = smov [#allocation17]   ;;  %s5619_s16 = smov [#allocation20]  }
  0xbf   : > { %s1088_s11 = sshll.u32 %s5618_s21, 4  ;;  %s1116_s0 = sshll.u32 %s5619_s16, 4  ;;  %s1089_s11 = int_to_ptr.vmem [resolvable:$true] %s1088_s11  ;;  %s1117_s0 = int_to_ptr.vmem [resolvable:$true] %s1116_s0 }
  0xc0   : > { %s5186_s12 = scalar_lea.hbm %s5791_s30, 16 }
  0xc1   : > { %p5187_p0 = scmp.ne.s32.totalorder %s5791_s30, %s5186_s12  ;;  %p5193_p5 = scmp.lt.u32.totalorder %s5186_s12, %s5791_s30 }
  0xc3   : > { %p5189_p2 = pnand %p5187_p0, %p5907_p1 }
  0xc5   : > { %p5190_p3 = pneg %p5189_p2 }
  0xc7   : > { %p5195_p6 = pnand %p5193_p5, %p5190_p3 }
  0xc9   : > { %5198 = shalt.err (!%p5195_p6)
}
  0xca   : > { %s5199_s23 = scalar_lea.vmem %s1089_s11, 16  ;;  %s5206_s15 = scalar_lea.vmem %s1089_s11, 32 }
  0xcb   : > { %p5200_p4 = scmp.ne.s32.totalorder %s1089_s11, %s5199_s23  ;;  %p5207_p11 = scmp.lt.s32.totalorder %s1089_s11, %s1089_s11 }
  0xcc   : > { %p5208_p7 = scmp.lt.s32.totalorder %s5206_s15, %s5199_s23 }
  0xcd   : > { %p5202_p8 = pnand %p5200_p4, %p5907_p1 }
  0xce   : > { %p5209_p9 = por %p5208_p7, %p5207_p11 }
  0xcf   : > { %p5203_p10 = pneg %p5202_p8 }
  0xd1   : > { %p5210_p12 = pnand %p5209_p9, %p5203_p10 }
  0xd3   : > { %5213 = shalt.err (!%p5210_p12)
}
  0xd4   : > { %4781 = dma.hbm_to_vmem [thread:$0]  (!%p5895_p13), %s5791_s30, 16, %s1089_s11, [#allocation18]  }
  0xd5   : > { %s5214_s12 = scalar_lea.hbm %s5811_s17, 16 }
  0xd6   : > { %p5215_p0 = scmp.ne.s32.totalorder %s5811_s17, %s5214_s12  ;;  %p5221_p5 = scmp.lt.u32.totalorder %s5214_s12, %s5811_s17 }
  0xd8   : > { %p5217_p2 = pnand %p5215_p0, %p5907_p1 }
  0xda   : > { %p5218_p3 = pneg %p5217_p2 }
  0xdc   : > { %p5223_p6 = pnand %p5221_p5, %p5218_p3 }
  0xde   : > { %5226 = shalt.err (!%p5223_p6)
}
  0xdf   : > { %s5227_s2 = scalar_lea.vmem %s1117_s0, 16  ;;  %s5234_s21 = scalar_lea.vmem %s1117_s0, 32 }
  0xe0   : > { %p5228_p4 = scmp.ne.s32.totalorder %s1117_s0, %s5227_s2  ;;  %p5235_p11 = scmp.lt.s32.totalorder %s1117_s0, %s1117_s0 }
  0xe1   : > { %p5236_p7 = scmp.lt.s32.totalorder %s5234_s21, %s5227_s2 }
  0xe2   : > { %p5230_p8 = pnand %p5228_p4, %p5907_p1 }
  0xe3   : > { %p5237_p9 = por %p5236_p7, %p5235_p11 }
  0xe4   : > { %p5231_p10 = pneg %p5230_p8 }
  0xe6   : > { %p5238_p12 = pnand %p5237_p9, %p5231_p10 }
  0xe8   : > { %5241 = shalt.err (!%p5238_p12)
}
  0xe9   : > { %4787 = dma.hbm_to_vmem [thread:$0]  (!%p5895_p13), %s5811_s17, 16, %s1117_s0, [#allocation21]  }
  0xea   : > { %s5620_s11 = smov [#allocation2]   ;;  %s5621_s23 = smov [#allocation7]  }
  0xeb   : > { %s980_s16 = sshll.u32 %s5620_s11, 4  ;;  %s1008_s15 = sshll.u32 %s5621_s23, 4  ;;  %s981_s16 = int_to_ptr.vmem [resolvable:$true] %s980_s16  ;;  %s1009_s15 = int_to_ptr.vmem [resolvable:$true] %s1008_s15 }
  0xec   : > { %s5242_s12 = scalar_lea.hbm %s6897_s4, 16 }
  0xed   : > { %p5243_p0 = scmp.ne.s32.totalorder %s6897_s4, %s5242_s12  ;;  %p5249_p5 = scmp.lt.u32.totalorder %s5242_s12, %s6897_s4 }
  0xef   : > { %p5245_p2 = pnand %p5243_p0, %p5907_p1 }
  0xf1   : > { %p5246_p3 = pneg %p5245_p2 }
  0xf3   : > { %p5251_p6 = pnand %p5249_p5, %p5246_p3 }
  0xf5   : > { %5254 = shalt.err (!%p5251_p6)
}
  0xf6   : > { %s5255_s2 = scalar_lea.vmem %s981_s16, 16  ;;  %s5262_s0 = scalar_lea.vmem %s981_s16, 32 }
  0xf7   : > { %p5256_p4 = scmp.ne.s32.totalorder %s981_s16, %s5255_s2  ;;  %p5263_p11 = scmp.lt.s32.totalorder %s981_s16, %s981_s16 }
  0xf8   : > { %p5264_p7 = scmp.lt.s32.totalorder %s5262_s0, %s5255_s2 }
  0xf9   : > { %p5258_p8 = pnand %p5256_p4, %p5907_p1 }
  0xfa   : > { %p5265_p9 = por %p5264_p7, %p5263_p11 }
  0xfb   : > { %p5259_p10 = pneg %p5258_p8 }
  0xfd   : > { %p5266_p12 = pnand %p5265_p9, %p5259_p10 }
  0xff   : > { %5269 = shalt.err (!%p5266_p12)
}
 0x100   : > { %4754 = dma.hbm_to_vmem [thread:$0]  (!%p5895_p13), %s6897_s4, 16, %s981_s16, [#allocation3]  }
 0x101   : > { %s5270_s21 = scalar_lea.hbm %s6894_s13, 16 }
 0x102   : > { %p5271_p0 = scmp.ne.s32.totalorder %s6894_s13, %s5270_s21  ;;  %p5277_p5 = scmp.lt.u32.totalorder %s5270_s21, %s6894_s13 }
 0x104   : > { %p5273_p2 = pnand %p5271_p0, %p5907_p1 }
 0x106   : > { %p5274_p3 = pneg %p5273_p2 }
 0x108   : > { %p5279_p6 = pnand %p5277_p5, %p5274_p3 }
 0x10a   : > { %5282 = shalt.err (!%p5279_p6)
}
 0x10b   : > { %s5283_s11 = scalar_lea.vmem %s1009_s15, 16  ;;  %s5290_s23 = scalar_lea.vmem %s1009_s15, 32 }
 0x10c   : > { %p5284_p4 = scmp.ne.s32.totalorder %s1009_s15, %s5283_s11  ;;  %p5291_p11 = scmp.lt.s32.totalorder %s1009_s15, %s1009_s15 }
 0x10d   : > { %p5292_p7 = scmp.lt.s32.totalorder %s5290_s23, %s5283_s11 }
 0x10e   : > { %p5286_p8 = pnand %p5284_p4, %p5907_p1 }
 0x10f   : > { %p5293_p9 = por %p5292_p7, %p5291_p11 }
 0x110   : > { %p5287_p10 = pneg %p5286_p8 }
 0x112   : > { %p5294_p12 = pnand %p5293_p9, %p5287_p10 }
 0x114   : > { %5297 = shalt.err (!%p5294_p12)
}
 0x115   : > { %4760 = dma.hbm_to_vmem [thread:$0]  (!%p5895_p13), %s6894_s13, 16, %s1009_s15, [#allocation6]  }
 0x116   : > { %s5622_s16 = smov [#allocation10]   ;;  %s5623_s2 = smov [#allocation13]  }
 0x117   : > { %s1033_s12 = sshll.u32 %s5622_s16, 4  ;;  %s1055_s0 = sshll.u32 %s5623_s2, 4  ;;  %s1034_s12 = int_to_ptr.vmem [resolvable:$true] %s1033_s12  ;;  %s1056_s0 = int_to_ptr.vmem [resolvable:$true] %s1055_s0 }
 0x118   : > { %s5298_s21 = scalar_lea.hbm %s5766_s27, 16 }
 0x119   : > { %p5299_p0 = scmp.ne.s32.totalorder %s5766_s27, %s5298_s21  ;;  %p5305_p5 = scmp.lt.u32.totalorder %s5298_s21, %s5766_s27 }
 0x11b   : > { %p5301_p2 = pnand %p5299_p0, %p5907_p1 }
 0x11d   : > { %p5302_p3 = pneg %p5301_p2 }
 0x11f   : > { %p5307_p6 = pnand %p5305_p5, %p5302_p3 }
 0x121   : > { %5310 = shalt.err (!%p5307_p6)
}
 0x122   : > { %s5311_s11 = scalar_lea.vmem %s1034_s12, 16  ;;  %s5318_s15 = scalar_lea.vmem %s1034_s12, 32 }
 0x123   : > { %p5312_p4 = scmp.ne.s32.totalorder %s1034_s12, %s5311_s11  ;;  %p5319_p11 = scmp.lt.s32.totalorder %s1034_s12, %s1034_s12 }
 0x124   : > { %p5320_p7 = scmp.lt.s32.totalorder %s5318_s15, %s5311_s11 }
 0x125   : > { %p5314_p8 = pnand %p5312_p4, %p5907_p1 }
 0x126   : > { %p5321_p9 = por %p5320_p7, %p5319_p11 }
 0x127   : > { %p5315_p10 = pneg %p5314_p8 }
 0x129   : > { %p5322_p12 = pnand %p5321_p9, %p5315_p10 }
 0x12b   : > { %5325 = shalt.err (!%p5322_p12)
}
 0x12c   : > { %4766 = dma.hbm_to_vmem [thread:$0]  (!%p5895_p13), %s5766_s27, 16, %s1034_s12, [#allocation9]  }
 0x12d   : > { %s5326_s23 = scalar_lea.hbm %s5776_s29, 16 }
 0x12e   : > { %p5327_p0 = scmp.ne.s32.totalorder %s5776_s29, %s5326_s23  ;;  %p5333_p5 = scmp.lt.u32.totalorder %s5326_s23, %s5776_s29 }
 0x130   : > { %p5329_p2 = pnand %p5327_p0, %p5907_p1 }
 0x132   : > { %p5330_p3 = pneg %p5329_p2 }
 0x134   : > { %p5335_p6 = pnand %p5333_p5, %p5330_p3 }
 0x136   : > { %5338 = shalt.err (!%p5335_p6)
}
 0x137   : > { %s5339_s16 = scalar_lea.vmem %s1056_s0, 16  ;;  %s5346_s2 = scalar_lea.vmem %s1056_s0, 32 }
 0x138   : > { %p5340_p4 = scmp.ne.s32.totalorder %s1056_s0, %s5339_s16  ;;  %p5347_p11 = scmp.lt.s32.totalorder %s1056_s0, %s1056_s0 }
 0x139   : > { %p5348_p7 = scmp.lt.s32.totalorder %s5346_s2, %s5339_s16 }
 0x13a   : > { %p5342_p8 = pnand %p5340_p4, %p5907_p1 }
 0x13b   : > { %p5349_p9 = por %p5348_p7, %p5347_p11 }
 0x13c   : > { %p5343_p10 = pneg %p5342_p8 }
 0x13e   : > { %p5350_p12 = pnand %p5349_p9, %p5343_p10 }
 0x140   : > { %5353 = shalt.err (!%p5350_p12)
}
 0x141   : > { %4772 = dma.hbm_to_vmem [thread:$0]  (!%p5895_p13), %s5776_s29, 16, %s1056_s0, [#allocation12]  }
 0x142   : > { %s5624_s12 = smov [#allocation16]   ;;  %s5625_s11 = smov [#allocation19]  }
 0x143   : > { %s1077_s21 = sshll.u32 %s5624_s12, 4  ;;  %s1102_s15 = sshll.u32 %s5625_s11, 4  ;;  %s1078_s21 = int_to_ptr.vmem [resolvable:$true] %s1077_s21  ;;  %s1103_s15 = int_to_ptr.vmem [resolvable:$true] %s1102_s15 }
 0x144   : > { %s5354_s23 = scalar_lea.hbm %s6898_s3, 16 }
 0x145   : > { %p5355_p0 = scmp.ne.s32.totalorder %s6898_s3, %s5354_s23  ;;  %p5361_p5 = scmp.lt.u32.totalorder %s5354_s23, %s6898_s3 }
 0x147   : > { %p5357_p2 = pnand %p5355_p0, %p5907_p1 }
 0x149   : > { %p5358_p3 = pneg %p5357_p2 }
 0x14b   : > { %p5363_p6 = pnand %p5361_p5, %p5358_p3 }
 0x14d   : > { %5366 = shalt.err (!%p5363_p6)
}
 0x14e   : > { %s5367_s16 = scalar_lea.vmem %s1078_s21, 16  ;;  %s5374_s0 = scalar_lea.vmem %s1078_s21, 32 }
 0x14f   : > { %p5368_p4 = scmp.ne.s32.totalorder %s1078_s21, %s5367_s16  ;;  %p5375_p11 = scmp.lt.s32.totalorder %s1078_s21, %s1078_s21 }
 0x150   : > { %p5376_p7 = scmp.lt.s32.totalorder %s5374_s0, %s5367_s16 }
 0x151   : > { %p5370_p8 = pnand %p5368_p4, %p5907_p1 }
 0x152   : > { %p5377_p9 = por %p5376_p7, %p5375_p11 }
 0x153   : > { %p5371_p10 = pneg %p5370_p8 }
 0x155   : > { %p5378_p12 = pnand %p5377_p9, %p5371_p10 }
 0x157   : > { %5381 = shalt.err (!%p5378_p12)
}
 0x158   : > { %4778 = dma.hbm_to_vmem [thread:$0]  (!%p5895_p13), %s6898_s3, 16, %s1078_s21, [#allocation15]  }
 0x159   : > { %s5382_s2 = scalar_lea.hbm %s5801_s24, 16 }
 0x15a   : > { %p5383_p0 = scmp.ne.s32.totalorder %s5801_s24, %s5382_s2  ;;  %p5389_p5 = scmp.lt.u32.totalorder %s5382_s2, %s5801_s24 }
 0x15c   : > { %p5385_p2 = pnand %p5383_p0, %p5907_p1 }
 0x15e   : > { %p5386_p3 = pneg %p5385_p2 }
 0x160   : > { %p5391_p6 = pnand %p5389_p5, %p5386_p3 }
 0x162   : > { %5394 = shalt.err (!%p5391_p6)
}
 0x163   : > { %s5395_s12 = scalar_lea.vmem %s1103_s15, 16  ;;  %s5402_s11 = scalar_lea.vmem %s1103_s15, 32 }
 0x164   : > { %p5396_p4 = scmp.ne.s32.totalorder %s1103_s15, %s5395_s12  ;;  %p5403_p11 = scmp.lt.s32.totalorder %s1103_s15, %s1103_s15 }
 0x165   : > { %p5404_p7 = scmp.lt.s32.totalorder %s5402_s11, %s5395_s12 }
 0x166   : > { %p5398_p8 = pnand %p5396_p4, %p5907_p1 }
 0x167   : > { %p5405_p9 = por %p5404_p7, %p5403_p11 }
 0x168   : > { %p5399_p10 = pneg %p5398_p8 }
 0x16a   : > { %p5406_p12 = pnand %p5405_p9, %p5399_p10 }
 0x16c   : > { %5409 = shalt.err (!%p5406_p12)
}
 0x16d   : > { %4784 = dma.hbm_to_vmem [thread:$0]  (!%p5895_p13), %s5801_s24, 16, %s1103_s15, [#allocation18]  }
 0x16e   : > { %s5626_s21 = smov [#allocation22]   ;;  %s5627_s16 = smov [#allocation23]  }
 0x16f   : > { %s1127_s23 = sshll.u32 %s5626_s21, 4  ;;  %s1138_s0 = sshll.u32 %s5627_s16, 4  ;;  %s1128_s23 = int_to_ptr.vmem [resolvable:$true] %s1127_s23  ;;  %s1139_s0 = int_to_ptr.vmem [resolvable:$true] %s1138_s0 }
 0x170   : > { %s5410_s2 = scalar_lea.hbm %s5816_s14, 16 }
 0x171   : > { %p5411_p0 = scmp.ne.s32.totalorder %s5816_s14, %s5410_s2  ;;  %p5417_p5 = scmp.lt.u32.totalorder %s5410_s2, %s5816_s14 }
 0x173   : > { %p5413_p2 = pnand %p5411_p0, %p5907_p1 }
 0x175   : > { %p5414_p3 = pneg %p5413_p2 }
 0x177   : > { %p5419_p6 = pnand %p5417_p5, %p5414_p3 }
 0x179   : > { %5422 = shalt.err (!%p5419_p6)
}
 0x17a   : > { %s5423_s12 = scalar_lea.vmem %s1128_s23, 16  ;;  %s5430_s15 = scalar_lea.vmem %s1128_s23, 32 }
 0x17b   : > { %p5424_p4 = scmp.ne.s32.totalorder %s1128_s23, %s5423_s12  ;;  %p5431_p11 = scmp.lt.s32.totalorder %s1128_s23, %s1128_s23 }
 0x17c   : > { %p5432_p7 = scmp.lt.s32.totalorder %s5430_s15, %s5423_s12 }
 0x17d   : > { %p5426_p8 = pnand %p5424_p4, %p5907_p1 }
 0x17e   : > { %p5433_p9 = por %p5432_p7, %p5431_p11 }
 0x17f   : > { %p5427_p10 = pneg %p5426_p8 }
 0x181   : > { %p5434_p12 = pnand %p5433_p9, %p5427_p10 }
 0x183   : > { %5437 = shalt.err (!%p5434_p12)
}
 0x184   : > { %4790 = dma.hbm_to_vmem [thread:$0]  (!%p5895_p13), %s5816_s14, 16, %s1128_s23, [#allocation21]  }
 0x185   : > { %s5438_s11 = scalar_lea.hbm %s6895_s8, 16 }
 0x186   : > { %p5439_p0 = scmp.ne.s32.totalorder %s6895_s8, %s5438_s11  ;;  %p5445_p5 = scmp.lt.u32.totalorder %s5438_s11, %s6895_s8 }
 0x188   : > { %p5441_p2 = pnand %p5439_p0, %p5907_p1 }
 0x18a   : > { %p5442_p3 = pneg %p5441_p2 }
 0x18c   : > { %p5447_p6 = pnand %p5445_p5, %p5442_p3 }
 0x18e   : > { %5450 = shalt.err (!%p5447_p6)
}
 0x18f   : > { %s5451_s21 = scalar_lea.vmem %s1139_s0, 16  ;;  %s5458_s16 = scalar_lea.vmem %s1139_s0, 32 }
 0x190   : > { %p5452_p4 = scmp.ne.s32.totalorder %s1139_s0, %s5451_s21  ;;  %p5459_p11 = scmp.lt.s32.totalorder %s1139_s0, %s1139_s0 }
 0x191   : > { %p5460_p7 = scmp.lt.s32.totalorder %s5458_s16, %s5451_s21 }
 0x192   : > { %p5454_p8 = pnand %p5452_p4, %p5907_p1 }
 0x193   : > { %p5461_p9 = por %p5460_p7, %p5459_p11 }
 0x194   : > { %p5455_p10 = pneg %p5454_p8 }
 0x196   : > { %p5462_p12 = pnand %p5461_p9, %p5455_p10 }
 0x198   : > { %5465 = shalt.err (!%p5462_p12)
}
 0x199   : > { %4793 = dma.hbm_to_vmem [thread:$0]  (!%p5895_p13), %s6895_s8, 16, %s1139_s0, [#allocation24]  }
 0x19a   : > { %p6913_p0 = scmp.ne.s32.totalorder %s6909_s28, 0 }
 0x19b   : > { %p6914_p2 = scmp.ne.s32.totalorder (!%p6913_p0), %s6910_s22, 0 }
 0x19c   : > { %1186 = sbr.rel (%p6913_p0) target bundleno = 6764 (0x1a6c), region = 164 }
 0x1a3   : > { %5519 = dma.done.wait (%p6914_p2), [#allocation3], 16  }
 0x1a4   : > { %5521 = vsyncadd (%p6914_p2), [#allocation3], 4294967280 }
 0x1a5   : > { %5523 = dma.done.wait (%p6914_p2), [#allocation6], 32  }
 0x1a6   : > { %5525 = vsyncadd (%p6914_p2), [#allocation6], 4294967264 }
 0x1a7   : > { %5527 = dma.done.wait (%p6914_p2), [#allocation9], 32  }
 0x1a8   : > { %5529 = vsyncadd (%p6914_p2), [#allocation9], 4294967264 }
 0x1a9   : > { %5531 = dma.done.wait (%p6914_p2), [#allocation12], 32  }
 0x1aa   : > { %5533 = vsyncadd (%p6914_p2), [#allocation12], 4294967264 }
 0x1ab   : > { %5535 = dma.done.wait (%p6914_p2), [#allocation15], 32  }
 0x1ac   : > { %5537 = vsyncadd (%p6914_p2), [#allocation15], 4294967264 }
 0x1ad   : > { %5539 = dma.done.wait (%p6914_p2), [#allocation18], 32  }
 0x1ae   : > { %5541 = vsyncadd (%p6914_p2), [#allocation18], 4294967264 }
 0x1af   : > { %5543 = dma.done.wait (%p6914_p2), [#allocation21], 32  }
 0x1b0   : > { %5545 = vsyncadd (%p6914_p2), [#allocation21], 4294967264 }
 0x1b1   : > { %5547 = dma.done.wait (%p6914_p2), [#allocation24], 16  }
 0x1b2   : > { %5549 = vsyncadd (%p6914_p2), [#allocation24], 4294967280  ;;  %s6915_s5 = sld [smem:[#allocation35_spill]]  ;;  %s6916_s9 = sld [smem:[#allocation36_spill]]  ;;  %vm1425_vm0 = vcmask 261120   ;;  %v4964_v28 = vld [vmem:[%s5696_s19] sm:$0xff]  }
 0x1b3   : > { %p1350_p13 = scmp.lt.s32.totalorder %s5568_s7, 1  ;;  %s6917_s22 = sld [smem:[#allocation43_spill]]  ;;  %v5628_v29 = vmov 0.0   ;;  %v4966_v31 = vld [vmem:[%s5696_s19 + $0x8] sm:$0xff]   ;;  %vm5629_vm1 = vmmov 0   ;;  %vm1710_vm2 = vcmask 64512  }
 0x1b4   : > { %4385 = vmatprep.subr.bf16.mxu1 %v5628_v29  ;;  %4377 = vmatprep.subr.bf16.mxu0 %v5628_v29  ;;  %s6918_s0 = sld [smem:[#allocation38_spill]]  ;;  %v4156_v46 = vld [vmem:[#allocation10] ss:$0 sm:$0xff]  ;;  %v4157_v50 = vld [vmem:[#allocation11] ss:$0 sm:$0xff]  ;;  %s6920_s2 = sld [smem:[#allocation39_spill]] }
 0x1b5   : > { %s6092_s28 = scalar_select %p1350_p13, %s5568_s7, 1  ;;  %4386 = vmatpush3.bf16.msra.mxu1 %v4964_v28  ;;  %4389 = vmatprep.mubr.msk.bf16.mxu1 %vm5629_vm1, %v5628_v29  ;;  %vm1768_vm3 = vcmask 130048   ;;  %vm2242_vm4 = vcmask 195584   ;;  %vm3698_vm5 = vcmask 523264  }
 0x1b6   : > { %4387 = vmatprep.subr.bf16.mxu1 %v5628_v29  ;;  %4381 = vmatprep.mubr.msk.bf16.mxu0 %vm5629_vm1, %v5628_v29  ;;  %s6922_s11 = sld [smem:[#allocation45_spill]]  ;;  %s6923_s21 = sld [smem:[#allocation44_spill]] }
 0x1b7   : > { %s4239_s26 = sshll.u32 %s6092_s28, 4  ;;  %s6854_s16 = smov 120  }
 0x1b8   : > { %s1354_s18 = scalar_lea.vmem %s6915_s5, %s4239_s26  ;;  %s1363_s23 = scalar_lea.vmem %s6916_s9, %s4239_s26 }
 0x1b9   : > { %v6097_v0 = vld [vmem:[%s1354_s18] sm:$0xff]  ;;  %v6105_v4 = vld [vmem:[%s1354_s18 + $0x8] sm:$0xff]  ;;  %4388 = vmatpush3.bf16.msra.mxu1 %v4966_v31  ;;  %s6924_s26 = sld [smem:[#allocation46_spill]]  ;;  %s6850_s18 = smov 104  }
 0x1ba   : > { %v6099_v1 = vld [vmem:[%s1363_s23] sm:$0xff]  ;;  %v1426_v2 = vsel %vm1425_vm0, %v6097_v0, 0.0  ;;  %v6107_v5 = vld [vmem:[%s1363_s23 + $0x8] sm:$0xff]  ;;  %v1429_v6 = vsel %vm1425_vm0, %v6105_v4, 0.0  ;;  %4401 = vmatprep.subr.bf16.mxu1 %v5628_v29  ;;  %s6919_s12 = smov %s6918_s0  ;;  %s6921_s15 = smov %s6920_s2 }
 0x1bb   : > { %v1471_v3 = vsel %vm1425_vm0, %v6099_v1, 0.0  ;;  %1427 = vadd.xlane.f32.xlu0 %v1426_v2  ;;  %v1474_v7 = vsel %vm1425_vm0, %v6107_v5, 0.0  ;;  %v4965_v30 = vld [vmem:[%s6917_s22] sm:$0xff]   ;;  %v4967_v32 = vld [vmem:[%s6917_s22 + $0x8] sm:$0xff]   ;;  %s6852_s23 = smov 112   ;;  %s6951_s5 = sld [smem:[#allocation67_spill]] }
 0x1bc   : > { %1472 = vadd.xlane.f32.xlu1 %v1471_v3  ;;  %4378 = vmatpush3.bf16.msra.mxu0 %v4965_v30  ;;  %v1401_v57 = vld [vmem:[%s6918_s0] sm:$0xff]  ;;  %v1402_v58 = vld [vmem:[%s6919_s12 + $0x8] sm:$0xff]  ;;  %s6925_s0 = sld [smem:[#allocation42_spill]]  ;;  %s4242_s6 = sshll.u32 %s5568_s7, 8 }
 0x1bd   : > { %4379 = vmatprep.subr.bf16.mxu0 %v5628_v29 }
 0x1bf   : > { %1430 = vadd.xlane.f32.xlu0 %v1429_v6  ;;  %v6138_v6 = vld [vmem:[%s6920_s2] sm:$0xff]  ;;  %s6926_s2 = sld [smem:[#allocation47_spill]] }
 0x1c0   : > { %1475 = vadd.xlane.f32.xlu1 %v1474_v7  ;;  %4380 = vmatpush3.bf16.msra.mxu0 %v4967_v32  ;;  %v6141_v7 = vld [vmem:[%s6921_s15 + $0x8] sm:$0xff]  ;;  %v4968_v31 = vld [vmem:[%s6924_s26] sm:$0xff]  }
 0x1c1   : > { %4393 = vmatprep.subr.bf16.mxu0 %v5628_v29  ;;  %v4969_v32 = vld [vmem:[%s6924_s26 + $0x8] sm:$0xff]   ;;  %p6952_p3 = scmp.ne.s32.totalorder %s6951_s5, 0 }
 0x248   : > { %v1428_v8 = vpop.xlane.xlu0 %1427 }
 0x249   : > { %v1473_v9 = vpop.xlane.xlu1 %1472  ;;  %v1433_v10 = vmul.f32 0.03125, %v1428_v8 }
 0x24a   : > { %v1477_v11 = vmul.f32 0.03125, %v1473_v9 }
 0x24b   : > { %v1435_v12 = vsub.f32 %v6097_v0, %v1433_v10 }
 0x24c   : > { %v1479_v13 = vsub.f32 %v6099_v1, %v1477_v11  ;;  %v1431_v14 = vpop.xlane.xlu0 %1430 }
 0x24d   : > { %v1476_v15 = vpop.xlane.xlu1 %1475  ;;  %v1434_v16 = vmul.f32 0.03125, %v1431_v14  ;;  %v1437_v18 = vmul.f32 %v1435_v12, %v1435_v12 }
 0x24e   : > { %v1478_v17 = vmul.f32 0.03125, %v1476_v15  ;;  %v1481_v19 = vmul.f32 %v1479_v13, %v1479_v13 }
 0x24f   : > { %v1436_v20 = vsub.f32 %v6105_v4, %v1434_v16  ;;  %v1439_v22 = vsel %vm1425_vm0, %v1437_v18, 0.0 }
 0x250   : > { %v1480_v21 = vsub.f32 %v6107_v5, %v1478_v17  ;;  %1440 = vadd.xlane.f32.xlu0 %v1439_v22  ;;  %v1483_v23 = vsel %vm1425_vm0, %v1481_v19, 0.0 }
 0x251   : > { %v1438_v24 = vmul.f32 %v1436_v20, %v1436_v20 }
 0x252   : > { %v1482_v25 = vmul.f32 %v1480_v21, %v1480_v21 }
 0x253   : > { %v1442_v26 = vsel %vm1425_vm0, %v1438_v24, 0.0 }
 0x254   : > { %1484 = vadd.xlane.f32.xlu0 %v1483_v23  ;;  %1443 = vadd.xlane.f32.xlu1 %v1442_v26  ;;  %v1486_v27 = vsel %vm1425_vm0, %v1482_v25, 0.0 }
 0x258   : > { %1487 = vadd.xlane.f32.xlu1 %v1486_v27 }
 0x2dd   : > { %v1441_v33 = vpop.xlane.xlu0 %1440 }
 0x2de   : > { %v1445_v34 = vmul.f32 0.03125, %v1441_v33  ;;  %v1641_v33 = vpack.c.bf16 %v6105_v4, %v6097_v0 }
 0x2e0   : > { %v1447_v35 = vadd.f32 1e-05, %v1445_v34 }
 0x2e1   : > { %v1444_v36 = vpop.xlane.xlu1 %1443  ;;  %v1485_v37 = vpop.xlane.xlu0 %1484 }
 0x2e2   : > { %4986 = vrsqrt.f32 %v1447_v35  ;;  %v1446_v38 = vmul.f32 0.03125, %v1444_v36  ;;  %v1489_v39 = vmul.f32 0.03125, %v1485_v37 }
 0x2e4   : > { %v1448_v40 = vadd.f32 1e-05, %v1446_v38  ;;  %v1491_v41 = vadd.f32 1e-05, %v1489_v39 }
 0x2e5   : > { %v1488_v42 = vpop.xlane.xlu1 %1487 }
 0x2e6   : > { %4988 = vrsqrt.f32 %v1448_v40  ;;  %v1490_v43 = vmul.f32 0.03125, %v1488_v42  ;;  %v4171_v42 = vld [vmem:[%s6925_s0] ss:$0 sm:$0xff]  ;;  %s6849_s0 = smov 16  }
 0x2e7   : > { %4990 = vrsqrt.f32 %v1491_v41 }
 0x2e8   : > { %v1492_v44 = vadd.f32 1e-05, %v1490_v43 }
 0x2ea   : > { %4992 = vrsqrt.f32 %v1492_v44 }
 0x2ec   : > { %v4987_v45 = vpop.eup %4986 }
 0x2ed   : > { %v1451_v47 = vmul.f32 %v4987_v45, %v1435_v12 }
 0x2ef   : > { %v1459_v48 = vmul.f32 %v4156_v46, %v1451_v47 }
 0x2f0   : > { %v4989_v49 = vpop.eup %4988 }
 0x2f1   : > { %v4991_v51 = vpop.eup %4990  ;;  %v1452_v52 = vmul.f32 %v4989_v49, %v1436_v20  ;;  %v1467_v55 = vadd.f32 %v4157_v50, %v1459_v48  ;;  %v4158_v20 = vld [vmem:[%s6923_s21] ss:$0 sm:$0xff]  ;;  %s6846_s21 = smov 8  }
 0x2f2   : > { %v1495_v53 = vmul.f32 %v4991_v51, %v1479_v13  ;;  %v4162_v13 = vld [vmem:[%s6922_s11] ss:$0 sm:$0xff]  ;;  %s6927_s11 = sld [smem:[#allocation48_spill]] }
 0x2f3   : > { %v1460_v54 = vmul.f32 %v4156_v46, %v1452_v52  ;;  %v1469_v62 = vadd.f32 %v1467_v55, %v1401_v57 }
 0x2f4   : > { %v4993_v56 = vpop.eup %4992  ;;  %v1497_v59 = vmul.f32 %v4156_v46, %v1495_v53 }
 0x2f5   : > { %v1496_v60 = vmul.f32 %v4993_v56, %v1480_v21  ;;  %v1468_v61 = vadd.f32 %v4157_v50, %v1460_v54 }
 0x2f6   : > { %v1499_v3 = vadd.f32 %v4157_v50, %v1497_v59 }
 0x2f7   : > { %v1470_v63 = vadd.f32 %v1468_v61, %v1402_v58  ;;  %v1498_v2 = vmul.f32 %v4156_v46, %v1496_v60 }
 0x2f8   : > { %v1501_v10 = vadd.f32 %v1499_v3, %v6138_v6 }
 0x2f9   : > { %v1572_v8 = vpack.c.bf16 %v1470_v63, %v1469_v62  ;;  %v1500_v9 = vadd.f32 %v4157_v50, %v1498_v2 }
 0x2fb   : > { %4390 = vmatmul.mubr.msk.bf16.vlgmr.msra.gmra.mrb[0].mxu1 %vm1425_vm0, %v1572_v8  ;;  %v1502_v11 = vadd.f32 %v1500_v9, %v6141_v7 }
 0x2fc   : > { %4403 = vmatprep.mubr.msk.bf16.mxu1 %vm5629_vm1, %v5628_v29 }
 0x2fd   : > { %v1503_v12 = vpack.c.bf16 %v1502_v11, %v1501_v10 }
 0x2ff   : > { %4382 = vmatmul.mubr.msk.bf16.vlgmr.msra.gmra.mrb[0].mxu0 %vm1425_vm0, %v1503_v12 }
 0x300   : > { %4397 = vmatprep.mubr.msk.bf16.mxu0 %vm5629_vm1, %v5628_v29  ;;  %4394 = vmatpush3.bf16.msra.mxu0 %v4968_v31 }
 0x301   : > { %4395 = vmatprep.subr.bf16.mxu0 %v5628_v29 }
 0x304   : > { %4396 = vmatpush3.bf16.msra.mxu0 %v4969_v32 }
 0x305   : > { %4407 = vmatprep.subr.bf16.mxu0 %v5628_v29 }
 0x307   : > { %4398 = vmatmul.mubr.msk.bf16.vlgmr.msra.gmra.mrb[4].mxu0 %vm1425_vm0, %v1641_v33 }
 0x308   : > { %4409 = vmatprep.mubr.msk.bf16.mxu0 %vm5629_vm1, %v5628_v29 }
 0x3ce   : > { %v1633_v14 = vpop.f32.mrb[0].mxu1 }
 0x3cf   : > { %v4391_v15 = vpop.f32.mrb[1].mxu1  ;;  %v1634_v17 = vadd.f32 %v4162_v13, %v1633_v14 }
 0x3d0   : > { %v1636_v16 = vpop.f32.mrb[2].mxu1 }
 0x3d1   : > { %v1637_v18 = vadd.f32 %v4162_v13, %v1636_v16  ;;  %v4392_v19 = vpop.f32.mrb[3].mxu1 }
 0x3d2   : > { %v1564_v21 = vpop.f32.mrb[0].mxu0 }
 0x3d3   : > { %v1640_v22 = vpack.c.bf16 %v1637_v18, %v1634_v17  ;;  %v4383_v23 = vpop.f32.mrb[1].mxu0  ;;  %v1565_v25 = vadd.f32 %v4158_v20, %v1564_v21 }
 0x3d4   : > { %v1567_v24 = vpop.f32.mrb[2].mxu0 }
 0x3d5   : > { %v1568_v26 = vadd.f32 %v4158_v20, %v1567_v24  ;;  %1840 = vrot.lane.b32.xlu0 %v1640_v22, %s6854_s16  ;;  %v4384_v27 = vpop.f32.mrb[3].mxu0  ;;  %v1715_v28 = vsel %vm1710_vm2, %v1640_v22, 0 }
 0x3d6   : > { %4402 = vmatpush3.bf16.xpose.msra.mxu1 %v1715_v28 }
 0x3d7   : > { %v1571_v30 = vpack.c.bf16 %v1568_v26, %v1565_v25  ;;  %4413 = vmatprep.subr.bf16.mxu1 %v5628_v29 }
 0x3d9   : > { %2091 = vrot.lane.b32.xlu0 %v1640_v22, %s6850_s18  ;;  %1837 = vrot.lane.b32.xlu1 %v1571_v30, %s6854_s16 }
 0x3dd   : > { %1966 = vrot.lane.b32.xlu1 %v1640_v22, %s6852_s23  ;;  %4404 = vmatmul.mubr.msk.bf16.vlgmr.msra.gmra.mrb[4].mxu1 %vm1710_vm2, %v1571_v30 }
 0x3de   : > { %4415 = vmatprep.mubr.msk.bf16.mxu1 %vm5629_vm1, %v5628_v29 }
 0x3e1   : > { %1964 = vrot.lane.b32.xlu1 %v1571_v30, %s6852_s23 }
 0x3e5   : > { %2089 = vrot.lane.b32.xlu1 %v1571_v30, %s6850_s18 }
 0x447   : > { %v1841_v34 = vpop.permute.xlu0 %1840 }
 0x448   : > { %v1846_v35 = vsel %vm1710_vm2, %v1841_v34, 0 }
 0x449   : > { %4414 = vmatpush3.bf16.xpose.msra.mxu1 %v1846_v35  ;;  %v4166_v35 = vld [vmem:[%s6926_s2] ss:$0 sm:$0xff]  ;;  %s6848_s2 = smov 24  }
 0x44a   : > { %4425 = vmatprep.subr.bf16.mxu1 %v5628_v29 }
 0x44b   : > { %v1838_v36 = vpop.permute.xlu1 %1837  ;;  %v2092_v0 = vpop.permute.xlu0 %2091 }
 0x44c   : > { %v2097_v39 = vsel %vm1710_vm2, %v2092_v0, 0 }
 0x44f   : > { %v1967_v37 = vpop.permute.xlu1 %1966 }
 0x450   : > { %v1972_v38 = vsel %vm1710_vm2, %v1967_v37, 0  ;;  %4416 = vmatmul.mubr.msk.bf16.vlgmr.msra.gmra.mrb[8].mxu1 %vm1710_vm2, %v1838_v36  ;;  %v1702_v36 = vpop.f32.mrb[4].mxu0 }
 0x451   : > { %4426 = vmatpush3.bf16.xpose.msra.mxu1 %v1972_v38  ;;  %4427 = vmatprep.mubr.msk.bf16.mxu1 %vm5629_vm1, %v5628_v29  ;;  %v1703_v37 = vadd.f32 %v4166_v35, %v1702_v36  ;;  %v4399_v38 = vpop.f32.mrb[5].mxu0 }
 0x452   : > { %4437 = vmatprep.subr.bf16.mxu1 %v5628_v29  ;;  %v1705_v0 = vpop.f32.mrb[6].mxu0 }
 0x453   : > { %v1965_v4 = vpop.permute.xlu1 %1964 }
 0x457   : > { %v2090_v40 = vpop.permute.xlu1 %2089 }
 0x458   : > { %4428 = vmatmul.mubr.msk.bf16.vlgmr.msra.gmra.mrb[12].mxu1 %vm1710_vm2, %v1965_v4  ;;  %v1706_v4 = vadd.f32 %v4166_v35, %v1705_v0 }
 0x459   : > { %4438 = vmatpush3.bf16.xpose.msra.mxu1 %v2097_v39  ;;  %4439 = vmatprep.mubr.msk.bf16.mxu1 %vm5629_vm1, %v5628_v29  ;;  %v4400_v39 = vpop.f32.mrb[7].mxu0 }
 0x45a   : > { %4449 = vmatprep.subr.bf16.mxu1 %v5628_v29 }
 0x460   : > { %4440 = vmatmul.mubr.msk.bf16.vlgmr.msra.gmra.mrb[16].mxu1 %vm1710_vm2, %v2090_v40  ;;  %v1709_v40 = vpack.c.bf16 %v1706_v4, %v1703_v37 }
 0x461   : > { %4453 = vmatprep.mubr.msk.bf16.mxu1 %vm5629_vm1, %v5628_v29 }
 0x462   : > { %4408 = vmatpush3.bf16.msra.mxu0 %v1709_v40 }
 0x463   : > { %4419 = vmatprep.subr.bf16.mxu0 %v5628_v29 }
 0x4b0   : > { %v1751_v41 = vpop.f32.mrb[4].mxu1 }
 0x4b1   : > { %v1758_v43 = vmul.f32 0.35355338, %v1751_v41  ;;  %v4405_v44 = vpop.f32.mrb[5].mxu1 }
 0x4b2   : > { %v1754_v45 = vpop.f32.mrb[6].mxu1 }
 0x4b3   : > { %v1759_v46 = vmul.f32 0.35355338, %v1754_v45  ;;  %v4406_v47 = vpop.f32.mrb[7].mxu1  ;;  %v1766_v48 = vadd.f32 %v4171_v42, %v1758_v43 }
 0x4b5   : > { %v1769_v49 = vsel %vm1768_vm3, %v1766_v48, -inf  ;;  %v1767_v50 = vadd.f32 %v4171_v42, %v1759_v46 }
 0x4b6   : > { %1770 = vmax.xlane.f32.xlu0 %v1769_v49 }
 0x4b7   : > { %v1772_v51 = vsel %vm1768_vm3, %v1767_v50, -inf }
 0x4b8   : > { %1773 = vmax.xlane.f32.xlu1 %v1772_v51 }
 0x523   : > { %v1882_v52 = vpop.f32.mrb[8].mxu1 }
 0x524   : > { %v1889_v53 = vmul.f32 0.35355338, %v1882_v52  ;;  %v4417_v54 = vpop.f32.mrb[9].mxu1 }
 0x525   : > { %v1885_v55 = vpop.f32.mrb[10].mxu1 }
 0x526   : > { %v1890_v56 = vmul.f32 0.35355338, %v1885_v55  ;;  %v4418_v57 = vpop.f32.mrb[11].mxu1  ;;  %v1891_v58 = vadd.f32 %v4171_v42, %v1889_v53 }
 0x528   : > { %v1893_v59 = vsel %vm1768_vm3, %v1891_v58, -inf  ;;  %v1892_v60 = vadd.f32 %v4171_v42, %v1890_v56 }
 0x529   : > { %1894 = vmax.xlane.f32.xlu0 %v1893_v59 }
 0x52a   : > { %v1896_v2 = vsel %vm1768_vm3, %v1892_v60, -inf }
 0x52b   : > { %v2008_v61 = vpop.f32.mrb[12].mxu1 }
 0x52c   : > { %v2015_v62 = vmul.f32 0.35355338, %v2008_v61  ;;  %v4429_v63 = vpop.f32.mrb[13].mxu1 }
 0x52d   : > { %1897 = vmax.xlane.f32.xlu0 %v1896_v2  ;;  %v2011_v3 = vpop.f32.mrb[14].mxu1 }
 0x52e   : > { %v2016_v8 = vmul.f32 0.35355338, %v2011_v3  ;;  %v4430_v9 = vpop.f32.mrb[15].mxu1  ;;  %v2017_v10 = vadd.f32 %v4171_v42, %v2015_v62 }
 0x530   : > { %v2019_v11 = vsel %vm1768_vm3, %v2017_v10, -inf  ;;  %v2018_v12 = vadd.f32 %v4171_v42, %v2016_v8 }
 0x531   : > { %2020 = vmax.xlane.f32.xlu0 %v2019_v11 }
 0x532   : > { %v2022_v13 = vsel %vm1768_vm3, %v2018_v12, -inf }
 0x533   : > { %2023 = vmax.xlane.f32.xlu1 %v2022_v13  ;;  %v2133_v14 = vpop.f32.mrb[16].mxu1 }
 0x534   : > { %v2140_v15 = vmul.f32 0.35355338, %v2133_v14  ;;  %v4441_v16 = vpop.f32.mrb[17].mxu1 }
 0x535   : > { %v2136_v17 = vpop.f32.mrb[18].mxu1 }
 0x536   : > { %v2141_v18 = vmul.f32 0.35355338, %v2136_v17  ;;  %v4442_v19 = vpop.f32.mrb[19].mxu1  ;;  %v2142_v20 = vadd.f32 %v4171_v42, %v2140_v15 }
 0x538   : > { %v2144_v21 = vsel %vm1768_vm3, %v2142_v20, -inf  ;;  %v6196_v22 = vadd.f32 %v4171_v42, %v2141_v18 }
 0x539   : > { %2145 = vmax.xlane.f32.xlu0 %v2144_v21 }
 0x53a   : > { %v2147_v23 = vsel %vm1768_vm3, %v6196_v22, -inf }
 0x53b   : > { %2148 = vmax.xlane.f32.xlu1 %v2147_v23 }
 0x543   : > { %v1771_v24 = vpop.xlane.xlu0 %1770 }
 0x544   : > { %v1775_v25 = vsub.f32 %v1766_v48, %v1771_v24 }
 0x545   : > { %v1774_v26 = vpop.xlane.xlu1 %1773 }
 0x546   : > { %v1777_v27 = vmul.f32 1.442695, %v1775_v25  ;;  %v1776_v28 = vsub.f32 %v1767_v50, %v1774_v26 }
 0x548   : > { %4994 = vpow2.f32 %v1777_v27  ;;  %v1779_v30 = vmul.f32 1.442695, %v1776_v28 }
 0x54a   : > { %4996 = vpow2.f32 %v1779_v30 }
 0x552   : > { %v4995_v31 = vpop.eup %4994 }
 0x553   : > { %v1781_v32 = vsel %vm1768_vm3, %v4995_v31, 0.0 }
 0x554   : > { %v4997_v33 = vpop.eup %4996  ;;  %1782 = vadd.xlane.f32.xlu0 %v1781_v32 }
 0x555   : > { %v1784_v34 = vsel %vm1768_vm3, %v4997_v33, 0.0 }
 0x556   : > { %1785 = vadd.xlane.f32.xlu1 %v1784_v34 }
 0x5b6   : > { %v1895_v41 = vpop.xlane.xlu0 %1894 }
 0x5b7   : > { %v1899_v42 = vsub.f32 %v1891_v58, %v1895_v41 }
 0x5b9   : > { %v1901_v43 = vmul.f32 1.442695, %v1899_v42 }
 0x5ba   : > { %v1898_v44 = vpop.xlane.xlu0 %1897 }
 0x5bb   : > { %4998 = vpow2.f32 %v1901_v43  ;;  %v1900_v45 = vsub.f32 %v1892_v60, %v1898_v44 }
 0x5bd   : > { %v1903_v46 = vmul.f32 1.442695, %v1900_v45 }
 0x5be   : > { %v2021_v47 = vpop.xlane.xlu0 %2020 }
 0x5bf   : > { %5000 = vpow2.f32 %v1903_v46  ;;  %v2025_v48 = vsub.f32 %v2017_v10, %v2021_v47 }
 0x5c0   : > { %v2024_v49 = vpop.xlane.xlu1 %2023 }
 0x5c1   : > { %v2027_v50 = vmul.f32 1.442695, %v2025_v48  ;;  %v2026_v51 = vsub.f32 %v2018_v12, %v2024_v49 }
 0x5c3   : > { %5002 = vpow2.f32 %v2027_v50  ;;  %v2029_v52 = vmul.f32 1.442695, %v2026_v51  ;;  %v4970_v50 = vld [vmem:[%s6927_s11] sm:$0xff]  }
 0x5c4   : > { %4450 = vmatpush3.bf16.msra.mxu1 %v4970_v50 }
 0x5c5   : > { %v4999_v53 = vpop.eup %4998  ;;  %5004 = vpow2.f32 %v2029_v52  ;;  %4451 = vmatprep.subr.bf16.mxu1 %v5628_v29 }
 0x5c6   : > { %v2146_v54 = vpop.xlane.xlu0 %2145  ;;  %v1905_v55 = vsel %vm1768_vm3, %v4999_v53, 0.0 }
 0x5c7   : > { %v2150_v56 = vsub.f32 %v2142_v20, %v2146_v54  ;;  %1906 = vadd.xlane.f32.xlu0 %v1905_v55 }
 0x5c8   : > { %v2149_v8 = vpop.xlane.xlu1 %2148 }
 0x5c9   : > { %v5001_v57 = vpop.eup %5000  ;;  %v2152_v58 = vmul.f32 1.442695, %v2150_v56  ;;  %v2151_v15 = vsub.f32 %v6196_v22, %v2149_v8 }
 0x5ca   : > { %v1908_v59 = vsel %vm1768_vm3, %v5001_v57, 0.0 }
 0x5cb   : > { %5006 = vpow2.f32 %v2152_v58  ;;  %1909 = vadd.xlane.f32.xlu1 %v1908_v59  ;;  %v2154_v17 = vmul.f32 1.442695, %v2151_v15  ;;  %v4971_v58 = vld [vmem:[%s6927_s11 + $0x8] sm:$0xff]  }
 0x5cc   : > { %4452 = vmatpush3.bf16.msra.mxu1 %v4971_v58 }
 0x5cd   : > { %v5003_v60 = vpop.eup %5002 }
 0x5ce   : > { %v2031_v61 = vsel %vm1768_vm3, %v5003_v60, 0.0 }
 0x5cf   : > { %v5005_v62 = vpop.eup %5004  ;;  %2032 = vadd.xlane.f32.xlu0 %v2031_v61 }
 0x5d0   : > { %v2034_v63 = vsel %vm1768_vm3, %v5005_v62, 0.0 }
 0x5d1   : > { %2035 = vadd.xlane.f32.xlu1 %v2034_v63 }
 0x5d5   : > { %v5007_v2 = vpop.eup %5006 }
 0x5d6   : > { %v2156_v3 = vsel %vm1768_vm3, %v5007_v2, 0.0 }
 0x5d7   : > { %2157 = vadd.xlane.f32.xlu0 %v2156_v3 }
 0x5e1   : > { %v1783_v9 = vpop.xlane.xlu0 %1782 }
 0x5e2   : > { %5008 = vrcp.f32 %v1783_v9  ;;  %2042 = vrot.lane.b32.xlu1 %v1709_v40, %s6852_s23  ;;  %s6932_s23 = sld [smem:[#allocation40_spill]] }
 0x5e3   : > { %v1786_v10 = vpop.xlane.xlu1 %1785 }
 0x5e4   : > { %5010 = vrcp.f32 %v1786_v10 }
 0x5e5   : > { %5012 = vpow2.f32 %v2154_v17 }
 0x5ec   : > { %v5009_v11 = vpop.eup %5008 }
 0x5ed   : > { %1917 = vrot.lane.b32.xlu0 %v1709_v40, %s6854_s16  ;;  %v1789_v13 = vmul.f32 %v5009_v11, %v4995_v31 }
 0x5ee   : > { %v5011_v12 = vpop.eup %5010 }
 0x5ef   : > { %v1790_v14 = vmul.f32 %v5011_v12, %v4997_v33  ;;  %v5013_v18 = vpop.eup %5012 }
 0x5f0   : > { %v2159_v19 = vsel %vm1768_vm3, %v5013_v18, 0.0 }
 0x5f1   : > { %v1791_v16 = vpack.c.bf16 %v1790_v14, %v1789_v13 }
 0x5f3   : > { %4410 = vmatmul.mubr.msk.bf16.vlgmr.msra.gmra.mrb[8].mxu0 %vm1768_vm3, %v1791_v16 }
 0x5f4   : > { %4421 = vmatprep.mubr.msk.bf16.mxu0 %vm5629_vm1, %v5628_v29 }
 0x606   : > { %2160 = vadd.xlane.f32.xlu1 %v2159_v19 }
 0x617   : > { %2167 = vrot.lane.b32.xlu1 %v1709_v40, %s6850_s18 }
 0x654   : > { %v1907_v20 = vpop.xlane.xlu0 %1906 }
 0x658   : > { %v1910_v21 = vpop.xlane.xlu1 %1909 }
 0x659   : > { %5014 = vrcp.f32 %v1910_v21 }
 0x65a   : > { %5016 = vrcp.f32 %v1907_v20 }
 0x65c   : > { %v2033_v22 = vpop.xlane.xlu0 %2032 }
 0x65e   : > { %v2036_v23 = vpop.xlane.xlu1 %2035 }
 0x65f   : > { %5018 = vrcp.f32 %v2036_v23 }
 0x660   : > { %5020 = vrcp.f32 %v2033_v22 }
 0x662   : > { %v2043_v33 = vpop.permute.xlu1 %2042 }
 0x663   : > { %v5015_v24 = vpop.eup %5014 }
 0x664   : > { %v2158_v25 = vpop.xlane.xlu0 %2157  ;;  %v5017_v26 = vpop.eup %5016  ;;  %v1914_v27 = vmul.f32 %v5015_v24, %v5001_v57 }
 0x665   : > { %v1913_v28 = vmul.f32 %v5017_v26, %v4999_v53  ;;  %5022 = vrcp.f32 %v2158_v25 }
 0x667   : > { %v1915_v31 = vpack.c.bf16 %v1914_v27, %v1913_v28 }
 0x668   : > { %v1918_v30 = vpop.permute.xlu0 %1917 }
 0x669   : > { %4420 = vmatpush3.bf16.msra.mxu0 %v1918_v30  ;;  %v5019_v32 = vpop.eup %5018 }
 0x66a   : > { %4431 = vmatprep.subr.bf16.mxu0 %v5628_v29  ;;  %v5021_v34 = vpop.eup %5020  ;;  %v2040_v35 = vmul.f32 %v5019_v32, %v5005_v62 }
 0x66b   : > { %v2039_v36 = vmul.f32 %v5021_v34, %v5003_v60 }
 0x66c   : > { %4422 = vmatmul.mubr.msk.bf16.vlgmr.msra.gmra.mrb[12].mxu0 %vm1768_vm3, %v1915_v31 }
 0x66d   : > { %4432 = vmatpush3.bf16.msra.mxu0 %v2043_v33  ;;  %4433 = vmatprep.mubr.msk.bf16.mxu0 %vm5629_vm1, %v5628_v29  ;;  %v2041_v37 = vpack.c.bf16 %v2040_v35, %v2039_v36  ;;  %v1405_v36 = vld [vmem:[%s6932_s23] sm:$0xff] }
 0x66e   : > { %4443 = vmatprep.subr.bf16.mxu0 %v5628_v29 }
 0x66f   : > { %v5023_v4 = vpop.eup %5022 }
 0x670   : > { %v2164_v40 = vmul.f32 %v5023_v4, %v5007_v2 }
 0x674   : > { %4434 = vmatmul.mubr.msk.bf16.vlgmr.msra.gmra.mrb[16].mxu0 %vm1768_vm3, %v2041_v37  ;;  %v1406_v37 = vld [vmem:[%s6932_s23 + $0x8] sm:$0xff] }
 0x675   : > { %4445 = vmatprep.mubr.msk.bf16.mxu0 %vm5629_vm1, %v5628_v29 }
 0x693   : > { %v2161_v38 = vpop.xlane.xlu1 %2160 }
 0x694   : > { %5024 = vrcp.f32 %v2161_v38 }
 0x697   : > { %v2168_v0 = vpop.permute.xlu1 %2167 }
 0x698   : > { %4444 = vmatpush3.bf16.msra.mxu0 %v2168_v0 }
 0x699   : > { %4457 = vmatprep.subr.bf16.mxu0 %v5628_v29 }
 0x69e   : > { %v5025_v39 = vpop.eup %5024 }
 0x69f   : > { %v2165_v41 = vmul.f32 %v5025_v39, %v5013_v18 }
 0x6a1   : > { %v2166_v42 = vpack.c.bf16 %v2165_v41, %v2164_v40  ;;  %v1407_v40 = vld [vmem:[%s6932_s23 + $0x10] sm:$0xff]  ;;  %v1408_v41 = vld [vmem:[%s6932_s23 + $0x18] sm:$0xff] }
 0x6a3   : > { %4446 = vmatmul.mubr.msk.bf16.vlgmr.msra.gmra.mrb[20].mxu0 %vm1768_vm3, %v2166_v42 }
 0x6a4   : > { %4461 = vmatprep.mubr.msk.bf16.mxu0 %vm5629_vm1, %v5628_v29 }
 0x6c6   : > { %v1829_v43 = vpop.f32.mrb[8].mxu0 }
 0x6c7   : > { %v4411_v44 = vpop.f32.mrb[9].mxu0 }
 0x6c8   : > { %v1832_v45 = vpop.f32.mrb[10].mxu0 }
 0x6c9   : > { %v4412_v46 = vpop.f32.mrb[11].mxu0 }
 0x73f   : > { %v1957_v47 = vpop.f32.mrb[12].mxu0 }
 0x740   : > { %v4423_v48 = vpop.f32.mrb[13].mxu0 }
 0x741   : > { %v1960_v49 = vpop.f32.mrb[14].mxu0  ;;  %v1410_v48 = vld [vmem:[%s6932_s23 + $0x28] sm:$0xff] }
 0x742   : > { %v4934_v51 = vpack.i.bf16 %v1960_v49, %v1957_v47  ;;  %v4424_v52 = vpop.f32.mrb[15].mxu0  ;;  %v1409_v47 = vld [vmem:[%s6932_s23 + $0x20] sm:$0xff] }
 0x744   : > { %4935 = vrot.lane.b32.xlu1 %v4934_v51, %s6846_s21  ;;  %s6928_s21 = sld [smem:[#allocation49_spill]] }
 0x747   : > { %v2082_v53 = vpop.f32.mrb[16].mxu0 }
 0x748   : > { %v4435_v54 = vpop.f32.mrb[17].mxu0 }
 0x749   : > { %v2085_v55 = vpop.f32.mrb[18].mxu0 }
 0x74a   : > { %v4939_v56 = vpack.i.bf16 %v2085_v55, %v2082_v53  ;;  %v4436_v57 = vpop.f32.mrb[19].mxu0  ;;  %v4179_v23 = vld [vmem:[%s6928_s21] ss:$0 sm:$0xff]  ;;  %s4241_s21 = sshll.u32 %s6092_s28, 7  ;;  %v1411_v55 = vld [vmem:[%s6932_s23 + $0x30] sm:$0xff] }
 0x74c   : > { %4940 = vrot.lane.b32.xlu0 %v4939_v56, %s6849_s0  ;;  %s6930_s0 = sld [smem:[#allocation52_spill]]  ;;  %v1412_v56 = vld [vmem:[%s6932_s23 + $0x38] sm:$0xff] }
 0x752   : > { %s6931_s18 = smov %s6930_s0 }
 0x776   : > { %v2207_v59 = vpop.f32.mrb[20].mxu0 }
 0x777   : > { %v4447_v60 = vpop.f32.mrb[21].mxu0 }
 0x778   : > { %v2210_v61 = vpop.f32.mrb[22].mxu0  ;;  %v1414_v60 = vld [vmem:[%s6932_s23 + $0x48] sm:$0xff] }
 0x779   : > { %v4944_v62 = vpack.i.bf16 %v2210_v61, %v2207_v59  ;;  %v4448_v63 = vpop.f32.mrb[23].mxu0  ;;  %v1413_v59 = vld [vmem:[%s6932_s23 + $0x40] sm:$0xff] }
 0x77b   : > { %4945 = vrot.lane.b32.xlu1 %v4944_v62, %s6848_s2  ;;  %s6929_s2 = sld [smem:[#allocation37_spill]] }
 0x781   : > { %s6255_s16 = scalar_lea.vmem %s6929_s2, %s4241_s21  ;;  %s6936_s2 = sld [smem:[#allocation41_spill]] }
 0x782   : > { %v6260_v34 = vld [vmem:[%s6255_s16] sm:$0xff]  ;;  %v6263_v35 = vld [vmem:[%s6255_s16 + $0x8] sm:$0xff]  ;;  %v6270_v4 = vld [vmem:[%s6255_s16 + $0x10] sm:$0xff] }
 0x783   : > { %v2361_v38 = vadd.f32 %v1405_v36, %v6260_v34  ;;  %v2362_v0 = vadd.f32 %v1406_v37, %v6263_v35  ;;  %v6273_v39 = vld [vmem:[%s6255_s16 + $0x18] sm:$0xff]  ;;  %v2363_v42 = vadd.f32 %v1407_v40, %v6270_v4  ;;  %v6282_v44 = vld [vmem:[%s6255_s16 + $0x28] sm:$0xff]  ;;  %v6291_v52 = vld [vmem:[%s6255_s16 + $0x30] sm:$0xff] }
 0x784   : > { %v2364_v46 = vadd.f32 %v1408_v41, %v6273_v39  ;;  %v2366_v50 = vadd.f32 %v1410_v48, %v6282_v44  ;;  %v6294_v53 = vld [vmem:[%s6255_s16 + $0x38] sm:$0xff]  ;;  %v6299_v57 = vld [vmem:[%s6255_s16 + $0x40] sm:$0xff]  ;;  %v6302_v58 = vld [vmem:[%s6255_s16 + $0x48] sm:$0xff]  ;;  %v2367_v61 = vadd.f32 %v1411_v55, %v6291_v52 }
 0x785   : > { %v2368_v62 = vadd.f32 %v1412_v56, %v6294_v53  ;;  %v2369_v63 = vadd.f32 %v1413_v59, %v6299_v57  ;;  %v1419_v37 = vld [vmem:[%s6932_s23 + $0x70] sm:$0xff] }
 0x786   : > { %v2447_v51 = vpack.c.bf16 %v2364_v46, %v2363_v42 }
 0x7b6   : > { %v4936_v2 = vpop.permute.xlu1 %4935 }
 0x7b7   : > { %v4938_v8 = vunpack.i.h.bf16 %v4936_v2  ;;  %v4937_v9 = vunpack.i.l.bf16 %v4936_v2  ;;  %v2370_v2 = vadd.f32 %v1414_v60, %v6302_v58 }
 0x7b9   : > { %v2239_v13 = vsel %vm1710_vm2, %v1832_v45, %v4938_v8  ;;  %v2238_v14 = vsel %vm1710_vm2, %v1829_v43, %v4937_v9  ;;  %v6279_v43 = vld [vmem:[%s6255_s16 + $0x20] sm:$0xff]  ;;  %v2446_v45 = vpack.c.bf16 %v2362_v0, %v2361_v38  ;;  %v6314_v8 = vld [vmem:[%s6255_s16 + $0x50] sm:$0xff]  ;;  %v2450_v9 = vpack.c.bf16 %v2370_v2, %v2369_v63  ;;  %v1420_v38 = vld [vmem:[%s6932_s23 + $0x78] sm:$0xff] }
 0x7ba   : > { %v2365_v49 = vadd.f32 %v1409_v47, %v6279_v43  ;;  %v6365_v47 = vld [vmem:[#allocation5] ss:$0 sm:$0xff] }
 0x7bc   : > { %v2448_v54 = vpack.c.bf16 %v2366_v50, %v2365_v49 }
 0x7be   : > { %v4941_v3 = vpop.permute.xlu0 %4940 }
 0x7bf   : > { %v4943_v10 = vunpack.i.h.bf16 %v4941_v3  ;;  %v4942_v11 = vunpack.i.l.bf16 %v4941_v3  ;;  %v2449_v3 = vpack.c.bf16 %v2368_v62, %v2367_v61 }
 0x7c1   : > { %v2241_v17 = vsel %vm1768_vm3, %v2239_v13, %v4943_v10  ;;  %v2240_v18 = vsel %vm1768_vm3, %v2238_v14, %v4942_v11  ;;  %v6317_v10 = vld [vmem:[%s6255_s16 + $0x58] sm:$0xff]  ;;  %v1415_v11 = vld [vmem:[%s6932_s23 + $0x50] sm:$0xff] }
 0x7c2   : > { %v2371_v13 = vadd.f32 %v1415_v11, %v6314_v8 }
 0x7ed   : > { %v4946_v12 = vpop.permute.xlu1 %4945 }
 0x7ee   : > { %v4948_v15 = vunpack.i.h.bf16 %v4946_v12  ;;  %v4947_v16 = vunpack.i.l.bf16 %v4946_v12  ;;  %v1416_v12 = vld [vmem:[%s6932_s23 + $0x58] sm:$0xff] }
 0x7ef   : > { %v2372_v14 = vadd.f32 %v1416_v12, %v6317_v10 }
 0x7f0   : > { %v2244_v19 = vsel %vm2242_vm4, %v2241_v17, %v4948_v15  ;;  %v2243_v20 = vsel %vm2242_vm4, %v2240_v18, %v4947_v16 }
 0x7f1   : > { %v2245_v21 = vpack.c.bf16 %v2244_v19, %v2243_v20  ;;  %v2451_v15 = vpack.c.bf16 %v2372_v14, %v2371_v13 }
 0x7f3   : > { %4454 = vmatmul.mubr.msk.bf16.vlgmr.msra.gmra.mrb[20].mxu1 %vm1425_vm0, %v2245_v21 }
 0x7f4   : > { %4469 = vmatprep.mubr.msk.bf16.mxu1 %vm1425_vm0, %v2446_v45 }
 0x8c6   : > { %v2306_v22 = vpop.f32.mrb[20].mxu1 }
 0x8c7   : > { %v2307_v24 = vadd.f32 %v4179_v23, %v2306_v22  ;;  %v4455_v25 = vpop.f32.mrb[21].mxu1 }
 0x8c8   : > { %v2309_v26 = vpop.f32.mrb[22].mxu1 }
 0x8c9   : > { %v6244_v27 = vadd.f32 %v2307_v24, %v6099_v1  ;;  %v2310_v28 = vadd.f32 %v4179_v23, %v2309_v26  ;;  %v4456_v30 = vpop.f32.mrb[23].mxu1  ;;  %v4972_v1 = vld [vmem:[%s6930_s0] sm:$0xff]   ;;  %s6933_s0 = sld [smem:[#allocation50_spill]] }
 0x8ca   : > { %4465 = vmatprep.subr.bf16.mxu1 %v4972_v1  ;;  %v6339_v26 = vld [vmem:[%s6255_s16 + $0x60] sm:$0xff] }
 0x8cb   : > { %v6247_v31 = vadd.f32 %v2310_v28, %v6107_v5  ;;  %v2317_v32 = vsel %vm1425_vm0, %v6244_v27, 0.0  ;;  %v4973_v5 = vld [vmem:[%s6931_s18 + $0x8] sm:$0xff]   ;;  %4466 = vmatpush3.bf16.msra.mxu1 %v4972_v1  ;;  %v1417_v30 = vld [vmem:[%s6932_s23 + $0x60] sm:$0xff]  ;;  %v6348_v1 = vld [vmem:[%s6255_s16 + $0x70] sm:$0xff] }
 0x8cc   : > { %2318 = vadd.xlane.f32.xlu0 %v2317_v32  ;;  %4467 = vmatprep.subr.bf16.mxu1 %v4973_v5  ;;  %v6342_v28 = vld [vmem:[%s6255_s16 + $0x68] sm:$0xff]  ;;  %v2375_v0 = vadd.f32 %v1419_v37, %v6348_v1 }
 0x8cd   : > { %v2320_v33 = vsel %vm1425_vm0, %v6247_v31, 0.0  ;;  %v1418_v32 = vld [vmem:[%s6932_s23 + $0x68] sm:$0xff] }
 0x8ce   : > { %2321 = vadd.xlane.f32.xlu1 %v2320_v33  ;;  %v2373_v33 = vadd.f32 %v1417_v30, %v6339_v26  ;;  %v2374_v36 = vadd.f32 %v1418_v32, %v6342_v28 }
 0x8cf   : > { %4468 = vmatpush3.bf16.msra.mxu1 %v4973_v5  ;;  %s6934_s21 = smov %s6933_s0  ;;  %v6351_v5 = vld [vmem:[%s6255_s16 + $0x78] sm:$0xff]  ;;  %v4974_v45 = vld [vmem:[%s6933_s0] sm:$0xff]   ;;  %s6935_s16 = sld [smem:[#allocation53_spill]] }
 0x8d0   : > { %4505 = vmatprep.subr.bf16.mxu1 %v5628_v29  ;;  %v2376_v40 = vadd.f32 %v1420_v38, %v6351_v5  ;;  %v2452_v41 = vpack.c.bf16 %v2374_v36, %v2373_v33  ;;  %4458 = vmatpush3.bf16.msra.mxu0 %v4974_v45  ;;  %v4975_v46 = vld [vmem:[%s6934_s21 + $0x8] sm:$0xff]   ;;  %s1378_s0 = scalar_lea.vmem %s6936_s2, %s6092_s28  ;;  %s6937_s28 = smov 120  }
 0x8d1   : > { %4459 = vmatprep.subr.bf16.mxu0 %v5628_v29  ;;  %s6938_s2 = smov 112  }
 0x8d2   : > { %4470 = vmatmul.mubr.msk.bf16.vlgmr.msra.gmra.mrb[24].mxu1 %vm1425_vm0, %v2447_v51  ;;  %v2453_v42 = vpack.c.bf16 %v2376_v40, %v2375_v0 }
 0x8d3   : > { %4473 = vmatprep.mubr.msk.bf16.mxu1 %vm1425_vm0, %v2448_v54 }
 0x8d4   : > { %4460 = vmatpush3.bf16.msra.mxu0 %v4975_v46 }
 0x8da   : > { %4474 = vmatmul.mubr.msk.bf16.gmra.mrb[28].mxu1 %vm1425_vm0, %v2449_v3 }
 0x8db   : > { %4477 = vmatprep.mubr.msk.bf16.mxu1 %vm1425_vm0, %v2450_v9 }
 0x8e2   : > { %4478 = vmatmul.mubr.msk.bf16.gmra.mrb[32].mxu1 %vm1425_vm0, %v2451_v15 }
 0x8e3   : > { %4481 = vmatprep.mubr.msk.bf16.mxu1 %vm1425_vm0, %v2452_v41 }
 0x8ea   : > { %4482 = vmatmul.mubr.msk.bf16.gmra.mrb[36].mxu1 %vm1425_vm0, %v2453_v42 }
 0x8eb   : > { %4521 = vmatprep.mubr.msk.bf16.mxu1 %vm5629_vm1, %v5628_v29 }
 0x959   : > { %v2319_v16 = vpop.xlane.xlu0 %2318 }
 0x95a   : > { %v2323_v17 = vmul.f32 0.03125, %v2319_v16 }
 0x95b   : > { %v2322_v18 = vpop.xlane.xlu1 %2321 }
 0x95c   : > { %v6327_v19 = vsub.f32 %v6244_v27, %v2323_v17  ;;  %v2324_v20 = vmul.f32 0.03125, %v2322_v18 }
 0x95e   : > { %v6330_v21 = vsub.f32 %v6247_v31, %v2324_v20  ;;  %v2327_v23 = vmul.f32 %v6327_v19, %v6327_v19 }
 0x960   : > { %v2329_v22 = vsel %vm1425_vm0, %v2327_v23, 0.0  ;;  %v2328_v24 = vmul.f32 %v6330_v21, %v6330_v21 }
 0x961   : > { %2330 = vadd.xlane.f32.xlu0 %v2329_v22 }
 0x962   : > { %v2332_v25 = vsel %vm1425_vm0, %v2328_v24, 0.0 }
 0x965   : > { %2333 = vadd.xlane.f32.xlu0 %v2332_v25 }
 0x9a5   : > { %v4471_v48 = vpop.f32.mrb[24].mxu1 }
 0x9a6   : > { %v2544_v49 = vadd.f32 %v4471_v48, %v6365_v47  ;;  %v2535_v50 = vpop.f32.mrb[25].mxu1 }
 0x9a7   : > { %v2536_v51 = vadd.f32 %v6365_v47, %v2535_v50  ;;  %v4472_v54 = vpop.f32.mrb[26].mxu1 }
 0x9a8   : > { %v2547_v55 = vadd.f32 %v4472_v54, %v6365_v47  ;;  %v2538_v56 = vpop.f32.mrb[27].mxu1 }
 0x9a9   : > { %v2539_v59 = vadd.f32 %v6365_v47, %v2538_v56 }
 0x9aa   : > { %v6371_v60 = vpack.c.bf16 %v2547_v55, %v2544_v49 }
 0x9ab   : > { %v6373_v61 = vpack.c.bf16 %v2539_v59, %v2536_v51  ;;  %v4183_v51 = vld [vmem:[#allocation13] ss:$0 sm:$0xff]  ;;  %v4184_v59 = vld [vmem:[#allocation14] ss:$0 sm:$0xff] }
 0x9ac   : > { %v2773_v16 = vsel %vm1710_vm2, %v6371_v60, 0 }
 0x9ad   : > { %v2770_v62 = vsel %vm1710_vm2, %v6373_v61, 0  ;;  %v4475_v63 = vpop.f32.mrb[28].mxu1 }
 0x9ae   : > { %4506 = vmatpush3.bf16.xpose.msra.mxu1 %v2770_v62  ;;  %v2560_v2 = vadd.f32 %v4475_v63, %v6365_v47  ;;  %v2551_v3 = vpop.f32.mrb[29].mxu1 }
 0x9af   : > { %4507 = vmatprep.subr.bf16.mxu1 %v5628_v29  ;;  %v2552_v9 = vadd.f32 %v6365_v47, %v2551_v3  ;;  %v4476_v11 = vpop.f32.mrb[30].mxu1 }
 0x9b0   : > { %v2563_v12 = vadd.f32 %v4476_v11, %v6365_v47  ;;  %v2554_v13 = vpop.f32.mrb[31].mxu1 }
 0x9b1   : > { %v2555_v14 = vadd.f32 %v6365_v47, %v2554_v13 }
 0x9b2   : > { %v6382_v15 = vpack.c.bf16 %v2563_v12, %v2560_v2 }
 0x9b3   : > { %v6386_v17 = vpack.c.bf16 %v2555_v14, %v2552_v9 }
 0x9b4   : > { %v2779_v38 = vsel %vm1710_vm2, %v6382_v15, 0 }
 0x9b5   : > { %v4479_v18 = vpop.f32.mrb[32].mxu1  ;;  %v2776_v36 = vsel %vm1710_vm2, %v6386_v17, 0 }
 0x9b6   : > { %4508 = vmatpush3.bf16.xpose.msra.mxu1 %v2773_v16  ;;  %v2576_v20 = vadd.f32 %v4479_v18, %v6365_v47  ;;  %v2567_v23 = vpop.f32.mrb[33].mxu1 }
 0x9b7   : > { %4509 = vmatprep.subr.bf16.mxu1 %v5628_v29  ;;  %v2568_v22 = vadd.f32 %v6365_v47, %v2567_v23  ;;  %v4480_v24 = vpop.f32.mrb[34].mxu1 }
 0x9b8   : > { %v2579_v25 = vadd.f32 %v4480_v24, %v6365_v47  ;;  %v2570_v30 = vpop.f32.mrb[35].mxu1 }
 0x9b9   : > { %v2571_v32 = vadd.f32 %v6365_v47, %v2570_v30 }
 0x9ba   : > { %v6393_v33 = vpack.c.bf16 %v2579_v25, %v2576_v20  ;;  %v4185_v25 = vld [vmem:[#allocation2] ss:$0 sm:$0xff] }
 0x9bb   : > { %v6397_v37 = vpack.c.bf16 %v2571_v32, %v2568_v22 }
 0x9bc   : > { %v2785_v42 = vsel %vm1710_vm2, %v6393_v33, 0 }
 0x9bd   : > { %v2782_v0 = vsel %vm1710_vm2, %v6397_v37, 0  ;;  %v4483_v13 = vpop.f32.mrb[36].mxu1 }
 0x9be   : > { %4510 = vmatpush3.bf16.xpose.msra.mxu1 %v2776_v36  ;;  %v2592_v14 = vadd.f32 %v4483_v13, %v6365_v47  ;;  %v2583_v16 = vpop.f32.mrb[37].mxu1 }
 0x9bf   : > { %4511 = vmatprep.subr.bf16.mxu1 %v5628_v29  ;;  %v4484_v18 = vpop.f32.mrb[38].mxu1 }
 0x9c0   : > { %v2595_v20 = vadd.f32 %v4484_v18, %v6365_v47 }
 0x9c2   : > { %v6418_v22 = vpack.c.bf16 %v2595_v20, %v2592_v14 }
 0x9c4   : > { %v2791_v24 = vsel %vm1710_vm2, %v6418_v22, 0 }
 0x9c6   : > { %4512 = vmatpush3.bf16.xpose.msra.mxu1 %v2779_v38 }
 0x9c7   : > { %4513 = vmatprep.subr.bf16.mxu1 %v5628_v29 }
 0x9ce   : > { %4514 = vmatpush3.bf16.xpose.msra.mxu1 %v2782_v0 }
 0x9cf   : > { %4515 = vmatprep.subr.bf16.mxu1 %v5628_v29 }
 0x9d6   : > { %4516 = vmatpush3.bf16.xpose.msra.mxu1 %v2785_v42  ;;  %v4977_v42 = vld [vmem:[%s6935_s16 + $0x8] sm:$0xff]  }
 0x9d7   : > { %4517 = vmatprep.subr.bf16.mxu1 %v5628_v29 }
 0x9ee   : > { %v2331_v40 = vpop.xlane.xlu0 %2330 }
 0x9ef   : > { %v2335_v41 = vmul.f32 0.03125, %v2331_v40 }
 0x9f1   : > { %v2337_v45 = vadd.f32 1e-05, %v2335_v41  ;;  %v4976_v41 = vld [vmem:[%s6935_s16] sm:$0xff]  }
 0x9f2   : > { %v2334_v46 = vpop.xlane.xlu0 %2333  ;;  %4485 = vmatprep.subr.bf16.mxu0 %v4976_v41 }
 0x9f3   : > { %5026 = vrsqrt.f32 %v2337_v45  ;;  %v2336_v48 = vmul.f32 0.03125, %v2334_v46  ;;  %v2606_v45 = vpack.c.bf16 %v6263_v35, %v6260_v34  ;;  %v2607_v46 = vpack.c.bf16 %v6273_v39, %v6270_v4 }
 0x9f4   : > { %v2609_v34 = vpack.c.bf16 %v6294_v53, %v6291_v52  ;;  %v2610_v35 = vpack.c.bf16 %v6302_v58, %v6299_v57  ;;  %v2611_v4 = vpack.c.bf16 %v6317_v10, %v6314_v8  ;;  %v2612_v39 = vpack.c.bf16 %v6342_v28, %v6339_v26 }
 0x9f5   : > { %v2338_v49 = vadd.f32 1e-05, %v2336_v48  ;;  %v2608_v48 = vpack.c.bf16 %v6282_v44, %v6279_v43  ;;  %v2613_v43 = vpack.c.bf16 %v6351_v5, %v6348_v1  ;;  %v6465_v44 = vld [vmem:[%s1378_s0] ss:$0 sm:$0xff]  ;;  %v4200_v1 = vld [vmem:[#allocation7] ss:$0 sm:$0xff] }
 0x9f6   : > { %s6939_s0 = smov 104  }
 0x9f7   : > { %5028 = vrsqrt.f32 %v2338_v49 }
 0x9fd   : > { %v5027_v50 = vpop.eup %5026 }
 0x9fe   : > { %v2341_v54 = vmul.f32 %v5027_v50, %v6327_v19  ;;  %v2584_v19 = vadd.f32 %v6365_v47, %v2583_v16 }
 0xa00   : > { %v2349_v55 = vmul.f32 %v4183_v51, %v2341_v54 }
 0xa01   : > { %v5029_v56 = vpop.eup %5028 }
 0xa02   : > { %v2342_v62 = vmul.f32 %v5029_v56, %v6330_v21  ;;  %v2357_v2 = vadd.f32 %v4184_v59, %v2349_v55  ;;  %v2586_v21 = vpop.f32.mrb[39].mxu1 }
 0xa03   : > { %v2587_v23 = vadd.f32 %v6365_v47, %v2586_v21 }
 0xa04   : > { %v2350_v63 = vmul.f32 %v4183_v51, %v2342_v62  ;;  %v2359_v9 = vadd.f32 %v2357_v2, %v6138_v6 }
 0xa05   : > { %v6420_v6 = vpack.c.bf16 %v2587_v23, %v2584_v19 }
 0xa06   : > { %v2358_v3 = vadd.f32 %v4184_v59, %v2350_v63 }
 0xa08   : > { %v2360_v11 = vadd.f32 %v2358_v3, %v6141_v7  ;;  %v2788_v7 = vsel %vm1710_vm2, %v6420_v6, 0 }
 0xa09   : > { %4518 = vmatpush3.bf16.xpose.msra.mxu1 %v2788_v7 }
 0xa0a   : > { %v2377_v12 = vpack.c.bf16 %v2360_v11, %v2359_v9  ;;  %4519 = vmatprep.subr.bf16.mxu1 %v5628_v29 }
 0xa0c   : > { %4462 = vmatmul.mubr.msk.bf16.vlgmr.msra.gmra.mrb[24].mxu0 %vm1425_vm0, %v2377_v12 }
 0xa0d   : > { %4489 = vmatprep.mubr.msk.bf16.mxu0 %vm1425_vm0, %v2606_v45  ;;  %4486 = vmatpush3.bf16.msra.mxu0 %v4976_v41 }
 0xa0e   : > { %4487 = vmatprep.subr.bf16.mxu0 %v4977_v42 }
 0xa11   : > { %4520 = vmatpush3.bf16.xpose.msra.mxu1 %v2791_v24  ;;  %4488 = vmatpush3.bf16.msra.mxu0 %v4977_v42 }
 0xa12   : > { %4565 = vmatprep.subr.bf16.mxu1 %v5628_v29  ;;  %4525 = vmatprep.subr.bf16.mxu0 %v5628_v29 }
 0xa14   : > { %4490 = vmatmul.mubr.msk.bf16.vlgmr.msra.gmra.mrb[28].mxu0 %vm1425_vm0, %v2607_v46 }
 0xa15   : > { %4493 = vmatprep.mubr.msk.bf16.mxu0 %vm1425_vm0, %v2608_v48 }
 0xa1c   : > { %4494 = vmatmul.mubr.msk.bf16.gmra.mrb[32].mxu0 %vm1425_vm0, %v2609_v34 }
 0xa1d   : > { %4497 = vmatprep.mubr.msk.bf16.mxu0 %vm1425_vm0, %v2610_v35 }
 0xa24   : > { %4498 = vmatmul.mubr.msk.bf16.gmra.mrb[36].mxu0 %vm1425_vm0, %v2611_v4 }
 0xa25   : > { %4501 = vmatprep.mubr.msk.bf16.mxu0 %vm1425_vm0, %v2612_v39 }
 0xa2c   : > { %4502 = vmatmul.mubr.msk.bf16.gmra.mrb[40].mxu0 %vm1425_vm0, %v2613_v43 }
 0xa2d   : > { %4541 = vmatprep.mubr.msk.bf16.mxu0 %vm5629_vm1, %v5628_v29 }
 0xadf   : > { %v2438_v47 = vpop.f32.mrb[24].mxu0 }
 0xae0   : > { %v4463_v30 = vpop.f32.mrb[25].mxu0  ;;  %v2439_v36 = vadd.f32 %v4185_v25, %v2438_v47 }
 0xae1   : > { %v2441_v32 = vpop.f32.mrb[26].mxu0 }
 0xae2   : > { %v2442_v38 = vadd.f32 %v4185_v25, %v2441_v32  ;;  %v4464_v0 = vpop.f32.mrb[27].mxu0 }
 0xae4   : > { %v6428_v40 = vpack.c.bf16 %v2442_v38, %v2439_v36 }
 0xae6   : > { %4522 = vmatmul.mubr.msk.bf16.vlgmr.msra.gmra.mrb[40].mxu1 %vm1710_vm2, %v6428_v40 }
 0xae7   : > { %4581 = vmatprep.mubr.msk.bf16.mxu1 %vm5629_vm1, %v5628_v29  ;;  %v4491_v5 = vpop.f32.mrb[28].mxu0 }
 0xae8   : > { %v2704_v49 = vadd.f32 %v4491_v5, %v4200_v1  ;;  %v2695_v50 = vpop.f32.mrb[29].mxu0 }
 0xae9   : > { %v2696_v51 = vadd.f32 %v4200_v1, %v2695_v50  ;;  %v4492_v54 = vpop.f32.mrb[30].mxu0 }
 0xaea   : > { %v2707_v55 = vadd.f32 %v4492_v54, %v4200_v1  ;;  %v2698_v56 = vpop.f32.mrb[31].mxu0 }
 0xaeb   : > { %v2699_v59 = vadd.f32 %v4200_v1, %v2698_v56 }
 0xaec   : > { %v6475_v62 = vpack.c.bf16 %v2707_v55, %v2704_v49 }
 0xaed   : > { %v6477_v63 = vpack.c.bf16 %v2699_v59, %v2696_v51 }
 0xaef   : > { %v4495_v2 = vpop.f32.mrb[32].mxu0  ;;  %4526 = vmatpush3.bf16.msra.mxu0 %v6477_v63 }
 0xaf0   : > { %v2720_v3 = vadd.f32 %v4495_v2, %v4200_v1  ;;  %v2711_v9 = vpop.f32.mrb[33].mxu0  ;;  %4527 = vmatprep.subr.bf16.mxu0 %v5628_v29 }
 0xaf1   : > { %v2712_v11 = vadd.f32 %v4200_v1, %v2711_v9  ;;  %v4496_v12 = vpop.f32.mrb[34].mxu0 }
 0xaf2   : > { %v2723_v13 = vadd.f32 %v4496_v12, %v4200_v1  ;;  %v2714_v14 = vpop.f32.mrb[35].mxu0 }
 0xaf3   : > { %v2715_v16 = vadd.f32 %v4200_v1, %v2714_v14  ;;  %4528 = vmatpush3.bf16.msra.mxu0 %v6475_v62 }
 0xaf4   : > { %v6482_v19 = vpack.c.bf16 %v2723_v13, %v2720_v3  ;;  %4529 = vmatprep.subr.bf16.mxu0 %v5628_v29 }
 0xaf5   : > { %v6485_v18 = vpack.c.bf16 %v2715_v16, %v2712_v11 }
 0xaf7   : > { %v4499_v20 = vpop.f32.mrb[36].mxu0  ;;  %4530 = vmatpush3.bf16.msra.mxu0 %v6485_v18 }
 0xaf8   : > { %v2736_v21 = vadd.f32 %v4499_v20, %v4200_v1  ;;  %v2727_v23 = vpop.f32.mrb[37].mxu0  ;;  %4531 = vmatprep.subr.bf16.mxu0 %v5628_v29 }
 0xaf9   : > { %v2728_v7 = vadd.f32 %v4200_v1, %v2727_v23  ;;  %v4500_v24 = vpop.f32.mrb[38].mxu0 }
 0xafa   : > { %v2739_v25 = vadd.f32 %v4500_v24, %v4200_v1  ;;  %v2730_v47 = vpop.f32.mrb[39].mxu0 }
 0xafb   : > { %v2731_v30 = vadd.f32 %v4200_v1, %v2730_v47  ;;  %4532 = vmatpush3.bf16.msra.mxu0 %v6482_v19 }
 0xafc   : > { %v6490_v32 = vpack.c.bf16 %v2739_v25, %v2736_v21  ;;  %4533 = vmatprep.subr.bf16.mxu0 %v5628_v29 }
 0xafd   : > { %v6493_v36 = vpack.c.bf16 %v2731_v30, %v2728_v7 }
 0xaff   : > { %v4503_v38 = vpop.f32.mrb[40].mxu0  ;;  %4534 = vmatpush3.bf16.msra.mxu0 %v6493_v36 }
 0xb00   : > { %v2752_v0 = vadd.f32 %v4503_v38, %v4200_v1  ;;  %v2743_v41 = vpop.f32.mrb[41].mxu0  ;;  %4535 = vmatprep.subr.bf16.mxu0 %v5628_v29 }
 0xb01   : > { %v2744_v42 = vadd.f32 %v4200_v1, %v2743_v41  ;;  %v4504_v45 = vpop.f32.mrb[42].mxu0 }
 0xb02   : > { %v2755_v46 = vadd.f32 %v4504_v45, %v4200_v1  ;;  %v2746_v48 = vpop.f32.mrb[43].mxu0 }
 0xb03   : > { %v2747_v34 = vadd.f32 %v4200_v1, %v2746_v48  ;;  %4536 = vmatpush3.bf16.msra.mxu0 %v6490_v32 }
 0xb04   : > { %v6498_v35 = vpack.c.bf16 %v2755_v46, %v2752_v0  ;;  %4537 = vmatprep.subr.bf16.mxu0 %v5628_v29 }
 0xb05   : > { %v6501_v4 = vpack.c.bf16 %v2747_v34, %v2744_v42 }
 0xb07   : > { %4538 = vmatpush3.bf16.msra.mxu0 %v6501_v4 }
 0xb08   : > { %4539 = vmatprep.subr.bf16.mxu0 %v5628_v29 }
 0xb0b   : > { %4540 = vmatpush3.bf16.msra.mxu0 %v6498_v35 }
 0xb0c   : > { %4545 = vmatprep.subr.bf16.mxu0 %v5628_v29 }
 0xbb9   : > { %v2827_v52 = vpop.f32.mrb[40].mxu1 }
 0xbba   : > { %v2834_v53 = vmul.f32 0.35355338, %v2827_v52  ;;  %v4523_v57 = vpop.f32.mrb[41].mxu1 }
 0xbbb   : > { %v2830_v58 = vpop.f32.mrb[42].mxu1 }
 0xbbc   : > { %v2835_v8 = vmul.f32 0.35355338, %v2830_v58  ;;  %v4524_v10 = vpop.f32.mrb[43].mxu1  ;;  %v6468_v26 = vadd.f32 %v6465_v44, %v2834_v53 }
 0xbbe   : > { %2844 = vmax.xlane.f32.xlu0 %v6468_v26  ;;  %v6472_v28 = vadd.f32 %v6465_v44, %v2835_v8 }
 0xbc0   : > { %2846 = vmax.xlane.f32.xlu1 %v6472_v28 }
 0xc4b   : > { %v2845_v39 = vpop.xlane.xlu0 %2844 }
 0xc4c   : > { %v2848_v43 = vsub.f32 %v6468_v26, %v2845_v39 }
 0xc4d   : > { %v2847_v52 = vpop.xlane.xlu1 %2846 }
 0xc4e   : > { %v2850_v53 = vmul.f32 1.442695, %v2848_v43  ;;  %v2849_v57 = vsub.f32 %v6472_v28, %v2847_v52 }
 0xc50   : > { %5030 = vpow2.f32 %v2850_v53  ;;  %v2852_v58 = vmul.f32 1.442695, %v2849_v57 }
 0xc52   : > { %5032 = vpow2.f32 %v2852_v58 }
 0xc5a   : > { %v5031_v8 = vpop.eup %5030 }
 0xc5b   : > { %2854 = vadd.xlane.f32.xlu0 %v5031_v8 }
 0xc5c   : > { %v5033_v10 = vpop.eup %5032 }
 0xc5d   : > { %2856 = vadd.xlane.f32.xlu1 %v5033_v10 }
 0xc6e   : > { %2917 = vrot.lane.b32.xlu1 %v6371_v60, %s6937_s28 }
 0xc71   : > { %2915 = vrot.lane.b32.xlu0 %v6373_v61, %s6937_s28 }
 0xc72   : > { %2919 = vrot.lane.b32.xlu1 %v6386_v17, %s6937_s28 }
 0xc75   : > { %2923 = vrot.lane.b32.xlu0 %v6397_v37, %s6937_s28 }
 0xc76   : > { %2921 = vrot.lane.b32.xlu1 %v6382_v15, %s6937_s28 }
 0xc79   : > { %2927 = vrot.lane.b32.xlu0 %v6420_v6, %s6937_s28 }
 0xc7a   : > { %2925 = vrot.lane.b32.xlu1 %v6393_v33, %s6937_s28 }
 0xc7d   : > { %2905 = vrot.lane.b32.xlu0 %v6428_v40, %s6937_s28 }
 0xc7e   : > { %2929 = vrot.lane.b32.xlu1 %v6418_v22, %s6937_s28 }
 0xce8   : > { %v2855_v26 = vpop.xlane.xlu0 %2854 }
 0xce9   : > { %5034 = vrcp.f32 %v2855_v26 }
 0xcea   : > { %v2857_v28 = vpop.xlane.xlu1 %2856 }
 0xceb   : > { %5036 = vrcp.f32 %v2857_v28 }
 0xcec   : > { %v2916_v51 = vpop.permute.xlu0 %2915 }
 0xced   : > { %v2935_v55 = vsel %vm1710_vm2, %v2916_v51, 0 }
 0xcee   : > { %v2918_v56 = vpop.permute.xlu1 %2917 }
 0xcef   : > { %v2938_v59 = vsel %vm1710_vm2, %v2918_v56, 0 }
 0xcf0   : > { %v2924_v12 = vpop.permute.xlu0 %2923 }
 0xcf1   : > { %v2947_v13 = vsel %vm1710_vm2, %v2924_v12, 0 }
 0xcf2   : > { %v2920_v2 = vpop.permute.xlu1 %2919 }
 0xcf3   : > { %v5035_v1 = vpop.eup %5034  ;;  %v2941_v3 = vsel %vm1710_vm2, %v2920_v2, 0 }
 0xcf4   : > { %v2860_v49 = vmul.f32 %v5035_v1, %v5031_v8  ;;  %v2928_v20 = vpop.permute.xlu0 %2927 }
 0xcf5   : > { %v5037_v5 = vpop.eup %5036  ;;  %v2953_v21 = vsel %vm1710_vm2, %v2928_v20, 0 }
 0xcf6   : > { %v2861_v50 = vmul.f32 %v5037_v5, %v5033_v10  ;;  %v2922_v9 = vpop.permute.xlu1 %2921 }
 0xcf7   : > { %v2944_v11 = vsel %vm1710_vm2, %v2922_v9, 0 }
 0xcf8   : > { %v2862_v54 = vpack.c.bf16 %v2861_v50, %v2860_v49  ;;  %v2906_v24 = vpop.permute.xlu0 %2905 }
 0xcfa   : > { %4542 = vmatmul.mubr.bf16.vlgmr.msra.gmra.mrb[44].mxu0 %v2862_v54  ;;  %v2926_v14 = vpop.permute.xlu1 %2925 }
 0xcfb   : > { %4546 = vmatpush3.bf16.xpose.msra.mxu0 %v2935_v55  ;;  %4561 = vmatprep.mubr.msk.bf16.mxu0 %vm5629_vm1, %v5628_v29  ;;  %v2950_v16 = vsel %vm1710_vm2, %v2926_v14, 0 }
 0xcfc   : > { %4547 = vmatprep.subr.bf16.mxu0 %v5628_v29 }
 0xcfe   : > { %v2930_v23 = vpop.permute.xlu1 %2929 }
 0xcff   : > { %v2956_v7 = vsel %vm1710_vm2, %v2930_v23, 0 }
 0xd03   : > { %4548 = vmatpush3.bf16.xpose.msra.mxu0 %v2938_v59 }
 0xd04   : > { %4549 = vmatprep.subr.bf16.mxu0 %v5628_v29 }
 0xd0b   : > { %4550 = vmatpush3.bf16.xpose.msra.mxu0 %v2941_v3 }
 0xd0c   : > { %4551 = vmatprep.subr.bf16.mxu0 %v5628_v29 }
 0xd13   : > { %4552 = vmatpush3.bf16.xpose.msra.mxu0 %v2944_v11 }
 0xd14   : > { %4553 = vmatprep.subr.bf16.mxu0 %v5628_v29 }
 0xd1b   : > { %4554 = vmatpush3.bf16.xpose.msra.mxu0 %v2947_v13 }
 0xd1c   : > { %4555 = vmatprep.subr.bf16.mxu0 %v5628_v29 }
 0xd23   : > { %4556 = vmatpush3.bf16.xpose.msra.mxu0 %v2950_v16 }
 0xd24   : > { %4557 = vmatprep.subr.bf16.mxu0 %v5628_v29 }
 0xd2b   : > { %4558 = vmatpush3.bf16.xpose.msra.mxu0 %v2953_v21 }
 0xd2c   : > { %4559 = vmatprep.subr.bf16.mxu0 %v5628_v29 }
 0xd33   : > { %4560 = vmatpush3.bf16.xpose.msra.mxu0 %v2956_v7 }
 0xd34   : > { %4605 = vmatprep.subr.bf16.mxu0 %v5628_v29 }
 0xd3a   : > { %4562 = vmatmul.mubr.msk.bf16.vlgmr.msra.gmra.mrb[48].mxu0 %vm1710_vm2, %v2906_v24 }
 0xd3b   : > { %4621 = vmatprep.mubr.msk.bf16.mxu0 %vm5629_vm1, %v5628_v29 }
 0xdcd   : > { %v6548_v25 = vpop.f32.mrb[44].mxu0 }
 0xdce   : > { %v4543_v47 = vpop.f32.mrb[45].mxu0 }
 0xdcf   : > { %v6550_v30 = vpop.f32.mrb[46].mxu0 }
 0xdd0   : > { %v4544_v38 = vpop.f32.mrb[47].mxu0 }
 0xe0d   : > { %v2992_v0 = vpop.f32.mrb[48].mxu0 }
 0xe0e   : > { %v2999_v41 = vmul.f32 0.35355338, %v2992_v0  ;;  %v4563_v42 = vpop.f32.mrb[49].mxu0 }
 0xe0f   : > { %v2995_v45 = vpop.f32.mrb[50].mxu0 }
 0xe10   : > { %v3000_v46 = vmul.f32 0.35355338, %v2995_v45  ;;  %v4564_v48 = vpop.f32.mrb[51].mxu0  ;;  %v3001_v34 = vadd.f32 %v6465_v44, %v2999_v41 }
 0xe12   : > { %3003 = vmax.xlane.f32.xlu1 %v3001_v34  ;;  %v3002_v39 = vadd.f32 %v6465_v44, %v3000_v46 }
 0xe14   : > { %3005 = vmax.xlane.f32.xlu0 %v3002_v39 }
 0xe23   : > { %3032 = vrot.lane.b32.xlu1 %v6475_v62, %s6937_s28 }
 0xe27   : > { %3036 = vrot.lane.b32.xlu1 %v6482_v19, %s6937_s28 }
 0xe2a   : > { %3030 = vrot.lane.b32.xlu0 %v6477_v63, %s6937_s28 }
 0xe2b   : > { %3038 = vrot.lane.b32.xlu1 %v6493_v36, %s6937_s28 }
 0xe2e   : > { %3034 = vrot.lane.b32.xlu0 %v6485_v18, %s6937_s28 }
 0xe2f   : > { %3042 = vrot.lane.b32.xlu1 %v6501_v4, %s6937_s28 }
 0xe32   : > { %3040 = vrot.lane.b32.xlu0 %v6490_v32, %s6937_s28 }
 0xe9f   : > { %v3004_v43 = vpop.xlane.xlu1 %3003 }
 0xea0   : > { %v3007_v52 = vsub.f32 %v3001_v34, %v3004_v43 }
 0xea1   : > { %v3006_v53 = vpop.xlane.xlu0 %3005 }
 0xea2   : > { %v3009_v57 = vmul.f32 1.442695, %v3007_v52  ;;  %v3008_v58 = vsub.f32 %v3002_v39, %v3006_v53 }
 0xea3   : > { %v3033_v26 = vpop.permute.xlu1 %3032 }
 0xea4   : > { %5038 = vpow2.f32 %v3009_v57  ;;  %v3011_v8 = vmul.f32 1.442695, %v3008_v58 }
 0xea5   : > { %v3031_v10 = vpop.permute.xlu0 %3030 }
 0xea6   : > { %5040 = vpow2.f32 %v3011_v8  ;;  %4566 = vmatpush3.bf16.msra.mxu1 %v3031_v10 }
 0xea7   : > { %4567 = vmatprep.subr.bf16.mxu1 %v5628_v29  ;;  %v3037_v5 = vpop.permute.xlu1 %3036 }
 0xea9   : > { %v3035_v28 = vpop.permute.xlu0 %3034 }
 0xeaa   : > { %4568 = vmatpush3.bf16.msra.mxu1 %v3033_v26 }
 0xeab   : > { %4569 = vmatprep.subr.bf16.mxu1 %v5628_v29  ;;  %v3039_v50 = vpop.permute.xlu1 %3038 }
 0xead   : > { %v3041_v51 = vpop.permute.xlu0 %3040 }
 0xeae   : > { %v5039_v1 = vpop.eup %5038  ;;  %4570 = vmatpush3.bf16.msra.mxu1 %v3035_v28 }
 0xeaf   : > { %3013 = vadd.xlane.f32.xlu1 %v5039_v1  ;;  %4571 = vmatprep.subr.bf16.mxu1 %v5628_v29  ;;  %v3043_v54 = vpop.permute.xlu1 %3042 }
 0xeb0   : > { %v5041_v49 = vpop.eup %5040 }
 0xeb1   : > { %3015 = vadd.xlane.f32.xlu0 %v5041_v49 }
 0xeb2   : > { %4572 = vmatpush3.bf16.msra.mxu1 %v3037_v5 }
 0xeb3   : > { %4573 = vmatprep.subr.bf16.mxu1 %v5628_v29 }
 0xeb6   : > { %4574 = vmatpush3.bf16.msra.mxu1 %v3039_v50 }
 0xeb7   : > { %4575 = vmatprep.subr.bf16.mxu1 %v5628_v29 }
 0xeba   : > { %4576 = vmatpush3.bf16.msra.mxu1 %v3041_v51 }
 0xebb   : > { %4577 = vmatprep.subr.bf16.mxu1 %v5628_v29 }
 0xebe   : > { %4578 = vmatpush3.bf16.msra.mxu1 %v3043_v54 }
 0xebf   : > { %4579 = vmatprep.subr.bf16.mxu1 %v5628_v29 }
 0xec0   : > { %3097 = vrot.lane.b32.xlu1 %v6373_v61, %s6938_s2 }
 0xec4   : > { %3101 = vrot.lane.b32.xlu1 %v6386_v17, %s6938_s2 }
 0xec7   : > { %3044 = vrot.lane.b32.xlu0 %v6498_v35, %s6937_s28  ;;  %s6940_s28 = smov 16  }
 0xec8   : > { %3105 = vrot.lane.b32.xlu1 %v6397_v37, %s6938_s2 }
 0xecb   : > { %3099 = vrot.lane.b32.xlu0 %v6371_v60, %s6938_s2 }
 0xecc   : > { %3109 = vrot.lane.b32.xlu1 %v6420_v6, %s6938_s2 }
 0xecf   : > { %3103 = vrot.lane.b32.xlu0 %v6382_v15, %s6938_s2 }
 0xed0   : > { %3095 = vrot.lane.b32.xlu1 %v6428_v40, %s6938_s2 }
 0xed3   : > { %3107 = vrot.lane.b32.xlu0 %v6393_v33, %s6938_s2 }
 0xed7   : > { %3111 = vrot.lane.b32.xlu0 %v6418_v22, %s6938_s2 }
 0xf3c   : > { %v3014_v55 = vpop.xlane.xlu1 %3013 }
 0xf3d   : > { %5042 = vrcp.f32 %v3014_v55 }
 0xf3e   : > { %v3016_v56 = vpop.xlane.xlu0 %3015 }
 0xf3f   : > { %5044 = vrcp.f32 %v3016_v56 }
 0xf40   : > { %v3098_v12 = vpop.permute.xlu1 %3097 }
 0xf41   : > { %v3117_v14 = vsel %vm1710_vm2, %v3098_v12, 0 }
 0xf42   : > { %v3045_v59 = vpop.permute.xlu0 %3044 }
 0xf43   : > { %4580 = vmatpush3.bf16.msra.mxu1 %v3045_v59 }
 0xf44   : > { %4585 = vmatprep.subr.bf16.mxu1 %v5628_v29  ;;  %v3102_v21 = vpop.permute.xlu1 %3101 }
 0xf45   : > { %v3123_v23 = vsel %vm1710_vm2, %v3102_v21, 0 }
 0xf46   : > { %v3100_v16 = vpop.permute.xlu0 %3099 }
 0xf47   : > { %v5043_v2 = vpop.eup %5042  ;;  %v3120_v20 = vsel %vm1710_vm2, %v3100_v16, 0 }
 0xf48   : > { %v3019_v9 = vmul.f32 %v5043_v2, %v5039_v1  ;;  %v3106_v47 = vpop.permute.xlu1 %3105 }
 0xf49   : > { %v5045_v3 = vpop.eup %5044  ;;  %v3129_v38 = vsel %vm1710_vm2, %v3106_v47, 0 }
 0xf4a   : > { %v3020_v11 = vmul.f32 %v5045_v3, %v5041_v49  ;;  %v3104_v7 = vpop.permute.xlu0 %3103 }
 0xf4b   : > { %v3126_v24 = vsel %vm1710_vm2, %v3104_v7, 0 }
 0xf4c   : > { %v3021_v13 = vpack.c.bf16 %v3020_v11, %v3019_v9  ;;  %v3110_v42 = vpop.permute.xlu1 %3109 }
 0xf4d   : > { %v3135_v45 = vsel %vm1710_vm2, %v3110_v42, 0 }
 0xf4e   : > { %4582 = vmatmul.mubr.bf16.vlgmr.msra.gmra.mrb[44].mxu1 %v3021_v13  ;;  %v3108_v0 = vpop.permute.xlu0 %3107 }
 0xf4f   : > { %4586 = vmatpush3.bf16.xpose.msra.mxu1 %v3117_v14  ;;  %4601 = vmatprep.mubr.msk.bf16.mxu1 %vm5629_vm1, %v5628_v29  ;;  %v3132_v41 = vsel %vm1710_vm2, %v3108_v0, 0 }
 0xf50   : > { %4587 = vmatprep.subr.bf16.mxu1 %v5628_v29  ;;  %v3096_v34 = vpop.permute.xlu1 %3095 }
 0xf52   : > { %v3112_v46 = vpop.permute.xlu0 %3111 }
 0xf53   : > { %v3138_v48 = vsel %vm1710_vm2, %v3112_v46, 0 }
 0xf57   : > { %4588 = vmatpush3.bf16.xpose.msra.mxu1 %v3120_v20 }
 0xf58   : > { %4589 = vmatprep.subr.bf16.mxu1 %v5628_v29 }
 0xf5f   : > { %4590 = vmatpush3.bf16.xpose.msra.mxu1 %v3123_v23 }
 0xf60   : > { %4591 = vmatprep.subr.bf16.mxu1 %v5628_v29 }
 0xf67   : > { %4592 = vmatpush3.bf16.xpose.msra.mxu1 %v3126_v24 }
 0xf68   : > { %4593 = vmatprep.subr.bf16.mxu1 %v5628_v29 }
 0xf6f   : > { %4594 = vmatpush3.bf16.xpose.msra.mxu1 %v3129_v38 }
 0xf70   : > { %4595 = vmatprep.subr.bf16.mxu1 %v5628_v29 }
 0xf77   : > { %4596 = vmatpush3.bf16.xpose.msra.mxu1 %v3132_v41 }
 0xf78   : > { %4597 = vmatprep.subr.bf16.mxu1 %v5628_v29 }
 0xf7f   : > { %4598 = vmatpush3.bf16.xpose.msra.mxu1 %v3135_v45 }
 0xf80   : > { %4599 = vmatprep.subr.bf16.mxu1 %v5628_v29 }
 0xf87   : > { %4600 = vmatpush3.bf16.xpose.msra.mxu1 %v3138_v48 }
 0xf88   : > { %4645 = vmatprep.subr.bf16.mxu1 %v5628_v29 }
 0xf8e   : > { %4602 = vmatmul.mubr.msk.bf16.vlgmr.msra.gmra.mrb[48].mxu1 %vm1710_vm2, %v3096_v34 }
 0xf8f   : > { %4661 = vmatprep.mubr.msk.bf16.mxu1 %vm5629_vm1, %v5628_v29 }
0x1021   : > { %v6617_v39 = vpop.f32.mrb[44].mxu1 }
0x1022   : > { %v4583_v43 = vpop.f32.mrb[45].mxu1 }
0x1023   : > { %v6619_v52 = vpop.f32.mrb[46].mxu1 }
0x1024   : > { %v4949_v53 = vpack.i.bf16 %v6619_v52, %v6617_v39  ;;  %v4584_v57 = vpop.f32.mrb[47].mxu1 }
0x1061   : > { %v3174_v58 = vpop.f32.mrb[48].mxu1 }
0x1062   : > { %v3181_v8 = vmul.f32 0.35355338, %v3174_v58  ;;  %v4603_v10 = vpop.f32.mrb[49].mxu1 }
0x1063   : > { %v3177_v26 = vpop.f32.mrb[50].mxu1 }
0x1064   : > { %v3182_v28 = vmul.f32 0.35355338, %v3177_v26  ;;  %v4604_v1 = vpop.f32.mrb[51].mxu1  ;;  %v3183_v5 = vadd.f32 %v6465_v44, %v3181_v8 }
0x1066   : > { %3185 = vmax.xlane.f32.xlu0 %v3183_v5  ;;  %v3184_v49 = vadd.f32 %v6465_v44, %v3182_v28 }
0x1068   : > { %3187 = vmax.xlane.f32.xlu1 %v3184_v49 }
0x1079   : > { %3206 = vrot.lane.b32.xlu1 %v6475_v62, %s6938_s2 }
0x107c   : > { %3204 = vrot.lane.b32.xlu0 %v6477_v63, %s6938_s2 }
0x107d   : > { %3210 = vrot.lane.b32.xlu1 %v6482_v19, %s6938_s2 }
0x1080   : > { %3208 = vrot.lane.b32.xlu0 %v6485_v18, %s6938_s2 }
0x1081   : > { %3214 = vrot.lane.b32.xlu1 %v6490_v32, %s6938_s2 }
0x1084   : > { %3212 = vrot.lane.b32.xlu0 %v6493_v36, %s6938_s2 }
0x1085   : > { %3218 = vrot.lane.b32.xlu1 %v6498_v35, %s6938_s2 }
0x1088   : > { %3216 = vrot.lane.b32.xlu0 %v6501_v4, %s6938_s2  ;;  %s6941_s2 = smov 8  }
0x10f3   : > { %v3186_v50 = vpop.xlane.xlu0 %3185 }
0x10f4   : > { %v3189_v51 = vsub.f32 %v3183_v5, %v3186_v50 }
0x10f5   : > { %v3188_v54 = vpop.xlane.xlu1 %3187 }
0x10f6   : > { %v3191_v55 = vmul.f32 1.442695, %v3189_v51  ;;  %v3190_v56 = vsub.f32 %v3184_v49, %v3188_v54 }
0x10f7   : > { %v3205_v59 = vpop.permute.xlu0 %3204 }
0x10f8   : > { %5046 = vpow2.f32 %v3191_v55  ;;  %v3193_v2 = vmul.f32 1.442695, %v3190_v56  ;;  %4606 = vmatpush3.bf16.msra.mxu0 %v3205_v59 }
0x10f9   : > { %4607 = vmatprep.subr.bf16.mxu0 %v5628_v29  ;;  %v3207_v3 = vpop.permute.xlu1 %3206 }
0x10fa   : > { %5048 = vpow2.f32 %v3193_v2 }
0x10fb   : > { %v3209_v9 = vpop.permute.xlu0 %3208 }
0x10fc   : > { %4608 = vmatpush3.bf16.msra.mxu0 %v3207_v3 }
0x10fd   : > { %4609 = vmatprep.subr.bf16.mxu0 %v5628_v29  ;;  %v3211_v12 = vpop.permute.xlu1 %3210 }
0x10ff   : > { %v3213_v14 = vpop.permute.xlu0 %3212 }
0x1100   : > { %4610 = vmatpush3.bf16.msra.mxu0 %v3209_v9 }
0x1101   : > { %4611 = vmatprep.subr.bf16.mxu0 %v5628_v29  ;;  %v3215_v16 = vpop.permute.xlu1 %3214 }
0x1102   : > { %v5047_v11 = vpop.eup %5046 }
0x1103   : > { %3195 = vadd.xlane.f32.xlu0 %v5047_v11  ;;  %v3217_v20 = vpop.permute.xlu0 %3216 }
0x1104   : > { %v5049_v13 = vpop.eup %5048  ;;  %4612 = vmatpush3.bf16.msra.mxu0 %v3211_v12 }
0x1105   : > { %3197 = vadd.xlane.f32.xlu1 %v5049_v13  ;;  %4613 = vmatprep.subr.bf16.mxu0 %v5628_v29  ;;  %v3219_v21 = vpop.permute.xlu1 %3218 }
0x1108   : > { %4614 = vmatpush3.bf16.msra.mxu0 %v3213_v14 }
0x1109   : > { %4615 = vmatprep.subr.bf16.mxu0 %v5628_v29 }
0x110c   : > { %4616 = vmatpush3.bf16.msra.mxu0 %v3215_v16 }
0x110d   : > { %4617 = vmatprep.subr.bf16.mxu0 %v5628_v29 }
0x1110   : > { %4618 = vmatpush3.bf16.msra.mxu0 %v3217_v20 }
0x1111   : > { %4619 = vmatprep.subr.bf16.mxu0 %v5628_v29 }
0x1114   : > { %4620 = vmatpush3.bf16.msra.mxu0 %v3219_v21 }
0x1115   : > { %4625 = vmatprep.subr.bf16.mxu0 %v5628_v29 }
0x1116   : > { %3273 = vrot.lane.b32.xlu1 %v6371_v60, %s6939_s0 }
0x1119   : > { %3271 = vrot.lane.b32.xlu0 %v6373_v61, %s6939_s0 }
0x111a   : > { %3277 = vrot.lane.b32.xlu1 %v6382_v15, %s6939_s0 }
0x111d   : > { %3275 = vrot.lane.b32.xlu0 %v6386_v17, %s6939_s0 }
0x111e   : > { %3281 = vrot.lane.b32.xlu1 %v6393_v33, %s6939_s0 }
0x1121   : > { %3279 = vrot.lane.b32.xlu0 %v6397_v37, %s6939_s0 }
0x1122   : > { %3285 = vrot.lane.b32.xlu1 %v6418_v22, %s6939_s0 }
0x1125   : > { %3283 = vrot.lane.b32.xlu0 %v6420_v6, %s6939_s0 }
0x1129   : > { %3269 = vrot.lane.b32.xlu0 %v6428_v40, %s6939_s0 }
0x1190   : > { %v3196_v60 = vpop.xlane.xlu0 %3195 }
0x1191   : > { %5050 = vrcp.f32 %v3196_v60 }
0x1192   : > { %v3198_v61 = vpop.xlane.xlu1 %3197 }
0x1193   : > { %5052 = vrcp.f32 %v3198_v61 }
0x1194   : > { %v3272_v7 = vpop.permute.xlu0 %3271 }
0x1195   : > { %v3291_v37 = vsel %vm1710_vm2, %v3272_v7, 0 }
0x1196   : > { %v3274_v22 = vpop.permute.xlu1 %3273 }
0x1197   : > { %v3294_v6 = vsel %vm1710_vm2, %v3274_v22, 0 }
0x1198   : > { %v3276_v40 = vpop.permute.xlu0 %3275 }
0x1199   : > { %v3297_v47 = vsel %vm1710_vm2, %v3276_v40, 0 }
0x119a   : > { %v3278_v38 = vpop.permute.xlu1 %3277 }
0x119b   : > { %v5051_v15 = vpop.eup %5050  ;;  %v3300_v0 = vsel %vm1710_vm2, %v3278_v38, 0 }
0x119c   : > { %v3201_v23 = vmul.f32 %v5051_v15, %v5047_v11  ;;  %v3280_v41 = vpop.permute.xlu0 %3279 }
0x119d   : > { %v5053_v17 = vpop.eup %5052  ;;  %v3303_v42 = vsel %vm1710_vm2, %v3280_v41, 0 }
0x119e   : > { %v3202_v33 = vmul.f32 %v5053_v17, %v5049_v13  ;;  %v3282_v45 = vpop.permute.xlu1 %3281 }
0x119f   : > { %v3306_v46 = vsel %vm1710_vm2, %v3282_v45, 0 }
0x11a0   : > { %v3203_v24 = vpack.c.bf16 %v3202_v33, %v3201_v23  ;;  %v3284_v48 = vpop.permute.xlu0 %3283 }
0x11a1   : > { %v3309_v34 = vsel %vm1710_vm2, %v3284_v48, 0 }
0x11a2   : > { %4622 = vmatmul.mubr.bf16.vlgmr.msra.gmra.mrb[52].mxu0 %v3203_v24  ;;  %v3286_v43 = vpop.permute.xlu1 %3285 }
0x11a3   : > { %4626 = vmatpush3.bf16.xpose.msra.mxu0 %v3291_v37  ;;  %4641 = vmatprep.mubr.msk.bf16.mxu0 %vm5629_vm1, %v5628_v29  ;;  %v3312_v57 = vsel %vm1710_vm2, %v3286_v43, 0 }
0x11a4   : > { %4627 = vmatprep.subr.bf16.mxu0 %v5628_v29  ;;  %v3270_v58 = vpop.permute.xlu0 %3269 }
0x11ab   : > { %4628 = vmatpush3.bf16.xpose.msra.mxu0 %v3294_v6 }
0x11ac   : > { %4629 = vmatprep.subr.bf16.mxu0 %v5628_v29 }
0x11b3   : > { %4630 = vmatpush3.bf16.xpose.msra.mxu0 %v3297_v47 }
0x11b4   : > { %4631 = vmatprep.subr.bf16.mxu0 %v5628_v29 }
0x11bb   : > { %4632 = vmatpush3.bf16.xpose.msra.mxu0 %v3300_v0 }
0x11bc   : > { %4633 = vmatprep.subr.bf16.mxu0 %v5628_v29 }
0x11c3   : > { %4634 = vmatpush3.bf16.xpose.msra.mxu0 %v3303_v42 }
0x11c4   : > { %4635 = vmatprep.subr.bf16.mxu0 %v5628_v29 }
0x11cb   : > { %4636 = vmatpush3.bf16.xpose.msra.mxu0 %v3306_v46 }
0x11cc   : > { %4637 = vmatprep.subr.bf16.mxu0 %v5628_v29 }
0x11d3   : > { %4638 = vmatpush3.bf16.xpose.msra.mxu0 %v3309_v34 }
0x11d4   : > { %4639 = vmatprep.subr.bf16.mxu0 %v5628_v29 }
0x11db   : > { %4640 = vmatpush3.bf16.xpose.msra.mxu0 %v3312_v57 }
0x11dc   : > { %4673 = vmatprep.subr.bf16.mxu0 %v5628_v29 }
0x11e2   : > { %4642 = vmatmul.mubr.msk.bf16.vlgmr.msra.gmra.mrb[56].mxu0 %vm1710_vm2, %v3270_v58 }
0x11e3   : > { %4677 = vmatprep.mubr.msk.bf16.mxu0 %vm5629_vm1, %v5628_v29 }
0x1275   : > { %v3262_v8 = vpop.f32.mrb[52].mxu0 }
0x1276   : > { %v4623_v10 = vpop.f32.mrb[53].mxu0 }
0x1277   : > { %v3265_v26 = vpop.f32.mrb[54].mxu0 }
0x1278   : > { %v4954_v28 = vpack.i.bf16 %v3265_v26, %v3262_v8  ;;  %v4624_v1 = vpop.f32.mrb[55].mxu0 }
0x12b5   : > { %v3348_v5 = vpop.f32.mrb[56].mxu0 }
0x12b6   : > { %v3355_v49 = vmul.f32 0.35355338, %v3348_v5  ;;  %v4643_v50 = vpop.f32.mrb[57].mxu0 }
0x12b7   : > { %v3351_v51 = vpop.f32.mrb[58].mxu0 }
0x12b8   : > { %v3356_v54 = vmul.f32 0.35355338, %v3351_v51  ;;  %v4644_v55 = vpop.f32.mrb[59].mxu0  ;;  %v3357_v56 = vadd.f32 %v6465_v44, %v3355_v49 }
0x12ba   : > { %3359 = vmax.xlane.f32.xlu1 %v3357_v56  ;;  %v3358_v59 = vadd.f32 %v6465_v44, %v3356_v54 }
0x12bc   : > { %3361 = vmax.xlane.f32.xlu0 %v3358_v59 }
0x12cb   : > { %3380 = vrot.lane.b32.xlu1 %v6475_v62, %s6939_s0 }
0x12cf   : > { %3386 = vrot.lane.b32.xlu1 %v6493_v36, %s6939_s0 }
0x12d2   : > { %3378 = vrot.lane.b32.xlu0 %v6477_v63, %s6939_s0 }
0x12d6   : > { %3382 = vrot.lane.b32.xlu0 %v6485_v18, %s6939_s0 }
0x12da   : > { %3384 = vrot.lane.b32.xlu0 %v6482_v19, %s6939_s0 }
0x12de   : > { %3388 = vrot.lane.b32.xlu0 %v6490_v32, %s6939_s0 }
0x12e2   : > { %3392 = vrot.lane.b32.xlu0 %v6498_v35, %s6939_s0 }
0x12e6   : > { %4955 = vrot.lane.b32.xlu0 %v4954_v28, %s6940_s28  ;;  %s6942_s28 = sld [smem:[#allocation55_spill]] }
0x12ec   : > { %s6943_s3 = smov %s6942_s28  ;;  %v4978_v52 = vld [vmem:[%s6942_s28] sm:$0xff]   ;;  %s6945_s28 = sld [smem:[#allocation59_spill]] }
0x1347   : > { %v3360_v44 = vpop.xlane.xlu1 %3359 }
0x1348   : > { %v3363_v62 = vsub.f32 %v3357_v56, %v3360_v44 }
0x1349   : > { %v3362_v36 = vpop.xlane.xlu0 %3361 }
0x134a   : > { %v3365_v2 = vmul.f32 1.442695, %v3363_v62  ;;  %v3364_v3 = vsub.f32 %v3358_v59, %v3362_v36 }
0x134b   : > { %v3381_v19 = vpop.permute.xlu1 %3380 }
0x134c   : > { %5054 = vpow2.f32 %v3365_v2  ;;  %v3367_v63 = vmul.f32 1.442695, %v3364_v3  ;;  %v4980_v3 = vld [vmem:[%s6945_s28] sm:$0xff]  }
0x134d   : > { %v3379_v9 = vpop.permute.xlu0 %3378  ;;  %4674 = vmatpush3.bf16.msra.mxu0 %v4980_v3 }
0x134e   : > { %4646 = vmatpush3.bf16.msra.mxu1 %v3379_v9  ;;  %5056 = vpow2.f32 %v3367_v63  ;;  %4675 = vmatprep.subr.bf16.mxu0 %v5628_v29 }
0x134f   : > { %4647 = vmatprep.subr.bf16.mxu1 %v5628_v29  ;;  %v3387_v12 = vpop.permute.xlu1 %3386 }
0x1351   : > { %v3383_v18 = vpop.permute.xlu0 %3382 }
0x1352   : > { %4648 = vmatpush3.bf16.msra.mxu1 %v3381_v19 }
0x1353   : > { %4649 = vmatprep.subr.bf16.mxu1 %v5628_v29 }
0x1355   : > { %v3385_v35 = vpop.permute.xlu0 %3384 }
0x1356   : > { %v5055_v32 = vpop.eup %5054  ;;  %4650 = vmatpush3.bf16.msra.mxu1 %v3383_v18 }
0x1357   : > { %3369 = vadd.xlane.f32.xlu1 %v5055_v32  ;;  %4651 = vmatprep.subr.bf16.mxu1 %v5628_v29 }
0x1358   : > { %v5057_v11 = vpop.eup %5056 }
0x1359   : > { %v3389_v13 = vpop.permute.xlu0 %3388 }
0x135a   : > { %4652 = vmatpush3.bf16.msra.mxu1 %v3385_v35 }
0x135b   : > { %3371 = vadd.xlane.f32.xlu1 %v5057_v11  ;;  %4653 = vmatprep.subr.bf16.mxu1 %v5628_v29 }
0x135d   : > { %v3393_v21 = vpop.permute.xlu0 %3392 }
0x135e   : > { %4654 = vmatpush3.bf16.msra.mxu1 %v3387_v12 }
0x135f   : > { %4655 = vmatprep.subr.bf16.mxu1 %v5628_v29 }
0x1361   : > { %v4956_v40 = vpop.permute.xlu0 %4955 }
0x1362   : > { %4656 = vmatpush3.bf16.msra.mxu1 %v3389_v13  ;;  %v4958_v0 = vunpack.i.h.bf16 %v4956_v40  ;;  %v4957_v41 = vunpack.i.l.bf16 %v4956_v40 }
0x1363   : > { %4657 = vmatprep.subr.bf16.mxu1 %v5628_v29 }
0x136c   : > { %3390 = vrot.lane.b32.xlu1 %v6501_v4, %s6939_s0  ;;  %s6944_s0 = smov 24  }
0x1370   : > { %4950 = vrot.lane.b32.xlu1 %v4949_v53, %s6941_s2  ;;  %v4979_v53 = vld [vmem:[%s6943_s3 + $0x8] sm:$0xff]   ;;  %s6946_s3 = smov %s6945_s28  ;;  %s6949_s28 = sld [smem:[#allocation62_spill]] }
0x1371   : > { %v4981_v63 = vld [vmem:[%s6946_s3 + $0x8] sm:$0xff]  }
0x1372   : > { %4676 = vmatpush3.bf16.msra.mxu0 %v4981_v63 }
0x1376   : > { %s6950_s3 = smov %s6949_s28  ;;  %s6771_s11 = scalar_lea.hbm %s6949_s28, %s4242_s6 }
0x13e4   : > { %v3370_v14 = vpop.xlane.xlu1 %3369 }
0x13e5   : > { %5058 = vrcp.f32 %v3370_v14  ;;  %v4220_v14 = vld [vmem:[#allocation16] ss:$0 sm:$0xff] }
0x13e8   : > { %v3372_v16 = vpop.xlane.xlu1 %3371 }
0x13e9   : > { %5060 = vrcp.f32 %v3372_v16 }
0x13ec   : > { %v3391_v20 = vpop.permute.xlu1 %3390 }
0x13ed   : > { %4658 = vmatpush3.bf16.msra.mxu1 %v3391_v20 }
0x13ee   : > { %4659 = vmatprep.subr.bf16.mxu1 %v5628_v29 }
0x13ef   : > { %v5059_v60 = vpop.eup %5058 }
0x13f0   : > { %v3375_v61 = vmul.f32 %v5059_v60, %v5055_v32  ;;  %v4951_v37 = vpop.permute.xlu1 %4950  ;;  %v4221_v60 = vld [vmem:[#allocation17] ss:$0 sm:$0xff] }
0x13f1   : > { %4660 = vmatpush3.bf16.msra.mxu1 %v3393_v21  ;;  %v4953_v22 = vunpack.i.h.bf16 %v4951_v37  ;;  %v4952_v6 = vunpack.i.l.bf16 %v4951_v37 }
0x13f2   : > { %4665 = vmatprep.subr.bf16.mxu1 %v5628_v29 }
0x13f3   : > { %v5061_v4 = vpop.eup %5060  ;;  %v3468_v47 = vsel %vm1710_vm2, %v6550_v30, %v4953_v22  ;;  %v3467_v38 = vsel %vm1710_vm2, %v6548_v25, %v4952_v6  ;;  %v4216_v25 = vld [vmem:[#allocation8] ss:$0 sm:$0xff] }
0x13f4   : > { %v3376_v15 = vmul.f32 %v5061_v4, %v5057_v11  ;;  %v3469_v48 = vsel %vm1768_vm3, %v3467_v38, %v4957_v41  ;;  %v3470_v34 = vsel %vm1768_vm3, %v3468_v47, %v4958_v0 }
0x13f6   : > { %v3377_v39 = vpack.c.bf16 %v3376_v15, %v3375_v61 }
0x13f8   : > { %4662 = vmatmul.mubr.bf16.vlgmr.msra.gmra.mrb[52].mxu1 %v3377_v39 }
0x13f9   : > { %4669 = vmatprep.mubr.msk.bf16.mxu1 %vm5629_vm1, %v5628_v29  ;;  %4666 = vmatpush3.bf16.msra.mxu1 %v4978_v52 }
0x13fa   : > { %4667 = vmatprep.subr.bf16.mxu1 %v5628_v29 }
0x13fd   : > { %4668 = vmatpush3.bf16.msra.mxu1 %v4979_v53 }
0x13fe   : > { %4681 = vmatprep.subr.bf16.mxu1 %v5628_v29 }
0x14cb   : > { %v3436_v17 = vpop.f32.mrb[52].mxu1 }
0x14cc   : > { %v4663_v23 = vpop.f32.mrb[53].mxu1 }
0x14cd   : > { %v3439_v33 = vpop.f32.mrb[54].mxu1 }
0x14ce   : > { %v4959_v7 = vpack.i.bf16 %v3439_v33, %v3436_v17  ;;  %v4664_v24 = vpop.f32.mrb[55].mxu1  ;;  %v4222_v33 = vld [vmem:[#allocation19] ss:$0 sm:$0xff] }
0x14d0   : > { %4960 = vrot.lane.b32.xlu1 %v4959_v7, %s6944_s0  ;;  %s6947_s0 = sld [smem:[#allocation60_spill]] }
0x14d6   : > { %s6948_s4 = smov %s6947_s0  ;;  %v4982_v52 = vld [vmem:[%s6947_s0] sm:$0xff]   ;;  %s1347_s0 = sand.u32 1, %s5560_s1  }
0x14d7   : > { %v4983_v53 = vld [vmem:[%s6948_s4 + $0x8] sm:$0xff]   ;;  %v4984_v17 = vld [vmem:[%s6948_s4 + $0x10] sm:$0xff]   ;;  %v4985_v23 = vld [vmem:[%s6948_s4 + $0x18] sm:$0xff]   ;;  %s4149_s4 = sshll.u32 %s1347_s0, 4  ;;  %s6777_s12 = scalar_lea.sflag [#allocation4], %s1347_s0 }
0x14d8   : > { %s1349_s8 = scalar_lea.vmem [#allocation25], %s4149_s4  ;;  %s5636_s4 = smov [#allocation25]  }
0x14d9   : > { %s3816_s9 = sshll.u32 %s1349_s8, 4  ;;  %s5470_s6 = sshll.u32 %s5636_s4, 4  ;;  %s6774_s9 = int_to_ptr.vmem [resolvable:$true] %s3816_s9  ;;  %s5471_s6 = int_to_ptr.vmem [resolvable:$false] %s5470_s6 }
0x14da   : > { %s5466_s13 = scalar_lea.vmem %s6774_s9, 256  ;;  %s5472_s7 = scalar_lea.vmem %s5471_s6, 512 }
0x14db   : > { %p5467_p1 = scmp.ne.s32.totalorder %s6774_s9, %s5466_s13  ;;  %p5473_p4 = scmp.lt.s32.totalorder %s6774_s9, %s5471_s6 }
0x14dc   : > { %p5474_p8 = scmp.lt.s32.totalorder %s5472_s7, %s5466_s13 }
0x14dd   : > { %p5468_p5 = pnand %p5467_p1, %p6952_p3 }
0x14de   : > { %p5475_p10 = por %p5474_p8, %p5473_p4 }
0x14df   : > { %p5469_p6 = pneg %p5468_p5 }
0x14e1   : > { %p5476_p11 = pnand %p5475_p10, %p5469_p6 }
0x1542   : > { %v4961_v42 = vpop.permute.xlu1 %4960 }
0x1543   : > { %v4963_v45 = vunpack.i.h.bf16 %v4961_v42  ;;  %v4962_v46 = vunpack.i.l.bf16 %v4961_v42 }
0x1545   : > { %v3471_v43 = vsel %vm2242_vm4, %v3469_v48, %v4962_v46  ;;  %v3472_v57 = vsel %vm2242_vm4, %v3470_v34, %v4963_v45 }
0x1546   : > { %v3473_v58 = vpack.c.bf16 %v3472_v57, %v3471_v43 }
0x1548   : > { %4670 = vmatmul.mubr.msk.bf16.vlgmr.msra.gmra.mrb[56].mxu1 %vm1425_vm0, %v3473_v58  ;;  %v4231_v58 = vld [vmem:[#allocation20] ss:$0 sm:$0xff] }
0x1549   : > { %4689 = vmatprep.mubr.msk.bf16.mxu1 %vm5629_vm1, %v5628_v29  ;;  %4682 = vmatpush3.bf16.msra.mxu1 %v4982_v52 }
0x154a   : > { %4683 = vmatprep.subr.bf16.mxu1 %v5628_v29 }
0x154d   : > { %4684 = vmatpush3.bf16.msra.mxu1 %v4983_v53 }
0x154e   : > { %4685 = vmatprep.subr.bf16.mxu1 %v5628_v29 }
0x1551   : > { %4686 = vmatpush3.bf16.msra.mxu1 %v4984_v17 }
0x1552   : > { %4687 = vmatprep.subr.bf16.mxu1 %v5628_v29 }
0x1555   : > { %4688 = vmatpush3.bf16.msra.mxu1 %v4985_v23 }
0x161b   : > { %v3534_v30 = vpop.f32.mrb[56].mxu1 }
0x161c   : > { %v3535_v8 = vadd.f32 %v4216_v25, %v3534_v30  ;;  %v4671_v10 = vpop.f32.mrb[57].mxu1 }
0x161d   : > { %v3537_v26 = vpop.f32.mrb[58].mxu1 }
0x161e   : > { %v6738_v28 = vadd.f32 %v3535_v8, %v6244_v27  ;;  %v3538_v1 = vadd.f32 %v4216_v25, %v3537_v26  ;;  %v4672_v5 = vpop.f32.mrb[59].mxu1 }
0x1620   : > { %v6741_v49 = vadd.f32 %v3538_v1, %v6247_v31  ;;  %v3545_v50 = vsel %vm1425_vm0, %v6738_v28, 0.0 }
0x1621   : > { %3546 = vadd.xlane.f32.xlu0 %v3545_v50 }
0x1622   : > { %v3548_v51 = vsel %vm1425_vm0, %v6741_v49, 0.0 }
0x1623   : > { %3549 = vadd.xlane.f32.xlu1 %v3548_v51 }
0x16ae   : > { %v3547_v54 = vpop.xlane.xlu0 %3546 }
0x16af   : > { %v3551_v55 = vmul.f32 0.03125, %v3547_v54 }
0x16b0   : > { %v3550_v56 = vpop.xlane.xlu1 %3549 }
0x16b1   : > { %v3553_v27 = vsub.f32 %v6738_v28, %v3551_v55  ;;  %v3552_v59 = vmul.f32 0.03125, %v3550_v56 }
0x16b3   : > { %v3554_v44 = vsub.f32 %v6741_v49, %v3552_v59  ;;  %v3555_v31 = vmul.f32 %v3553_v27, %v3553_v27 }
0x16b5   : > { %v3557_v62 = vsel %vm1425_vm0, %v3555_v31, 0.0  ;;  %v3556_v36 = vmul.f32 %v3554_v44, %v3554_v44 }
0x16b6   : > { %3558 = vadd.xlane.f32.xlu0 %v3557_v62 }
0x16b7   : > { %v3560_v2 = vsel %vm1425_vm0, %v3556_v36, 0.0 }
0x16ba   : > { %3561 = vadd.xlane.f32.xlu0 %v3560_v2 }
0x1743   : > { %v3559_v9 = vpop.xlane.xlu0 %3558 }
0x1744   : > { %v3563_v19 = vmul.f32 0.03125, %v3559_v9 }
0x1746   : > { %v3565_v18 = vadd.f32 1e-05, %v3563_v19 }
0x1747   : > { %v3562_v32 = vpop.xlane.xlu0 %3561 }
0x1748   : > { %5062 = vrsqrt.f32 %v3565_v18  ;;  %v3564_v35 = vmul.f32 0.03125, %v3562_v32  ;;  %v4232_v32 = vld [vmem:[#allocation22] ss:$0 sm:$0xff] }
0x174a   : > { %v3566_v11 = vadd.f32 1e-05, %v3564_v35 }
0x174c   : > { %5064 = vrsqrt.f32 %v3566_v11 }
0x1752   : > { %v5063_v12 = vpop.eup %5062 }
0x1753   : > { %v3569_v13 = vmul.f32 %v5063_v12, %v3553_v27  ;;  %v4233_v12 = vld [vmem:[#allocation23] ss:$0 sm:$0xff] }
0x1755   : > { %v3577_v20 = vmul.f32 %v4220_v14, %v3569_v13 }
0x1756   : > { %v5065_v16 = vpop.eup %5064 }
0x1757   : > { %v3570_v21 = vmul.f32 %v5065_v16, %v3554_v44  ;;  %v3585_v61 = vadd.f32 %v4221_v60, %v3577_v20 }
0x1759   : > { %v3578_v4 = vmul.f32 %v4220_v14, %v3570_v21 }
0x175b   : > { %v3586_v15 = vadd.f32 %v4221_v60, %v3578_v4 }
0x175d   : > { %v3587_v39 = vpack.c.bf16 %v3586_v15, %v3585_v61 }
0x175f   : > { %4678 = vmatmul.mubr.msk.bf16.vlgmr.msra.gmra.mrb[60].mxu0 %vm1425_vm0, %v3587_v39 }
0x1832   : > { %v3648_v7 = vpop.f32.mrb[60].mxu0 }
0x1833   : > { %v3649_v24 = vadd.f32 %v4222_v33, %v3648_v7  ;;  %v4679_v37 = vpop.f32.mrb[61].mxu0 }
0x1834   : > { %v3651_v22 = vpop.f32.mrb[62].mxu0 }
0x1835   : > { %v3657_v6 = vmul.f32 0.70710677, %v3649_v24  ;;  %v3652_v40 = vadd.f32 %v4222_v33, %v3651_v22  ;;  %v4680_v47 = vpop.f32.mrb[63].mxu0  ;;  %v3655_v45 = vmul.f32 0.5, %v3649_v24 }
0x1837   : > { %5066 = verf.f32 %v3657_v6  ;;  %v3658_v38 = vmul.f32 0.70710677, %v3652_v40  ;;  %v3656_v46 = vmul.f32 0.5, %v3652_v40 }
0x1839   : > { %5068 = verf.f32 %v3658_v38 }
0x1841   : > { %v5067_v0 = vpop.eup %5066 }
0x1842   : > { %v3661_v41 = vadd.f32 1.0, %v5067_v0 }
0x1843   : > { %v5069_v42 = vpop.eup %5068 }
0x1844   : > { %v3662_v48 = vadd.f32 1.0, %v5069_v42  ;;  %v3663_v29 = vmul.f32 %v3661_v41, %v3655_v45 }
0x1846   : > { %v3664_v34 = vmul.f32 %v3662_v48, %v3656_v46 }
0x1848   : > { %v3665_v43 = vpack.c.bf16 %v3664_v34, %v3663_v29 }
0x184a   : > { %4690 = vmatmul.mubr.msk.bf16.vlgmr.msra.gmra.mrb[60].mxu1 %vm3698_vm5, %v3665_v43 }
0x191d   : > { %v3736_v57 = vpop.f32.mrb[60].mxu1 }
0x191e   : > { %v3743_v25 = vadd.f32 %v3736_v57, %v6738_v28  ;;  %v4691_v30 = vpop.f32.mrb[61].mxu1 }
0x191f   : > { %v3739_v8 = vpop.f32.mrb[62].mxu1 }
0x1920   : > { %v3752_v10 = vadd.f32 %v4231_v58, %v3743_v25  ;;  %v3744_v26 = vadd.f32 %v3739_v8, %v6741_v49  ;;  %v4692_v1 = vpop.f32.mrb[63].mxu1 }
0x1922   : > { %v3753_v5 = vadd.f32 %v4231_v58, %v3744_v26  ;;  %v3756_v50 = vsel %vm1425_vm0, %v3752_v10, 0.0 }
0x1923   : > { %3757 = vadd.xlane.f32.xlu0 %v3756_v50 }
0x1924   : > { %v3759_v51 = vsel %vm1425_vm0, %v3753_v5, 0.0 }
0x1925   : > { %3760 = vadd.xlane.f32.xlu1 %v3759_v51 }
0x19b0   : > { %v3758_v54 = vpop.xlane.xlu0 %3757 }
0x19b1   : > { %v3762_v55 = vmul.f32 0.03125, %v3758_v54 }
0x19b2   : > { %v3761_v56 = vpop.xlane.xlu1 %3760 }
0x19b3   : > { %v3764_v27 = vsub.f32 %v3752_v10, %v3762_v55  ;;  %v3763_v59 = vmul.f32 0.03125, %v3761_v56 }
0x19b5   : > { %v3765_v28 = vsub.f32 %v3753_v5, %v3763_v59  ;;  %v3766_v44 = vmul.f32 %v3764_v27, %v3764_v27 }
0x19b7   : > { %v3768_v31 = vsel %vm1425_vm0, %v3766_v44, 0.0  ;;  %v3767_v62 = vmul.f32 %v3765_v28, %v3765_v28 }
0x19b8   : > { %3769 = vadd.xlane.f32.xlu0 %v3768_v31 }
0x19b9   : > { %v3771_v49 = vsel %vm1425_vm0, %v3767_v62, 0.0 }
0x19ba   : > { %3772 = vadd.xlane.f32.xlu1 %v3771_v49 }
0x1a45   : > { %v3770_v36 = vpop.xlane.xlu0 %3769 }
0x1a46   : > { %v3774_v2 = vmul.f32 0.03125, %v3770_v36 }
0x1a47   : > { %v3773_v3 = vpop.xlane.xlu1 %3772 }
0x1a48   : > { %v3776_v63 = vadd.f32 1e-05, %v3774_v2  ;;  %v3775_v9 = vmul.f32 0.03125, %v3773_v3 }
0x1a4a   : > { %5070 = vrsqrt.f32 %v3776_v63  ;;  %v3777_v19 = vadd.f32 1e-05, %v3775_v9 }
0x1a4c   : > { %5072 = vrsqrt.f32 %v3777_v19 }
0x1a54   : > { %v5071_v18 = vpop.eup %5070 }
0x1a55   : > { %v3780_v35 = vmul.f32 %v5071_v18, %v3764_v27 }
0x1a56   : > { %v5073_v11 = vpop.eup %5072 }
0x1a57   : > { %v3788_v13 = vmul.f32 %v4232_v32, %v3780_v35  ;;  %v3781_v14 = vmul.f32 %v5073_v11, %v3765_v28 }
0x1a59   : > { %v3796_v16 = vadd.f32 %v4233_v12, %v3788_v13  ;;  %v3789_v20 = vmul.f32 %v4232_v32, %v3781_v14 }
0x1a5b   : > { %v3797_v21 = vadd.f32 %v4233_v12, %v3789_v20  ;;  %3798 = vst.msk [vmem:[%s1349_s8] sm:$0xff] %vm1425_vm0, %v3796_v16 }
0x1a5d   : > { %3799 = vst.msk [vmem:[%s1349_s8 + $0x8] sm:$0xff] %vm1425_vm0, %v3797_v21 }
0x1a5e   : > { %5479 = shalt.err (!%p5476_p11)
}
0x1a5f   : > { %s5480_s8 = scalar_lea.hbm %s6771_s11, 256  ;;  %s5484_s28 = scalar_lea.hbm %s6950_s3, 512 }
0x1a60   : > { %p5481_p7 = scmp.ne.s32.totalorder %s6771_s11, %s5480_s8  ;;  %p5485_p0 = scmp.lt.u32.totalorder %s6771_s11, %s6950_s3 }
0x1a61   : > { %p5486_p2 = scmp.lt.u32.totalorder %s5484_s28, %s5480_s8  ;;  %p5488_p1 = scmp.lt.u32.totalorder %s5480_s8, %s6771_s11 }
0x1a62   : > { %p5482_p9 = pnand %p5481_p7, %p6952_p3 }
0x1a63   : > { %p5487_p13 = por %p5486_p2, %p5485_p0 }
0x1a64   : > { %p5483_p12 = pneg %p5482_p9 }
0x1a65   : > { %p5489_p5 = por %p5488_p1, %p5487_p13 }
0x1a67   : > { %p5490_p6 = pnand %p5489_p5, %p5483_p12 }
0x1a69   : > { %5493 = shalt.err (!%p5490_p6)
}
0x1a6a   : > { %s5637_s13 = smov 128  }
0x1a6b   : > { %4749 = dma.vmem_to_hbm [thread:$0]  (%p6952_p3), %s6774_s9, 256, %s6771_s11, %s6777_s12, %s5637_s13, %s5637_s13, %s6941_s2  }
0x1a6c PF: > { %s6953_s0 = sld [smem:[#allocation63_spill]]  ;;  %s6954_s4 = sld [smem:[#allocation68_spill]] }
0x1a6d   : > { %p4826_p4 = scmp.ge.s32.totalorder %s5576_s10, 2 }
0x1a72   : > { %s3831_s6 = sand.u32 1, %s6953_s0   ;;  %p6955_p8 = scmp.ne.s32.totalorder %s6954_s4, 0 }
0x1a73   : > { %s3832_s7 = scalar_lea.sflag [#allocation4], %s3831_s6 }
0x1a74   : > { %p4795_p10 = pnand %p4826_p4, %p6955_p8 }
0x1a76   : > { %5551 = dma.done.wait (!%p4795_p10), %s3832_s7, 256  }
0x1a77   : > { %5553 = vsyncadd (!%p4795_p10), %s3832_s7, 4294967040  ;;  %s94_s10 = sadd.s32 1, %s5576_s10   ;;  %s6956_s5 = sld [smem:[#allocation64_spill]] }
0x1a78   : > { %p91_p11 = scmp.ge.s32.totalorder %s94_s10, 4   ;;  %s6957_s2 = sld [smem:[#allocation69_spill]] }
0x1a79   : > { %s6958_s7 = sld [smem:[#allocation65_spill]]  ;;  %s6959_s0 = sld [smem:[#allocation66_spill]] }
0x1a7a   : > { %s6960_s28 = smov %s5560_s1  ;;  %93 = sbr.rel (!%p91_p11) target bundleno = 82 (0x52), region = 304 }
0x1a7d   : > { %s6961_s1 = smov %s6956_s5 }
0x1a81   :  { %3837 = vsyncpa [#allocation3], 1 }
0x1a82   :  { %3839 = vsyncpa [#allocation3 + $0x1], 1 }
0x1a83   :  { %3840 = vsyncpa [#allocation6], 1 }
0x1a84   :  { %3841 = vsyncpa [#allocation9], 1 }
0x1a85   :  { %3842 = vsyncpa [#allocation12], 1 }
0x1a86   :  { %3843 = vsyncpa [#allocation15], 1 }
0x1a87   :  { %3844 = vsyncpa [#allocation18], 1 }
0x1a88   :  { %3845 = vsyncpa [#allocation21], 1 }
0x1a89   :  { %3846 = vsyncpa [#allocation24], 1 }
0x1a8a   :  { %3847 = vsyncpa [#allocation4], 1 }
0x1a8b   :  { %3849 = vsyncpa [#allocation4 + $0x1], 1 }

// kernel: decoder_forward.2
= control target key start
LH: loop header
LB: loop body
LE: loop exit
PB: predicated region body
PF: predicated region fallthrough
CT: control target
= control target key end

     0   :  { %s4475_s6 = smov 1   ;;  %s4476_s10 = smov 2   ;;  %s5416_s0 = inlined_call_operand.smem [shape: u32[35], index: -1, kind: input, shape index: {}] }
   0x1   :  { %s4525_s5 = sld [smem:[%s5416_s0]]   ;;  %s4477_s14 = smov 3  }
   0x2   :  { %s4530_s9 = sld [smem:[%s5416_s0 + %s4475_s6]]   ;;  %s4478_s18 = smov 4  }
   0x3   :  { %s4535_s13 = sld [smem:[%s5416_s0 + %s4476_s10]]   ;;  %s4479_s22 = smov 5  }
   0x4   :  { %s4540_s17 = sld [smem:[%s5416_s0 + %s4477_s14]]   ;;  %s4480_s26 = smov 6  }
   0x5   :  { %s4545_s21 = sld [smem:[%s5416_s0 + %s4478_s18]]   ;;  %s4481_s30 = smov 7  }
   0x6   :  { %s4550_s25 = sld [smem:[%s5416_s0 + %s4479_s22]]   ;;  %s4482_s4 = smov 8  }
   0x7   :  { %s4555_s29 = sld [smem:[%s5416_s0 + %s4480_s26]]   ;;  %s4483_s10 = smov 9  }
   0x8   :  { %s4560_s3 = sld [smem:[%s5416_s0 + %s4481_s30]]   ;;  %s4484_s15 = smov 10  }
   0x9   :  { %5430 = sst [smem:[#allocation2_spill]] %s4535_s13  ;;  %s4485_s20 = smov 11  }
   0xa   :  { %s4565_s8 = sld [smem:[%s5416_s0 + %s4482_s4]]   ;;  %s4486_s26 = smov 12  }
   0xb   :  { %s4570_s14 = sld [smem:[%s5416_s0 + %s4483_s10]]   ;;  %s4487_s1 = smov 13  }
   0xc   :  { %5431 = sst [smem:[#allocation3_spill]] %s4550_s25  ;;  %s4488_s7 = smov 14  }
   0xd   :  { %5432 = sst [smem:[#allocation4_spill]] %s4555_s29  ;;  %s4490_s22 = smov 16  }
   0xe   :  { %s4575_s19 = sld [smem:[%s5416_s0 + %s4484_s15]]   ;;  %s4489_s15 = smov 15  }
   0xf   :  { %s4580_s24 = sld [smem:[%s5416_s0 + %s4485_s20]]   ;;  %s4491_s28 = smov 17  }
  0x10   :  { %s4585_s30 = sld [smem:[%s5416_s0 + %s4486_s26]]   ;;  %s4699_s16 = smov 0  }
  0x11   :  { %s4590_s6 = sld [smem:[%s5416_s0 + %s4487_s1]]   ;;  %s4701_s18 = smov 0  }
  0x12   :  { %s4595_s12 = sld [smem:[%s5416_s0 + %s4488_s7]]   ;;  %s4492_s7 = smov 18  }
  0x13   :  { %s4600_s20 = sld [smem:[%s5416_s0 + %s4489_s15]]   ;;  %s4493_s15 = smov 19  }
  0x14   :  { %s4605_s27 = sld [smem:[%s5416_s0 + %s4490_s22]]   ;;  %s4494_s22 = smov 20  }
  0x15   :  { %s4610_s4 = sld [smem:[%s5416_s0 + %s4491_s28]]   ;;  %s4495_s28 = smov 21  }
  0x16   :  { %s4615_s29 = sld [smem:[%s5416_s0 + %s4492_s7]]   ;;  %s4496_s7 = smov 22  }
  0x17   :  { %s4620_s25 = sld [smem:[%s5416_s0 + %s4493_s15]]   ;;  %s4497_s15 = smov 23  }
  0x19   :  { %5433 = sst [smem:[#allocation5_spill]] %s4600_s20 }
  0x1a   :  { %5434 = sst [smem:[#allocation6_spill]] %s4605_s27 }
  0x1b   :  { %5435 = sst [smem:[#allocation7_spill]] %s4610_s4 }
  0x1c   :  { %5436 = sst [smem:[#allocation8_spill]] %s4615_s29 }
  0x1d   :  { %5437 = sst [smem:[#allocation9_spill]] %s4620_s25 }
  0x1e   :  { %s4625_s27 = sld [smem:[%s5416_s0 + %s4494_s22]]   ;;  %s4498_s22 = smov 24  }
  0x1f   :  { %s4630_s4 = sld [smem:[%s5416_s0 + %s4495_s28]]   ;;  %s4499_s28 = smov 25  }
  0x20   :  { %s4635_s29 = sld [smem:[%s5416_s0 + %s4496_s7]]   ;;  %s4500_s7 = smov 26  }
  0x21   :  { %s4640_s25 = sld [smem:[%s5416_s0 + %s4497_s15]]   ;;  %s4501_s15 = smov 27  }
  0x24   :  { %5438 = sst [smem:[#allocation10_spill]] %s4625_s27 }
  0x25   :  { %5439 = sst [smem:[#allocation11_spill]] %s4630_s4 }
  0x26   :  { %5440 = sst [smem:[#allocation12_spill]] %s4635_s29 }
  0x27   :  { %5441 = sst [smem:[#allocation13_spill]] %s4640_s25 }
  0x28   :  { %s4645_s27 = sld [smem:[%s5416_s0 + %s4498_s22]]   ;;  %s4502_s22 = smov 28  }
  0x29   :  { %s4650_s4 = sld [smem:[%s5416_s0 + %s4499_s28]]   ;;  %s4503_s28 = smov 29  }
  0x2a   :  { %s4655_s29 = sld [smem:[%s5416_s0 + %s4500_s7]]   ;;  %s4504_s7 = smov 30  }
  0x2b   :  { %s4660_s25 = sld [smem:[%s5416_s0 + %s4501_s15]]   ;;  %s4505_s15 = smov 31  }
  0x2c   :  { %s4665_s13 = sld [smem:[%s5416_s0 + %s4502_s22]]   ;;  %s4506_s22 = smov 32  }
  0x2d   :  { %s4670_s20 = sld [smem:[%s5416_s0 + %s4503_s28]]   ;;  %s4507_s28 = smov 33  }
  0x30   :  { %5442 = sst [smem:[#allocation14_spill]] %s4655_s29 }
  0x31   :  { %5443 = sst [smem:[#allocation15_spill]] %s4660_s25 }
  0x32   :  { %5444 = sst [smem:[#allocation16_spill]] %s4665_s13 }
  0x33   :  { %5445 = sst [smem:[#allocation17_spill]] %s4670_s20 }
  0x34   :  { %s4675_s29 = sld [smem:[%s5416_s0 + %s4504_s7]]   ;;  %s4508_s7 = smov 34  }
  0x35   :  { %s4680_s25 = sld [smem:[%s5416_s0 + %s4505_s15]]   ;;  %s4697_s15 = smov 0  }
  0x36   :  { %s4685_s13 = sld [smem:[%s5416_s0 + %s4506_s22]]  }
  0x37   :  { %s4690_s20 = sld [smem:[%s5416_s0 + %s4507_s28]]  }
  0x3a   :  { %5446 = sst [smem:[#allocation18_spill]] %s4675_s29 }
  0x3b   :  { %s4695_s29 = sld [smem:[%s5416_s0 + %s4508_s7]]  }
  0x3c LB: > { %s91_s0 = sadd.s32 1, %s4469_s16  ;;  %p3708_p0 = scmp.ge.s32.totalorder %s4473_s18, 1  ;;  %s4473_s18 = sphi %s4701_s18, %s79_s18   ;;  %s4469_s16 = sphi %s4699_s16, %s5470_s16   ;;  %s4465_s15 = sphi %s4697_s15, %s5469_s15  }
  0x3d   : > { %p93_p1 = scmp.ge.s32.totalorder %s91_s0, 2  ;;  %p1007_p2 = scmp.lt.s32.totalorder %s4473_s18, 3 }
  0x3f   : > { %s5472_s0 = smov (%p93_p1, %s91_s0), 0  ;;  %p1008_p3 = pnand %p3708_p0, %p1007_p2 }
  0x40   : > { %p1119_p4 = scmp.lt.s32.totalorder (!%p1008_p3), %s4465_s15, 1  ;;  %vm1203_vm0 = vcmask (!%p1008_p3), 261120   ;;  %v4345_v28 = vld [vmem:[%s4575_s19] sm:$0xff] (!%p1008_p3)   ;;  %v4509_v29 = vmov (!%p1008_p3), 0.0   ;;  %v4347_v31 = vld [vmem:[%s4575_s19 + $0x8] sm:$0xff] (!%p1008_p3)   ;;  %vm4510_vm1 = vmmov (!%p1008_p3), 0  }
  0x41   : > { %1011 = sbr.rel (%p1008_p3) target bundleno = 6071 (0x17b7), region = 156  ;;  %3941 = vmatprep.subr.bf16.mxu1 (!%p1008_p3), %v4509_v29  ;;  %3933 = vmatprep.subr.bf16.mxu0 (!%p1008_p3), %v4509_v29  ;;  %v4346_v30 = vld [vmem:[%s4565_s8] sm:$0xff] (!%p1008_p3)   ;;  %v4348_v32 = vld [vmem:[%s4565_s8 + $0x8] sm:$0xff] (!%p1008_p3)   ;;  %vm1488_vm2 = vcmask (!%p1008_p3), 64512   ;;  %s4511_s28 = smov (!%p1008_p3), 120   ;;  %vm1546_vm3 = vcmask (!%p1008_p3), 130048  }
  0x42   : > { %3942 = vmatpush3.bf16.msra.mxu1 (!%p1008_p3), %v4345_v28  ;;  %3945 = vmatprep.mubr.msk.bf16.mxu1 (!%p1008_p3), %vm4510_vm1, %v4509_v29  ;;  %v3717_v46 = vld [vmem:[%s4645_s27] ss:$0 sm:$0xff] (!%p1008_p3)  ;;  %v1180_v58 = vld [vmem:[%s4540_s17 + $0x8] sm:$0xff] (!%p1008_p3)  ;;  %s5426_s1 = smov (!%p1008_p3), 104   ;;  %s5428_s2 = smov (!%p1008_p3), 112   ;;  %vm2020_vm4 = vcmask (!%p1008_p3), 195584  }
  0x43   : > { %3943 = vmatprep.subr.bf16.mxu1 (!%p1008_p3), %v4509_v29  ;;  %3934 = vmatpush3.bf16.msra.mxu0 (!%p1008_p3), %v4346_v30  ;;  %v3718_v50 = vld [vmem:[%s4650_s4] ss:$0 sm:$0xff] (!%p1008_p3)  ;;  %s5424_s7 = smov (!%p1008_p3), 8   ;;  %s5425_s10 = smov (!%p1008_p3), 16   ;;  %vm3476_vm5 = vcmask (!%p1008_p3), 523264  }
  0x44   : > { %3937 = vmatprep.mubr.msk.bf16.mxu0 (!%p1008_p3), %vm4510_vm1, %v4509_v29  ;;  %3935 = vmatprep.subr.bf16.mxu0 (!%p1008_p3), %v4509_v29  ;;  %v1179_v57 = vld [vmem:[%s4540_s17] sm:$0xff] (!%p1008_p3)  ;;  %s5423_s11 = smov (!%p1008_p3), 24  }
  0x46   : > { %3944 = vmatpush3.bf16.msra.mxu1 (!%p1008_p3), %v4347_v31  ;;  %v4349_v31 = vld [vmem:[%s4585_s30] sm:$0xff] (!%p1008_p3)  }
  0x47   : > { %3957 = vmatprep.subr.bf16.mxu1 (!%p1008_p3), %v4509_v29  ;;  %3936 = vmatpush3.bf16.msra.mxu0 (!%p1008_p3), %v4348_v32  ;;  %v4350_v32 = vld [vmem:[%s4585_s30 + $0x8] sm:$0xff] (!%p1008_p3)  }
  0x48   : > { %s5474_s15 = smov (!%p1119_p4, %s4465_s15), 1  ;;  %3949 = vmatprep.subr.bf16.mxu0 %v4509_v29 }
  0x49   : > { %s4718_s22 = sshll.u32 %s5474_s15, 4 }
  0x4a   : > { %s1123_s23 = scalar_lea.vmem %s4525_s5, %s4718_s22  ;;  %s1132_s26 = scalar_lea.vmem %s4530_s9, %s4718_s22 }
  0x4b   : > { %v4722_v0 = vld [vmem:[%s1123_s23] sm:$0xff]  ;;  %v4724_v1 = vld [vmem:[%s1123_s23 + $0x8] sm:$0xff]  ;;  %s5447_s23 = sld [smem:[#allocation5_spill]] }
  0x4c   : > { %v1204_v2 = vsel %vm1203_vm0, %v4722_v0, 0.0  ;;  %v4730_v3 = vld [vmem:[%s1132_s26] sm:$0xff]  ;;  %v1207_v4 = vsel %vm1203_vm0, %v4724_v1, 0.0  ;;  %v4734_v5 = vld [vmem:[%s1132_s26 + $0x8] sm:$0xff]  ;;  %s5448_s26 = sld [smem:[#allocation2_spill]] }
  0x4d   : > { %1205 = vadd.xlane.f32.xlu0 %v1204_v2  ;;  %v1249_v6 = vsel %vm1203_vm0, %v4730_v3, 0.0  ;;  %v1252_v7 = vsel %vm1203_vm0, %v4734_v5, 0.0 }
  0x4e   : > { %1250 = vadd.xlane.f32.xlu1 %v1249_v6  ;;  %v4767_v6 = vld [vmem:[%s4545_s21] sm:$0xff] }
  0x51   : > { %1208 = vadd.xlane.f32.xlu0 %v1207_v4 }
  0x52   : > { %1253 = vadd.xlane.f32.xlu1 %v1252_v7  ;;  %v4770_v7 = vld [vmem:[%s4545_s21 + $0x8] sm:$0xff] }
  0xda   : > { %v1206_v8 = vpop.xlane.xlu0 %1205 }
  0xdb   : > { %v1211_v9 = vmul.f32 0.03125, %v1206_v8  ;;  %v1251_v10 = vpop.xlane.xlu1 %1250 }
  0xdc   : > { %v1255_v12 = vmul.f32 0.03125, %v1251_v10 }
  0xdd   : > { %v1213_v11 = vsub.f32 %v4722_v0, %v1211_v9 }
  0xde   : > { %v1209_v13 = vpop.xlane.xlu0 %1208  ;;  %v1257_v14 = vsub.f32 %v4730_v3, %v1255_v12 }
  0xdf   : > { %v1212_v15 = vmul.f32 0.03125, %v1209_v13  ;;  %v1215_v16 = vmul.f32 %v1213_v11, %v1213_v11  ;;  %v1254_v17 = vpop.xlane.xlu1 %1253  ;;  %v3723_v13 = vld [vmem:[%s4580_s24] ss:$0 sm:$0xff] }
  0xe0   : > { %v1256_v19 = vmul.f32 0.03125, %v1254_v17  ;;  %v1259_v21 = vmul.f32 %v1257_v14, %v1257_v14 }
  0xe1   : > { %v1214_v18 = vsub.f32 %v4724_v1, %v1212_v15  ;;  %v1217_v20 = vsel %vm1203_vm0, %v1215_v16, 0.0 }
  0xe2   : > { %1218 = vadd.xlane.f32.xlu0 %v1217_v20  ;;  %v1258_v22 = vsub.f32 %v4734_v5, %v1256_v19  ;;  %v1261_v23 = vsel %vm1203_vm0, %v1259_v21, 0.0  ;;  %v3719_v20 = vld [vmem:[%s4570_s14] ss:$0 sm:$0xff] }
  0xe3   : > { %v1216_v24 = vmul.f32 %v1214_v18, %v1214_v18 }
  0xe4   : > { %v1260_v26 = vmul.f32 %v1258_v22, %v1258_v22 }
  0xe5   : > { %v1220_v25 = vsel %vm1203_vm0, %v1216_v24, 0.0 }
  0xe6   : > { %1262 = vadd.xlane.f32.xlu0 %v1261_v23  ;;  %1221 = vadd.xlane.f32.xlu1 %v1220_v25  ;;  %v1264_v27 = vsel %vm1203_vm0, %v1260_v26, 0.0 }
  0xea   : > { %1265 = vadd.xlane.f32.xlu1 %v1264_v27 }
 0x16f   : > { %v1219_v33 = vpop.xlane.xlu0 %1218 }
 0x170   : > { %v1223_v34 = vmul.f32 0.03125, %v1219_v33  ;;  %v1419_v33 = vpack.c.bf16 %v4724_v1, %v4722_v0 }
 0x172   : > { %v1225_v35 = vadd.f32 1e-05, %v1223_v34 }
 0x173   : > { %v1222_v36 = vpop.xlane.xlu1 %1221  ;;  %v1263_v37 = vpop.xlane.xlu0 %1262 }
 0x174   : > { %4367 = vrsqrt.f32 %v1225_v35  ;;  %v1224_v38 = vmul.f32 0.03125, %v1222_v36  ;;  %v1267_v39 = vmul.f32 0.03125, %v1263_v37 }
 0x176   : > { %v1226_v40 = vadd.f32 1e-05, %v1224_v38  ;;  %v1269_v41 = vadd.f32 1e-05, %v1267_v39 }
 0x177   : > { %v1266_v42 = vpop.xlane.xlu1 %1265 }
 0x178   : > { %4369 = vrsqrt.f32 %v1226_v40  ;;  %v1268_v43 = vmul.f32 0.03125, %v1266_v42  ;;  %v3732_v42 = vld [vmem:[%s4560_s3] ss:$0 sm:$0xff] }
 0x179   : > { %4371 = vrsqrt.f32 %v1269_v41 }
 0x17a   : > { %v1270_v44 = vadd.f32 1e-05, %v1268_v43 }
 0x17c   : > { %4373 = vrsqrt.f32 %v1270_v44 }
 0x17e   : > { %v4368_v45 = vpop.eup %4367 }
 0x17f   : > { %v1229_v47 = vmul.f32 %v4368_v45, %v1213_v11 }
 0x181   : > { %v1237_v48 = vmul.f32 %v3717_v46, %v1229_v47 }
 0x182   : > { %v4370_v49 = vpop.eup %4369 }
 0x183   : > { %v4372_v51 = vpop.eup %4371  ;;  %v1230_v52 = vmul.f32 %v4370_v49, %v1214_v18  ;;  %v1245_v55 = vadd.f32 %v3718_v50, %v1237_v48 }
 0x184   : > { %v1273_v53 = vmul.f32 %v4372_v51, %v1257_v14 }
 0x185   : > { %v1238_v54 = vmul.f32 %v3717_v46, %v1230_v52  ;;  %v1247_v62 = vadd.f32 %v1245_v55, %v1179_v57 }
 0x186   : > { %v4374_v56 = vpop.eup %4373  ;;  %v1275_v59 = vmul.f32 %v3717_v46, %v1273_v53 }
 0x187   : > { %v1274_v60 = vmul.f32 %v4374_v56, %v1258_v22  ;;  %v1246_v61 = vadd.f32 %v3718_v50, %v1238_v54 }
 0x188   : > { %v1277_v4 = vadd.f32 %v3718_v50, %v1275_v59 }
 0x189   : > { %v1248_v63 = vadd.f32 %v1246_v61, %v1180_v58  ;;  %v1276_v2 = vmul.f32 %v3717_v46, %v1274_v60 }
 0x18a   : > { %v1279_v10 = vadd.f32 %v1277_v4, %v4767_v6 }
 0x18b   : > { %v1350_v8 = vpack.c.bf16 %v1248_v63, %v1247_v62  ;;  %v1278_v9 = vadd.f32 %v3718_v50, %v1276_v2 }
 0x18d   : > { %3946 = vmatmul.mubr.msk.bf16.vlgmr.msra.gmra.mrb[0].mxu1 %vm1203_vm0, %v1350_v8  ;;  %v1280_v11 = vadd.f32 %v1278_v9, %v4770_v7 }
 0x18e   : > { %3959 = vmatprep.mubr.msk.bf16.mxu1 %vm4510_vm1, %v4509_v29 }
 0x18f   : > { %v1281_v12 = vpack.c.bf16 %v1280_v11, %v1279_v10 }
 0x191   : > { %3938 = vmatmul.mubr.msk.bf16.vlgmr.msra.gmra.mrb[0].mxu0 %vm1203_vm0, %v1281_v12 }
 0x192   : > { %3953 = vmatprep.mubr.msk.bf16.mxu0 %vm4510_vm1, %v4509_v29  ;;  %3950 = vmatpush3.bf16.msra.mxu0 %v4349_v31 }
 0x193   : > { %3951 = vmatprep.subr.bf16.mxu0 %v4509_v29 }
 0x196   : > { %3952 = vmatpush3.bf16.msra.mxu0 %v4350_v32 }
 0x197   : > { %3963 = vmatprep.subr.bf16.mxu0 %v4509_v29 }
 0x199   : > { %3954 = vmatmul.mubr.msk.bf16.vlgmr.msra.gmra.mrb[4].mxu0 %vm1203_vm0, %v1419_v33 }
 0x19a   : > { %3965 = vmatprep.mubr.msk.bf16.mxu0 %vm4510_vm1, %v4509_v29 }
 0x260   : > { %v1411_v14 = vpop.f32.mrb[0].mxu1 }
 0x261   : > { %v3947_v15 = vpop.f32.mrb[1].mxu1  ;;  %v1412_v17 = vadd.f32 %v3723_v13, %v1411_v14 }
 0x262   : > { %v1414_v16 = vpop.f32.mrb[2].mxu1 }
 0x263   : > { %v1415_v18 = vadd.f32 %v3723_v13, %v1414_v16  ;;  %v3948_v19 = vpop.f32.mrb[3].mxu1 }
 0x264   : > { %v1342_v21 = vpop.f32.mrb[0].mxu0 }
 0x265   : > { %v1418_v22 = vpack.c.bf16 %v1415_v18, %v1412_v17  ;;  %v3939_v23 = vpop.f32.mrb[1].mxu0  ;;  %v1343_v25 = vadd.f32 %v3719_v20, %v1342_v21 }
 0x266   : > { %v1345_v24 = vpop.f32.mrb[2].mxu0 }
 0x267   : > { %v1346_v26 = vadd.f32 %v3719_v20, %v1345_v24  ;;  %1618 = vrot.lane.b32.xlu0 %v1418_v22, %s4511_s28  ;;  %v3940_v27 = vpop.f32.mrb[3].mxu0  ;;  %v1493_v28 = vsel %vm1488_vm2, %v1418_v22, 0 }
 0x268   : > { %3958 = vmatpush3.bf16.xpose.msra.mxu1 %v1493_v28 }
 0x269   : > { %v1349_v30 = vpack.c.bf16 %v1346_v26, %v1343_v25  ;;  %3969 = vmatprep.subr.bf16.mxu1 %v4509_v29 }
 0x26b   : > { %1869 = vrot.lane.b32.xlu0 %v1418_v22, %s5426_s1  ;;  %1615 = vrot.lane.b32.xlu1 %v1349_v30, %s4511_s28 }
 0x26f   : > { %1744 = vrot.lane.b32.xlu1 %v1418_v22, %s5428_s2  ;;  %3960 = vmatmul.mubr.msk.bf16.vlgmr.msra.gmra.mrb[4].mxu1 %vm1488_vm2, %v1349_v30 }
 0x270   : > { %3971 = vmatprep.mubr.msk.bf16.mxu1 %vm4510_vm1, %v4509_v29 }
 0x273   : > { %1742 = vrot.lane.b32.xlu1 %v1349_v30, %s5428_s2 }
 0x277   : > { %1867 = vrot.lane.b32.xlu1 %v1349_v30, %s5426_s1 }
 0x2d9   : > { %v1619_v34 = vpop.permute.xlu0 %1618 }
 0x2da   : > { %v1624_v35 = vsel %vm1488_vm2, %v1619_v34, 0 }
 0x2db   : > { %3970 = vmatpush3.bf16.xpose.msra.mxu1 %v1624_v35  ;;  %v3727_v35 = vld [vmem:[%s4590_s6] ss:$0 sm:$0xff] }
 0x2dc   : > { %3981 = vmatprep.subr.bf16.mxu1 %v4509_v29 }
 0x2dd   : > { %v1616_v36 = vpop.permute.xlu1 %1615  ;;  %v1870_v0 = vpop.permute.xlu0 %1869 }
 0x2de   : > { %v1875_v39 = vsel %vm1488_vm2, %v1870_v0, 0 }
 0x2e1   : > { %v1745_v37 = vpop.permute.xlu1 %1744 }
 0x2e2   : > { %v1750_v38 = vsel %vm1488_vm2, %v1745_v37, 0  ;;  %3972 = vmatmul.mubr.msk.bf16.vlgmr.msra.gmra.mrb[8].mxu1 %vm1488_vm2, %v1616_v36  ;;  %v1480_v36 = vpop.f32.mrb[4].mxu0 }
 0x2e3   : > { %3982 = vmatpush3.bf16.xpose.msra.mxu1 %v1750_v38  ;;  %3983 = vmatprep.mubr.msk.bf16.mxu1 %vm4510_vm1, %v4509_v29  ;;  %v1481_v37 = vadd.f32 %v3727_v35, %v1480_v36  ;;  %v3955_v38 = vpop.f32.mrb[5].mxu0 }
 0x2e4   : > { %3993 = vmatprep.subr.bf16.mxu1 %v4509_v29  ;;  %v1483_v0 = vpop.f32.mrb[6].mxu0 }
 0x2e5   : > { %v1743_v1 = vpop.permute.xlu1 %1742 }
 0x2e9   : > { %v1868_v40 = vpop.permute.xlu1 %1867 }
 0x2ea   : > { %3984 = vmatmul.mubr.msk.bf16.vlgmr.msra.gmra.mrb[12].mxu1 %vm1488_vm2, %v1743_v1  ;;  %v1484_v1 = vadd.f32 %v3727_v35, %v1483_v0 }
 0x2eb   : > { %3994 = vmatpush3.bf16.xpose.msra.mxu1 %v1875_v39  ;;  %3995 = vmatprep.mubr.msk.bf16.mxu1 %vm4510_vm1, %v4509_v29  ;;  %v3956_v39 = vpop.f32.mrb[7].mxu0 }
 0x2ec   : > { %4005 = vmatprep.subr.bf16.mxu1 %v4509_v29 }
 0x2f2   : > { %3996 = vmatmul.mubr.msk.bf16.vlgmr.msra.gmra.mrb[16].mxu1 %vm1488_vm2, %v1868_v40  ;;  %v1487_v40 = vpack.c.bf16 %v1484_v1, %v1481_v37 }
 0x2f3   : > { %4009 = vmatprep.mubr.msk.bf16.mxu1 %vm4510_vm1, %v4509_v29 }
 0x2f4   : > { %3964 = vmatpush3.bf16.msra.mxu0 %v1487_v40 }
 0x2f5   : > { %3975 = vmatprep.subr.bf16.mxu0 %v4509_v29 }
 0x342   : > { %v1529_v41 = vpop.f32.mrb[4].mxu1 }
 0x343   : > { %v1536_v43 = vmul.f32 0.35355338, %v1529_v41  ;;  %v3961_v44 = vpop.f32.mrb[5].mxu1 }
 0x344   : > { %v1532_v45 = vpop.f32.mrb[6].mxu1 }
 0x345   : > { %v1537_v46 = vmul.f32 0.35355338, %v1532_v45  ;;  %v3962_v47 = vpop.f32.mrb[7].mxu1  ;;  %v1544_v48 = vadd.f32 %v3732_v42, %v1536_v43 }
 0x347   : > { %v1547_v49 = vsel %vm1546_vm3, %v1544_v48, -inf  ;;  %v1545_v50 = vadd.f32 %v3732_v42, %v1537_v46 }
 0x348   : > { %1548 = vmax.xlane.f32.xlu0 %v1547_v49 }
 0x349   : > { %v1550_v51 = vsel %vm1546_vm3, %v1545_v50, -inf }
 0x34a   : > { %1551 = vmax.xlane.f32.xlu1 %v1550_v51 }
 0x3b5   : > { %v1660_v52 = vpop.f32.mrb[8].mxu1 }
 0x3b6   : > { %v1667_v53 = vmul.f32 0.35355338, %v1660_v52  ;;  %v3973_v54 = vpop.f32.mrb[9].mxu1 }
 0x3b7   : > { %v1663_v55 = vpop.f32.mrb[10].mxu1 }
 0x3b8   : > { %v1668_v56 = vmul.f32 0.35355338, %v1663_v55  ;;  %v3974_v57 = vpop.f32.mrb[11].mxu1  ;;  %v1669_v58 = vadd.f32 %v3732_v42, %v1667_v53 }
 0x3ba   : > { %v1671_v59 = vsel %vm1546_vm3, %v1669_v58, -inf  ;;  %v1670_v60 = vadd.f32 %v3732_v42, %v1668_v56 }
 0x3bb   : > { %1672 = vmax.xlane.f32.xlu0 %v1671_v59 }
 0x3bc   : > { %v1674_v2 = vsel %vm1546_vm3, %v1670_v60, -inf }
 0x3bd   : > { %v1786_v61 = vpop.f32.mrb[12].mxu1 }
 0x3be   : > { %v1793_v62 = vmul.f32 0.35355338, %v1786_v61  ;;  %v3985_v63 = vpop.f32.mrb[13].mxu1 }
 0x3bf   : > { %1675 = vmax.xlane.f32.xlu0 %v1674_v2  ;;  %v1789_v4 = vpop.f32.mrb[14].mxu1 }
 0x3c0   : > { %v1794_v8 = vmul.f32 0.35355338, %v1789_v4  ;;  %v3986_v9 = vpop.f32.mrb[15].mxu1  ;;  %v1795_v10 = vadd.f32 %v3732_v42, %v1793_v62 }
 0x3c2   : > { %v1797_v11 = vsel %vm1546_vm3, %v1795_v10, -inf  ;;  %v1796_v12 = vadd.f32 %v3732_v42, %v1794_v8 }
 0x3c3   : > { %1798 = vmax.xlane.f32.xlu0 %v1797_v11 }
 0x3c4   : > { %v1800_v13 = vsel %vm1546_vm3, %v1796_v12, -inf }
 0x3c5   : > { %1801 = vmax.xlane.f32.xlu1 %v1800_v13  ;;  %v1911_v14 = vpop.f32.mrb[16].mxu1 }
 0x3c6   : > { %v1918_v15 = vmul.f32 0.35355338, %v1911_v14  ;;  %v3997_v16 = vpop.f32.mrb[17].mxu1 }
 0x3c7   : > { %v1914_v17 = vpop.f32.mrb[18].mxu1 }
 0x3c8   : > { %v1919_v18 = vmul.f32 0.35355338, %v1914_v17  ;;  %v3998_v19 = vpop.f32.mrb[19].mxu1  ;;  %v1920_v20 = vadd.f32 %v3732_v42, %v1918_v15 }
 0x3ca   : > { %v1922_v21 = vsel %vm1546_vm3, %v1920_v20, -inf  ;;  %v4825_v22 = vadd.f32 %v3732_v42, %v1919_v18 }
 0x3cb   : > { %1923 = vmax.xlane.f32.xlu0 %v1922_v21 }
 0x3cc   : > { %v1925_v23 = vsel %vm1546_vm3, %v4825_v22, -inf }
 0x3cd   : > { %1926 = vmax.xlane.f32.xlu1 %v1925_v23 }
 0x3d5   : > { %v1549_v24 = vpop.xlane.xlu0 %1548 }
 0x3d6   : > { %v1553_v25 = vsub.f32 %v1544_v48, %v1549_v24 }
 0x3d7   : > { %v1552_v26 = vpop.xlane.xlu1 %1551 }
 0x3d8   : > { %v1555_v27 = vmul.f32 1.442695, %v1553_v25  ;;  %v1554_v28 = vsub.f32 %v1545_v50, %v1552_v26 }
 0x3da   : > { %4375 = vpow2.f32 %v1555_v27  ;;  %v1557_v30 = vmul.f32 1.442695, %v1554_v28 }
 0x3dc   : > { %4377 = vpow2.f32 %v1557_v30 }
 0x3e4   : > { %v4376_v31 = vpop.eup %4375 }
 0x3e5   : > { %v1559_v32 = vsel %vm1546_vm3, %v4376_v31, 0.0 }
 0x3e6   : > { %v4378_v33 = vpop.eup %4377  ;;  %1560 = vadd.xlane.f32.xlu0 %v1559_v32 }
 0x3e7   : > { %v1562_v34 = vsel %vm1546_vm3, %v4378_v33, 0.0 }
 0x3e8   : > { %1563 = vadd.xlane.f32.xlu1 %v1562_v34 }
 0x448   : > { %v1673_v41 = vpop.xlane.xlu0 %1672 }
 0x449   : > { %v1677_v42 = vsub.f32 %v1669_v58, %v1673_v41 }
 0x44b   : > { %v1679_v43 = vmul.f32 1.442695, %v1677_v42 }
 0x44c   : > { %v1676_v44 = vpop.xlane.xlu0 %1675 }
 0x44d   : > { %4379 = vpow2.f32 %v1679_v43  ;;  %v1678_v45 = vsub.f32 %v1670_v60, %v1676_v44 }
 0x44f   : > { %v1681_v46 = vmul.f32 1.442695, %v1678_v45 }
 0x450   : > { %v1799_v47 = vpop.xlane.xlu0 %1798 }
 0x451   : > { %4381 = vpow2.f32 %v1681_v46  ;;  %v1803_v48 = vsub.f32 %v1795_v10, %v1799_v47 }
 0x452   : > { %v1802_v49 = vpop.xlane.xlu1 %1801 }
 0x453   : > { %v1805_v50 = vmul.f32 1.442695, %v1803_v48  ;;  %v1804_v51 = vsub.f32 %v1796_v12, %v1802_v49 }
 0x455   : > { %4383 = vpow2.f32 %v1805_v50  ;;  %v1807_v52 = vmul.f32 1.442695, %v1804_v51  ;;  %v4351_v50 = vld [vmem:[%s4595_s12] sm:$0xff]  }
 0x456   : > { %4006 = vmatpush3.bf16.msra.mxu1 %v4351_v50 }
 0x457   : > { %v4380_v53 = vpop.eup %4379  ;;  %4385 = vpow2.f32 %v1807_v52  ;;  %4007 = vmatprep.subr.bf16.mxu1 %v4509_v29 }
 0x458   : > { %v1924_v54 = vpop.xlane.xlu0 %1923  ;;  %v1683_v55 = vsel %vm1546_vm3, %v4380_v53, 0.0 }
 0x459   : > { %v1928_v56 = vsub.f32 %v1920_v20, %v1924_v54  ;;  %1684 = vadd.xlane.f32.xlu0 %v1683_v55 }
 0x45a   : > { %v1927_v8 = vpop.xlane.xlu1 %1926 }
 0x45b   : > { %v4382_v57 = vpop.eup %4381  ;;  %v1930_v58 = vmul.f32 1.442695, %v1928_v56  ;;  %v1929_v15 = vsub.f32 %v4825_v22, %v1927_v8 }
 0x45c   : > { %v1686_v59 = vsel %vm1546_vm3, %v4382_v57, 0.0 }
 0x45d   : > { %4387 = vpow2.f32 %v1930_v58  ;;  %1687 = vadd.xlane.f32.xlu1 %v1686_v59  ;;  %v1932_v17 = vmul.f32 1.442695, %v1929_v15  ;;  %v4352_v58 = vld [vmem:[%s4595_s12 + $0x8] sm:$0xff]  }
 0x45e   : > { %4008 = vmatpush3.bf16.msra.mxu1 %v4352_v58 }
 0x45f   : > { %v4384_v60 = vpop.eup %4383 }
 0x460   : > { %v1809_v61 = vsel %vm1546_vm3, %v4384_v60, 0.0 }
 0x461   : > { %v4386_v62 = vpop.eup %4385  ;;  %1810 = vadd.xlane.f32.xlu0 %v1809_v61 }
 0x462   : > { %v1812_v63 = vsel %vm1546_vm3, %v4386_v62, 0.0 }
 0x463   : > { %1813 = vadd.xlane.f32.xlu1 %v1812_v63 }
 0x467   : > { %v4388_v2 = vpop.eup %4387 }
 0x468   : > { %v1934_v4 = vsel %vm1546_vm3, %v4388_v2, 0.0 }
 0x469   : > { %1935 = vadd.xlane.f32.xlu0 %v1934_v4 }
 0x473   : > { %v1561_v9 = vpop.xlane.xlu0 %1560 }
 0x474   : > { %4389 = vrcp.f32 %v1561_v9  ;;  %1820 = vrot.lane.b32.xlu1 %v1487_v40, %s5428_s2 }
 0x475   : > { %v1564_v10 = vpop.xlane.xlu1 %1563 }
 0x476   : > { %4391 = vrcp.f32 %v1564_v10 }
 0x477   : > { %4393 = vpow2.f32 %v1932_v17 }
 0x47e   : > { %v4390_v11 = vpop.eup %4389 }
 0x47f   : > { %1695 = vrot.lane.b32.xlu0 %v1487_v40, %s4511_s28  ;;  %v1567_v13 = vmul.f32 %v4390_v11, %v4376_v31 }
 0x480   : > { %v4392_v12 = vpop.eup %4391 }
 0x481   : > { %v1568_v14 = vmul.f32 %v4392_v12, %v4378_v33  ;;  %v4394_v18 = vpop.eup %4393 }
 0x482   : > { %v1937_v19 = vsel %vm1546_vm3, %v4394_v18, 0.0 }
 0x483   : > { %v1569_v16 = vpack.c.bf16 %v1568_v14, %v1567_v13 }
 0x485   : > { %3966 = vmatmul.mubr.msk.bf16.vlgmr.msra.gmra.mrb[8].mxu0 %vm1546_vm3, %v1569_v16 }
 0x486   : > { %3977 = vmatprep.mubr.msk.bf16.mxu0 %vm4510_vm1, %v4509_v29 }
 0x498   : > { %1938 = vadd.xlane.f32.xlu1 %v1937_v19 }
 0x4a9   : > { %1945 = vrot.lane.b32.xlu1 %v1487_v40, %s5426_s1  ;;  %s5458_s1 = sld [smem:[#allocation11_spill]] }
 0x4e6   : > { %v1685_v20 = vpop.xlane.xlu0 %1684 }
 0x4ea   : > { %v1688_v21 = vpop.xlane.xlu1 %1687 }
 0x4eb   : > { %4395 = vrcp.f32 %v1688_v21 }
 0x4ec   : > { %4397 = vrcp.f32 %v1685_v20 }
 0x4ee   : > { %v1811_v22 = vpop.xlane.xlu0 %1810 }
 0x4f0   : > { %v1814_v23 = vpop.xlane.xlu1 %1813 }
 0x4f1   : > { %4399 = vrcp.f32 %v1814_v23  ;;  %v3740_v23 = vld [vmem:[%s5447_s23] ss:$0 sm:$0xff]  ;;  %s3797_s23 = sshll.u32 %s5474_s15, 7 }
 0x4f2   : > { %4401 = vrcp.f32 %v1811_v22 }
 0x4f4   : > { %v1821_v33 = vpop.permute.xlu1 %1820 }
 0x4f5   : > { %v4396_v24 = vpop.eup %4395 }
 0x4f6   : > { %v1936_v25 = vpop.xlane.xlu0 %1935  ;;  %v4398_v26 = vpop.eup %4397  ;;  %v1692_v27 = vmul.f32 %v4396_v24, %v4382_v57 }
 0x4f7   : > { %v1691_v28 = vmul.f32 %v4398_v26, %v4380_v53  ;;  %4403 = vrcp.f32 %v1936_v25 }
 0x4f9   : > { %v1693_v31 = vpack.c.bf16 %v1692_v27, %v1691_v28 }
 0x4fa   : > { %v1696_v30 = vpop.permute.xlu0 %1695 }
 0x4fb   : > { %3976 = vmatpush3.bf16.msra.mxu0 %v1696_v30  ;;  %v4400_v32 = vpop.eup %4399 }
 0x4fc   : > { %3987 = vmatprep.subr.bf16.mxu0 %v4509_v29  ;;  %v4402_v34 = vpop.eup %4401  ;;  %v1818_v35 = vmul.f32 %v4400_v32, %v4386_v62 }
 0x4fd   : > { %v1817_v36 = vmul.f32 %v4402_v34, %v4384_v60 }
 0x4fe   : > { %3978 = vmatmul.mubr.msk.bf16.vlgmr.msra.gmra.mrb[12].mxu0 %vm1546_vm3, %v1693_v31 }
 0x4ff   : > { %3988 = vmatpush3.bf16.msra.mxu0 %v1821_v33  ;;  %3989 = vmatprep.mubr.msk.bf16.mxu0 %vm4510_vm1, %v4509_v29  ;;  %v1819_v37 = vpack.c.bf16 %v1818_v35, %v1817_v36 }
 0x500   : > { %3999 = vmatprep.subr.bf16.mxu0 %v4509_v29 }
 0x501   : > { %v4404_v1 = vpop.eup %4403 }
 0x502   : > { %v1942_v40 = vmul.f32 %v4404_v1, %v4388_v2 }
 0x506   : > { %3990 = vmatmul.mubr.msk.bf16.vlgmr.msra.gmra.mrb[16].mxu0 %vm1546_vm3, %v1819_v37 }
 0x507   : > { %4001 = vmatprep.mubr.msk.bf16.mxu0 %vm4510_vm1, %v4509_v29 }
 0x525   : > { %v1939_v38 = vpop.xlane.xlu1 %1938 }
 0x526   : > { %4405 = vrcp.f32 %v1939_v38 }
 0x529   : > { %v1946_v0 = vpop.permute.xlu1 %1945 }
 0x52a   : > { %4000 = vmatpush3.bf16.msra.mxu0 %v1946_v0 }
 0x52b   : > { %4013 = vmatprep.subr.bf16.mxu0 %v4509_v29 }
 0x530   : > { %v4406_v39 = vpop.eup %4405 }
 0x531   : > { %v1943_v41 = vmul.f32 %v4406_v39, %v4394_v18 }
 0x533   : > { %v1944_v42 = vpack.c.bf16 %v1943_v41, %v1942_v40 }
 0x535   : > { %4002 = vmatmul.mubr.msk.bf16.vlgmr.msra.gmra.mrb[20].mxu0 %vm1546_vm3, %v1944_v42 }
 0x536   : > { %4017 = vmatprep.mubr.msk.bf16.mxu0 %vm4510_vm1, %v4509_v29 }
 0x558   : > { %v1607_v43 = vpop.f32.mrb[8].mxu0 }
 0x559   : > { %v3967_v44 = vpop.f32.mrb[9].mxu0 }
 0x55a   : > { %v1610_v45 = vpop.f32.mrb[10].mxu0 }
 0x55b   : > { %v3968_v46 = vpop.f32.mrb[11].mxu0 }
 0x5d1   : > { %v1735_v47 = vpop.f32.mrb[12].mxu0 }
 0x5d2   : > { %v3979_v48 = vpop.f32.mrb[13].mxu0 }
 0x5d3   : > { %v1738_v49 = vpop.f32.mrb[14].mxu0 }
 0x5d4   : > { %v4315_v51 = vpack.i.bf16 %v1738_v49, %v1735_v47  ;;  %v3980_v52 = vpop.f32.mrb[15].mxu0 }
 0x5d6   : > { %4316 = vrot.lane.b32.xlu1 %v4315_v51, %s5424_s7  ;;  %s5450_s7 = sld [smem:[#allocation3_spill]] }
 0x5d9   : > { %v1860_v53 = vpop.f32.mrb[16].mxu0 }
 0x5da   : > { %v3991_v54 = vpop.f32.mrb[17].mxu0 }
 0x5db   : > { %v1863_v55 = vpop.f32.mrb[18].mxu0 }
 0x5dc   : > { %v4320_v56 = vpack.i.bf16 %v1863_v55, %v1860_v53  ;;  %v3992_v57 = vpop.f32.mrb[19].mxu0  ;;  %v1183_v36 = vld [vmem:[%s5450_s7] sm:$0xff]  ;;  %v1184_v37 = vld [vmem:[%s5450_s7 + $0x8] sm:$0xff]  ;;  %v1185_v40 = vld [vmem:[%s5450_s7 + $0x10] sm:$0xff] }
 0x5dd   : > { %v1186_v41 = vld [vmem:[%s5450_s7 + $0x18] sm:$0xff]  ;;  %v1187_v47 = vld [vmem:[%s5450_s7 + $0x20] sm:$0xff]  ;;  %v1188_v48 = vld [vmem:[%s5450_s7 + $0x28] sm:$0xff] }
 0x5de   : > { %4321 = vrot.lane.b32.xlu0 %v4320_v56, %s5425_s10  ;;  %s4884_s10 = scalar_lea.vmem %s5448_s26, %s3797_s23  ;;  %v1189_v55 = vld [vmem:[%s5450_s7 + $0x30] sm:$0xff]  ;;  %v1190_v56 = vld [vmem:[%s5450_s7 + $0x38] sm:$0xff]  ;;  %s5451_s26 = sld [smem:[#allocation6_spill]] }
 0x5df   : > { %v4889_v34 = vld [vmem:[%s4884_s10] sm:$0xff]  ;;  %v4892_v35 = vld [vmem:[%s4884_s10 + $0x8] sm:$0xff]  ;;  %v4899_v1 = vld [vmem:[%s4884_s10 + $0x10] sm:$0xff]  ;;  %s5452_s23 = sld [smem:[#allocation9_spill]] }
 0x5e0   : > { %v2139_v38 = vadd.f32 %v1183_v36, %v4889_v34  ;;  %v2140_v0 = vadd.f32 %v1184_v37, %v4892_v35  ;;  %v4902_v39 = vld [vmem:[%s4884_s10 + $0x18] sm:$0xff]  ;;  %v2141_v42 = vadd.f32 %v1185_v40, %v4899_v1  ;;  %v4911_v44 = vld [vmem:[%s4884_s10 + $0x28] sm:$0xff]  ;;  %v4920_v52 = vld [vmem:[%s4884_s10 + $0x30] sm:$0xff] }
 0x5e1   : > { %v2142_v46 = vadd.f32 %v1186_v41, %v4902_v39  ;;  %v2144_v50 = vadd.f32 %v1188_v48, %v4911_v44  ;;  %v4923_v53 = vld [vmem:[%s4884_s10 + $0x38] sm:$0xff]  ;;  %v4928_v57 = vld [vmem:[%s4884_s10 + $0x40] sm:$0xff]  ;;  %v4931_v58 = vld [vmem:[%s4884_s10 + $0x48] sm:$0xff] }
 0x5e2   : > { %v1197_v37 = vld [vmem:[%s5450_s7 + $0x70] sm:$0xff] }
 0x5e3   : > { %v2225_v51 = vpack.c.bf16 %v2142_v46, %v2141_v42 }
 0x5e4   : > { %v4356_v46 = vld [vmem:[%s5451_s26 + $0x8] sm:$0xff]  }
 0x608   : > { %v1985_v59 = vpop.f32.mrb[20].mxu0 }
 0x609   : > { %v4003_v60 = vpop.f32.mrb[21].mxu0 }
 0x60a   : > { %v1988_v61 = vpop.f32.mrb[22].mxu0  ;;  %v1192_v60 = vld [vmem:[%s5450_s7 + $0x48] sm:$0xff] }
 0x60b   : > { %v4325_v62 = vpack.i.bf16 %v1988_v61, %v1985_v59  ;;  %v4004_v63 = vpop.f32.mrb[23].mxu0  ;;  %v1191_v59 = vld [vmem:[%s5450_s7 + $0x40] sm:$0xff]  ;;  %v2145_v61 = vadd.f32 %v1189_v55, %v4920_v52 }
 0x60c   : > { %v2147_v63 = vadd.f32 %v1191_v59, %v4928_v57 }
 0x60d   : > { %4326 = vrot.lane.b32.xlu1 %v4325_v62, %s5423_s11  ;;  %s5449_s11 = sld [smem:[#allocation8_spill]]  ;;  %v2146_v62 = vadd.f32 %v1190_v56, %v4923_v53 }
 0x648   : > { %v4317_v2 = vpop.permute.xlu1 %4316 }
 0x649   : > { %v4319_v8 = vunpack.i.h.bf16 %v4317_v2  ;;  %v4318_v9 = vunpack.i.l.bf16 %v4317_v2  ;;  %v2148_v2 = vadd.f32 %v1192_v60, %v4931_v58 }
 0x64b   : > { %v2017_v13 = vsel %vm1488_vm2, %v1610_v45, %v4319_v8  ;;  %v2016_v14 = vsel %vm1488_vm2, %v1607_v43, %v4318_v9  ;;  %v4908_v43 = vld [vmem:[%s4884_s10 + $0x20] sm:$0xff]  ;;  %v2224_v45 = vpack.c.bf16 %v2140_v0, %v2139_v38  ;;  %v4943_v8 = vld [vmem:[%s4884_s10 + $0x50] sm:$0xff]  ;;  %v2228_v9 = vpack.c.bf16 %v2148_v2, %v2147_v63  ;;  %v1198_v38 = vld [vmem:[%s5450_s7 + $0x78] sm:$0xff] }
 0x64c   : > { %v2143_v49 = vadd.f32 %v1187_v47, %v4908_v43  ;;  %v4995_v47 = vld [vmem:[%s5452_s23] ss:$0 sm:$0xff]  ;;  %s5454_s23 = sld [smem:[#allocation15_spill]] }
 0x64e   : > { %v2226_v54 = vpack.c.bf16 %v2144_v50, %v2143_v49 }
 0x650   : > { %v4322_v4 = vpop.permute.xlu0 %4321 }
 0x651   : > { %v4324_v10 = vunpack.i.h.bf16 %v4322_v4  ;;  %v4323_v11 = vunpack.i.l.bf16 %v4322_v4  ;;  %v2227_v4 = vpack.c.bf16 %v2146_v62, %v2145_v61 }
 0x653   : > { %v2019_v17 = vsel %vm1546_vm3, %v2017_v13, %v4324_v10  ;;  %v2018_v18 = vsel %vm1546_vm3, %v2016_v14, %v4323_v11  ;;  %v4946_v10 = vld [vmem:[%s4884_s10 + $0x58] sm:$0xff]  ;;  %v1193_v11 = vld [vmem:[%s5450_s7 + $0x50] sm:$0xff] }
 0x654   : > { %v2149_v13 = vadd.f32 %v1193_v11, %v4943_v8 }
 0x67f   : > { %v4327_v12 = vpop.permute.xlu1 %4326 }
 0x680   : > { %v4329_v15 = vunpack.i.h.bf16 %v4327_v12  ;;  %v4328_v16 = vunpack.i.l.bf16 %v4327_v12  ;;  %v1194_v12 = vld [vmem:[%s5450_s7 + $0x58] sm:$0xff] }
 0x681   : > { %v2150_v14 = vadd.f32 %v1194_v12, %v4946_v10 }
 0x682   : > { %v2022_v19 = vsel %vm2020_vm4, %v2019_v17, %v4329_v15  ;;  %v2021_v20 = vsel %vm2020_vm4, %v2018_v18, %v4328_v16 }
 0x683   : > { %v2023_v21 = vpack.c.bf16 %v2022_v19, %v2021_v20  ;;  %v2229_v15 = vpack.c.bf16 %v2150_v14, %v2149_v13 }
 0x685   : > { %4010 = vmatmul.mubr.msk.bf16.vlgmr.msra.gmra.mrb[20].mxu1 %vm1203_vm0, %v2023_v21 }
 0x686   : > { %4025 = vmatprep.mubr.msk.bf16.mxu1 %vm1203_vm0, %v2224_v45  ;;  %v4355_v45 = vld [vmem:[%s5451_s26] sm:$0xff]  }
 0x687   : > { %4014 = vmatpush3.bf16.msra.mxu0 %v4355_v45 }
 0x688   : > { %4015 = vmatprep.subr.bf16.mxu0 %v4509_v29 }
 0x68b   : > { %4016 = vmatpush3.bf16.msra.mxu0 %v4356_v46 }
 0x758   : > { %v2084_v22 = vpop.f32.mrb[20].mxu1 }
 0x759   : > { %v2085_v24 = vadd.f32 %v3740_v23, %v2084_v22  ;;  %v4011_v25 = vpop.f32.mrb[21].mxu1 }
 0x75a   : > { %v2087_v26 = vpop.f32.mrb[22].mxu1 }
 0x75b   : > { %v4873_v27 = vadd.f32 %v2085_v24, %v4730_v3  ;;  %v2088_v28 = vadd.f32 %v3740_v23, %v2087_v26  ;;  %v4012_v30 = vpop.f32.mrb[23].mxu1  ;;  %v4353_v3 = vld [vmem:[%s5449_s11] sm:$0xff]  }
 0x75c   : > { %4021 = vmatprep.subr.bf16.mxu1 %v4353_v3  ;;  %v4968_v26 = vld [vmem:[%s4884_s10 + $0x60] sm:$0xff] }
 0x75d   : > { %v4876_v31 = vadd.f32 %v2088_v28, %v4734_v5  ;;  %v2095_v32 = vsel %vm1203_vm0, %v4873_v27, 0.0  ;;  %v4354_v5 = vld [vmem:[%s5449_s11 + $0x8] sm:$0xff]   ;;  %4022 = vmatpush3.bf16.msra.mxu1 %v4353_v3  ;;  %v1195_v30 = vld [vmem:[%s5450_s7 + $0x60] sm:$0xff]  ;;  %v4977_v3 = vld [vmem:[%s4884_s10 + $0x70] sm:$0xff] }
 0x75e   : > { %2096 = vadd.xlane.f32.xlu0 %v2095_v32  ;;  %4023 = vmatprep.subr.bf16.mxu1 %v4354_v5  ;;  %v4971_v28 = vld [vmem:[%s4884_s10 + $0x68] sm:$0xff]  ;;  %v2153_v0 = vadd.f32 %v1197_v37, %v4977_v3 }
 0x75f   : > { %v2098_v33 = vsel %vm1203_vm0, %v4876_v31, 0.0  ;;  %v1196_v32 = vld [vmem:[%s5450_s7 + $0x68] sm:$0xff] }
 0x760   : > { %2099 = vadd.xlane.f32.xlu1 %v2098_v33  ;;  %v2151_v33 = vadd.f32 %v1195_v30, %v4968_v26  ;;  %v2152_v36 = vadd.f32 %v1196_v32, %v4971_v28 }
 0x761   : > { %4024 = vmatpush3.bf16.msra.mxu1 %v4354_v5  ;;  %v4980_v5 = vld [vmem:[%s4884_s10 + $0x78] sm:$0xff]  ;;  %s5453_s10 = sld [smem:[#allocation14_spill]] }
 0x762   : > { %4061 = vmatprep.subr.bf16.mxu1 %v4509_v29  ;;  %v2154_v40 = vadd.f32 %v1198_v38, %v4980_v5  ;;  %v2230_v41 = vpack.c.bf16 %v2152_v36, %v2151_v33 }
 0x764   : > { %4026 = vmatmul.mubr.msk.bf16.vlgmr.msra.gmra.mrb[24].mxu1 %vm1203_vm0, %v2225_v51  ;;  %v2231_v42 = vpack.c.bf16 %v2154_v40, %v2153_v0 }
 0x765   : > { %4029 = vmatprep.mubr.msk.bf16.mxu1 %vm1203_vm0, %v2226_v54 }
 0x76c   : > { %4030 = vmatmul.mubr.msk.bf16.gmra.mrb[28].mxu1 %vm1203_vm0, %v2227_v4 }
 0x76d   : > { %4033 = vmatprep.mubr.msk.bf16.mxu1 %vm1203_vm0, %v2228_v9 }
 0x774   : > { %4034 = vmatmul.mubr.msk.bf16.gmra.mrb[32].mxu1 %vm1203_vm0, %v2229_v15 }
 0x775   : > { %4037 = vmatprep.mubr.msk.bf16.mxu1 %vm1203_vm0, %v2230_v41 }
 0x77c   : > { %4038 = vmatmul.mubr.msk.bf16.gmra.mrb[36].mxu1 %vm1203_vm0, %v2231_v42 }
 0x77d   : > { %4077 = vmatprep.mubr.msk.bf16.mxu1 %vm4510_vm1, %v4509_v29 }
 0x7eb   : > { %v2097_v16 = vpop.xlane.xlu0 %2096 }
 0x7ec   : > { %v2101_v17 = vmul.f32 0.03125, %v2097_v16 }
 0x7ed   : > { %v2100_v18 = vpop.xlane.xlu1 %2099 }
 0x7ee   : > { %v4956_v19 = vsub.f32 %v4873_v27, %v2101_v17  ;;  %v2102_v20 = vmul.f32 0.03125, %v2100_v18 }
 0x7f0   : > { %v4959_v21 = vsub.f32 %v4876_v31, %v2102_v20  ;;  %v2105_v23 = vmul.f32 %v4956_v19, %v4956_v19 }
 0x7f2   : > { %v2107_v22 = vsel %vm1203_vm0, %v2105_v23, 0.0  ;;  %v2106_v24 = vmul.f32 %v4959_v21, %v4959_v21 }
 0x7f3   : > { %2108 = vadd.xlane.f32.xlu0 %v2107_v22 }
 0x7f4   : > { %v2110_v25 = vsel %vm1203_vm0, %v2106_v24, 0.0 }
 0x7f7   : > { %2111 = vadd.xlane.f32.xlu0 %v2110_v25 }
 0x837   : > { %v4027_v48 = vpop.f32.mrb[24].mxu1 }
 0x838   : > { %v2322_v49 = vadd.f32 %v4027_v48, %v4995_v47  ;;  %v2313_v50 = vpop.f32.mrb[25].mxu1 }
 0x839   : > { %v2314_v51 = vadd.f32 %v4995_v47, %v2313_v50  ;;  %v4028_v54 = vpop.f32.mrb[26].mxu1 }
 0x83a   : > { %v2325_v55 = vadd.f32 %v4028_v54, %v4995_v47  ;;  %v2316_v56 = vpop.f32.mrb[27].mxu1 }
 0x83b   : > { %v2317_v59 = vadd.f32 %v4995_v47, %v2316_v56 }
 0x83c   : > { %v5001_v60 = vpack.c.bf16 %v2325_v55, %v2322_v49 }
 0x83d   : > { %v5003_v61 = vpack.c.bf16 %v2317_v59, %v2314_v51  ;;  %v3744_v51 = vld [vmem:[%s5453_s10] ss:$0 sm:$0xff]  ;;  %s5455_s10 = sld [smem:[#allocation7_spill]] }
 0x83e   : > { %v2551_v16 = vsel %vm1488_vm2, %v5001_v60, 0  ;;  %v3745_v59 = vld [vmem:[%s5454_s23] ss:$0 sm:$0xff]  ;;  %s5456_s23 = sld [smem:[#allocation10_spill]] }
 0x83f   : > { %v2548_v62 = vsel %vm1488_vm2, %v5003_v61, 0  ;;  %v4031_v63 = vpop.f32.mrb[28].mxu1 }
 0x840   : > { %4062 = vmatpush3.bf16.xpose.msra.mxu1 %v2548_v62  ;;  %v2338_v2 = vadd.f32 %v4031_v63, %v4995_v47  ;;  %v2329_v4 = vpop.f32.mrb[29].mxu1 }
 0x841   : > { %4063 = vmatprep.subr.bf16.mxu1 %v4509_v29  ;;  %v2330_v9 = vadd.f32 %v4995_v47, %v2329_v4  ;;  %v4032_v11 = vpop.f32.mrb[30].mxu1 }
 0x842   : > { %v2341_v12 = vadd.f32 %v4032_v11, %v4995_v47  ;;  %v2332_v13 = vpop.f32.mrb[31].mxu1 }
 0x843   : > { %v2333_v14 = vadd.f32 %v4995_v47, %v2332_v13 }
 0x844   : > { %v5012_v15 = vpack.c.bf16 %v2341_v12, %v2338_v2 }
 0x845   : > { %v5016_v17 = vpack.c.bf16 %v2333_v14, %v2330_v9 }
 0x846   : > { %v2557_v38 = vsel %vm1488_vm2, %v5012_v15, 0 }
 0x847   : > { %v4035_v18 = vpop.f32.mrb[32].mxu1  ;;  %v2554_v36 = vsel %vm1488_vm2, %v5016_v17, 0 }
 0x848   : > { %4064 = vmatpush3.bf16.xpose.msra.mxu1 %v2551_v16  ;;  %v2354_v20 = vadd.f32 %v4035_v18, %v4995_v47  ;;  %v2345_v23 = vpop.f32.mrb[33].mxu1 }
 0x849   : > { %4065 = vmatprep.subr.bf16.mxu1 %v4509_v29  ;;  %v2346_v22 = vadd.f32 %v4995_v47, %v2345_v23  ;;  %v4036_v24 = vpop.f32.mrb[34].mxu1 }
 0x84a   : > { %v2357_v25 = vadd.f32 %v4036_v24, %v4995_v47  ;;  %v2348_v30 = vpop.f32.mrb[35].mxu1 }
 0x84b   : > { %v2349_v32 = vadd.f32 %v4995_v47, %v2348_v30 }
 0x84c   : > { %v5023_v33 = vpack.c.bf16 %v2357_v25, %v2354_v20  ;;  %v3746_v25 = vld [vmem:[%s5455_s10] ss:$0 sm:$0xff]  ;;  %s5457_s10 = sld [smem:[#allocation4_spill]] }
 0x84d   : > { %v5027_v37 = vpack.c.bf16 %v2349_v32, %v2346_v22 }
 0x84e   : > { %v2563_v42 = vsel %vm1488_vm2, %v5023_v33, 0 }
 0x84f   : > { %v2560_v0 = vsel %vm1488_vm2, %v5027_v37, 0  ;;  %v4039_v13 = vpop.f32.mrb[36].mxu1 }
 0x850   : > { %4066 = vmatpush3.bf16.xpose.msra.mxu1 %v2554_v36  ;;  %v2370_v14 = vadd.f32 %v4039_v13, %v4995_v47 }
 0x851   : > { %4067 = vmatprep.subr.bf16.mxu1 %v4509_v29 }
 0x852   : > { %s1147_s2 = scalar_lea.vmem %s5457_s10, %s5474_s15  ;;  %s5459_s15 = smov 112  }
 0x853   : > { %s5463_s10 = sld [smem:[#allocation12_spill]] }
 0x858   : > { %4068 = vmatpush3.bf16.xpose.msra.mxu1 %v2557_v38 }
 0x859   : > { %4069 = vmatprep.subr.bf16.mxu1 %v4509_v29 }
 0x860   : > { %4070 = vmatpush3.bf16.xpose.msra.mxu1 %v2560_v0 }
 0x861   : > { %4071 = vmatprep.subr.bf16.mxu1 %v4509_v29 }
 0x868   : > { %4072 = vmatpush3.bf16.xpose.msra.mxu1 %v2563_v42  ;;  %v4358_v42 = vld [vmem:[%s5456_s23 + $0x8] sm:$0xff]  }
 0x869   : > { %4073 = vmatprep.subr.bf16.mxu1 %v4509_v29 }
 0x880   : > { %v2109_v40 = vpop.xlane.xlu0 %2108 }
 0x881   : > { %v2113_v41 = vmul.f32 0.03125, %v2109_v40 }
 0x883   : > { %v2115_v45 = vadd.f32 1e-05, %v2113_v41  ;;  %v4357_v41 = vld [vmem:[%s5456_s23] sm:$0xff]  }
 0x884   : > { %v2112_v46 = vpop.xlane.xlu0 %2111  ;;  %4041 = vmatprep.subr.bf16.mxu0 %v4357_v41 }
 0x885   : > { %4407 = vrsqrt.f32 %v2115_v45  ;;  %v2114_v48 = vmul.f32 0.03125, %v2112_v46  ;;  %v2384_v45 = vpack.c.bf16 %v4892_v35, %v4889_v34  ;;  %v2385_v46 = vpack.c.bf16 %v4902_v39, %v4899_v1 }
 0x886   : > { %v2387_v34 = vpack.c.bf16 %v4923_v53, %v4920_v52  ;;  %v2388_v35 = vpack.c.bf16 %v4931_v58, %v4928_v57  ;;  %v2389_v1 = vpack.c.bf16 %v4946_v10, %v4943_v8  ;;  %v2390_v39 = vpack.c.bf16 %v4971_v28, %v4968_v26 }
 0x887   : > { %v2116_v49 = vadd.f32 1e-05, %v2114_v48  ;;  %v2386_v48 = vpack.c.bf16 %v4911_v44, %v4908_v43  ;;  %v2391_v43 = vpack.c.bf16 %v4980_v5, %v4977_v3  ;;  %v5098_v44 = vld [vmem:[%s1147_s2] ss:$0 sm:$0xff]  ;;  %s5462_s2 = smov 8  }
 0x888   : > { %v3761_v3 = vld [vmem:[%s5458_s1] ss:$0 sm:$0xff]  ;;  %s5461_s1 = smov 16  }
 0x889   : > { %4409 = vrsqrt.f32 %v2116_v49 }
 0x88f   : > { %v4408_v50 = vpop.eup %4407 }
 0x890   : > { %v2119_v54 = vmul.f32 %v4408_v50, %v4956_v19  ;;  %v2361_v19 = vpop.f32.mrb[37].mxu1 }
 0x891   : > { %v2362_v16 = vadd.f32 %v4995_v47, %v2361_v19  ;;  %v4040_v18 = vpop.f32.mrb[38].mxu1 }
 0x892   : > { %v2127_v55 = vmul.f32 %v3744_v51, %v2119_v54  ;;  %v2364_v20 = vpop.f32.mrb[39].mxu1 }
 0x893   : > { %v4410_v56 = vpop.eup %4409  ;;  %v2365_v23 = vadd.f32 %v4995_v47, %v2364_v20 }
 0x894   : > { %v2120_v62 = vmul.f32 %v4410_v56, %v4959_v21  ;;  %v2135_v2 = vadd.f32 %v3745_v59, %v2127_v55  ;;  %v2373_v21 = vadd.f32 %v4040_v18, %v4995_v47 }
 0x896   : > { %v2128_v63 = vmul.f32 %v3744_v51, %v2120_v62  ;;  %v2137_v9 = vadd.f32 %v2135_v2, %v4767_v6  ;;  %v5050_v22 = vpack.c.bf16 %v2373_v21, %v2370_v14  ;;  %v5052_v6 = vpack.c.bf16 %v2365_v23, %v2362_v16 }
 0x898   : > { %v2136_v4 = vadd.f32 %v3745_v59, %v2128_v63  ;;  %v2569_v24 = vsel %vm1488_vm2, %v5050_v22, 0 }
 0x89a   : > { %v2138_v11 = vadd.f32 %v2136_v4, %v4770_v7  ;;  %v2566_v7 = vsel %vm1488_vm2, %v5052_v6, 0 }
 0x89b   : > { %4074 = vmatpush3.bf16.xpose.msra.mxu1 %v2566_v7 }
 0x89c   : > { %v2155_v12 = vpack.c.bf16 %v2138_v11, %v2137_v9  ;;  %4075 = vmatprep.subr.bf16.mxu1 %v4509_v29 }
 0x89e   : > { %4018 = vmatmul.mubr.msk.bf16.vlgmr.msra.gmra.mrb[24].mxu0 %vm1203_vm0, %v2155_v12 }
 0x89f   : > { %4045 = vmatprep.mubr.msk.bf16.mxu0 %vm1203_vm0, %v2384_v45  ;;  %4042 = vmatpush3.bf16.msra.mxu0 %v4357_v41 }
 0x8a0   : > { %4043 = vmatprep.subr.bf16.mxu0 %v4358_v42 }
 0x8a3   : > { %4076 = vmatpush3.bf16.xpose.msra.mxu1 %v2569_v24  ;;  %4044 = vmatpush3.bf16.msra.mxu0 %v4358_v42 }
 0x8a4   : > { %4121 = vmatprep.subr.bf16.mxu1 %v4509_v29  ;;  %4081 = vmatprep.subr.bf16.mxu0 %v4509_v29 }
 0x8a6   : > { %4046 = vmatmul.mubr.msk.bf16.vlgmr.msra.gmra.mrb[28].mxu0 %vm1203_vm0, %v2385_v46 }
 0x8a7   : > { %4049 = vmatprep.mubr.msk.bf16.mxu0 %vm1203_vm0, %v2386_v48 }
 0x8ae   : > { %4050 = vmatmul.mubr.msk.bf16.gmra.mrb[32].mxu0 %vm1203_vm0, %v2387_v34 }
 0x8af   : > { %4053 = vmatprep.mubr.msk.bf16.mxu0 %vm1203_vm0, %v2388_v35 }
 0x8b6   : > { %4054 = vmatmul.mubr.msk.bf16.gmra.mrb[36].mxu0 %vm1203_vm0, %v2389_v1 }
 0x8b7   : > { %4057 = vmatprep.mubr.msk.bf16.mxu0 %vm1203_vm0, %v2390_v39 }
 0x8be   : > { %4058 = vmatmul.mubr.msk.bf16.gmra.mrb[40].mxu0 %vm1203_vm0, %v2391_v43 }
 0x8bf   : > { %4097 = vmatprep.mubr.msk.bf16.mxu0 %vm4510_vm1, %v4509_v29 }
 0x971   : > { %v2216_v47 = vpop.f32.mrb[24].mxu0 }
 0x972   : > { %v4019_v30 = vpop.f32.mrb[25].mxu0  ;;  %v2217_v36 = vadd.f32 %v3746_v25, %v2216_v47 }
 0x973   : > { %v2219_v32 = vpop.f32.mrb[26].mxu0 }
 0x974   : > { %v2220_v38 = vadd.f32 %v3746_v25, %v2219_v32  ;;  %v4020_v0 = vpop.f32.mrb[27].mxu0 }
 0x976   : > { %v5061_v40 = vpack.c.bf16 %v2220_v38, %v2217_v36 }
 0x978   : > { %4078 = vmatmul.mubr.msk.bf16.vlgmr.msra.gmra.mrb[40].mxu1 %vm1488_vm2, %v5061_v40 }
 0x979   : > { %4137 = vmatprep.mubr.msk.bf16.mxu1 %vm4510_vm1, %v4509_v29  ;;  %v4047_v5 = vpop.f32.mrb[28].mxu0 }
 0x97a   : > { %v2482_v49 = vadd.f32 %v4047_v5, %v3761_v3  ;;  %v2473_v50 = vpop.f32.mrb[29].mxu0 }
 0x97b   : > { %v2474_v51 = vadd.f32 %v3761_v3, %v2473_v50  ;;  %v4048_v54 = vpop.f32.mrb[30].mxu0 }
 0x97c   : > { %v2485_v55 = vadd.f32 %v4048_v54, %v3761_v3  ;;  %v2476_v56 = vpop.f32.mrb[31].mxu0 }
 0x97d   : > { %v2477_v59 = vadd.f32 %v3761_v3, %v2476_v56 }
 0x97e   : > { %v5109_v62 = vpack.c.bf16 %v2485_v55, %v2482_v49 }
 0x97f   : > { %v5111_v63 = vpack.c.bf16 %v2477_v59, %v2474_v51 }
 0x981   : > { %v4051_v2 = vpop.f32.mrb[32].mxu0  ;;  %4082 = vmatpush3.bf16.msra.mxu0 %v5111_v63 }
 0x982   : > { %v2498_v4 = vadd.f32 %v4051_v2, %v3761_v3  ;;  %v2489_v9 = vpop.f32.mrb[33].mxu0  ;;  %4083 = vmatprep.subr.bf16.mxu0 %v4509_v29 }
 0x983   : > { %v2490_v11 = vadd.f32 %v3761_v3, %v2489_v9  ;;  %v4052_v12 = vpop.f32.mrb[34].mxu0 }
 0x984   : > { %v2501_v13 = vadd.f32 %v4052_v12, %v3761_v3  ;;  %v2492_v14 = vpop.f32.mrb[35].mxu0 }
 0x985   : > { %v2493_v19 = vadd.f32 %v3761_v3, %v2492_v14  ;;  %4084 = vmatpush3.bf16.msra.mxu0 %v5109_v62 }
 0x986   : > { %v5116_v16 = vpack.c.bf16 %v2501_v13, %v2498_v4  ;;  %4085 = vmatprep.subr.bf16.mxu0 %v4509_v29 }
 0x987   : > { %v5119_v18 = vpack.c.bf16 %v2493_v19, %v2490_v11 }
 0x989   : > { %v4055_v21 = vpop.f32.mrb[36].mxu0  ;;  %4086 = vmatpush3.bf16.msra.mxu0 %v5119_v18 }
 0x98a   : > { %v2514_v20 = vadd.f32 %v4055_v21, %v3761_v3  ;;  %v2505_v23 = vpop.f32.mrb[37].mxu0  ;;  %4087 = vmatprep.subr.bf16.mxu0 %v4509_v29 }
 0x98b   : > { %v2506_v7 = vadd.f32 %v3761_v3, %v2505_v23  ;;  %v4056_v24 = vpop.f32.mrb[38].mxu0 }
 0x98c   : > { %v2517_v25 = vadd.f32 %v4056_v24, %v3761_v3  ;;  %v2508_v47 = vpop.f32.mrb[39].mxu0 }
 0x98d   : > { %v2509_v30 = vadd.f32 %v3761_v3, %v2508_v47  ;;  %4088 = vmatpush3.bf16.msra.mxu0 %v5116_v16 }
 0x98e   : > { %v5124_v32 = vpack.c.bf16 %v2517_v25, %v2514_v20  ;;  %4089 = vmatprep.subr.bf16.mxu0 %v4509_v29 }
 0x98f   : > { %v5127_v36 = vpack.c.bf16 %v2509_v30, %v2506_v7 }
 0x991   : > { %v4059_v38 = vpop.f32.mrb[40].mxu0  ;;  %4090 = vmatpush3.bf16.msra.mxu0 %v5127_v36 }
 0x992   : > { %v2530_v0 = vadd.f32 %v4059_v38, %v3761_v3  ;;  %v2521_v41 = vpop.f32.mrb[41].mxu0  ;;  %4091 = vmatprep.subr.bf16.mxu0 %v4509_v29 }
 0x993   : > { %v2522_v42 = vadd.f32 %v3761_v3, %v2521_v41  ;;  %v4060_v45 = vpop.f32.mrb[42].mxu0 }
 0x994   : > { %v2533_v46 = vadd.f32 %v4060_v45, %v3761_v3  ;;  %v2524_v48 = vpop.f32.mrb[43].mxu0 }
 0x995   : > { %v2525_v34 = vadd.f32 %v3761_v3, %v2524_v48  ;;  %4092 = vmatpush3.bf16.msra.mxu0 %v5124_v32 }
 0x996   : > { %v5132_v35 = vpack.c.bf16 %v2533_v46, %v2530_v0  ;;  %4093 = vmatprep.subr.bf16.mxu0 %v4509_v29 }
 0x997   : > { %v5135_v1 = vpack.c.bf16 %v2525_v34, %v2522_v42 }
 0x999   : > { %4094 = vmatpush3.bf16.msra.mxu0 %v5135_v1 }
 0x99a   : > { %4095 = vmatprep.subr.bf16.mxu0 %v4509_v29 }
 0x99d   : > { %4096 = vmatpush3.bf16.msra.mxu0 %v5132_v35 }
 0x99e   : > { %4101 = vmatprep.subr.bf16.mxu0 %v4509_v29 }
 0xa4b   : > { %v2605_v52 = vpop.f32.mrb[40].mxu1 }
 0xa4c   : > { %v2612_v53 = vmul.f32 0.35355338, %v2605_v52  ;;  %v4079_v57 = vpop.f32.mrb[41].mxu1 }
 0xa4d   : > { %v2608_v58 = vpop.f32.mrb[42].mxu1 }
 0xa4e   : > { %v2613_v8 = vmul.f32 0.35355338, %v2608_v58  ;;  %v4080_v10 = vpop.f32.mrb[43].mxu1  ;;  %v5101_v26 = vadd.f32 %v5098_v44, %v2612_v53 }
 0xa50   : > { %2622 = vmax.xlane.f32.xlu0 %v5101_v26  ;;  %v5105_v28 = vadd.f32 %v5098_v44, %v2613_v8 }
 0xa52   : > { %2624 = vmax.xlane.f32.xlu1 %v5105_v28 }
 0xadd   : > { %v2623_v39 = vpop.xlane.xlu0 %2622 }
 0xade   : > { %v2626_v43 = vsub.f32 %v5101_v26, %v2623_v39 }
 0xadf   : > { %v2625_v52 = vpop.xlane.xlu1 %2624 }
 0xae0   : > { %v2628_v53 = vmul.f32 1.442695, %v2626_v43  ;;  %v2627_v57 = vsub.f32 %v5105_v28, %v2625_v52 }
 0xae2   : > { %4411 = vpow2.f32 %v2628_v53  ;;  %v2630_v58 = vmul.f32 1.442695, %v2627_v57 }
 0xae4   : > { %4413 = vpow2.f32 %v2630_v58 }
 0xaec   : > { %v4412_v8 = vpop.eup %4411 }
 0xaed   : > { %2632 = vadd.xlane.f32.xlu0 %v4412_v8 }
 0xaee   : > { %v4414_v10 = vpop.eup %4413 }
 0xaef   : > { %2634 = vadd.xlane.f32.xlu1 %v4414_v10 }
 0xb00   : > { %2695 = vrot.lane.b32.xlu1 %v5001_v60, %s4511_s28 }
 0xb03   : > { %2693 = vrot.lane.b32.xlu0 %v5003_v61, %s4511_s28 }
 0xb04   : > { %2697 = vrot.lane.b32.xlu1 %v5016_v17, %s4511_s28 }
 0xb07   : > { %2701 = vrot.lane.b32.xlu0 %v5027_v37, %s4511_s28 }
 0xb08   : > { %2699 = vrot.lane.b32.xlu1 %v5012_v15, %s4511_s28 }
 0xb0b   : > { %2705 = vrot.lane.b32.xlu0 %v5052_v6, %s4511_s28 }
 0xb0c   : > { %2703 = vrot.lane.b32.xlu1 %v5023_v33, %s4511_s28 }
 0xb0f   : > { %2683 = vrot.lane.b32.xlu0 %v5061_v40, %s4511_s28 }
 0xb10   : > { %2707 = vrot.lane.b32.xlu1 %v5050_v22, %s4511_s28 }
 0xb7a   : > { %v2633_v26 = vpop.xlane.xlu0 %2632 }
 0xb7b   : > { %4415 = vrcp.f32 %v2633_v26 }
 0xb7c   : > { %v2635_v28 = vpop.xlane.xlu1 %2634 }
 0xb7d   : > { %4417 = vrcp.f32 %v2635_v28 }
 0xb7e   : > { %v2694_v51 = vpop.permute.xlu0 %2693 }
 0xb7f   : > { %v2713_v55 = vsel %vm1488_vm2, %v2694_v51, 0 }
 0xb80   : > { %v2696_v56 = vpop.permute.xlu1 %2695 }
 0xb81   : > { %v2716_v59 = vsel %vm1488_vm2, %v2696_v56, 0 }
 0xb82   : > { %v2702_v12 = vpop.permute.xlu0 %2701 }
 0xb83   : > { %v2725_v13 = vsel %vm1488_vm2, %v2702_v12, 0 }
 0xb84   : > { %v2698_v2 = vpop.permute.xlu1 %2697 }
 0xb85   : > { %v4416_v3 = vpop.eup %4415  ;;  %v2719_v4 = vsel %vm1488_vm2, %v2698_v2, 0 }
 0xb86   : > { %v2638_v49 = vmul.f32 %v4416_v3, %v4412_v8  ;;  %v2706_v21 = vpop.permute.xlu0 %2705 }
 0xb87   : > { %v4418_v5 = vpop.eup %4417  ;;  %v2731_v20 = vsel %vm1488_vm2, %v2706_v21, 0 }
 0xb88   : > { %v2639_v50 = vmul.f32 %v4418_v5, %v4414_v10  ;;  %v2700_v9 = vpop.permute.xlu1 %2699 }
 0xb89   : > { %v2722_v11 = vsel %vm1488_vm2, %v2700_v9, 0 }
 0xb8a   : > { %v2640_v54 = vpack.c.bf16 %v2639_v50, %v2638_v49  ;;  %v2684_v24 = vpop.permute.xlu0 %2683 }
 0xb8c   : > { %4098 = vmatmul.mubr.bf16.vlgmr.msra.gmra.mrb[44].mxu0 %v2640_v54  ;;  %v2704_v14 = vpop.permute.xlu1 %2703 }
 0xb8d   : > { %4102 = vmatpush3.bf16.xpose.msra.mxu0 %v2713_v55  ;;  %4117 = vmatprep.mubr.msk.bf16.mxu0 %vm4510_vm1, %v4509_v29  ;;  %v2728_v19 = vsel %vm1488_vm2, %v2704_v14, 0 }
 0xb8e   : > { %4103 = vmatprep.subr.bf16.mxu0 %v4509_v29 }
 0xb90   : > { %v2708_v23 = vpop.permute.xlu1 %2707 }
 0xb91   : > { %v2734_v7 = vsel %vm1488_vm2, %v2708_v23, 0 }
 0xb95   : > { %4104 = vmatpush3.bf16.xpose.msra.mxu0 %v2716_v59 }
 0xb96   : > { %4105 = vmatprep.subr.bf16.mxu0 %v4509_v29 }
 0xb9d   : > { %4106 = vmatpush3.bf16.xpose.msra.mxu0 %v2719_v4 }
 0xb9e   : > { %4107 = vmatprep.subr.bf16.mxu0 %v4509_v29 }
 0xba5   : > { %4108 = vmatpush3.bf16.xpose.msra.mxu0 %v2722_v11 }
 0xba6   : > { %4109 = vmatprep.subr.bf16.mxu0 %v4509_v29 }
 0xbad   : > { %4110 = vmatpush3.bf16.xpose.msra.mxu0 %v2725_v13 }
 0xbae   : > { %4111 = vmatprep.subr.bf16.mxu0 %v4509_v29 }
 0xbb5   : > { %4112 = vmatpush3.bf16.xpose.msra.mxu0 %v2728_v19 }
 0xbb6   : > { %4113 = vmatprep.subr.bf16.mxu0 %v4509_v29 }
 0xbbd   : > { %4114 = vmatpush3.bf16.xpose.msra.mxu0 %v2731_v20 }
 0xbbe   : > { %4115 = vmatprep.subr.bf16.mxu0 %v4509_v29 }
 0xbc5   : > { %4116 = vmatpush3.bf16.xpose.msra.mxu0 %v2734_v7 }
 0xbc6   : > { %4161 = vmatprep.subr.bf16.mxu0 %v4509_v29 }
 0xbcc   : > { %4118 = vmatmul.mubr.msk.bf16.vlgmr.msra.gmra.mrb[48].mxu0 %vm1488_vm2, %v2684_v24 }
 0xbcd   : > { %4177 = vmatprep.mubr.msk.bf16.mxu0 %vm4510_vm1, %v4509_v29 }
 0xc5f   : > { %v5182_v25 = vpop.f32.mrb[44].mxu0 }
 0xc60   : > { %v4099_v47 = vpop.f32.mrb[45].mxu0 }
 0xc61   : > { %v5184_v30 = vpop.f32.mrb[46].mxu0 }
 0xc62   : > { %v4100_v38 = vpop.f32.mrb[47].mxu0 }
 0xc9f   : > { %v2770_v0 = vpop.f32.mrb[48].mxu0 }
 0xca0   : > { %v2777_v41 = vmul.f32 0.35355338, %v2770_v0  ;;  %v4119_v42 = vpop.f32.mrb[49].mxu0 }
 0xca1   : > { %v2773_v45 = vpop.f32.mrb[50].mxu0 }
 0xca2   : > { %v2778_v46 = vmul.f32 0.35355338, %v2773_v45  ;;  %v4120_v48 = vpop.f32.mrb[51].mxu0  ;;  %v2779_v34 = vadd.f32 %v5098_v44, %v2777_v41 }
 0xca4   : > { %2781 = vmax.xlane.f32.xlu1 %v2779_v34  ;;  %v2780_v39 = vadd.f32 %v5098_v44, %v2778_v46 }
 0xca6   : > { %2783 = vmax.xlane.f32.xlu0 %v2780_v39 }
 0xcb5   : > { %2810 = vrot.lane.b32.xlu1 %v5109_v62, %s4511_s28 }
 0xcb9   : > { %2814 = vrot.lane.b32.xlu1 %v5116_v16, %s4511_s28 }
 0xcbc   : > { %2808 = vrot.lane.b32.xlu0 %v5111_v63, %s4511_s28 }
 0xcbd   : > { %2816 = vrot.lane.b32.xlu1 %v5127_v36, %s4511_s28 }
 0xcc0   : > { %2812 = vrot.lane.b32.xlu0 %v5119_v18, %s4511_s28 }
 0xcc1   : > { %2820 = vrot.lane.b32.xlu1 %v5135_v1, %s4511_s28 }
 0xcc4   : > { %2818 = vrot.lane.b32.xlu0 %v5124_v32, %s4511_s28 }
 0xd31   : > { %v2782_v43 = vpop.xlane.xlu1 %2781 }
 0xd32   : > { %v2785_v52 = vsub.f32 %v2779_v34, %v2782_v43 }
 0xd33   : > { %v2784_v53 = vpop.xlane.xlu0 %2783 }
 0xd34   : > { %v2787_v57 = vmul.f32 1.442695, %v2785_v52  ;;  %v2786_v58 = vsub.f32 %v2780_v39, %v2784_v53 }
 0xd35   : > { %v2811_v26 = vpop.permute.xlu1 %2810 }
 0xd36   : > { %4419 = vpow2.f32 %v2787_v57  ;;  %v2789_v8 = vmul.f32 1.442695, %v2786_v58 }
 0xd37   : > { %v2809_v10 = vpop.permute.xlu0 %2808 }
 0xd38   : > { %4421 = vpow2.f32 %v2789_v8  ;;  %4122 = vmatpush3.bf16.msra.mxu1 %v2809_v10 }
 0xd39   : > { %4123 = vmatprep.subr.bf16.mxu1 %v4509_v29  ;;  %v2815_v5 = vpop.permute.xlu1 %2814 }
 0xd3b   : > { %v2813_v28 = vpop.permute.xlu0 %2812 }
 0xd3c   : > { %4124 = vmatpush3.bf16.msra.mxu1 %v2811_v26 }
 0xd3d   : > { %4125 = vmatprep.subr.bf16.mxu1 %v4509_v29  ;;  %v2817_v50 = vpop.permute.xlu1 %2816 }
 0xd3f   : > { %v2819_v51 = vpop.permute.xlu0 %2818 }
 0xd40   : > { %v4420_v3 = vpop.eup %4419  ;;  %4126 = vmatpush3.bf16.msra.mxu1 %v2813_v28 }
 0xd41   : > { %2791 = vadd.xlane.f32.xlu1 %v4420_v3  ;;  %4127 = vmatprep.subr.bf16.mxu1 %v4509_v29  ;;  %v2821_v54 = vpop.permute.xlu1 %2820 }
 0xd42   : > { %v4422_v49 = vpop.eup %4421 }
 0xd43   : > { %2793 = vadd.xlane.f32.xlu0 %v4422_v49 }
 0xd44   : > { %4128 = vmatpush3.bf16.msra.mxu1 %v2815_v5 }
 0xd45   : > { %4129 = vmatprep.subr.bf16.mxu1 %v4509_v29 }
 0xd48   : > { %4130 = vmatpush3.bf16.msra.mxu1 %v2817_v50 }
 0xd49   : > { %4131 = vmatprep.subr.bf16.mxu1 %v4509_v29 }
 0xd4c   : > { %4132 = vmatpush3.bf16.msra.mxu1 %v2819_v51 }
 0xd4d   : > { %4133 = vmatprep.subr.bf16.mxu1 %v4509_v29 }
 0xd50   : > { %4134 = vmatpush3.bf16.msra.mxu1 %v2821_v54 }
 0xd51   : > { %4135 = vmatprep.subr.bf16.mxu1 %v4509_v29 }
 0xd52   : > { %2875 = vrot.lane.b32.xlu1 %v5003_v61, %s5459_s15 }
 0xd56   : > { %2879 = vrot.lane.b32.xlu1 %v5016_v17, %s5459_s15 }
 0xd59   : > { %2822 = vrot.lane.b32.xlu0 %v5132_v35, %s4511_s28  ;;  %s5460_s28 = smov 104  }
 0xd5a   : > { %2883 = vrot.lane.b32.xlu1 %v5027_v37, %s5459_s15 }
 0xd5d   : > { %2877 = vrot.lane.b32.xlu0 %v5001_v60, %s5459_s15 }
 0xd5e   : > { %2887 = vrot.lane.b32.xlu1 %v5052_v6, %s5459_s15 }
 0xd61   : > { %2881 = vrot.lane.b32.xlu0 %v5012_v15, %s5459_s15 }
 0xd62   : > { %2873 = vrot.lane.b32.xlu1 %v5061_v40, %s5459_s15 }
 0xd65   : > { %2885 = vrot.lane.b32.xlu0 %v5023_v33, %s5459_s15 }
 0xd69   : > { %2889 = vrot.lane.b32.xlu0 %v5050_v22, %s5459_s15 }
 0xdce   : > { %v2792_v55 = vpop.xlane.xlu1 %2791 }
 0xdcf   : > { %4423 = vrcp.f32 %v2792_v55 }
 0xdd0   : > { %v2794_v56 = vpop.xlane.xlu0 %2793 }
 0xdd1   : > { %4425 = vrcp.f32 %v2794_v56 }
 0xdd2   : > { %v2876_v12 = vpop.permute.xlu1 %2875 }
 0xdd3   : > { %v2895_v14 = vsel %vm1488_vm2, %v2876_v12, 0 }
 0xdd4   : > { %v2823_v59 = vpop.permute.xlu0 %2822 }
 0xdd5   : > { %4136 = vmatpush3.bf16.msra.mxu1 %v2823_v59 }
 0xdd6   : > { %4141 = vmatprep.subr.bf16.mxu1 %v4509_v29  ;;  %v2880_v20 = vpop.permute.xlu1 %2879 }
 0xdd7   : > { %v2901_v23 = vsel %vm1488_vm2, %v2880_v20, 0 }
 0xdd8   : > { %v2878_v19 = vpop.permute.xlu0 %2877 }
 0xdd9   : > { %v4424_v2 = vpop.eup %4423  ;;  %v2898_v21 = vsel %vm1488_vm2, %v2878_v19, 0 }
 0xdda   : > { %v2797_v9 = vmul.f32 %v4424_v2, %v4420_v3  ;;  %v2884_v47 = vpop.permute.xlu1 %2883 }
 0xddb   : > { %v4426_v4 = vpop.eup %4425  ;;  %v2907_v38 = vsel %vm1488_vm2, %v2884_v47, 0 }
 0xddc   : > { %v2798_v11 = vmul.f32 %v4426_v4, %v4422_v49  ;;  %v2882_v7 = vpop.permute.xlu0 %2881 }
 0xddd   : > { %v2904_v24 = vsel %vm1488_vm2, %v2882_v7, 0 }
 0xdde   : > { %v2799_v13 = vpack.c.bf16 %v2798_v11, %v2797_v9  ;;  %v2888_v42 = vpop.permute.xlu1 %2887 }
 0xddf   : > { %v2913_v45 = vsel %vm1488_vm2, %v2888_v42, 0 }
 0xde0   : > { %4138 = vmatmul.mubr.bf16.vlgmr.msra.gmra.mrb[44].mxu1 %v2799_v13  ;;  %v2886_v0 = vpop.permute.xlu0 %2885 }
 0xde1   : > { %4142 = vmatpush3.bf16.xpose.msra.mxu1 %v2895_v14  ;;  %4157 = vmatprep.mubr.msk.bf16.mxu1 %vm4510_vm1, %v4509_v29  ;;  %v2910_v41 = vsel %vm1488_vm2, %v2886_v0, 0 }
 0xde2   : > { %4143 = vmatprep.subr.bf16.mxu1 %v4509_v29  ;;  %v2874_v34 = vpop.permute.xlu1 %2873 }
 0xde4   : > { %v2890_v46 = vpop.permute.xlu0 %2889 }
 0xde5   : > { %v2916_v48 = vsel %vm1488_vm2, %v2890_v46, 0 }
 0xde9   : > { %4144 = vmatpush3.bf16.xpose.msra.mxu1 %v2898_v21 }
 0xdea   : > { %4145 = vmatprep.subr.bf16.mxu1 %v4509_v29 }
 0xdf1   : > { %4146 = vmatpush3.bf16.xpose.msra.mxu1 %v2901_v23 }
 0xdf2   : > { %4147 = vmatprep.subr.bf16.mxu1 %v4509_v29 }
 0xdf9   : > { %4148 = vmatpush3.bf16.xpose.msra.mxu1 %v2904_v24 }
 0xdfa   : > { %4149 = vmatprep.subr.bf16.mxu1 %v4509_v29 }
 0xe01   : > { %4150 = vmatpush3.bf16.xpose.msra.mxu1 %v2907_v38 }
 0xe02   : > { %4151 = vmatprep.subr.bf16.mxu1 %v4509_v29 }
 0xe09   : > { %4152 = vmatpush3.bf16.xpose.msra.mxu1 %v2910_v41 }
 0xe0a   : > { %4153 = vmatprep.subr.bf16.mxu1 %v4509_v29 }
 0xe11   : > { %4154 = vmatpush3.bf16.xpose.msra.mxu1 %v2913_v45 }
 0xe12   : > { %4155 = vmatprep.subr.bf16.mxu1 %v4509_v29 }
 0xe19   : > { %4156 = vmatpush3.bf16.xpose.msra.mxu1 %v2916_v48 }
 0xe1a   : > { %4201 = vmatprep.subr.bf16.mxu1 %v4509_v29 }
 0xe20   : > { %4158 = vmatmul.mubr.msk.bf16.vlgmr.msra.gmra.mrb[48].mxu1 %vm1488_vm2, %v2874_v34 }
 0xe21   : > { %4217 = vmatprep.mubr.msk.bf16.mxu1 %vm4510_vm1, %v4509_v29 }
 0xeb3   : > { %v5251_v39 = vpop.f32.mrb[44].mxu1 }
 0xeb4   : > { %v4139_v43 = vpop.f32.mrb[45].mxu1 }
 0xeb5   : > { %v5253_v52 = vpop.f32.mrb[46].mxu1 }
 0xeb6   : > { %v4330_v53 = vpack.i.bf16 %v5253_v52, %v5251_v39  ;;  %v4140_v57 = vpop.f32.mrb[47].mxu1  ;;  %v4359_v52 = vld [vmem:[%s5463_s10] sm:$0xff]  }
 0xef3   : > { %v2952_v58 = vpop.f32.mrb[48].mxu1 }
 0xef4   : > { %v2959_v8 = vmul.f32 0.35355338, %v2952_v58  ;;  %v4159_v10 = vpop.f32.mrb[49].mxu1 }
 0xef5   : > { %v2955_v26 = vpop.f32.mrb[50].mxu1 }
 0xef6   : > { %v2960_v28 = vmul.f32 0.35355338, %v2955_v26  ;;  %v4160_v3 = vpop.f32.mrb[51].mxu1  ;;  %v2961_v5 = vadd.f32 %v5098_v44, %v2959_v8 }
 0xef8   : > { %2963 = vmax.xlane.f32.xlu0 %v2961_v5  ;;  %v2962_v49 = vadd.f32 %v5098_v44, %v2960_v28 }
 0xefa   : > { %2965 = vmax.xlane.f32.xlu1 %v2962_v49 }
 0xf0b   : > { %2984 = vrot.lane.b32.xlu1 %v5109_v62, %s5459_s15 }
 0xf0e   : > { %2982 = vrot.lane.b32.xlu0 %v5111_v63, %s5459_s15 }
 0xf0f   : > { %2988 = vrot.lane.b32.xlu1 %v5116_v16, %s5459_s15 }
 0xf12   : > { %2986 = vrot.lane.b32.xlu0 %v5119_v18, %s5459_s15 }
 0xf13   : > { %2992 = vrot.lane.b32.xlu1 %v5124_v32, %s5459_s15 }
 0xf16   : > { %2990 = vrot.lane.b32.xlu0 %v5127_v36, %s5459_s15 }
 0xf17   : > { %2996 = vrot.lane.b32.xlu1 %v5132_v35, %s5459_s15 }
 0xf1a   : > { %2994 = vrot.lane.b32.xlu0 %v5135_v1, %s5459_s15  ;;  %s5464_s15 = smov 24  }
 0xf85   : > { %v2964_v50 = vpop.xlane.xlu0 %2963 }
 0xf86   : > { %v2967_v51 = vsub.f32 %v2961_v5, %v2964_v50 }
 0xf87   : > { %v2966_v54 = vpop.xlane.xlu1 %2965 }
 0xf88   : > { %v2969_v55 = vmul.f32 1.442695, %v2967_v51  ;;  %v2968_v56 = vsub.f32 %v2962_v49, %v2966_v54 }
 0xf89   : > { %v2983_v59 = vpop.permute.xlu0 %2982 }
 0xf8a   : > { %4427 = vpow2.f32 %v2969_v55  ;;  %v2971_v2 = vmul.f32 1.442695, %v2968_v56  ;;  %4162 = vmatpush3.bf16.msra.mxu0 %v2983_v59 }
 0xf8b   : > { %4163 = vmatprep.subr.bf16.mxu0 %v4509_v29  ;;  %v2985_v4 = vpop.permute.xlu1 %2984 }
 0xf8c   : > { %4429 = vpow2.f32 %v2971_v2 }
 0xf8d   : > { %v2987_v9 = vpop.permute.xlu0 %2986 }
 0xf8e   : > { %4164 = vmatpush3.bf16.msra.mxu0 %v2985_v4 }
 0xf8f   : > { %4165 = vmatprep.subr.bf16.mxu0 %v4509_v29  ;;  %v2989_v12 = vpop.permute.xlu1 %2988 }
 0xf91   : > { %v2991_v14 = vpop.permute.xlu0 %2990 }
 0xf92   : > { %4166 = vmatpush3.bf16.msra.mxu0 %v2987_v9 }
 0xf93   : > { %4167 = vmatprep.subr.bf16.mxu0 %v4509_v29  ;;  %v2993_v19 = vpop.permute.xlu1 %2992 }
 0xf94   : > { %v4428_v11 = vpop.eup %4427 }
 0xf95   : > { %2973 = vadd.xlane.f32.xlu0 %v4428_v11  ;;  %v2995_v21 = vpop.permute.xlu0 %2994 }
 0xf96   : > { %v4430_v13 = vpop.eup %4429  ;;  %4168 = vmatpush3.bf16.msra.mxu0 %v2989_v12 }
 0xf97   : > { %2975 = vadd.xlane.f32.xlu1 %v4430_v13  ;;  %4169 = vmatprep.subr.bf16.mxu0 %v4509_v29  ;;  %v2997_v20 = vpop.permute.xlu1 %2996 }
 0xf9a   : > { %4170 = vmatpush3.bf16.msra.mxu0 %v2991_v14 }
 0xf9b   : > { %4171 = vmatprep.subr.bf16.mxu0 %v4509_v29 }
 0xf9e   : > { %4172 = vmatpush3.bf16.msra.mxu0 %v2993_v19 }
 0xf9f   : > { %4173 = vmatprep.subr.bf16.mxu0 %v4509_v29 }
 0xfa2   : > { %4174 = vmatpush3.bf16.msra.mxu0 %v2995_v21 }
 0xfa3   : > { %4175 = vmatprep.subr.bf16.mxu0 %v4509_v29 }
 0xfa6   : > { %4176 = vmatpush3.bf16.msra.mxu0 %v2997_v20 }
 0xfa7   : > { %4181 = vmatprep.subr.bf16.mxu0 %v4509_v29 }
 0xfa8   : > { %3051 = vrot.lane.b32.xlu1 %v5001_v60, %s5460_s28 }
 0xfab   : > { %3049 = vrot.lane.b32.xlu0 %v5003_v61, %s5460_s28 }
 0xfac   : > { %3055 = vrot.lane.b32.xlu1 %v5012_v15, %s5460_s28 }
 0xfaf   : > { %3053 = vrot.lane.b32.xlu0 %v5016_v17, %s5460_s28 }
 0xfb0   : > { %3059 = vrot.lane.b32.xlu1 %v5023_v33, %s5460_s28 }
 0xfb3   : > { %3057 = vrot.lane.b32.xlu0 %v5027_v37, %s5460_s28 }
 0xfb4   : > { %3063 = vrot.lane.b32.xlu1 %v5050_v22, %s5460_s28 }
 0xfb7   : > { %3061 = vrot.lane.b32.xlu0 %v5052_v6, %s5460_s28 }
 0xfbb   : > { %3047 = vrot.lane.b32.xlu0 %v5061_v40, %s5460_s28 }
0x1022   : > { %v2974_v60 = vpop.xlane.xlu0 %2973 }
0x1023   : > { %4431 = vrcp.f32 %v2974_v60 }
0x1024   : > { %v2976_v61 = vpop.xlane.xlu1 %2975 }
0x1025   : > { %4433 = vrcp.f32 %v2976_v61 }
0x1026   : > { %v3050_v7 = vpop.permute.xlu0 %3049 }
0x1027   : > { %v3069_v37 = vsel %vm1488_vm2, %v3050_v7, 0 }
0x1028   : > { %v3052_v22 = vpop.permute.xlu1 %3051 }
0x1029   : > { %v3072_v6 = vsel %vm1488_vm2, %v3052_v22, 0 }
0x102a   : > { %v3054_v40 = vpop.permute.xlu0 %3053 }
0x102b   : > { %v3075_v47 = vsel %vm1488_vm2, %v3054_v40, 0 }
0x102c   : > { %v3056_v38 = vpop.permute.xlu1 %3055 }
0x102d   : > { %v4432_v15 = vpop.eup %4431  ;;  %v3078_v0 = vsel %vm1488_vm2, %v3056_v38, 0 }
0x102e   : > { %v2979_v23 = vmul.f32 %v4432_v15, %v4428_v11  ;;  %v3058_v41 = vpop.permute.xlu0 %3057 }
0x102f   : > { %v4434_v17 = vpop.eup %4433  ;;  %v3081_v42 = vsel %vm1488_vm2, %v3058_v41, 0 }
0x1030   : > { %v2980_v33 = vmul.f32 %v4434_v17, %v4430_v13  ;;  %v3060_v45 = vpop.permute.xlu1 %3059 }
0x1031   : > { %v3084_v46 = vsel %vm1488_vm2, %v3060_v45, 0 }
0x1032   : > { %v2981_v24 = vpack.c.bf16 %v2980_v33, %v2979_v23  ;;  %v3062_v48 = vpop.permute.xlu0 %3061 }
0x1033   : > { %v3087_v34 = vsel %vm1488_vm2, %v3062_v48, 0 }
0x1034   : > { %4178 = vmatmul.mubr.bf16.vlgmr.msra.gmra.mrb[52].mxu0 %v2981_v24  ;;  %v3064_v43 = vpop.permute.xlu1 %3063 }
0x1035   : > { %4182 = vmatpush3.bf16.xpose.msra.mxu0 %v3069_v37  ;;  %4197 = vmatprep.mubr.msk.bf16.mxu0 %vm4510_vm1, %v4509_v29  ;;  %v3090_v57 = vsel %vm1488_vm2, %v3064_v43, 0 }
0x1036   : > { %4183 = vmatprep.subr.bf16.mxu0 %v4509_v29  ;;  %v3048_v58 = vpop.permute.xlu0 %3047 }
0x103d   : > { %4184 = vmatpush3.bf16.xpose.msra.mxu0 %v3072_v6 }
0x103e   : > { %4185 = vmatprep.subr.bf16.mxu0 %v4509_v29 }
0x1045   : > { %4186 = vmatpush3.bf16.xpose.msra.mxu0 %v3075_v47 }
0x1046   : > { %4187 = vmatprep.subr.bf16.mxu0 %v4509_v29 }
0x104d   : > { %4188 = vmatpush3.bf16.xpose.msra.mxu0 %v3078_v0 }
0x104e   : > { %4189 = vmatprep.subr.bf16.mxu0 %v4509_v29 }
0x1055   : > { %4190 = vmatpush3.bf16.xpose.msra.mxu0 %v3081_v42 }
0x1056   : > { %4191 = vmatprep.subr.bf16.mxu0 %v4509_v29 }
0x105d   : > { %4192 = vmatpush3.bf16.xpose.msra.mxu0 %v3084_v46 }
0x105e   : > { %4193 = vmatprep.subr.bf16.mxu0 %v4509_v29 }
0x1065   : > { %4194 = vmatpush3.bf16.xpose.msra.mxu0 %v3087_v34 }
0x1066   : > { %4195 = vmatprep.subr.bf16.mxu0 %v4509_v29 }
0x106d   : > { %4196 = vmatpush3.bf16.xpose.msra.mxu0 %v3090_v57 }
0x106e   : > { %4229 = vmatprep.subr.bf16.mxu0 %v4509_v29 }
0x1074   : > { %4198 = vmatmul.mubr.msk.bf16.vlgmr.msra.gmra.mrb[56].mxu0 %vm1488_vm2, %v3048_v58 }
0x1075   : > { %4233 = vmatprep.mubr.msk.bf16.mxu0 %vm4510_vm1, %v4509_v29 }
0x1107   : > { %v3040_v8 = vpop.f32.mrb[52].mxu0 }
0x1108   : > { %v4179_v10 = vpop.f32.mrb[53].mxu0 }
0x1109   : > { %v3043_v26 = vpop.f32.mrb[54].mxu0 }
0x110a   : > { %v4335_v28 = vpack.i.bf16 %v3043_v26, %v3040_v8  ;;  %v4180_v3 = vpop.f32.mrb[55].mxu0 }
0x1147   : > { %v3126_v5 = vpop.f32.mrb[56].mxu0 }
0x1148   : > { %v3133_v49 = vmul.f32 0.35355338, %v3126_v5  ;;  %v4199_v50 = vpop.f32.mrb[57].mxu0 }
0x1149   : > { %v3129_v51 = vpop.f32.mrb[58].mxu0 }
0x114a   : > { %v3134_v54 = vmul.f32 0.35355338, %v3129_v51  ;;  %v4200_v55 = vpop.f32.mrb[59].mxu0  ;;  %v3135_v56 = vadd.f32 %v5098_v44, %v3133_v49 }
0x114c   : > { %3137 = vmax.xlane.f32.xlu1 %v3135_v56  ;;  %v3136_v59 = vadd.f32 %v5098_v44, %v3134_v54 }
0x114e   : > { %3139 = vmax.xlane.f32.xlu0 %v3136_v59 }
0x115d   : > { %3158 = vrot.lane.b32.xlu1 %v5109_v62, %s5460_s28 }
0x1161   : > { %3164 = vrot.lane.b32.xlu1 %v5127_v36, %s5460_s28 }
0x1164   : > { %3156 = vrot.lane.b32.xlu0 %v5111_v63, %s5460_s28 }
0x1168   : > { %3160 = vrot.lane.b32.xlu0 %v5119_v18, %s5460_s28 }
0x116c   : > { %3162 = vrot.lane.b32.xlu0 %v5116_v16, %s5460_s28 }
0x1170   : > { %3166 = vrot.lane.b32.xlu0 %v5124_v32, %s5460_s28 }
0x1174   : > { %3170 = vrot.lane.b32.xlu0 %v5132_v35, %s5460_s28 }
0x1178   : > { %4336 = vrot.lane.b32.xlu0 %v4335_v28, %s5461_s1  ;;  %s5466_s1 = sld [smem:[#allocation18_spill]] }
0x11d9   : > { %v3138_v44 = vpop.xlane.xlu1 %3137 }
0x11da   : > { %v3141_v62 = vsub.f32 %v3135_v56, %v3138_v44 }
0x11db   : > { %v3140_v36 = vpop.xlane.xlu0 %3139 }
0x11dc   : > { %v3143_v2 = vmul.f32 1.442695, %v3141_v62  ;;  %v3142_v4 = vsub.f32 %v3136_v59, %v3140_v36 }
0x11dd   : > { %v3159_v16 = vpop.permute.xlu1 %3158 }
0x11de   : > { %4435 = vpow2.f32 %v3143_v2  ;;  %v3145_v63 = vmul.f32 1.442695, %v3142_v4  ;;  %v4361_v4 = vld [vmem:[%s5466_s1] sm:$0xff]  }
0x11df   : > { %v3157_v9 = vpop.permute.xlu0 %3156  ;;  %4230 = vmatpush3.bf16.msra.mxu0 %v4361_v4 }
0x11e0   : > { %4202 = vmatpush3.bf16.msra.mxu1 %v3157_v9  ;;  %4437 = vpow2.f32 %v3145_v63  ;;  %4231 = vmatprep.subr.bf16.mxu0 %v4509_v29  ;;  %v4362_v63 = vld [vmem:[%s5466_s1 + $0x8] sm:$0xff]  }
0x11e1   : > { %4203 = vmatprep.subr.bf16.mxu1 %v4509_v29  ;;  %v3165_v12 = vpop.permute.xlu1 %3164 }
0x11e3   : > { %v3161_v18 = vpop.permute.xlu0 %3160  ;;  %4232 = vmatpush3.bf16.msra.mxu0 %v4362_v63 }
0x11e4   : > { %4204 = vmatpush3.bf16.msra.mxu1 %v3159_v16 }
0x11e5   : > { %4205 = vmatprep.subr.bf16.mxu1 %v4509_v29 }
0x11e7   : > { %v3163_v35 = vpop.permute.xlu0 %3162 }
0x11e8   : > { %v4436_v32 = vpop.eup %4435  ;;  %4206 = vmatpush3.bf16.msra.mxu1 %v3161_v18 }
0x11e9   : > { %3147 = vadd.xlane.f32.xlu1 %v4436_v32  ;;  %4207 = vmatprep.subr.bf16.mxu1 %v4509_v29 }
0x11ea   : > { %v4438_v11 = vpop.eup %4437 }
0x11eb   : > { %v3167_v13 = vpop.permute.xlu0 %3166 }
0x11ec   : > { %4208 = vmatpush3.bf16.msra.mxu1 %v3163_v35 }
0x11ed   : > { %3149 = vadd.xlane.f32.xlu1 %v4438_v11  ;;  %4209 = vmatprep.subr.bf16.mxu1 %v4509_v29 }
0x11ef   : > { %v3171_v20 = vpop.permute.xlu0 %3170 }
0x11f0   : > { %4210 = vmatpush3.bf16.msra.mxu1 %v3165_v12 }
0x11f1   : > { %4211 = vmatprep.subr.bf16.mxu1 %v4509_v29 }
0x11f3   : > { %v4337_v40 = vpop.permute.xlu0 %4336 }
0x11f4   : > { %4212 = vmatpush3.bf16.msra.mxu1 %v3167_v13  ;;  %v4339_v0 = vunpack.i.h.bf16 %v4337_v40  ;;  %v4338_v41 = vunpack.i.l.bf16 %v4337_v40 }
0x11f5   : > { %4213 = vmatprep.subr.bf16.mxu1 %v4509_v29 }
0x11fe   : > { %3168 = vrot.lane.b32.xlu1 %v5135_v1, %s5460_s28  ;;  %s5465_s28 = sld [smem:[#allocation13_spill]] }
0x1202   : > { %4331 = vrot.lane.b32.xlu1 %v4330_v53, %s5462_s2  ;;  %v4360_v53 = vld [vmem:[%s5463_s10 + $0x8] sm:$0xff]   ;;  %s5467_s2 = sld [smem:[#allocation16_spill]] }
0x1276   : > { %v3148_v14 = vpop.xlane.xlu1 %3147 }
0x1277   : > { %4439 = vrcp.f32 %v3148_v14  ;;  %v3781_v14 = vld [vmem:[%s5467_s2] ss:$0 sm:$0xff] }
0x127a   : > { %v3150_v19 = vpop.xlane.xlu1 %3149 }
0x127b   : > { %4441 = vrcp.f32 %v3150_v19 }
0x127e   : > { %v3169_v21 = vpop.permute.xlu1 %3168 }
0x127f   : > { %4214 = vmatpush3.bf16.msra.mxu1 %v3169_v21 }
0x1280   : > { %4215 = vmatprep.subr.bf16.mxu1 %v4509_v29 }
0x1281   : > { %v4440_v60 = vpop.eup %4439 }
0x1282   : > { %v3153_v61 = vmul.f32 %v4440_v60, %v4436_v32  ;;  %v4332_v37 = vpop.permute.xlu1 %4331 }
0x1283   : > { %4216 = vmatpush3.bf16.msra.mxu1 %v3171_v20  ;;  %v4334_v22 = vunpack.i.h.bf16 %v4332_v37  ;;  %v4333_v6 = vunpack.i.l.bf16 %v4332_v37 }
0x1284   : > { %4221 = vmatprep.subr.bf16.mxu1 %v4509_v29 }
0x1285   : > { %v4442_v1 = vpop.eup %4441  ;;  %v3246_v47 = vsel %vm1488_vm2, %v5184_v30, %v4334_v22  ;;  %v3245_v38 = vsel %vm1488_vm2, %v5182_v25, %v4333_v6  ;;  %v3777_v25 = vld [vmem:[%s5465_s28] ss:$0 sm:$0xff]  ;;  %s1156_s28 = scalar_lea.vmem %s4695_s29, %s4718_s22 }
0x1286   : > { %v3154_v15 = vmul.f32 %v4442_v1, %v4438_v11  ;;  %v3247_v48 = vsel %vm1546_vm3, %v3245_v38, %v4338_v41  ;;  %v3248_v34 = vsel %vm1546_vm3, %v3246_v47, %v4339_v0 }
0x1288   : > { %v3155_v39 = vpack.c.bf16 %v3154_v15, %v3153_v61 }
0x128a   : > { %4218 = vmatmul.mubr.bf16.vlgmr.msra.gmra.mrb[52].mxu1 %v3155_v39 }
0x128b   : > { %4225 = vmatprep.mubr.msk.bf16.mxu1 %vm4510_vm1, %v4509_v29  ;;  %4222 = vmatpush3.bf16.msra.mxu1 %v4359_v52  ;;  %v4363_v52 = vld [vmem:[%s4685_s13] sm:$0xff]  }
0x128c   : > { %4223 = vmatprep.subr.bf16.mxu1 %v4509_v29 }
0x128f   : > { %4224 = vmatpush3.bf16.msra.mxu1 %v4360_v53  ;;  %v4364_v53 = vld [vmem:[%s4685_s13 + $0x8] sm:$0xff]  }
0x1290   : > { %4237 = vmatprep.subr.bf16.mxu1 %v4509_v29 }
0x135d   : > { %v3214_v17 = vpop.f32.mrb[52].mxu1 }
0x135e   : > { %v4219_v23 = vpop.f32.mrb[53].mxu1 }
0x135f   : > { %v3217_v33 = vpop.f32.mrb[54].mxu1  ;;  %v4366_v23 = vld [vmem:[%s4685_s13 + $0x18] sm:$0xff]  }
0x1360   : > { %v4340_v7 = vpack.i.bf16 %v3217_v33, %v3214_v17  ;;  %v4220_v24 = vpop.f32.mrb[55].mxu1  ;;  %v4365_v17 = vld [vmem:[%s4685_s13 + $0x10] sm:$0xff]   ;;  %v3783_v33 = vld [vmem:[%s4680_s25] ss:$0 sm:$0xff] }
0x1362   : > { %4341 = vrot.lane.b32.xlu1 %v4340_v7, %s5464_s15  ;;  %s5468_s15 = sld [smem:[#allocation17_spill]] }
0x1368   : > { %v3782_v60 = vld [vmem:[%s5468_s15] ss:$0 sm:$0xff] }
0x13d4   : > { %v4342_v42 = vpop.permute.xlu1 %4341 }
0x13d5   : > { %v4344_v45 = vunpack.i.h.bf16 %v4342_v42  ;;  %v4343_v46 = vunpack.i.l.bf16 %v4342_v42 }
0x13d7   : > { %v3249_v43 = vsel %vm2020_vm4, %v3247_v48, %v4343_v46  ;;  %v3250_v57 = vsel %vm2020_vm4, %v3248_v34, %v4344_v45 }
0x13d8   : > { %v3251_v58 = vpack.c.bf16 %v3250_v57, %v3249_v43 }
0x13da   : > { %4226 = vmatmul.mubr.msk.bf16.vlgmr.msra.gmra.mrb[56].mxu1 %vm1203_vm0, %v3251_v58  ;;  %v3792_v58 = vld [vmem:[%s4690_s20] ss:$0 sm:$0xff] }
0x13db   : > { %4245 = vmatprep.mubr.msk.bf16.mxu1 %vm4510_vm1, %v4509_v29  ;;  %4238 = vmatpush3.bf16.msra.mxu1 %v4363_v52 }
0x13dc   : > { %4239 = vmatprep.subr.bf16.mxu1 %v4509_v29 }
0x13df   : > { %4240 = vmatpush3.bf16.msra.mxu1 %v4364_v53 }
0x13e0   : > { %4241 = vmatprep.subr.bf16.mxu1 %v4509_v29 }
0x13e3   : > { %4242 = vmatpush3.bf16.msra.mxu1 %v4365_v17 }
0x13e4   : > { %4243 = vmatprep.subr.bf16.mxu1 %v4509_v29 }
0x13e7   : > { %4244 = vmatpush3.bf16.msra.mxu1 %v4366_v23 }
0x14ad   : > { %v3312_v30 = vpop.f32.mrb[56].mxu1 }
0x14ae   : > { %v3313_v8 = vadd.f32 %v3777_v25, %v3312_v30  ;;  %v4227_v10 = vpop.f32.mrb[57].mxu1 }
0x14af   : > { %v3315_v26 = vpop.f32.mrb[58].mxu1 }
0x14b0   : > { %v5373_v28 = vadd.f32 %v3313_v8, %v4873_v27  ;;  %v3316_v3 = vadd.f32 %v3777_v25, %v3315_v26  ;;  %v4228_v5 = vpop.f32.mrb[59].mxu1 }
0x14b2   : > { %v5376_v49 = vadd.f32 %v3316_v3, %v4876_v31  ;;  %v3323_v50 = vsel %vm1203_vm0, %v5373_v28, 0.0 }
0x14b3   : > { %3324 = vadd.xlane.f32.xlu0 %v3323_v50 }
0x14b4   : > { %v3326_v51 = vsel %vm1203_vm0, %v5376_v49, 0.0 }
0x14b5   : > { %3327 = vadd.xlane.f32.xlu1 %v3326_v51 }
0x1540   : > { %v3325_v54 = vpop.xlane.xlu0 %3324 }
0x1541   : > { %v3329_v55 = vmul.f32 0.03125, %v3325_v54 }
0x1542   : > { %v3328_v56 = vpop.xlane.xlu1 %3327 }
0x1543   : > { %v3331_v27 = vsub.f32 %v5373_v28, %v3329_v55  ;;  %v3330_v59 = vmul.f32 0.03125, %v3328_v56 }
0x1545   : > { %v3332_v44 = vsub.f32 %v5376_v49, %v3330_v59  ;;  %v3333_v31 = vmul.f32 %v3331_v27, %v3331_v27 }
0x1547   : > { %v3335_v62 = vsel %vm1203_vm0, %v3333_v31, 0.0  ;;  %v3334_v36 = vmul.f32 %v3332_v44, %v3332_v44 }
0x1548   : > { %3336 = vadd.xlane.f32.xlu0 %v3335_v62 }
0x1549   : > { %v3338_v2 = vsel %vm1203_vm0, %v3334_v36, 0.0 }
0x154c   : > { %3339 = vadd.xlane.f32.xlu0 %v3338_v2 }
0x15d5   : > { %v3337_v9 = vpop.xlane.xlu0 %3336 }
0x15d6   : > { %v3341_v16 = vmul.f32 0.03125, %v3337_v9 }
0x15d8   : > { %v3343_v18 = vadd.f32 1e-05, %v3341_v16 }
0x15d9   : > { %v3340_v32 = vpop.xlane.xlu0 %3339 }
0x15da   : > { %4443 = vrsqrt.f32 %v3343_v18  ;;  %v3342_v35 = vmul.f32 0.03125, %v3340_v32 }
0x15dc   : > { %v3344_v11 = vadd.f32 1e-05, %v3342_v35 }
0x15de   : > { %4445 = vrsqrt.f32 %v3344_v11 }
0x15e4   : > { %v4444_v12 = vpop.eup %4443 }
0x15e5   : > { %v3347_v13 = vmul.f32 %v4444_v12, %v3331_v27 }
0x15e7   : > { %v3355_v21 = vmul.f32 %v3781_v14, %v3347_v13 }
0x15e8   : > { %v4446_v19 = vpop.eup %4445 }
0x15e9   : > { %v3348_v20 = vmul.f32 %v4446_v19, %v3332_v44  ;;  %v3363_v61 = vadd.f32 %v3782_v60, %v3355_v21 }
0x15eb   : > { %v3356_v1 = vmul.f32 %v3781_v14, %v3348_v20 }
0x15ed   : > { %v3364_v15 = vadd.f32 %v3782_v60, %v3356_v1 }
0x15ef   : > { %v3365_v39 = vpack.c.bf16 %v3364_v15, %v3363_v61 }
0x15f1   : > { %4234 = vmatmul.mubr.msk.bf16.vlgmr.msra.gmra.mrb[60].mxu0 %vm1203_vm0, %v3365_v39 }
0x16c4   : > { %v3426_v7 = vpop.f32.mrb[60].mxu0 }
0x16c5   : > { %v3427_v24 = vadd.f32 %v3783_v33, %v3426_v7  ;;  %v4235_v37 = vpop.f32.mrb[61].mxu0 }
0x16c6   : > { %v3429_v22 = vpop.f32.mrb[62].mxu0 }
0x16c7   : > { %v3435_v6 = vmul.f32 0.70710677, %v3427_v24  ;;  %v3430_v40 = vadd.f32 %v3783_v33, %v3429_v22  ;;  %v4236_v47 = vpop.f32.mrb[63].mxu0  ;;  %v3433_v29 = vmul.f32 0.5, %v3427_v24 }
0x16c9   : > { %4447 = verf.f32 %v3435_v6  ;;  %v3436_v38 = vmul.f32 0.70710677, %v3430_v40  ;;  %v3434_v45 = vmul.f32 0.5, %v3430_v40 }
0x16cb   : > { %4449 = verf.f32 %v3436_v38 }
0x16d3   : > { %v4448_v0 = vpop.eup %4447 }
0x16d4   : > { %v3439_v41 = vadd.f32 1.0, %v4448_v0 }
0x16d5   : > { %v4450_v42 = vpop.eup %4449 }
0x16d6   : > { %v3440_v46 = vadd.f32 1.0, %v4450_v42  ;;  %v3441_v48 = vmul.f32 %v3439_v41, %v3433_v29 }
0x16d8   : > { %v3442_v34 = vmul.f32 %v3440_v46, %v3434_v45 }
0x16da   : > { %v3443_v43 = vpack.c.bf16 %v3442_v34, %v3441_v48 }
0x16dc   : > { %4246 = vmatmul.mubr.msk.bf16.vlgmr.msra.gmra.mrb[60].mxu1 %vm3476_vm5, %v3443_v43 }
0x17af   : > { %v3514_v57 = vpop.f32.mrb[60].mxu1 }
0x17b0   : > { %v3521_v25 = vadd.f32 %v3514_v57, %v5373_v28  ;;  %v4247_v30 = vpop.f32.mrb[61].mxu1 }
0x17b1   : > { %v3517_v8 = vpop.f32.mrb[62].mxu1 }
0x17b2   : > { %v3530_v10 = vadd.f32 %v3792_v58, %v3521_v25  ;;  %v3522_v26 = vadd.f32 %v3517_v8, %v5376_v49  ;;  %v4248_v3 = vpop.f32.mrb[63].mxu1 }
0x17b4   : > { %3532 = vst.msk [vmem:[%s1156_s28] sm:$0xff] %vm1203_vm0, %v3530_v10  ;;  %v3531_v5 = vadd.f32 %v3792_v58, %v3522_v26 }
0x17b6   : > { %3533 = vst.msk [vmem:[%s1156_s28 + $0x8] sm:$0xff] %vm1203_vm0, %v3531_v5 }
0x17b7 PF: > { %s79_s18 = sadd.s32 1, %s4473_s18   ;;  %s5469_s15 = smov %s4469_s16 }
0x17b8   : > { %p76_p5 = scmp.ge.s32.totalorder %s79_s18, 4   ;;  %s5470_s16 = smov %s5472_s0 }
0x17ba   :  { %78 = sbr.rel (!%p76_p5) target bundleno = 60 (0x3c), region = 232 }

</bundles_post_ra>
